<compile_context>
chip_gen: v6e
topology: v6e:2x2x1
jax: 0.10.0
libtpu: 0.0.40
codegen_flags: <defaults>
</compile_context>

<pallas_src>
import functools

import jax
import jax.numpy as jnp
from jax.experimental import pallas as pl
from jax.experimental.pallas import tpu as pltpu


def _fea_extract_kernel(xp_ref, w0_ref, wres_ref, b_ref, o_ref,
                        *, H, W, n_blocks):
    """Fused Fea_extract for one batch element, activations in (C, H*W) layout.

    xp_ref:   (9*Cin, HW) bf16   im2col patch of the raw input (first conv only)
    w0_ref:   (Cout, 9*Cin) bf16 first conv weight, [co, tap*Cin + ci]
    wres_ref: (2*n_blocks*9, Cout, Cout) bf16  per-tap residual weights [co, ci]
    b_ref:    (1+2*n_blocks, Cout, 1) f32      biases
    o_ref:    (Cout, HW) f32     output; doubles as the f32 residual carry
    """
    HW = H * W

    # ---- "same"-padding validity masks over the flattened spatial lane dim --
    pos = jax.lax.broadcasted_iota(jnp.int32, (1, HW), 1)
    if W & (W - 1) == 0:
        col = jnp.bitwise_and(pos, W - 1)      # cheap path, W is a power of two
    else:
        col = jnp.remainder(pos, W)
    row_ok = {-1: pos >= W, 0: None, 1: pos < HW - W}
    col_ok = {-1: col >= 1, 0: None, 1: col < W - 1}

    def tap_mask(dy, dx):
        rm, cm = row_ok[dy], col_ok[dx]
        if rm is None:
            return cm
        if cm is None:
            return rm
        return jnp.logical_and(rm, cm)

    def shift_lanes(x, s):
        # y[:, p] = x[:, (p + s) % HW]; wrapped entries are killed by tap_mask.
        s = s % HW
        if s == 0:
            return x
        return jnp.concatenate([x[:, s:], x[:, :s]], axis=1)

    def conv3x3(a, layer):
        # a: (C, HW) bf16.  9 accumulated per-tap dots (C,C)@(C,HW) on the MXU.
        acc = None
        for ky in range(3):
            for kx in range(3):
                dy, dx = ky - 1, kx - 1
                x_t = shift_lanes(a, dy * W + dx)
                m = tap_mask(dy, dx)
                if m is not None:
                    x_t = jnp.where(m, x_t, 0)
                w_t = wres_ref[layer * 9 + ky * 3 + kx]            # (C, C) bf16
                d = jnp.dot(w_t, x_t, preferred_element_type=jnp.float32)
                acc = d if acc is None else acc + d
        return acc                                                 # (C, HW) f32

    # ---- first conv (+ReLU): one (Cout, 9*Cin)@(9*Cin, HW) dot --------------
    y0 = jnp.dot(w0_ref[...], xp_ref[...], preferred_element_type=jnp.float32)
    o_ref[...] = jnp.maximum(y0 + b_ref[0], 0.0)

    # ---- 5x ResidualBlock_noBN; f32 carry stays in o_ref (VMEM) -------------
    for i in range(n_blocks):
        a = o_ref[...].astype(jnp.bfloat16)                 # cast once per conv
        h = jnp.maximum(conv3x3(a, 2 * i) + b_ref[1 + 2 * i], 0.0)
        o_ref[...] = (o_ref[...]
                      + conv3x3(h.astype(jnp.bfloat16), 2 * i + 1)
                      + b_ref[2 + 2 * i])


def init_fea_extract_params(key, inchannel, outchannel):
    # TODO(synk): orthogonal_ init replaced with deterministic scaled-normal
    # weights (synthetic kernel, not a checkpoint load). Biases zero as in the
    # reference residual blocks.
    keys = jax.random.split(key, 1 + 5 * 2)

    def conv_w(k, cin, cout, scale):
        return scale * jax.random.normal(k, (3, 3, cin, cout), jnp.float32)

    params = {
        "fea_w": conv_w(keys[0], inchannel, outchannel, 0.3),
        "fea_b": jnp.zeros((outchannel,), jnp.float32),
        "res": [],
    }
    for i in range(5):
        w1 = conv_w(keys[1 + 2 * i], outchannel, outchannel, 0.05)
        w2 = conv_w(keys[2 + 2 * i], outchannel, outchannel, 0.05)
        params["res"].append(
            (w1, jnp.zeros((outchannel,), jnp.float32),
             w2, jnp.zeros((outchannel,), jnp.float32)))
    return params


def fea_extract_forward(params, x_nchw, *, matmul_dtype=jnp.bfloat16):
    """Matches Fea_extract.forward: x1 = ReLU(conv(x)); out = 5x ResidualBlock_noBN(x1)."""
    N, Cin, H, W = x_nchw.shape
    Cout = params["fea_w"].shape[-1]
    n_blocks = len(params["res"])
    n_conv = 1 + 2 * n_blocks
    HW = H * W

    # First-layer im2col patch (9*Cin, HW), built once in XLA (Cin is tiny):
    # rows ordered (tap, ci) with tap = ky*3 + kx.
    xpad = jnp.pad(x_nchw, ((0, 0), (0, 0), (1, 1), (1, 1)))
    taps = [xpad[:, :, ky:ky + H, kx:kx + W]
            for ky in range(3) for kx in range(3)]
    patches = jnp.stack(taps, axis=1).reshape(N, 9 * Cin, HW).astype(matmul_dtype)

    # First conv weight -> (Cout, 9*Cin): [co, (ky*3+kx)*Cin + ci].
    w0 = jnp.transpose(params["fea_w"], (3, 0, 1, 2)).reshape(Cout, 9 * Cin)
    w0 = w0.astype(matmul_dtype)

    # Residual conv weights -> per-tap (Cout, Cin) matrices, flattened to
    # (2*n_blocks*9, Cout, Cout) so the kernel indexes one leading dim.
    def per_tap(w):               # (3,3,Cin,Cout)[ky,kx,ci,co] -> (9, co, ci)
        return jnp.transpose(w, (0, 1, 3, 2)).reshape(9, Cout, Cout)

    wres = jnp.concatenate(
        [per_tap(w) for (w1, _, w2, _) in params["res"] for w in (w1, w2)],
        axis=0).astype(matmul_dtype)

    biases = jnp.stack(
        [params["fea_b"]]
        + [b for (_, b1, _, b2) in params["res"] for b in (b1, b2)]
    ).astype(jnp.float32)[:, :, None]                       # (n_conv, Cout, 1)

    kernel = functools.partial(_fea_extract_kernel, H=H, W=W, n_blocks=n_blocks)

    out = pl.pallas_call(
        kernel,
        out_shape=jax.ShapeDtypeStruct((N, Cout, HW), jnp.float32),
        grid=(N,),
        in_specs=[
            pl.BlockSpec((None, 9 * Cin, HW), lambda n: (n, 0, 0)),
            pl.BlockSpec((Cout, 9 * Cin), lambda n: (0, 0)),
            pl.BlockSpec((2 * n_blocks * 9, Cout, Cout), lambda n: (0, 0, 0)),
            pl.BlockSpec((n_conv, Cout, 1), lambda n: (0, 0, 0)),
        ],
        out_specs=pl.BlockSpec((None, Cout, HW), lambda n: (n, 0, 0)),
        compiler_params=pltpu.CompilerParams(
            dimension_semantics=("parallel",)),
    )(patches, w0, wres, biases)

    # (N, Cout, H*W) is already NCHW bytes: reshape only, no transpose.
    return out.reshape(N, Cout, H, W)


def _reference_forward(params, x_nchw):
    """Pure-JAX f32 reference (lax convs) for a sanity check."""
    dn = ("NHWC", "HWIO", "NHWC")

    def conv(h, w, b):
        return jax.lax.conv_general_dilated(
            h, w, (1, 1), "SAME", dimension_numbers=dn) + b

    x = jnp.transpose(x_nchw, (0, 2, 3, 1))
    out = jax.nn.relu(conv(x, params["fea_w"], params["fea_b"]))
    for (w1, b1, w2, b2) in params["res"]:
        h = jax.nn.relu(conv(out, w1, b1))
        out = out + conv(h, w2, b2)
    return jnp.transpose(out, (0, 3, 1, 2))


if __name__ == "__main__":
    key = jax.random.PRNGKey(0)
    k_x, k_p = jax.random.split(key)

    # Shapes consistent with the module: NCHW input, inchannel=1, outchannel=32.
    N, Cin, H, W = 2, 1, 16, 16
    Cout = 32
    x = jax.random.normal(k_x, (N, Cin, H, W), jnp.float32)
    params = init_fea_extract_params(k_p, Cin, Cout)

    fwd = jax.jit(fea_extract_forward)
    out = jax.block_until_ready(fwd(params, x))
    assert out.shape == (N, Cout, H, W), out.shape

    # Loose tolerance: kernel feeds the MXU in bf16 (f32 accumulation/epilogue).
    ref = jax.block_until_ready(_reference_forward(params, x))
    err = float(jnp.max(jnp.abs(out - ref)))
    scale = float(jnp.max(jnp.abs(ref)))
    assert err <= 0.05 * scale + 1e-3, (err, scale)

    print("KERNEL_OK")
</pallas_src>

<mosaic_0001>
module attributes {stable_mosaic.version = 11 : i64} {
  func.func @_fea_extract_kernel(%arg0: i32, %arg1: memref<1x9x256xbf16, #tpu.memory_space<vmem>>, %arg2: memref<32x9xbf16, #tpu.memory_space<vmem>>, %arg3: memref<90x32x32xbf16, #tpu.memory_space<vmem>>, %arg4: memref<11x32x1xf32, #tpu.memory_space<vmem>>, %arg5: memref<1x32x256xf32, #tpu.memory_space<vmem>>) attributes {dimension_semantics = [#tpu.dimension_semantics<parallel>], iteration_bounds = array<i64: 2>, scalar_prefetch = 0 : i64, scratch_operands = 0 : i64, tpu.core_type = #tpu.core_type<tc>, window_params = [{transform_indices = @transform_0, window_bounds = array<i64: 1, 9, 256>}, {pipeline_mode = #tpu.pipeline_mode<synchronous>, transform_indices = @transform_1, window_bounds = array<i64: 32, 9>}, {pipeline_mode = #tpu.pipeline_mode<synchronous>, transform_indices = @transform_2, window_bounds = array<i64: 90, 32, 32>}, {pipeline_mode = #tpu.pipeline_mode<synchronous>, transform_indices = @transform_3, window_bounds = array<i64: 11, 32, 1>}, {transform_indices = @transform_4, window_bounds = array<i64: 1, 32, 256>}]} {
    %0 = tpu.iota {dimensions = array<i32: 1>} : vector<1x256xi32>
    %c15_i32 = arith.constant 15 : i32
    %1 = vector.broadcast %c15_i32 : i32 to vector<1x256xi32>
    %2 = arith.andi %0, %1 : vector<1x256xi32>
    %c16_i32 = arith.constant 16 : i32
    %3 = vector.broadcast %c16_i32 : i32 to vector<1x256xi32>
    %4 = arith.cmpi sge, %0, %3 : vector<1x256xi32>
    %c240_i32 = arith.constant 240 : i32
    %5 = vector.broadcast %c240_i32 : i32 to vector<1x256xi32>
    %6 = arith.cmpi slt, %0, %5 : vector<1x256xi32>
    %c1_i32 = arith.constant 1 : i32
    %7 = vector.broadcast %c1_i32 : i32 to vector<1x256xi32>
    %8 = arith.cmpi sge, %2, %7 : vector<1x256xi32>
    %c15_i32_0 = arith.constant 15 : i32
    %9 = vector.broadcast %c15_i32_0 : i32 to vector<1x256xi32>
    %10 = arith.cmpi slt, %2, %9 : vector<1x256xi32>
    %c0 = arith.constant 0 : index
    %c0_1 = arith.constant 0 : index
    %11 = vector.load %arg2[%c0, %c0_1] : memref<32x9xbf16, #tpu.memory_space<vmem>>, vector<32x9xbf16>
    %c0_2 = arith.constant 0 : index
    %c0_3 = arith.constant 0 : index
    %c0_4 = arith.constant 0 : index
    %12 = vector.load %arg1[%c0_2, %c0_3, %c0_4] : memref<1x9x256xbf16, #tpu.memory_space<vmem>>, vector<1x9x256xbf16>
    %13 = vector.shape_cast %12 : vector<1x9x256xbf16> to vector<9x256xbf16>
    %cst = arith.constant dense<0.000000e+00> : vector<32x256xf32>
    %14 = tpu.matmul %11, %13, %cst {dimension_numbers = #tpu.dot_dimension_numbers<[1], [0], [0], [1], [0, 0, 1, 1], [], []>} : vector<32x9xbf16>, vector<9x256xbf16>, vector<32x256xf32> -> vector<32x256xf32>
    %c0_5 = arith.constant 0 : index
    %c0_6 = arith.constant 0 : index
    %c0_7 = arith.constant 0 : index
    %15 = vector.load %arg4[%c0_5, %c0_6, %c0_7] : memref<11x32x1xf32, #tpu.memory_space<vmem>>, vector<1x32x1xf32>
    %16 = vector.shape_cast %15 : vector<1x32x1xf32> to vector<32x1xf32>
    %17 = vector.broadcast %16 : vector<32x1xf32> to vector<32x256xf32>
    %18 = arith.addf %14, %17 : vector<32x256xf32>
    %cst_8 = arith.constant 0.000000e+00 : f32
    %19 = vector.broadcast %cst_8 : f32 to vector<32x256xf32>
    %20 = arith.maximumf %18, %19 : vector<32x256xf32>
    %c0_9 = arith.constant 0 : index
    %c0_10 = arith.constant 0 : index
    %c0_11 = arith.constant 0 : index
    %21 = vector.load %arg5[%c0_9, %c0_10, %c0_11] : memref<1x32x256xf32, #tpu.memory_space<vmem>>, vector<1x32x256xf32>
    %22 = vector.shape_cast %21 : vector<1x32x256xf32> to vector<32x256xf32>
    %23 = vector.shape_cast %20 : vector<32x256xf32> to vector<1x32x256xf32>
    tpu.vector_store %arg5[%c0_9, %c0_10, %c0_11], %23 {strides = array<i32>} : memref<1x32x256xf32, #tpu.memory_space<vmem>>, vector<1x32x256xf32>,
    %c0_12 = arith.constant 0 : index
    %c0_13 = arith.constant 0 : index
    %c0_14 = arith.constant 0 : index
    %24 = vector.load %arg5[%c0_12, %c0_13, %c0_14] : memref<1x32x256xf32, #tpu.memory_space<vmem>>, vector<1x32x256xf32>
    %25 = vector.shape_cast %24 : vector<1x32x256xf32> to vector<32x256xf32>
    %26 = arith.truncf %25 : vector<32x256xf32> to vector<32x256xbf16>
    %27 = vector.extract_strided_slice %26 {offsets = [0, 239], sizes = [32, 17], strides = [1, 1]} : vector<32x256xbf16> to vector<32x17xbf16>
    %28 = vector.extract_strided_slice %26 {offsets = [0, 0], sizes = [32, 239], strides = [1, 1]} : vector<32x256xbf16> to vector<32x239xbf16>
    %29 = tpu.concatenate %27, %28 in 1 : vector<32x17xbf16>, vector<32x239xbf16> -> vector<32x256xbf16>
    %30 = arith.andi %4, %8 : vector<1x256xi1>
    %c0_i32 = arith.constant 0 : i32
    %31 = arith.sitofp %c0_i32 : i32 to bf16
    %32 = vector.shape_cast %30 : vector<1x256xi1> to vector<1x256xi1>
    %33 = vector.broadcast %32 : vector<1x256xi1> to vector<32x256xi1>
    %34 = vector.broadcast %31 : bf16 to vector<32x256xbf16>
    %35 = arith.select %33, %29, %34 : vector<32x256xi1>, vector<32x256xbf16>
    %c0_15 = arith.constant 0 : index
    %c0_16 = arith.constant 0 : index
    %c0_17 = arith.constant 0 : index
    %36 = vector.load %arg3[%c0_15, %c0_16, %c0_17] : memref<90x32x32xbf16, #tpu.memory_space<vmem>>, vector<1x32x32xbf16>
    %37 = vector.shape_cast %36 : vector<1x32x32xbf16> to vector<32x32xbf16>
    %cst_18 = arith.constant dense<0.000000e+00> : vector<32x256xf32>
    %38 = tpu.matmul %37, %35, %cst_18 {dimension_numbers = #tpu.dot_dimension_numbers<[1], [0], [0], [1], [0, 0, 1, 1], [], []>} : vector<32x32xbf16>, vector<32x256xbf16>, vector<32x256xf32> -> vector<32x256xf32>
    %39 = vector.extract_strided_slice %26 {offsets = [0, 240], sizes = [32, 16], strides = [1, 1]} : vector<32x256xbf16> to vector<32x16xbf16>
    %40 = vector.extract_strided_slice %26 {offsets = [0, 0], sizes = [32, 240], strides = [1, 1]} : vector<32x256xbf16> to vector<32x240xbf16>
    %41 = tpu.concatenate %39, %40 in 1 : vector<32x16xbf16>, vector<32x240xbf16> -> vector<32x256xbf16>
    %c0_i32_19 = arith.constant 0 : i32
    %42 = arith.sitofp %c0_i32_19 : i32 to bf16
    %43 = vector.shape_cast %4 : vector<1x256xi1> to vector<1x256xi1>
    %44 = vector.broadcast %43 : vector<1x256xi1> to vector<32x256xi1>
    %45 = vector.broadcast %42 : bf16 to vector<32x256xbf16>
    %46 = arith.select %44, %41, %45 : vector<32x256xi1>, vector<32x256xbf16>
    %c1 = arith.constant 1 : index
    %c0_20 = arith.constant 0 : index
    %c0_21 = arith.constant 0 : index
    %47 = vector.load %arg3[%c1, %c0_20, %c0_21] : memref<90x32x32xbf16, #tpu.memory_space<vmem>>, vector<1x32x32xbf16>
    %48 = vector.shape_cast %47 : vector<1x32x32xbf16> to vector<32x32xbf16>
    %cst_22 = arith.constant dense<0.000000e+00> : vector<32x256xf32>
    %49 = tpu.matmul %48, %46, %cst_22 {dimension_numbers = #tpu.dot_dimension_numbers<[1], [0], [0], [1], [0, 0, 1, 1], [], []>} : vector<32x32xbf16>, vector<32x256xbf16>, vector<32x256xf32> -> vector<32x256xf32>
    %50 = arith.addf %38, %49 : vector<32x256xf32>
    %51 = vector.extract_strided_slice %26 {offsets = [0, 241], sizes = [32, 15], strides = [1, 1]} : vector<32x256xbf16> to vector<32x15xbf16>
    %52 = vector.extract_strided_slice %26 {offsets = [0, 0], sizes = [32, 241], strides = [1, 1]} : vector<32x256xbf16> to vector<32x241xbf16>
    %53 = tpu.concatenate %51, %52 in 1 : vector<32x15xbf16>, vector<32x241xbf16> -> vector<32x256xbf16>
    %54 = arith.andi %4, %10 : vector<1x256xi1>
    %c0_i32_23 = arith.constant 0 : i32
    %55 = arith.sitofp %c0_i32_23 : i32 to bf16
    %56 = vector.shape_cast %54 : vector<1x256xi1> to vector<1x256xi1>
    %57 = vector.broadcast %56 : vector<1x256xi1> to vector<32x256xi1>
    %58 = vector.broadcast %55 : bf16 to vector<32x256xbf16>
    %59 = arith.select %57, %53, %58 : vector<32x256xi1>, vector<32x256xbf16>
    %c2 = arith.constant 2 : index
    %c0_24 = arith.constant 0 : index
    %c0_25 = arith.constant 0 : index
    %60 = vector.load %arg3[%c2, %c0_24, %c0_25] : memref<90x32x32xbf16, #tpu.memory_space<vmem>>, vector<1x32x32xbf16>
    %61 = vector.shape_cast %60 : vector<1x32x32xbf16> to vector<32x32xbf16>
    %cst_26 = arith.constant dense<0.000000e+00> : vector<32x256xf32>
    %62 = tpu.matmul %61, %59, %cst_26 {dimension_numbers = #tpu.dot_dimension_numbers<[1], [0], [0], [1], [0, 0, 1, 1], [], []>} : vector<32x32xbf16>, vector<32x256xbf16>, vector<32x256xf32> -> vector<32x256xf32>
    %63 = arith.addf %50, %62 : vector<32x256xf32>
    %64 = vector.extract_strided_slice %26 {offsets = [0, 255], sizes = [32, 1], strides = [1, 1]} : vector<32x256xbf16> to vector<32x1xbf16>
    %65 = vector.extract_strided_slice %26 {offsets = [0, 0], sizes = [32, 255], strides = [1, 1]} : vector<32x256xbf16> to vector<32x255xbf16>
    %66 = tpu.concatenate %64, %65 in 1 : vector<32x1xbf16>, vector<32x255xbf16> -> vector<32x256xbf16>
    %c0_i32_27 = arith.constant 0 : i32
    %67 = arith.sitofp %c0_i32_27 : i32 to bf16
    %68 = vector.shape_cast %8 : vector<1x256xi1> to vector<1x256xi1>
    %69 = vector.broadcast %68 : vector<1x256xi1> to vector<32x256xi1>
    %70 = vector.broadcast %67 : bf16 to vector<32x256xbf16>
    %71 = arith.select %69, %66, %70 : vector<32x256xi1>, vector<32x256xbf16>
    %c3 = arith.constant 3 : index
    %c0_28 = arith.constant 0 : index
    %c0_29 = arith.constant 0 : index
    %72 = vector.load %arg3[%c3, %c0_28, %c0_29] : memref<90x32x32xbf16, #tpu.memory_space<vmem>>, vector<1x32x32xbf16>
    %73 = vector.shape_cast %72 : vector<1x32x32xbf16> to vector<32x32xbf16>
    %cst_30 = arith.constant dense<0.000000e+00> : vector<32x256xf32>
    %74 = tpu.matmul %73, %71, %cst_30 {dimension_numbers = #tpu.dot_dimension_numbers<[1], [0], [0], [1], [0, 0, 1, 1], [], []>} : vector<32x32xbf16>, vector<32x256xbf16>, vector<32x256xf32> -> vector<32x256xf32>
    %75 = arith.addf %63, %74 : vector<32x256xf32>
    %c4 = arith.constant 4 : index
    %c0_31 = arith.constant 0 : index
    %c0_32 = arith.constant 0 : index
    %76 = vector.load %arg3[%c4, %c0_31, %c0_32] : memref<90x32x32xbf16, #tpu.memory_space<vmem>>, vector<1x32x32xbf16>
    %77 = vector.shape_cast %76 : vector<1x32x32xbf16> to vector<32x32xbf16>
    %cst_33 = arith.constant dense<0.000000e+00> : vector<32x256xf32>
    %78 = tpu.matmul %77, %26, %cst_33 {dimension_numbers = #tpu.dot_dimension_numbers<[1], [0], [0], [1], [0, 0, 1, 1], [], []>} : vector<32x32xbf16>, vector<32x256xbf16>, vector<32x256xf32> -> vector<32x256xf32>
    %79 = arith.addf %75, %78 : vector<32x256xf32>
    %80 = vector.extract_strided_slice %26 {offsets = [0, 1], sizes = [32, 255], strides = [1, 1]} : vector<32x256xbf16> to vector<32x255xbf16>
    %81 = vector.extract_strided_slice %26 {offsets = [0, 0], sizes = [32, 1], strides = [1, 1]} : vector<32x256xbf16> to vector<32x1xbf16>
    %82 = tpu.concatenate %80, %81 in 1 : vector<32x255xbf16>, vector<32x1xbf16> -> vector<32x256xbf16>
    %c0_i32_34 = arith.constant 0 : i32
    %83 = arith.sitofp %c0_i32_34 : i32 to bf16
    %84 = vector.shape_cast %10 : vector<1x256xi1> to vector<1x256xi1>
    %85 = vector.broadcast %84 : vector<1x256xi1> to vector<32x256xi1>
    %86 = vector.broadcast %83 : bf16 to vector<32x256xbf16>
    %87 = arith.select %85, %82, %86 : vector<32x256xi1>, vector<32x256xbf16>
    %c5 = arith.constant 5 : index
    %c0_35 = arith.constant 0 : index
    %c0_36 = arith.constant 0 : index
    %88 = vector.load %arg3[%c5, %c0_35, %c0_36] : memref<90x32x32xbf16, #tpu.memory_space<vmem>>, vector<1x32x32xbf16>
    %89 = vector.shape_cast %88 : vector<1x32x32xbf16> to vector<32x32xbf16>
    %cst_37 = arith.constant dense<0.000000e+00> : vector<32x256xf32>
    %90 = tpu.matmul %89, %87, %cst_37 {dimension_numbers = #tpu.dot_dimension_numbers<[1], [0], [0], [1], [0, 0, 1, 1], [], []>} : vector<32x32xbf16>, vector<32x256xbf16>, vector<32x256xf32> -> vector<32x256xf32>
    %91 = arith.addf %79, %90 : vector<32x256xf32>
    %92 = vector.extract_strided_slice %26 {offsets = [0, 15], sizes = [32, 241], strides = [1, 1]} : vector<32x256xbf16> to vector<32x241xbf16>
    %93 = vector.extract_strided_slice %26 {offsets = [0, 0], sizes = [32, 15], strides = [1, 1]} : vector<32x256xbf16> to vector<32x15xbf16>
    %94 = tpu.concatenate %92, %93 in 1 : vector<32x241xbf16>, vector<32x15xbf16> -> vector<32x256xbf16>
    %95 = arith.andi %6, %8 : vector<1x256xi1>
    %c0_i32_38 = arith.constant 0 : i32
    %96 = arith.sitofp %c0_i32_38 : i32 to bf16
    %97 = vector.shape_cast %95 : vector<1x256xi1> to vector<1x256xi1>
    %98 = vector.broadcast %97 : vector<1x256xi1> to vector<32x256xi1>
    %99 = vector.broadcast %96 : bf16 to vector<32x256xbf16>
    %100 = arith.select %98, %94, %99 : vector<32x256xi1>, vector<32x256xbf16>
    %c6 = arith.constant 6 : index
    %c0_39 = arith.constant 0 : index
    %c0_40 = arith.constant 0 : index
    %101 = vector.load %arg3[%c6, %c0_39, %c0_40] : memref<90x32x32xbf16, #tpu.memory_space<vmem>>, vector<1x32x32xbf16>
    %102 = vector.shape_cast %101 : vector<1x32x32xbf16> to vector<32x32xbf16>
    %cst_41 = arith.constant dense<0.000000e+00> : vector<32x256xf32>
    %103 = tpu.matmul %102, %100, %cst_41 {dimension_numbers = #tpu.dot_dimension_numbers<[1], [0], [0], [1], [0, 0, 1, 1], [], []>} : vector<32x32xbf16>, vector<32x256xbf16>, vector<32x256xf32> -> vector<32x256xf32>
    %104 = arith.addf %91, %103 : vector<32x256xf32>
    %105 = vector.extract_strided_slice %26 {offsets = [0, 16], sizes = [32, 240], strides = [1, 1]} : vector<32x256xbf16> to vector<32x240xbf16>
    %106 = vector.extract_strided_slice %26 {offsets = [0, 0], sizes = [32, 16], strides = [1, 1]} : vector<32x256xbf16> to vector<32x16xbf16>
    %107 = tpu.concatenate %105, %106 in 1 : vector<32x240xbf16>, vector<32x16xbf16> -> vector<32x256xbf16>
    %c0_i32_42 = arith.constant 0 : i32
    %108 = arith.sitofp %c0_i32_42 : i32 to bf16
    %109 = vector.shape_cast %6 : vector<1x256xi1> to vector<1x256xi1>
    %110 = vector.broadcast %109 : vector<1x256xi1> to vector<32x256xi1>
    %111 = vector.broadcast %108 : bf16 to vector<32x256xbf16>
    %112 = arith.select %110, %107, %111 : vector<32x256xi1>, vector<32x256xbf16>
    %c7 = arith.constant 7 : index
    %c0_43 = arith.constant 0 : index
    %c0_44 = arith.constant 0 : index
    %113 = vector.load %arg3[%c7, %c0_43, %c0_44] : memref<90x32x32xbf16, #tpu.memory_space<vmem>>, vector<1x32x32xbf16>
    %114 = vector.shape_cast %113 : vector<1x32x32xbf16> to vector<32x32xbf16>
    %cst_45 = arith.constant dense<0.000000e+00> : vector<32x256xf32>
    %115 = tpu.matmul %114, %112, %cst_45 {dimension_numbers = #tpu.dot_dimension_numbers<[1], [0], [0], [1], [0, 0, 1, 1], [], []>} : vector<32x32xbf16>, vector<32x256xbf16>, vector<32x256xf32> -> vector<32x256xf32>
    %116 = arith.addf %104, %115 : vector<32x256xf32>
    %117 = vector.extract_strided_slice %26 {offsets = [0, 17], sizes = [32, 239], strides = [1, 1]} : vector<32x256xbf16> to vector<32x239xbf16>
    %118 = vector.extract_strided_slice %26 {offsets = [0, 0], sizes = [32, 17], strides = [1, 1]} : vector<32x256xbf16> to vector<32x17xbf16>
    %119 = tpu.concatenate %117, %118 in 1 : vector<32x239xbf16>, vector<32x17xbf16> -> vector<32x256xbf16>
    %120 = arith.andi %6, %10 : vector<1x256xi1>
    %c0_i32_46 = arith.constant 0 : i32
    %121 = arith.sitofp %c0_i32_46 : i32 to bf16
    %122 = vector.shape_cast %120 : vector<1x256xi1> to vector<1x256xi1>
    %123 = vector.broadcast %122 : vector<1x256xi1> to vector<32x256xi1>
    %124 = vector.broadcast %121 : bf16 to vector<32x256xbf16>
    %125 = arith.select %123, %119, %124 : vector<32x256xi1>, vector<32x256xbf16>
    %c8 = arith.constant 8 : index
    %c0_47 = arith.constant 0 : index
    %c0_48 = arith.constant 0 : index
    %126 = vector.load %arg3[%c8, %c0_47, %c0_48] : memref<90x32x32xbf16, #tpu.memory_space<vmem>>, vector<1x32x32xbf16>
    %127 = vector.shape_cast %126 : vector<1x32x32xbf16> to vector<32x32xbf16>
    %cst_49 = arith.constant dense<0.000000e+00> : vector<32x256xf32>
    %128 = tpu.matmul %127, %125, %cst_49 {dimension_numbers = #tpu.dot_dimension_numbers<[1], [0], [0], [1], [0, 0, 1, 1], [], []>} : vector<32x32xbf16>, vector<32x256xbf16>, vector<32x256xf32> -> vector<32x256xf32>
    %129 = arith.addf %116, %128 : vector<32x256xf32>
    %c1_50 = arith.constant 1 : index
    %c0_51 = arith.constant 0 : index
    %c0_52 = arith.constant 0 : index
    %130 = vector.load %arg4[%c1_50, %c0_51, %c0_52] : memref<11x32x1xf32, #tpu.memory_space<vmem>>, vector<1x32x1xf32>
    %131 = vector.shape_cast %130 : vector<1x32x1xf32> to vector<32x1xf32>
    %132 = vector.broadcast %131 : vector<32x1xf32> to vector<32x256xf32>
    %133 = arith.addf %129, %132 : vector<32x256xf32>
    %cst_53 = arith.constant 0.000000e+00 : f32
    %134 = vector.broadcast %cst_53 : f32 to vector<32x256xf32>
    %135 = arith.maximumf %133, %134 : vector<32x256xf32>
    %c0_54 = arith.constant 0 : index
    %c0_55 = arith.constant 0 : index
    %c0_56 = arith.constant 0 : index
    %136 = vector.load %arg5[%c0_54, %c0_55, %c0_56] : memref<1x32x256xf32, #tpu.memory_space<vmem>>, vector<1x32x256xf32>
    %137 = vector.shape_cast %136 : vector<1x32x256xf32> to vector<32x256xf32>
    %138 = arith.truncf %135 : vector<32x256xf32> to vector<32x256xbf16>
    %139 = vector.extract_strided_slice %138 {offsets = [0, 239], sizes = [32, 17], strides = [1, 1]} : vector<32x256xbf16> to vector<32x17xbf16>
    %140 = vector.extract_strided_slice %138 {offsets = [0, 0], sizes = [32, 239], strides = [1, 1]} : vector<32x256xbf16> to vector<32x239xbf16>
    %141 = tpu.concatenate %139, %140 in 1 : vector<32x17xbf16>, vector<32x239xbf16> -> vector<32x256xbf16>
    %142 = arith.andi %4, %8 : vector<1x256xi1>
    %c0_i32_57 = arith.constant 0 : i32
    %143 = arith.sitofp %c0_i32_57 : i32 to bf16
    %144 = vector.shape_cast %142 : vector<1x256xi1> to vector<1x256xi1>
    %145 = vector.broadcast %144 : vector<1x256xi1> to vector<32x256xi1>
    %146 = vector.broadcast %143 : bf16 to vector<32x256xbf16>
    %147 = arith.select %145, %141, %146 : vector<32x256xi1>, vector<32x256xbf16>
    %c9 = arith.constant 9 : index
    %c0_58 = arith.constant 0 : index
    %c0_59 = arith.constant 0 : index
    %148 = vector.load %arg3[%c9, %c0_58, %c0_59] : memref<90x32x32xbf16, #tpu.memory_space<vmem>>, vector<1x32x32xbf16>
    %149 = vector.shape_cast %148 : vector<1x32x32xbf16> to vector<32x32xbf16>
    %cst_60 = arith.constant dense<0.000000e+00> : vector<32x256xf32>
    %150 = tpu.matmul %149, %147, %cst_60 {dimension_numbers = #tpu.dot_dimension_numbers<[1], [0], [0], [1], [0, 0, 1, 1], [], []>} : vector<32x32xbf16>, vector<32x256xbf16>, vector<32x256xf32> -> vector<32x256xf32>
    %151 = vector.extract_strided_slice %138 {offsets = [0, 240], sizes = [32, 16], strides = [1, 1]} : vector<32x256xbf16> to vector<32x16xbf16>
    %152 = vector.extract_strided_slice %138 {offsets = [0, 0], sizes = [32, 240], strides = [1, 1]} : vector<32x256xbf16> to vector<32x240xbf16>
    %153 = tpu.concatenate %151, %152 in 1 : vector<32x16xbf16>, vector<32x240xbf16> -> vector<32x256xbf16>
    %c0_i32_61 = arith.constant 0 : i32
    %154 = arith.sitofp %c0_i32_61 : i32 to bf16
    %155 = vector.shape_cast %4 : vector<1x256xi1> to vector<1x256xi1>
    %156 = vector.broadcast %155 : vector<1x256xi1> to vector<32x256xi1>
    %157 = vector.broadcast %154 : bf16 to vector<32x256xbf16>
    %158 = arith.select %156, %153, %157 : vector<32x256xi1>, vector<32x256xbf16>
    %c10 = arith.constant 10 : index
    %c0_62 = arith.constant 0 : index
    %c0_63 = arith.constant 0 : index
    %159 = vector.load %arg3[%c10, %c0_62, %c0_63] : memref<90x32x32xbf16, #tpu.memory_space<vmem>>, vector<1x32x32xbf16>
    %160 = vector.shape_cast %159 : vector<1x32x32xbf16> to vector<32x32xbf16>
    %cst_64 = arith.constant dense<0.000000e+00> : vector<32x256xf32>
    %161 = tpu.matmul %160, %158, %cst_64 {dimension_numbers = #tpu.dot_dimension_numbers<[1], [0], [0], [1], [0, 0, 1, 1], [], []>} : vector<32x32xbf16>, vector<32x256xbf16>, vector<32x256xf32> -> vector<32x256xf32>
    %162 = arith.addf %150, %161 : vector<32x256xf32>
    %163 = vector.extract_strided_slice %138 {offsets = [0, 241], sizes = [32, 15], strides = [1, 1]} : vector<32x256xbf16> to vector<32x15xbf16>
    %164 = vector.extract_strided_slice %138 {offsets = [0, 0], sizes = [32, 241], strides = [1, 1]} : vector<32x256xbf16> to vector<32x241xbf16>
    %165 = tpu.concatenate %163, %164 in 1 : vector<32x15xbf16>, vector<32x241xbf16> -> vector<32x256xbf16>
    %166 = arith.andi %4, %10 : vector<1x256xi1>
    %c0_i32_65 = arith.constant 0 : i32
    %167 = arith.sitofp %c0_i32_65 : i32 to bf16
    %168 = vector.shape_cast %166 : vector<1x256xi1> to vector<1x256xi1>
    %169 = vector.broadcast %168 : vector<1x256xi1> to vector<32x256xi1>
    %170 = vector.broadcast %167 : bf16 to vector<32x256xbf16>
    %171 = arith.select %169, %165, %170 : vector<32x256xi1>, vector<32x256xbf16>
    %c11 = arith.constant 11 : index
    %c0_66 = arith.constant 0 : index
    %c0_67 = arith.constant 0 : index
    %172 = vector.load %arg3[%c11, %c0_66, %c0_67] : memref<90x32x32xbf16, #tpu.memory_space<vmem>>, vector<1x32x32xbf16>
    %173 = vector.shape_cast %172 : vector<1x32x32xbf16> to vector<32x32xbf16>
    %cst_68 = arith.constant dense<0.000000e+00> : vector<32x256xf32>
    %174 = tpu.matmul %173, %171, %cst_68 {dimension_numbers = #tpu.dot_dimension_numbers<[1], [0], [0], [1], [0, 0, 1, 1], [], []>} : vector<32x32xbf16>, vector<32x256xbf16>, vector<32x256xf32> -> vector<32x256xf32>
    %175 = arith.addf %162, %174 : vector<32x256xf32>
    %176 = vector.extract_strided_slice %138 {offsets = [0, 255], sizes = [32, 1], strides = [1, 1]} : vector<32x256xbf16> to vector<32x1xbf16>
    %177 = vector.extract_strided_slice %138 {offsets = [0, 0], sizes = [32, 255], strides = [1, 1]} : vector<32x256xbf16> to vector<32x255xbf16>
    %178 = tpu.concatenate %176, %177 in 1 : vector<32x1xbf16>, vector<32x255xbf16> -> vector<32x256xbf16>
    %c0_i32_69 = arith.constant 0 : i32
    %179 = arith.sitofp %c0_i32_69 : i32 to bf16
    %180 = vector.shape_cast %8 : vector<1x256xi1> to vector<1x256xi1>
    %181 = vector.broadcast %180 : vector<1x256xi1> to vector<32x256xi1>
    %182 = vector.broadcast %179 : bf16 to vector<32x256xbf16>
    %183 = arith.select %181, %178, %182 : vector<32x256xi1>, vector<32x256xbf16>
    %c12 = arith.constant 12 : index
    %c0_70 = arith.constant 0 : index
    %c0_71 = arith.constant 0 : index
    %184 = vector.load %arg3[%c12, %c0_70, %c0_71] : memref<90x32x32xbf16, #tpu.memory_space<vmem>>, vector<1x32x32xbf16>
    %185 = vector.shape_cast %184 : vector<1x32x32xbf16> to vector<32x32xbf16>
    %cst_72 = arith.constant dense<0.000000e+00> : vector<32x256xf32>
    %186 = tpu.matmul %185, %183, %cst_72 {dimension_numbers = #tpu.dot_dimension_numbers<[1], [0], [0], [1], [0, 0, 1, 1], [], []>} : vector<32x32xbf16>, vector<32x256xbf16>, vector<32x256xf32> -> vector<32x256xf32>
    %187 = arith.addf %175, %186 : vector<32x256xf32>
    %c13 = arith.constant 13 : index
    %c0_73 = arith.constant 0 : index
    %c0_74 = arith.constant 0 : index
    %188 = vector.load %arg3[%c13, %c0_73, %c0_74] : memref<90x32x32xbf16, #tpu.memory_space<vmem>>, vector<1x32x32xbf16>
    %189 = vector.shape_cast %188 : vector<1x32x32xbf16> to vector<32x32xbf16>
    %cst_75 = arith.constant dense<0.000000e+00> : vector<32x256xf32>
    %190 = tpu.matmul %189, %138, %cst_75 {dimension_numbers = #tpu.dot_dimension_numbers<[1], [0], [0], [1], [0, 0, 1, 1], [], []>} : vector<32x32xbf16>, vector<32x256xbf16>, vector<32x256xf32> -> vector<32x256xf32>
    %191 = arith.addf %187, %190 : vector<32x256xf32>
    %192 = vector.extract_strided_slice %138 {offsets = [0, 1], sizes = [32, 255], strides = [1, 1]} : vector<32x256xbf16> to vector<32x255xbf16>
    %193 = vector.extract_strided_slice %138 {offsets = [0, 0], sizes = [32, 1], strides = [1, 1]} : vector<32x256xbf16> to vector<32x1xbf16>
    %194 = tpu.concatenate %192, %193 in 1 : vector<32x255xbf16>, vector<32x1xbf16> -> vector<32x256xbf16>
    %c0_i32_76 = arith.constant 0 : i32
    %195 = arith.sitofp %c0_i32_76 : i32 to bf16
    %196 = vector.shape_cast %10 : vector<1x256xi1> to vector<1x256xi1>
    %197 = vector.broadcast %196 : vector<1x256xi1> to vector<32x256xi1>
    %198 = vector.broadcast %195 : bf16 to vector<32x256xbf16>
    %199 = arith.select %197, %194, %198 : vector<32x256xi1>, vector<32x256xbf16>
    %c14 = arith.constant 14 : index
    %c0_77 = arith.constant 0 : index
    %c0_78 = arith.constant 0 : index
    %200 = vector.load %arg3[%c14, %c0_77, %c0_78] : memref<90x32x32xbf16, #tpu.memory_space<vmem>>, vector<1x32x32xbf16>
    %201 = vector.shape_cast %200 : vector<1x32x32xbf16> to vector<32x32xbf16>
    %cst_79 = arith.constant dense<0.000000e+00> : vector<32x256xf32>
    %202 = tpu.matmul %201, %199, %cst_79 {dimension_numbers = #tpu.dot_dimension_numbers<[1], [0], [0], [1], [0, 0, 1, 1], [], []>} : vector<32x32xbf16>, vector<32x256xbf16>, vector<32x256xf32> -> vector<32x256xf32>
    %203 = arith.addf %191, %202 : vector<32x256xf32>
    %204 = vector.extract_strided_slice %138 {offsets = [0, 15], sizes = [32, 241], strides = [1, 1]} : vector<32x256xbf16> to vector<32x241xbf16>
    %205 = vector.extract_strided_slice %138 {offsets = [0, 0], sizes = [32, 15], strides = [1, 1]} : vector<32x256xbf16> to vector<32x15xbf16>
    %206 = tpu.concatenate %204, %205 in 1 : vector<32x241xbf16>, vector<32x15xbf16> -> vector<32x256xbf16>
    %207 = arith.andi %6, %8 : vector<1x256xi1>
    %c0_i32_80 = arith.constant 0 : i32
    %208 = arith.sitofp %c0_i32_80 : i32 to bf16
    %209 = vector.shape_cast %207 : vector<1x256xi1> to vector<1x256xi1>
    %210 = vector.broadcast %209 : vector<1x256xi1> to vector<32x256xi1>
    %211 = vector.broadcast %208 : bf16 to vector<32x256xbf16>
    %212 = arith.select %210, %206, %211 : vector<32x256xi1>, vector<32x256xbf16>
    %c15 = arith.constant 15 : index
    %c0_81 = arith.constant 0 : index
    %c0_82 = arith.constant 0 : index
    %213 = vector.load %arg3[%c15, %c0_81, %c0_82] : memref<90x32x32xbf16, #tpu.memory_space<vmem>>, vector<1x32x32xbf16>
    %214 = vector.shape_cast %213 : vector<1x32x32xbf16> to vector<32x32xbf16>
    %cst_83 = arith.constant dense<0.000000e+00> : vector<32x256xf32>
    %215 = tpu.matmul %214, %212, %cst_83 {dimension_numbers = #tpu.dot_dimension_numbers<[1], [0], [0], [1], [0, 0, 1, 1], [], []>} : vector<32x32xbf16>, vector<32x256xbf16>, vector<32x256xf32> -> vector<32x256xf32>
    %216 = arith.addf %203, %215 : vector<32x256xf32>
    %217 = vector.extract_strided_slice %138 {offsets = [0, 16], sizes = [32, 240], strides = [1, 1]} : vector<32x256xbf16> to vector<32x240xbf16>
    %218 = vector.extract_strided_slice %138 {offsets = [0, 0], sizes = [32, 16], strides = [1, 1]} : vector<32x256xbf16> to vector<32x16xbf16>
    %219 = tpu.concatenate %217, %218 in 1 : vector<32x240xbf16>, vector<32x16xbf16> -> vector<32x256xbf16>
    %c0_i32_84 = arith.constant 0 : i32
    %220 = arith.sitofp %c0_i32_84 : i32 to bf16
    %221 = vector.shape_cast %6 : vector<1x256xi1> to vector<1x256xi1>
    %222 = vector.broadcast %221 : vector<1x256xi1> to vector<32x256xi1>
    %223 = vector.broadcast %220 : bf16 to vector<32x256xbf16>
    %224 = arith.select %222, %219, %223 : vector<32x256xi1>, vector<32x256xbf16>
    %c16 = arith.constant 16 : index
    %c0_85 = arith.constant 0 : index
    %c0_86 = arith.constant 0 : index
    %225 = vector.load %arg3[%c16, %c0_85, %c0_86] : memref<90x32x32xbf16, #tpu.memory_space<vmem>>, vector<1x32x32xbf16>
    %226 = vector.shape_cast %225 : vector<1x32x32xbf16> to vector<32x32xbf16>
    %cst_87 = arith.constant dense<0.000000e+00> : vector<32x256xf32>
    %227 = tpu.matmul %226, %224, %cst_87 {dimension_numbers = #tpu.dot_dimension_numbers<[1], [0], [0], [1], [0, 0, 1, 1], [], []>} : vector<32x32xbf16>, vector<32x256xbf16>, vector<32x256xf32> -> vector<32x256xf32>
    %228 = arith.addf %216, %227 : vector<32x256xf32>
    %229 = vector.extract_strided_slice %138 {offsets = [0, 17], sizes = [32, 239], strides = [1, 1]} : vector<32x256xbf16> to vector<32x239xbf16>
    %230 = vector.extract_strided_slice %138 {offsets = [0, 0], sizes = [32, 17], strides = [1, 1]} : vector<32x256xbf16> to vector<32x17xbf16>
    %231 = tpu.concatenate %229, %230 in 1 : vector<32x239xbf16>, vector<32x17xbf16> -> vector<32x256xbf16>
    %232 = arith.andi %6, %10 : vector<1x256xi1>
    %c0_i32_88 = arith.constant 0 : i32
    %233 = arith.sitofp %c0_i32_88 : i32 to bf16
    %234 = vector.shape_cast %232 : vector<1x256xi1> to vector<1x256xi1>
    %235 = vector.broadcast %234 : vector<1x256xi1> to vector<32x256xi1>
    %236 = vector.broadcast %233 : bf16 to vector<32x256xbf16>
    %237 = arith.select %235, %231, %236 : vector<32x256xi1>, vector<32x256xbf16>
    %c17 = arith.constant 17 : index
    %c0_89 = arith.constant 0 : index
    %c0_90 = arith.constant 0 : index
    %238 = vector.load %arg3[%c17, %c0_89, %c0_90] : memref<90x32x32xbf16, #tpu.memory_space<vmem>>, vector<1x32x32xbf16>
    %239 = vector.shape_cast %238 : vector<1x32x32xbf16> to vector<32x32xbf16>
    %cst_91 = arith.constant dense<0.000000e+00> : vector<32x256xf32>
    %240 = tpu.matmul %239, %237, %cst_91 {dimension_numbers = #tpu.dot_dimension_numbers<[1], [0], [0], [1], [0, 0, 1, 1], [], []>} : vector<32x32xbf16>, vector<32x256xbf16>, vector<32x256xf32> -> vector<32x256xf32>
    %241 = arith.addf %228, %240 : vector<32x256xf32>
    %242 = arith.addf %137, %241 : vector<32x256xf32>
    %c2_92 = arith.constant 2 : index
    %c0_93 = arith.constant 0 : index
    %c0_94 = arith.constant 0 : index
    %243 = vector.load %arg4[%c2_92, %c0_93, %c0_94] : memref<11x32x1xf32, #tpu.memory_space<vmem>>, vector<1x32x1xf32>
    %244 = vector.shape_cast %243 : vector<1x32x1xf32> to vector<32x1xf32>
    %245 = vector.broadcast %244 : vector<32x1xf32> to vector<32x256xf32>
    %246 = arith.addf %242, %245 : vector<32x256xf32>
    %c0_95 = arith.constant 0 : index
    %c0_96 = arith.constant 0 : index
    %c0_97 = arith.constant 0 : index
    %247 = vector.load %arg5[%c0_95, %c0_96, %c0_97] : memref<1x32x256xf32, #tpu.memory_space<vmem>>, vector<1x32x256xf32>
    %248 = vector.shape_cast %247 : vector<1x32x256xf32> to vector<32x256xf32>
    %249 = vector.shape_cast %246 : vector<32x256xf32> to vector<1x32x256xf32>
    tpu.vector_store %arg5[%c0_95, %c0_96, %c0_97], %249 {strides = array<i32>} : memref<1x32x256xf32, #tpu.memory_space<vmem>>, vector<1x32x256xf32>,
    %c0_98 = arith.constant 0 : index
    %c0_99 = arith.constant 0 : index
    %c0_100 = arith.constant 0 : index
    %250 = vector.load %arg5[%c0_98, %c0_99, %c0_100] : memref<1x32x256xf32, #tpu.memory_space<vmem>>, vector<1x32x256xf32>
    %251 = vector.shape_cast %250 : vector<1x32x256xf32> to vector<32x256xf32>
    %252 = arith.truncf %251 : vector<32x256xf32> to vector<32x256xbf16>
    %253 = vector.extract_strided_slice %252 {offsets = [0, 239], sizes = [32, 17], strides = [1, 1]} : vector<32x256xbf16> to vector<32x17xbf16>
    %254 = vector.extract_strided_slice %252 {offsets = [0, 0], sizes = [32, 239], strides = [1, 1]} : vector<32x256xbf16> to vector<32x239xbf16>
    %255 = tpu.concatenate %253, %254 in 1 : vector<32x17xbf16>, vector<32x239xbf16> -> vector<32x256xbf16>
    %256 = arith.andi %4, %8 : vector<1x256xi1>
    %c0_i32_101 = arith.constant 0 : i32
    %257 = arith.sitofp %c0_i32_101 : i32 to bf16
    %258 = vector.shape_cast %256 : vector<1x256xi1> to vector<1x256xi1>
    %259 = vector.broadcast %258 : vector<1x256xi1> to vector<32x256xi1>
    %260 = vector.broadcast %257 : bf16 to vector<32x256xbf16>
    %261 = arith.select %259, %255, %260 : vector<32x256xi1>, vector<32x256xbf16>
    %c18 = arith.constant 18 : index
    %c0_102 = arith.constant 0 : index
    %c0_103 = arith.constant 0 : index
    %262 = vector.load %arg3[%c18, %c0_102, %c0_103] : memref<90x32x32xbf16, #tpu.memory_space<vmem>>, vector<1x32x32xbf16>
    %263 = vector.shape_cast %262 : vector<1x32x32xbf16> to vector<32x32xbf16>
    %cst_104 = arith.constant dense<0.000000e+00> : vector<32x256xf32>
    %264 = tpu.matmul %263, %261, %cst_104 {dimension_numbers = #tpu.dot_dimension_numbers<[1], [0], [0], [1], [0, 0, 1, 1], [], []>} : vector<32x32xbf16>, vector<32x256xbf16>, vector<32x256xf32> -> vector<32x256xf32>
    %265 = vector.extract_strided_slice %252 {offsets = [0, 240], sizes = [32, 16], strides = [1, 1]} : vector<32x256xbf16> to vector<32x16xbf16>
    %266 = vector.extract_strided_slice %252 {offsets = [0, 0], sizes = [32, 240], strides = [1, 1]} : vector<32x256xbf16> to vector<32x240xbf16>
    %267 = tpu.concatenate %265, %266 in 1 : vector<32x16xbf16>, vector<32x240xbf16> -> vector<32x256xbf16>
    %c0_i32_105 = arith.constant 0 : i32
    %268 = arith.sitofp %c0_i32_105 : i32 to bf16
    %269 = vector.shape_cast %4 : vector<1x256xi1> to vector<1x256xi1>
    %270 = vector.broadcast %269 : vector<1x256xi1> to vector<32x256xi1>
    %271 = vector.broadcast %268 : bf16 to vector<32x256xbf16>
    %272 = arith.select %270, %267, %271 : vector<32x256xi1>, vector<32x256xbf16>
    %c19 = arith.constant 19 : index
    %c0_106 = arith.constant 0 : index
    %c0_107 = arith.constant 0 : index
    %273 = vector.load %arg3[%c19, %c0_106, %c0_107] : memref<90x32x32xbf16, #tpu.memory_space<vmem>>, vector<1x32x32xbf16>
    %274 = vector.shape_cast %273 : vector<1x32x32xbf16> to vector<32x32xbf16>
    %cst_108 = arith.constant dense<0.000000e+00> : vector<32x256xf32>
    %275 = tpu.matmul %274, %272, %cst_108 {dimension_numbers = #tpu.dot_dimension_numbers<[1], [0], [0], [1], [0, 0, 1, 1], [], []>} : vector<32x32xbf16>, vector<32x256xbf16>, vector<32x256xf32> -> vector<32x256xf32>
    %276 = arith.addf %264, %275 : vector<32x256xf32>
    %277 = vector.extract_strided_slice %252 {offsets = [0, 241], sizes = [32, 15], strides = [1, 1]} : vector<32x256xbf16> to vector<32x15xbf16>
    %278 = vector.extract_strided_slice %252 {offsets = [0, 0], sizes = [32, 241], strides = [1, 1]} : vector<32x256xbf16> to vector<32x241xbf16>
    %279 = tpu.concatenate %277, %278 in 1 : vector<32x15xbf16>, vector<32x241xbf16> -> vector<32x256xbf16>
    %280 = arith.andi %4, %10 : vector<1x256xi1>
    %c0_i32_109 = arith.constant 0 : i32
    %281 = arith.sitofp %c0_i32_109 : i32 to bf16
    %282 = vector.shape_cast %280 : vector<1x256xi1> to vector<1x256xi1>
    %283 = vector.broadcast %282 : vector<1x256xi1> to vector<32x256xi1>
    %284 = vector.broadcast %281 : bf16 to vector<32x256xbf16>
    %285 = arith.select %283, %279, %284 : vector<32x256xi1>, vector<32x256xbf16>
    %c20 = arith.constant 20 : index
    %c0_110 = arith.constant 0 : index
    %c0_111 = arith.constant 0 : index
    %286 = vector.load %arg3[%c20, %c0_110, %c0_111] : memref<90x32x32xbf16, #tpu.memory_space<vmem>>, vector<1x32x32xbf16>
    %287 = vector.shape_cast %286 : vector<1x32x32xbf16> to vector<32x32xbf16>
    %cst_112 = arith.constant dense<0.000000e+00> : vector<32x256xf32>
    %288 = tpu.matmul %287, %285, %cst_112 {dimension_numbers = #tpu.dot_dimension_numbers<[1], [0], [0], [1], [0, 0, 1, 1], [], []>} : vector<32x32xbf16>, vector<32x256xbf16>, vector<32x256xf32> -> vector<32x256xf32>
    %289 = arith.addf %276, %288 : vector<32x256xf32>
    %290 = vector.extract_strided_slice %252 {offsets = [0, 255], sizes = [32, 1], strides = [1, 1]} : vector<32x256xbf16> to vector<32x1xbf16>
    %291 = vector.extract_strided_slice %252 {offsets = [0, 0], sizes = [32, 255], strides = [1, 1]} : vector<32x256xbf16> to vector<32x255xbf16>
    %292 = tpu.concatenate %290, %291 in 1 : vector<32x1xbf16>, vector<32x255xbf16> -> vector<32x256xbf16>
    %c0_i32_113 = arith.constant 0 : i32
    %293 = arith.sitofp %c0_i32_113 : i32 to bf16
    %294 = vector.shape_cast %8 : vector<1x256xi1> to vector<1x256xi1>
    %295 = vector.broadcast %294 : vector<1x256xi1> to vector<32x256xi1>
    %296 = vector.broadcast %293 : bf16 to vector<32x256xbf16>
    %297 = arith.select %295, %292, %296 : vector<32x256xi1>, vector<32x256xbf16>
    %c21 = arith.constant 21 : index
    %c0_114 = arith.constant 0 : index
    %c0_115 = arith.constant 0 : index
    %298 = vector.load %arg3[%c21, %c0_114, %c0_115] : memref<90x32x32xbf16, #tpu.memory_space<vmem>>, vector<1x32x32xbf16>
    %299 = vector.shape_cast %298 : vector<1x32x32xbf16> to vector<32x32xbf16>
    %cst_116 = arith.constant dense<0.000000e+00> : vector<32x256xf32>
    %300 = tpu.matmul %299, %297, %cst_116 {dimension_numbers = #tpu.dot_dimension_numbers<[1], [0], [0], [1], [0, 0, 1, 1], [], []>} : vector<32x32xbf16>, vector<32x256xbf16>, vector<32x256xf32> -> vector<32x256xf32>
    %301 = arith.addf %289, %300 : vector<32x256xf32>
    %c22 = arith.constant 22 : index
    %c0_117 = arith.constant 0 : index
    %c0_118 = arith.constant 0 : index
    %302 = vector.load %arg3[%c22, %c0_117, %c0_118] : memref<90x32x32xbf16, #tpu.memory_space<vmem>>, vector<1x32x32xbf16>
    %303 = vector.shape_cast %302 : vector<1x32x32xbf16> to vector<32x32xbf16>
    %cst_119 = arith.constant dense<0.000000e+00> : vector<32x256xf32>
    %304 = tpu.matmul %303, %252, %cst_119 {dimension_numbers = #tpu.dot_dimension_numbers<[1], [0], [0], [1], [0, 0, 1, 1], [], []>} : vector<32x32xbf16>, vector<32x256xbf16>, vector<32x256xf32> -> vector<32x256xf32>
    %305 = arith.addf %301, %304 : vector<32x256xf32>
    %306 = vector.extract_strided_slice %252 {offsets = [0, 1], sizes = [32, 255], strides = [1, 1]} : vector<32x256xbf16> to vector<32x255xbf16>
    %307 = vector.extract_strided_slice %252 {offsets = [0, 0], sizes = [32, 1], strides = [1, 1]} : vector<32x256xbf16> to vector<32x1xbf16>
    %308 = tpu.concatenate %306, %307 in 1 : vector<32x255xbf16>, vector<32x1xbf16> -> vector<32x256xbf16>
    %c0_i32_120 = arith.constant 0 : i32
    %309 = arith.sitofp %c0_i32_120 : i32 to bf16
    %310 = vector.shape_cast %10 : vector<1x256xi1> to vector<1x256xi1>
    %311 = vector.broadcast %310 : vector<1x256xi1> to vector<32x256xi1>
    %312 = vector.broadcast %309 : bf16 to vector<32x256xbf16>
    %313 = arith.select %311, %308, %312 : vector<32x256xi1>, vector<32x256xbf16>
    %c23 = arith.constant 23 : index
    %c0_121 = arith.constant 0 : index
    %c0_122 = arith.constant 0 : index
    %314 = vector.load %arg3[%c23, %c0_121, %c0_122] : memref<90x32x32xbf16, #tpu.memory_space<vmem>>, vector<1x32x32xbf16>
    %315 = vector.shape_cast %314 : vector<1x32x32xbf16> to vector<32x32xbf16>
    %cst_123 = arith.constant dense<0.000000e+00> : vector<32x256xf32>
    %316 = tpu.matmul %315, %313, %cst_123 {dimension_numbers = #tpu.dot_dimension_numbers<[1], [0], [0], [1], [0, 0, 1, 1], [], []>} : vector<32x32xbf16>, vector<32x256xbf16>, vector<32x256xf32> -> vector<32x256xf32>
    %317 = arith.addf %305, %316 : vector<32x256xf32>
    %318 = vector.extract_strided_slice %252 {offsets = [0, 15], sizes = [32, 241], strides = [1, 1]} : vector<32x256xbf16> to vector<32x241xbf16>
    %319 = vector.extract_strided_slice %252 {offsets = [0, 0], sizes = [32, 15], strides = [1, 1]} : vector<32x256xbf16> to vector<32x15xbf16>
    %320 = tpu.concatenate %318, %319 in 1 : vector<32x241xbf16>, vector<32x15xbf16> -> vector<32x256xbf16>
    %321 = arith.andi %6, %8 : vector<1x256xi1>
    %c0_i32_124 = arith.constant 0 : i32
    %322 = arith.sitofp %c0_i32_124 : i32 to bf16
    %323 = vector.shape_cast %321 : vector<1x256xi1> to vector<1x256xi1>
    %324 = vector.broadcast %323 : vector<1x256xi1> to vector<32x256xi1>
    %325 = vector.broadcast %322 : bf16 to vector<32x256xbf16>
    %326 = arith.select %324, %320, %325 : vector<32x256xi1>, vector<32x256xbf16>
    %c24 = arith.constant 24 : index
    %c0_125 = arith.constant 0 : index
    %c0_126 = arith.constant 0 : index
    %327 = vector.load %arg3[%c24, %c0_125, %c0_126] : memref<90x32x32xbf16, #tpu.memory_space<vmem>>, vector<1x32x32xbf16>
    %328 = vector.shape_cast %327 : vector<1x32x32xbf16> to vector<32x32xbf16>
    %cst_127 = arith.constant dense<0.000000e+00> : vector<32x256xf32>
    %329 = tpu.matmul %328, %326, %cst_127 {dimension_numbers = #tpu.dot_dimension_numbers<[1], [0], [0], [1], [0, 0, 1, 1], [], []>} : vector<32x32xbf16>, vector<32x256xbf16>, vector<32x256xf32> -> vector<32x256xf32>
    %330 = arith.addf %317, %329 : vector<32x256xf32>
    %331 = vector.extract_strided_slice %252 {offsets = [0, 16], sizes = [32, 240], strides = [1, 1]} : vector<32x256xbf16> to vector<32x240xbf16>
    %332 = vector.extract_strided_slice %252 {offsets = [0, 0], sizes = [32, 16], strides = [1, 1]} : vector<32x256xbf16> to vector<32x16xbf16>
    %333 = tpu.concatenate %331, %332 in 1 : vector<32x240xbf16>, vector<32x16xbf16> -> vector<32x256xbf16>
    %c0_i32_128 = arith.constant 0 : i32
    %334 = arith.sitofp %c0_i32_128 : i32 to bf16
    %335 = vector.shape_cast %6 : vector<1x256xi1> to vector<1x256xi1>
    %336 = vector.broadcast %335 : vector<1x256xi1> to vector<32x256xi1>
    %337 = vector.broadcast %334 : bf16 to vector<32x256xbf16>
    %338 = arith.select %336, %333, %337 : vector<32x256xi1>, vector<32x256xbf16>
    %c25 = arith.constant 25 : index
    %c0_129 = arith.constant 0 : index
    %c0_130 = arith.constant 0 : index
    %339 = vector.load %arg3[%c25, %c0_129, %c0_130] : memref<90x32x32xbf16, #tpu.memory_space<vmem>>, vector<1x32x32xbf16>
    %340 = vector.shape_cast %339 : vector<1x32x32xbf16> to vector<32x32xbf16>
    %cst_131 = arith.constant dense<0.000000e+00> : vector<32x256xf32>
    %341 = tpu.matmul %340, %338, %cst_131 {dimension_numbers = #tpu.dot_dimension_numbers<[1], [0], [0], [1], [0, 0, 1, 1], [], []>} : vector<32x32xbf16>, vector<32x256xbf16>, vector<32x256xf32> -> vector<32x256xf32>
    %342 = arith.addf %330, %341 : vector<32x256xf32>
    %343 = vector.extract_strided_slice %252 {offsets = [0, 17], sizes = [32, 239], strides = [1, 1]} : vector<32x256xbf16> to vector<32x239xbf16>
    %344 = vector.extract_strided_slice %252 {offsets = [0, 0], sizes = [32, 17], strides = [1, 1]} : vector<32x256xbf16> to vector<32x17xbf16>
    %345 = tpu.concatenate %343, %344 in 1 : vector<32x239xbf16>, vector<32x17xbf16> -> vector<32x256xbf16>
    %346 = arith.andi %6, %10 : vector<1x256xi1>
    %c0_i32_132 = arith.constant 0 : i32
    %347 = arith.sitofp %c0_i32_132 : i32 to bf16
    %348 = vector.shape_cast %346 : vector<1x256xi1> to vector<1x256xi1>
    %349 = vector.broadcast %348 : vector<1x256xi1> to vector<32x256xi1>
    %350 = vector.broadcast %347 : bf16 to vector<32x256xbf16>
    %351 = arith.select %349, %345, %350 : vector<32x256xi1>, vector<32x256xbf16>
    %c26 = arith.constant 26 : index
    %c0_133 = arith.constant 0 : index
    %c0_134 = arith.constant 0 : index
    %352 = vector.load %arg3[%c26, %c0_133, %c0_134] : memref<90x32x32xbf16, #tpu.memory_space<vmem>>, vector<1x32x32xbf16>
    %353 = vector.shape_cast %352 : vector<1x32x32xbf16> to vector<32x32xbf16>
    %cst_135 = arith.constant dense<0.000000e+00> : vector<32x256xf32>
    %354 = tpu.matmul %353, %351, %cst_135 {dimension_numbers = #tpu.dot_dimension_numbers<[1], [0], [0], [1], [0, 0, 1, 1], [], []>} : vector<32x32xbf16>, vector<32x256xbf16>, vector<32x256xf32> -> vector<32x256xf32>
    %355 = arith.addf %342, %354 : vector<32x256xf32>
    %c3_136 = arith.constant 3 : index
    %c0_137 = arith.constant 0 : index
    %c0_138 = arith.constant 0 : index
    %356 = vector.load %arg4[%c3_136, %c0_137, %c0_138] : memref<11x32x1xf32, #tpu.memory_space<vmem>>, vector<1x32x1xf32>
    %357 = vector.shape_cast %356 : vector<1x32x1xf32> to vector<32x1xf32>
    %358 = vector.broadcast %357 : vector<32x1xf32> to vector<32x256xf32>
    %359 = arith.addf %355, %358 : vector<32x256xf32>
    %cst_139 = arith.constant 0.000000e+00 : f32
    %360 = vector.broadcast %cst_139 : f32 to vector<32x256xf32>
    %361 = arith.maximumf %359, %360 : vector<32x256xf32>
    %c0_140 = arith.constant 0 : index
    %c0_141 = arith.constant 0 : index
    %c0_142 = arith.constant 0 : index
    %362 = vector.load %arg5[%c0_140, %c0_141, %c0_142] : memref<1x32x256xf32, #tpu.memory_space<vmem>>, vector<1x32x256xf32>
    %363 = vector.shape_cast %362 : vector<1x32x256xf32> to vector<32x256xf32>
    %364 = arith.truncf %361 : vector<32x256xf32> to vector<32x256xbf16>
    %365 = vector.extract_strided_slice %364 {offsets = [0, 239], sizes = [32, 17], strides = [1, 1]} : vector<32x256xbf16> to vector<32x17xbf16>
    %366 = vector.extract_strided_slice %364 {offsets = [0, 0], sizes = [32, 239], strides = [1, 1]} : vector<32x256xbf16> to vector<32x239xbf16>
    %367 = tpu.concatenate %365, %366 in 1 : vector<32x17xbf16>, vector<32x239xbf16> -> vector<32x256xbf16>
    %368 = arith.andi %4, %8 : vector<1x256xi1>
    %c0_i32_143 = arith.constant 0 : i32
    %369 = arith.sitofp %c0_i32_143 : i32 to bf16
    %370 = vector.shape_cast %368 : vector<1x256xi1> to vector<1x256xi1>
    %371 = vector.broadcast %370 : vector<1x256xi1> to vector<32x256xi1>
    %372 = vector.broadcast %369 : bf16 to vector<32x256xbf16>
    %373 = arith.select %371, %367, %372 : vector<32x256xi1>, vector<32x256xbf16>
    %c27 = arith.constant 27 : index
    %c0_144 = arith.constant 0 : index
    %c0_145 = arith.constant 0 : index
    %374 = vector.load %arg3[%c27, %c0_144, %c0_145] : memref<90x32x32xbf16, #tpu.memory_space<vmem>>, vector<1x32x32xbf16>
    %375 = vector.shape_cast %374 : vector<1x32x32xbf16> to vector<32x32xbf16>
    %cst_146 = arith.constant dense<0.000000e+00> : vector<32x256xf32>
    %376 = tpu.matmul %375, %373, %cst_146 {dimension_numbers = #tpu.dot_dimension_numbers<[1], [0], [0], [1], [0, 0, 1, 1], [], []>} : vector<32x32xbf16>, vector<32x256xbf16>, vector<32x256xf32> -> vector<32x256xf32>
    %377 = vector.extract_strided_slice %364 {offsets = [0, 240], sizes = [32, 16], strides = [1, 1]} : vector<32x256xbf16> to vector<32x16xbf16>
    %378 = vector.extract_strided_slice %364 {offsets = [0, 0], sizes = [32, 240], strides = [1, 1]} : vector<32x256xbf16> to vector<32x240xbf16>
    %379 = tpu.concatenate %377, %378 in 1 : vector<32x16xbf16>, vector<32x240xbf16> -> vector<32x256xbf16>
    %c0_i32_147 = arith.constant 0 : i32
    %380 = arith.sitofp %c0_i32_147 : i32 to bf16
    %381 = vector.shape_cast %4 : vector<1x256xi1> to vector<1x256xi1>
    %382 = vector.broadcast %381 : vector<1x256xi1> to vector<32x256xi1>
    %383 = vector.broadcast %380 : bf16 to vector<32x256xbf16>
    %384 = arith.select %382, %379, %383 : vector<32x256xi1>, vector<32x256xbf16>
    %c28 = arith.constant 28 : index
    %c0_148 = arith.constant 0 : index
    %c0_149 = arith.constant 0 : index
    %385 = vector.load %arg3[%c28, %c0_148, %c0_149] : memref<90x32x32xbf16, #tpu.memory_space<vmem>>, vector<1x32x32xbf16>
    %386 = vector.shape_cast %385 : vector<1x32x32xbf16> to vector<32x32xbf16>
    %cst_150 = arith.constant dense<0.000000e+00> : vector<32x256xf32>
    %387 = tpu.matmul %386, %384, %cst_150 {dimension_numbers = #tpu.dot_dimension_numbers<[1], [0], [0], [1], [0, 0, 1, 1], [], []>} : vector<32x32xbf16>, vector<32x256xbf16>, vector<32x256xf32> -> vector<32x256xf32>
    %388 = arith.addf %376, %387 : vector<32x256xf32>
    %389 = vector.extract_strided_slice %364 {offsets = [0, 241], sizes = [32, 15], strides = [1, 1]} : vector<32x256xbf16> to vector<32x15xbf16>
    %390 = vector.extract_strided_slice %364 {offsets = [0, 0], sizes = [32, 241], strides = [1, 1]} : vector<32x256xbf16> to vector<32x241xbf16>
    %391 = tpu.concatenate %389, %390 in 1 : vector<32x15xbf16>, vector<32x241xbf16> -> vector<32x256xbf16>
    %392 = arith.andi %4, %10 : vector<1x256xi1>
    %c0_i32_151 = arith.constant 0 : i32
    %393 = arith.sitofp %c0_i32_151 : i32 to bf16
    %394 = vector.shape_cast %392 : vector<1x256xi1> to vector<1x256xi1>
    %395 = vector.broadcast %394 : vector<1x256xi1> to vector<32x256xi1>
    %396 = vector.broadcast %393 : bf16 to vector<32x256xbf16>
    %397 = arith.select %395, %391, %396 : vector<32x256xi1>, vector<32x256xbf16>
    %c29 = arith.constant 29 : index
    %c0_152 = arith.constant 0 : index
    %c0_153 = arith.constant 0 : index
    %398 = vector.load %arg3[%c29, %c0_152, %c0_153] : memref<90x32x32xbf16, #tpu.memory_space<vmem>>, vector<1x32x32xbf16>
    %399 = vector.shape_cast %398 : vector<1x32x32xbf16> to vector<32x32xbf16>
    %cst_154 = arith.constant dense<0.000000e+00> : vector<32x256xf32>
    %400 = tpu.matmul %399, %397, %cst_154 {dimension_numbers = #tpu.dot_dimension_numbers<[1], [0], [0], [1], [0, 0, 1, 1], [], []>} : vector<32x32xbf16>, vector<32x256xbf16>, vector<32x256xf32> -> vector<32x256xf32>
    %401 = arith.addf %388, %400 : vector<32x256xf32>
    %402 = vector.extract_strided_slice %364 {offsets = [0, 255], sizes = [32, 1], strides = [1, 1]} : vector<32x256xbf16> to vector<32x1xbf16>
    %403 = vector.extract_strided_slice %364 {offsets = [0, 0], sizes = [32, 255], strides = [1, 1]} : vector<32x256xbf16> to vector<32x255xbf16>
    %404 = tpu.concatenate %402, %403 in 1 : vector<32x1xbf16>, vector<32x255xbf16> -> vector<32x256xbf16>
    %c0_i32_155 = arith.constant 0 : i32
    %405 = arith.sitofp %c0_i32_155 : i32 to bf16
    %406 = vector.shape_cast %8 : vector<1x256xi1> to vector<1x256xi1>
    %407 = vector.broadcast %406 : vector<1x256xi1> to vector<32x256xi1>
    %408 = vector.broadcast %405 : bf16 to vector<32x256xbf16>
    %409 = arith.select %407, %404, %408 : vector<32x256xi1>, vector<32x256xbf16>
    %c30 = arith.constant 30 : index
    %c0_156 = arith.constant 0 : index
    %c0_157 = arith.constant 0 : index
    %410 = vector.load %arg3[%c30, %c0_156, %c0_157] : memref<90x32x32xbf16, #tpu.memory_space<vmem>>, vector<1x32x32xbf16>
    %411 = vector.shape_cast %410 : vector<1x32x32xbf16> to vector<32x32xbf16>
    %cst_158 = arith.constant dense<0.000000e+00> : vector<32x256xf32>
    %412 = tpu.matmul %411, %409, %cst_158 {dimension_numbers = #tpu.dot_dimension_numbers<[1], [0], [0], [1], [0, 0, 1, 1], [], []>} : vector<32x32xbf16>, vector<32x256xbf16>, vector<32x256xf32> -> vector<32x256xf32>
    %413 = arith.addf %401, %412 : vector<32x256xf32>
    %c31 = arith.constant 31 : index
    %c0_159 = arith.constant 0 : index
    %c0_160 = arith.constant 0 : index
    %414 = vector.load %arg3[%c31, %c0_159, %c0_160] : memref<90x32x32xbf16, #tpu.memory_space<vmem>>, vector<1x32x32xbf16>
    %415 = vector.shape_cast %414 : vector<1x32x32xbf16> to vector<32x32xbf16>
    %cst_161 = arith.constant dense<0.000000e+00> : vector<32x256xf32>
    %416 = tpu.matmul %415, %364, %cst_161 {dimension_numbers = #tpu.dot_dimension_numbers<[1], [0], [0], [1], [0, 0, 1, 1], [], []>} : vector<32x32xbf16>, vector<32x256xbf16>, vector<32x256xf32> -> vector<32x256xf32>
    %417 = arith.addf %413, %416 : vector<32x256xf32>
    %418 = vector.extract_strided_slice %364 {offsets = [0, 1], sizes = [32, 255], strides = [1, 1]} : vector<32x256xbf16> to vector<32x255xbf16>
    %419 = vector.extract_strided_slice %364 {offsets = [0, 0], sizes = [32, 1], strides = [1, 1]} : vector<32x256xbf16> to vector<32x1xbf16>
    %420 = tpu.concatenate %418, %419 in 1 : vector<32x255xbf16>, vector<32x1xbf16> -> vector<32x256xbf16>
    %c0_i32_162 = arith.constant 0 : i32
    %421 = arith.sitofp %c0_i32_162 : i32 to bf16
    %422 = vector.shape_cast %10 : vector<1x256xi1> to vector<1x256xi1>
    %423 = vector.broadcast %422 : vector<1x256xi1> to vector<32x256xi1>
    %424 = vector.broadcast %421 : bf16 to vector<32x256xbf16>
    %425 = arith.select %423, %420, %424 : vector<32x256xi1>, vector<32x256xbf16>
    %c32 = arith.constant 32 : index
    %c0_163 = arith.constant 0 : index
    %c0_164 = arith.constant 0 : index
    %426 = vector.load %arg3[%c32, %c0_163, %c0_164] : memref<90x32x32xbf16, #tpu.memory_space<vmem>>, vector<1x32x32xbf16>
    %427 = vector.shape_cast %426 : vector<1x32x32xbf16> to vector<32x32xbf16>
    %cst_165 = arith.constant dense<0.000000e+00> : vector<32x256xf32>
    %428 = tpu.matmul %427, %425, %cst_165 {dimension_numbers = #tpu.dot_dimension_numbers<[1], [0], [0], [1], [0, 0, 1, 1], [], []>} : vector<32x32xbf16>, vector<32x256xbf16>, vector<32x256xf32> -> vector<32x256xf32>
    %429 = arith.addf %417, %428 : vector<32x256xf32>
    %430 = vector.extract_strided_slice %364 {offsets = [0, 15], sizes = [32, 241], strides = [1, 1]} : vector<32x256xbf16> to vector<32x241xbf16>
    %431 = vector.extract_strided_slice %364 {offsets = [0, 0], sizes = [32, 15], strides = [1, 1]} : vector<32x256xbf16> to vector<32x15xbf16>
    %432 = tpu.concatenate %430, %431 in 1 : vector<32x241xbf16>, vector<32x15xbf16> -> vector<32x256xbf16>
    %433 = arith.andi %6, %8 : vector<1x256xi1>
    %c0_i32_166 = arith.constant 0 : i32
    %434 = arith.sitofp %c0_i32_166 : i32 to bf16
    %435 = vector.shape_cast %433 : vector<1x256xi1> to vector<1x256xi1>
    %436 = vector.broadcast %435 : vector<1x256xi1> to vector<32x256xi1>
    %437 = vector.broadcast %434 : bf16 to vector<32x256xbf16>
    %438 = arith.select %436, %432, %437 : vector<32x256xi1>, vector<32x256xbf16>
    %c33 = arith.constant 33 : index
    %c0_167 = arith.constant 0 : index
    %c0_168 = arith.constant 0 : index
    %439 = vector.load %arg3[%c33, %c0_167, %c0_168] : memref<90x32x32xbf16, #tpu.memory_space<vmem>>, vector<1x32x32xbf16>
    %440 = vector.shape_cast %439 : vector<1x32x32xbf16> to vector<32x32xbf16>
    %cst_169 = arith.constant dense<0.000000e+00> : vector<32x256xf32>
    %441 = tpu.matmul %440, %438, %cst_169 {dimension_numbers = #tpu.dot_dimension_numbers<[1], [0], [0], [1], [0, 0, 1, 1], [], []>} : vector<32x32xbf16>, vector<32x256xbf16>, vector<32x256xf32> -> vector<32x256xf32>
    %442 = arith.addf %429, %441 : vector<32x256xf32>
    %443 = vector.extract_strided_slice %364 {offsets = [0, 16], sizes = [32, 240], strides = [1, 1]} : vector<32x256xbf16> to vector<32x240xbf16>
    %444 = vector.extract_strided_slice %364 {offsets = [0, 0], sizes = [32, 16], strides = [1, 1]} : vector<32x256xbf16> to vector<32x16xbf16>
    %445 = tpu.concatenate %443, %444 in 1 : vector<32x240xbf16>, vector<32x16xbf16> -> vector<32x256xbf16>
    %c0_i32_170 = arith.constant 0 : i32
    %446 = arith.sitofp %c0_i32_170 : i32 to bf16
    %447 = vector.shape_cast %6 : vector<1x256xi1> to vector<1x256xi1>
    %448 = vector.broadcast %447 : vector<1x256xi1> to vector<32x256xi1>
    %449 = vector.broadcast %446 : bf16 to vector<32x256xbf16>
    %450 = arith.select %448, %445, %449 : vector<32x256xi1>, vector<32x256xbf16>
    %c34 = arith.constant 34 : index
    %c0_171 = arith.constant 0 : index
    %c0_172 = arith.constant 0 : index
    %451 = vector.load %arg3[%c34, %c0_171, %c0_172] : memref<90x32x32xbf16, #tpu.memory_space<vmem>>, vector<1x32x32xbf16>
    %452 = vector.shape_cast %451 : vector<1x32x32xbf16> to vector<32x32xbf16>
    %cst_173 = arith.constant dense<0.000000e+00> : vector<32x256xf32>
    %453 = tpu.matmul %452, %450, %cst_173 {dimension_numbers = #tpu.dot_dimension_numbers<[1], [0], [0], [1], [0, 0, 1, 1], [], []>} : vector<32x32xbf16>, vector<32x256xbf16>, vector<32x256xf32> -> vector<32x256xf32>
    %454 = arith.addf %442, %453 : vector<32x256xf32>
    %455 = vector.extract_strided_slice %364 {offsets = [0, 17], sizes = [32, 239], strides = [1, 1]} : vector<32x256xbf16> to vector<32x239xbf16>
    %456 = vector.extract_strided_slice %364 {offsets = [0, 0], sizes = [32, 17], strides = [1, 1]} : vector<32x256xbf16> to vector<32x17xbf16>
    %457 = tpu.concatenate %455, %456 in 1 : vector<32x239xbf16>, vector<32x17xbf16> -> vector<32x256xbf16>
    %458 = arith.andi %6, %10 : vector<1x256xi1>
    %c0_i32_174 = arith.constant 0 : i32
    %459 = arith.sitofp %c0_i32_174 : i32 to bf16
    %460 = vector.shape_cast %458 : vector<1x256xi1> to vector<1x256xi1>
    %461 = vector.broadcast %460 : vector<1x256xi1> to vector<32x256xi1>
    %462 = vector.broadcast %459 : bf16 to vector<32x256xbf16>
    %463 = arith.select %461, %457, %462 : vector<32x256xi1>, vector<32x256xbf16>
    %c35 = arith.constant 35 : index
    %c0_175 = arith.constant 0 : index
    %c0_176 = arith.constant 0 : index
    %464 = vector.load %arg3[%c35, %c0_175, %c0_176] : memref<90x32x32xbf16, #tpu.memory_space<vmem>>, vector<1x32x32xbf16>
    %465 = vector.shape_cast %464 : vector<1x32x32xbf16> to vector<32x32xbf16>
    %cst_177 = arith.constant dense<0.000000e+00> : vector<32x256xf32>
    %466 = tpu.matmul %465, %463, %cst_177 {dimension_numbers = #tpu.dot_dimension_numbers<[1], [0], [0], [1], [0, 0, 1, 1], [], []>} : vector<32x32xbf16>, vector<32x256xbf16>, vector<32x256xf32> -> vector<32x256xf32>
    %467 = arith.addf %454, %466 : vector<32x256xf32>
    %468 = arith.addf %363, %467 : vector<32x256xf32>
    %c4_178 = arith.constant 4 : index
    %c0_179 = arith.constant 0 : index
    %c0_180 = arith.constant 0 : index
    %469 = vector.load %arg4[%c4_178, %c0_179, %c0_180] : memref<11x32x1xf32, #tpu.memory_space<vmem>>, vector<1x32x1xf32>
    %470 = vector.shape_cast %469 : vector<1x32x1xf32> to vector<32x1xf32>
    %471 = vector.broadcast %470 : vector<32x1xf32> to vector<32x256xf32>
    %472 = arith.addf %468, %471 : vector<32x256xf32>
    %c0_181 = arith.constant 0 : index
    %c0_182 = arith.constant 0 : index
    %c0_183 = arith.constant 0 : index
    %473 = vector.load %arg5[%c0_181, %c0_182, %c0_183] : memref<1x32x256xf32, #tpu.memory_space<vmem>>, vector<1x32x256xf32>
    %474 = vector.shape_cast %473 : vector<1x32x256xf32> to vector<32x256xf32>
    %475 = vector.shape_cast %472 : vector<32x256xf32> to vector<1x32x256xf32>
    tpu.vector_store %arg5[%c0_181, %c0_182, %c0_183], %475 {strides = array<i32>} : memref<1x32x256xf32, #tpu.memory_space<vmem>>, vector<1x32x256xf32>,
    %c0_184 = arith.constant 0 : index
    %c0_185 = arith.constant 0 : index
    %c0_186 = arith.constant 0 : index
    %476 = vector.load %arg5[%c0_184, %c0_185, %c0_186] : memref<1x32x256xf32, #tpu.memory_space<vmem>>, vector<1x32x256xf32>
    %477 = vector.shape_cast %476 : vector<1x32x256xf32> to vector<32x256xf32>
    %478 = arith.truncf %477 : vector<32x256xf32> to vector<32x256xbf16>
    %479 = vector.extract_strided_slice %478 {offsets = [0, 239], sizes = [32, 17], strides = [1, 1]} : vector<32x256xbf16> to vector<32x17xbf16>
    %480 = vector.extract_strided_slice %478 {offsets = [0, 0], sizes = [32, 239], strides = [1, 1]} : vector<32x256xbf16> to vector<32x239xbf16>
    %481 = tpu.concatenate %479, %480 in 1 : vector<32x17xbf16>, vector<32x239xbf16> -> vector<32x256xbf16>
    %482 = arith.andi %4, %8 : vector<1x256xi1>
    %c0_i32_187 = arith.constant 0 : i32
    %483 = arith.sitofp %c0_i32_187 : i32 to bf16
    %484 = vector.shape_cast %482 : vector<1x256xi1> to vector<1x256xi1>
    %485 = vector.broadcast %484 : vector<1x256xi1> to vector<32x256xi1>
    %486 = vector.broadcast %483 : bf16 to vector<32x256xbf16>
    %487 = arith.select %485, %481, %486 : vector<32x256xi1>, vector<32x256xbf16>
    %c36 = arith.constant 36 : index
    %c0_188 = arith.constant 0 : index
    %c0_189 = arith.constant 0 : index
    %488 = vector.load %arg3[%c36, %c0_188, %c0_189] : memref<90x32x32xbf16, #tpu.memory_space<vmem>>, vector<1x32x32xbf16>
    %489 = vector.shape_cast %488 : vector<1x32x32xbf16> to vector<32x32xbf16>
    %cst_190 = arith.constant dense<0.000000e+00> : vector<32x256xf32>
    %490 = tpu.matmul %489, %487, %cst_190 {dimension_numbers = #tpu.dot_dimension_numbers<[1], [0], [0], [1], [0, 0, 1, 1], [], []>} : vector<32x32xbf16>, vector<32x256xbf16>, vector<32x256xf32> -> vector<32x256xf32>
    %491 = vector.extract_strided_slice %478 {offsets = [0, 240], sizes = [32, 16], strides = [1, 1]} : vector<32x256xbf16> to vector<32x16xbf16>
    %492 = vector.extract_strided_slice %478 {offsets = [0, 0], sizes = [32, 240], strides = [1, 1]} : vector<32x256xbf16> to vector<32x240xbf16>
    %493 = tpu.concatenate %491, %492 in 1 : vector<32x16xbf16>, vector<32x240xbf16> -> vector<32x256xbf16>
    %c0_i32_191 = arith.constant 0 : i32
    %494 = arith.sitofp %c0_i32_191 : i32 to bf16
    %495 = vector.shape_cast %4 : vector<1x256xi1> to vector<1x256xi1>
    %496 = vector.broadcast %495 : vector<1x256xi1> to vector<32x256xi1>
    %497 = vector.broadcast %494 : bf16 to vector<32x256xbf16>
    %498 = arith.select %496, %493, %497 : vector<32x256xi1>, vector<32x256xbf16>
    %c37 = arith.constant 37 : index
    %c0_192 = arith.constant 0 : index
    %c0_193 = arith.constant 0 : index
    %499 = vector.load %arg3[%c37, %c0_192, %c0_193] : memref<90x32x32xbf16, #tpu.memory_space<vmem>>, vector<1x32x32xbf16>
    %500 = vector.shape_cast %499 : vector<1x32x32xbf16> to vector<32x32xbf16>
    %cst_194 = arith.constant dense<0.000000e+00> : vector<32x256xf32>
    %501 = tpu.matmul %500, %498, %cst_194 {dimension_numbers = #tpu.dot_dimension_numbers<[1], [0], [0], [1], [0, 0, 1, 1], [], []>} : vector<32x32xbf16>, vector<32x256xbf16>, vector<32x256xf32> -> vector<32x256xf32>
    %502 = arith.addf %490, %501 : vector<32x256xf32>
    %503 = vector.extract_strided_slice %478 {offsets = [0, 241], sizes = [32, 15], strides = [1, 1]} : vector<32x256xbf16> to vector<32x15xbf16>
    %504 = vector.extract_strided_slice %478 {offsets = [0, 0], sizes = [32, 241], strides = [1, 1]} : vector<32x256xbf16> to vector<32x241xbf16>
    %505 = tpu.concatenate %503, %504 in 1 : vector<32x15xbf16>, vector<32x241xbf16> -> vector<32x256xbf16>
    %506 = arith.andi %4, %10 : vector<1x256xi1>
    %c0_i32_195 = arith.constant 0 : i32
    %507 = arith.sitofp %c0_i32_195 : i32 to bf16
    %508 = vector.shape_cast %506 : vector<1x256xi1> to vector<1x256xi1>
    %509 = vector.broadcast %508 : vector<1x256xi1> to vector<32x256xi1>
    %510 = vector.broadcast %507 : bf16 to vector<32x256xbf16>
    %511 = arith.select %509, %505, %510 : vector<32x256xi1>, vector<32x256xbf16>
    %c38 = arith.constant 38 : index
    %c0_196 = arith.constant 0 : index
    %c0_197 = arith.constant 0 : index
    %512 = vector.load %arg3[%c38, %c0_196, %c0_197] : memref<90x32x32xbf16, #tpu.memory_space<vmem>>, vector<1x32x32xbf16>
    %513 = vector.shape_cast %512 : vector<1x32x32xbf16> to vector<32x32xbf16>
    %cst_198 = arith.constant dense<0.000000e+00> : vector<32x256xf32>
    %514 = tpu.matmul %513, %511, %cst_198 {dimension_numbers = #tpu.dot_dimension_numbers<[1], [0], [0], [1], [0, 0, 1, 1], [], []>} : vector<32x32xbf16>, vector<32x256xbf16>, vector<32x256xf32> -> vector<32x256xf32>
    %515 = arith.addf %502, %514 : vector<32x256xf32>
    %516 = vector.extract_strided_slice %478 {offsets = [0, 255], sizes = [32, 1], strides = [1, 1]} : vector<32x256xbf16> to vector<32x1xbf16>
    %517 = vector.extract_strided_slice %478 {offsets = [0, 0], sizes = [32, 255], strides = [1, 1]} : vector<32x256xbf16> to vector<32x255xbf16>
    %518 = tpu.concatenate %516, %517 in 1 : vector<32x1xbf16>, vector<32x255xbf16> -> vector<32x256xbf16>
    %c0_i32_199 = arith.constant 0 : i32
    %519 = arith.sitofp %c0_i32_199 : i32 to bf16
    %520 = vector.shape_cast %8 : vector<1x256xi1> to vector<1x256xi1>
    %521 = vector.broadcast %520 : vector<1x256xi1> to vector<32x256xi1>
    %522 = vector.broadcast %519 : bf16 to vector<32x256xbf16>
    %523 = arith.select %521, %518, %522 : vector<32x256xi1>, vector<32x256xbf16>
    %c39 = arith.constant 39 : index
    %c0_200 = arith.constant 0 : index
    %c0_201 = arith.constant 0 : index
    %524 = vector.load %arg3[%c39, %c0_200, %c0_201] : memref<90x32x32xbf16, #tpu.memory_space<vmem>>, vector<1x32x32xbf16>
    %525 = vector.shape_cast %524 : vector<1x32x32xbf16> to vector<32x32xbf16>
    %cst_202 = arith.constant dense<0.000000e+00> : vector<32x256xf32>
    %526 = tpu.matmul %525, %523, %cst_202 {dimension_numbers = #tpu.dot_dimension_numbers<[1], [0], [0], [1], [0, 0, 1, 1], [], []>} : vector<32x32xbf16>, vector<32x256xbf16>, vector<32x256xf32> -> vector<32x256xf32>
    %527 = arith.addf %515, %526 : vector<32x256xf32>
    %c40 = arith.constant 40 : index
    %c0_203 = arith.constant 0 : index
    %c0_204 = arith.constant 0 : index
    %528 = vector.load %arg3[%c40, %c0_203, %c0_204] : memref<90x32x32xbf16, #tpu.memory_space<vmem>>, vector<1x32x32xbf16>
    %529 = vector.shape_cast %528 : vector<1x32x32xbf16> to vector<32x32xbf16>
    %cst_205 = arith.constant dense<0.000000e+00> : vector<32x256xf32>
    %530 = tpu.matmul %529, %478, %cst_205 {dimension_numbers = #tpu.dot_dimension_numbers<[1], [0], [0], [1], [0, 0, 1, 1], [], []>} : vector<32x32xbf16>, vector<32x256xbf16>, vector<32x256xf32> -> vector<32x256xf32>
    %531 = arith.addf %527, %530 : vector<32x256xf32>
    %532 = vector.extract_strided_slice %478 {offsets = [0, 1], sizes = [32, 255], strides = [1, 1]} : vector<32x256xbf16> to vector<32x255xbf16>
    %533 = vector.extract_strided_slice %478 {offsets = [0, 0], sizes = [32, 1], strides = [1, 1]} : vector<32x256xbf16> to vector<32x1xbf16>
    %534 = tpu.concatenate %532, %533 in 1 : vector<32x255xbf16>, vector<32x1xbf16> -> vector<32x256xbf16>
    %c0_i32_206 = arith.constant 0 : i32
    %535 = arith.sitofp %c0_i32_206 : i32 to bf16
    %536 = vector.shape_cast %10 : vector<1x256xi1> to vector<1x256xi1>
    %537 = vector.broadcast %536 : vector<1x256xi1> to vector<32x256xi1>
    %538 = vector.broadcast %535 : bf16 to vector<32x256xbf16>
    %539 = arith.select %537, %534, %538 : vector<32x256xi1>, vector<32x256xbf16>
    %c41 = arith.constant 41 : index
    %c0_207 = arith.constant 0 : index
    %c0_208 = arith.constant 0 : index
    %540 = vector.load %arg3[%c41, %c0_207, %c0_208] : memref<90x32x32xbf16, #tpu.memory_space<vmem>>, vector<1x32x32xbf16>
    %541 = vector.shape_cast %540 : vector<1x32x32xbf16> to vector<32x32xbf16>
    %cst_209 = arith.constant dense<0.000000e+00> : vector<32x256xf32>
    %542 = tpu.matmul %541, %539, %cst_209 {dimension_numbers = #tpu.dot_dimension_numbers<[1], [0], [0], [1], [0, 0, 1, 1], [], []>} : vector<32x32xbf16>, vector<32x256xbf16>, vector<32x256xf32> -> vector<32x256xf32>
    %543 = arith.addf %531, %542 : vector<32x256xf32>
    %544 = vector.extract_strided_slice %478 {offsets = [0, 15], sizes = [32, 241], strides = [1, 1]} : vector<32x256xbf16> to vector<32x241xbf16>
    %545 = vector.extract_strided_slice %478 {offsets = [0, 0], sizes = [32, 15], strides = [1, 1]} : vector<32x256xbf16> to vector<32x15xbf16>
    %546 = tpu.concatenate %544, %545 in 1 : vector<32x241xbf16>, vector<32x15xbf16> -> vector<32x256xbf16>
    %547 = arith.andi %6, %8 : vector<1x256xi1>
    %c0_i32_210 = arith.constant 0 : i32
    %548 = arith.sitofp %c0_i32_210 : i32 to bf16
    %549 = vector.shape_cast %547 : vector<1x256xi1> to vector<1x256xi1>
    %550 = vector.broadcast %549 : vector<1x256xi1> to vector<32x256xi1>
    %551 = vector.broadcast %548 : bf16 to vector<32x256xbf16>
    %552 = arith.select %550, %546, %551 : vector<32x256xi1>, vector<32x256xbf16>
    %c42 = arith.constant 42 : index
    %c0_211 = arith.constant 0 : index
    %c0_212 = arith.constant 0 : index
    %553 = vector.load %arg3[%c42, %c0_211, %c0_212] : memref<90x32x32xbf16, #tpu.memory_space<vmem>>, vector<1x32x32xbf16>
    %554 = vector.shape_cast %553 : vector<1x32x32xbf16> to vector<32x32xbf16>
    %cst_213 = arith.constant dense<0.000000e+00> : vector<32x256xf32>
    %555 = tpu.matmul %554, %552, %cst_213 {dimension_numbers = #tpu.dot_dimension_numbers<[1], [0], [0], [1], [0, 0, 1, 1], [], []>} : vector<32x32xbf16>, vector<32x256xbf16>, vector<32x256xf32> -> vector<32x256xf32>
    %556 = arith.addf %543, %555 : vector<32x256xf32>
    %557 = vector.extract_strided_slice %478 {offsets = [0, 16], sizes = [32, 240], strides = [1, 1]} : vector<32x256xbf16> to vector<32x240xbf16>
    %558 = vector.extract_strided_slice %478 {offsets = [0, 0], sizes = [32, 16], strides = [1, 1]} : vector<32x256xbf16> to vector<32x16xbf16>
    %559 = tpu.concatenate %557, %558 in 1 : vector<32x240xbf16>, vector<32x16xbf16> -> vector<32x256xbf16>
    %c0_i32_214 = arith.constant 0 : i32
    %560 = arith.sitofp %c0_i32_214 : i32 to bf16
    %561 = vector.shape_cast %6 : vector<1x256xi1> to vector<1x256xi1>
    %562 = vector.broadcast %561 : vector<1x256xi1> to vector<32x256xi1>
    %563 = vector.broadcast %560 : bf16 to vector<32x256xbf16>
    %564 = arith.select %562, %559, %563 : vector<32x256xi1>, vector<32x256xbf16>
    %c43 = arith.constant 43 : index
    %c0_215 = arith.constant 0 : index
    %c0_216 = arith.constant 0 : index
    %565 = vector.load %arg3[%c43, %c0_215, %c0_216] : memref<90x32x32xbf16, #tpu.memory_space<vmem>>, vector<1x32x32xbf16>
    %566 = vector.shape_cast %565 : vector<1x32x32xbf16> to vector<32x32xbf16>
    %cst_217 = arith.constant dense<0.000000e+00> : vector<32x256xf32>
    %567 = tpu.matmul %566, %564, %cst_217 {dimension_numbers = #tpu.dot_dimension_numbers<[1], [0], [0], [1], [0, 0, 1, 1], [], []>} : vector<32x32xbf16>, vector<32x256xbf16>, vector<32x256xf32> -> vector<32x256xf32>
    %568 = arith.addf %556, %567 : vector<32x256xf32>
    %569 = vector.extract_strided_slice %478 {offsets = [0, 17], sizes = [32, 239], strides = [1, 1]} : vector<32x256xbf16> to vector<32x239xbf16>
    %570 = vector.extract_strided_slice %478 {offsets = [0, 0], sizes = [32, 17], strides = [1, 1]} : vector<32x256xbf16> to vector<32x17xbf16>
    %571 = tpu.concatenate %569, %570 in 1 : vector<32x239xbf16>, vector<32x17xbf16> -> vector<32x256xbf16>
    %572 = arith.andi %6, %10 : vector<1x256xi1>
    %c0_i32_218 = arith.constant 0 : i32
    %573 = arith.sitofp %c0_i32_218 : i32 to bf16
    %574 = vector.shape_cast %572 : vector<1x256xi1> to vector<1x256xi1>
    %575 = vector.broadcast %574 : vector<1x256xi1> to vector<32x256xi1>
    %576 = vector.broadcast %573 : bf16 to vector<32x256xbf16>
    %577 = arith.select %575, %571, %576 : vector<32x256xi1>, vector<32x256xbf16>
    %c44 = arith.constant 44 : index
    %c0_219 = arith.constant 0 : index
    %c0_220 = arith.constant 0 : index
    %578 = vector.load %arg3[%c44, %c0_219, %c0_220] : memref<90x32x32xbf16, #tpu.memory_space<vmem>>, vector<1x32x32xbf16>
    %579 = vector.shape_cast %578 : vector<1x32x32xbf16> to vector<32x32xbf16>
    %cst_221 = arith.constant dense<0.000000e+00> : vector<32x256xf32>
    %580 = tpu.matmul %579, %577, %cst_221 {dimension_numbers = #tpu.dot_dimension_numbers<[1], [0], [0], [1], [0, 0, 1, 1], [], []>} : vector<32x32xbf16>, vector<32x256xbf16>, vector<32x256xf32> -> vector<32x256xf32>
    %581 = arith.addf %568, %580 : vector<32x256xf32>
    %c5_222 = arith.constant 5 : index
    %c0_223 = arith.constant 0 : index
    %c0_224 = arith.constant 0 : index
    %582 = vector.load %arg4[%c5_222, %c0_223, %c0_224] : memref<11x32x1xf32, #tpu.memory_space<vmem>>, vector<1x32x1xf32>
    %583 = vector.shape_cast %582 : vector<1x32x1xf32> to vector<32x1xf32>
    %584 = vector.broadcast %583 : vector<32x1xf32> to vector<32x256xf32>
    %585 = arith.addf %581, %584 : vector<32x256xf32>
    %cst_225 = arith.constant 0.000000e+00 : f32
    %586 = vector.broadcast %cst_225 : f32 to vector<32x256xf32>
    %587 = arith.maximumf %585, %586 : vector<32x256xf32>
    %c0_226 = arith.constant 0 : index
    %c0_227 = arith.constant 0 : index
    %c0_228 = arith.constant 0 : index
    %588 = vector.load %arg5[%c0_226, %c0_227, %c0_228] : memref<1x32x256xf32, #tpu.memory_space<vmem>>, vector<1x32x256xf32>
    %589 = vector.shape_cast %588 : vector<1x32x256xf32> to vector<32x256xf32>
    %590 = arith.truncf %587 : vector<32x256xf32> to vector<32x256xbf16>
    %591 = vector.extract_strided_slice %590 {offsets = [0, 239], sizes = [32, 17], strides = [1, 1]} : vector<32x256xbf16> to vector<32x17xbf16>
    %592 = vector.extract_strided_slice %590 {offsets = [0, 0], sizes = [32, 239], strides = [1, 1]} : vector<32x256xbf16> to vector<32x239xbf16>
    %593 = tpu.concatenate %591, %592 in 1 : vector<32x17xbf16>, vector<32x239xbf16> -> vector<32x256xbf16>
    %594 = arith.andi %4, %8 : vector<1x256xi1>
    %c0_i32_229 = arith.constant 0 : i32
    %595 = arith.sitofp %c0_i32_229 : i32 to bf16
    %596 = vector.shape_cast %594 : vector<1x256xi1> to vector<1x256xi1>
    %597 = vector.broadcast %596 : vector<1x256xi1> to vector<32x256xi1>
    %598 = vector.broadcast %595 : bf16 to vector<32x256xbf16>
    %599 = arith.select %597, %593, %598 : vector<32x256xi1>, vector<32x256xbf16>
    %c45 = arith.constant 45 : index
    %c0_230 = arith.constant 0 : index
    %c0_231 = arith.constant 0 : index
    %600 = vector.load %arg3[%c45, %c0_230, %c0_231] : memref<90x32x32xbf16, #tpu.memory_space<vmem>>, vector<1x32x32xbf16>
    %601 = vector.shape_cast %600 : vector<1x32x32xbf16> to vector<32x32xbf16>
    %cst_232 = arith.constant dense<0.000000e+00> : vector<32x256xf32>
    %602 = tpu.matmul %601, %599, %cst_232 {dimension_numbers = #tpu.dot_dimension_numbers<[1], [0], [0], [1], [0, 0, 1, 1], [], []>} : vector<32x32xbf16>, vector<32x256xbf16>, vector<32x256xf32> -> vector<32x256xf32>
    %603 = vector.extract_strided_slice %590 {offsets = [0, 240], sizes = [32, 16], strides = [1, 1]} : vector<32x256xbf16> to vector<32x16xbf16>
    %604 = vector.extract_strided_slice %590 {offsets = [0, 0], sizes = [32, 240], strides = [1, 1]} : vector<32x256xbf16> to vector<32x240xbf16>
    %605 = tpu.concatenate %603, %604 in 1 : vector<32x16xbf16>, vector<32x240xbf16> -> vector<32x256xbf16>
    %c0_i32_233 = arith.constant 0 : i32
    %606 = arith.sitofp %c0_i32_233 : i32 to bf16
    %607 = vector.shape_cast %4 : vector<1x256xi1> to vector<1x256xi1>
    %608 = vector.broadcast %607 : vector<1x256xi1> to vector<32x256xi1>
    %609 = vector.broadcast %606 : bf16 to vector<32x256xbf16>
    %610 = arith.select %608, %605, %609 : vector<32x256xi1>, vector<32x256xbf16>
    %c46 = arith.constant 46 : index
    %c0_234 = arith.constant 0 : index
    %c0_235 = arith.constant 0 : index
    %611 = vector.load %arg3[%c46, %c0_234, %c0_235] : memref<90x32x32xbf16, #tpu.memory_space<vmem>>, vector<1x32x32xbf16>
    %612 = vector.shape_cast %611 : vector<1x32x32xbf16> to vector<32x32xbf16>
    %cst_236 = arith.constant dense<0.000000e+00> : vector<32x256xf32>
    %613 = tpu.matmul %612, %610, %cst_236 {dimension_numbers = #tpu.dot_dimension_numbers<[1], [0], [0], [1], [0, 0, 1, 1], [], []>} : vector<32x32xbf16>, vector<32x256xbf16>, vector<32x256xf32> -> vector<32x256xf32>
    %614 = arith.addf %602, %613 : vector<32x256xf32>
    %615 = vector.extract_strided_slice %590 {offsets = [0, 241], sizes = [32, 15], strides = [1, 1]} : vector<32x256xbf16> to vector<32x15xbf16>
    %616 = vector.extract_strided_slice %590 {offsets = [0, 0], sizes = [32, 241], strides = [1, 1]} : vector<32x256xbf16> to vector<32x241xbf16>
    %617 = tpu.concatenate %615, %616 in 1 : vector<32x15xbf16>, vector<32x241xbf16> -> vector<32x256xbf16>
    %618 = arith.andi %4, %10 : vector<1x256xi1>
    %c0_i32_237 = arith.constant 0 : i32
    %619 = arith.sitofp %c0_i32_237 : i32 to bf16
    %620 = vector.shape_cast %618 : vector<1x256xi1> to vector<1x256xi1>
    %621 = vector.broadcast %620 : vector<1x256xi1> to vector<32x256xi1>
    %622 = vector.broadcast %619 : bf16 to vector<32x256xbf16>
    %623 = arith.select %621, %617, %622 : vector<32x256xi1>, vector<32x256xbf16>
    %c47 = arith.constant 47 : index
    %c0_238 = arith.constant 0 : index
    %c0_239 = arith.constant 0 : index
    %624 = vector.load %arg3[%c47, %c0_238, %c0_239] : memref<90x32x32xbf16, #tpu.memory_space<vmem>>, vector<1x32x32xbf16>
    %625 = vector.shape_cast %624 : vector<1x32x32xbf16> to vector<32x32xbf16>
    %cst_240 = arith.constant dense<0.000000e+00> : vector<32x256xf32>
    %626 = tpu.matmul %625, %623, %cst_240 {dimension_numbers = #tpu.dot_dimension_numbers<[1], [0], [0], [1], [0, 0, 1, 1], [], []>} : vector<32x32xbf16>, vector<32x256xbf16>, vector<32x256xf32> -> vector<32x256xf32>
    %627 = arith.addf %614, %626 : vector<32x256xf32>
    %628 = vector.extract_strided_slice %590 {offsets = [0, 255], sizes = [32, 1], strides = [1, 1]} : vector<32x256xbf16> to vector<32x1xbf16>
    %629 = vector.extract_strided_slice %590 {offsets = [0, 0], sizes = [32, 255], strides = [1, 1]} : vector<32x256xbf16> to vector<32x255xbf16>
    %630 = tpu.concatenate %628, %629 in 1 : vector<32x1xbf16>, vector<32x255xbf16> -> vector<32x256xbf16>
    %c0_i32_241 = arith.constant 0 : i32
    %631 = arith.sitofp %c0_i32_241 : i32 to bf16
    %632 = vector.shape_cast %8 : vector<1x256xi1> to vector<1x256xi1>
    %633 = vector.broadcast %632 : vector<1x256xi1> to vector<32x256xi1>
    %634 = vector.broadcast %631 : bf16 to vector<32x256xbf16>
    %635 = arith.select %633, %630, %634 : vector<32x256xi1>, vector<32x256xbf16>
    %c48 = arith.constant 48 : index
    %c0_242 = arith.constant 0 : index
    %c0_243 = arith.constant 0 : index
    %636 = vector.load %arg3[%c48, %c0_242, %c0_243] : memref<90x32x32xbf16, #tpu.memory_space<vmem>>, vector<1x32x32xbf16>
    %637 = vector.shape_cast %636 : vector<1x32x32xbf16> to vector<32x32xbf16>
    %cst_244 = arith.constant dense<0.000000e+00> : vector<32x256xf32>
    %638 = tpu.matmul %637, %635, %cst_244 {dimension_numbers = #tpu.dot_dimension_numbers<[1], [0], [0], [1], [0, 0, 1, 1], [], []>} : vector<32x32xbf16>, vector<32x256xbf16>, vector<32x256xf32> -> vector<32x256xf32>
    %639 = arith.addf %627, %638 : vector<32x256xf32>
    %c49 = arith.constant 49 : index
    %c0_245 = arith.constant 0 : index
    %c0_246 = arith.constant 0 : index
    %640 = vector.load %arg3[%c49, %c0_245, %c0_246] : memref<90x32x32xbf16, #tpu.memory_space<vmem>>, vector<1x32x32xbf16>
    %641 = vector.shape_cast %640 : vector<1x32x32xbf16> to vector<32x32xbf16>
    %cst_247 = arith.constant dense<0.000000e+00> : vector<32x256xf32>
    %642 = tpu.matmul %641, %590, %cst_247 {dimension_numbers = #tpu.dot_dimension_numbers<[1], [0], [0], [1], [0, 0, 1, 1], [], []>} : vector<32x32xbf16>, vector<32x256xbf16>, vector<32x256xf32> -> vector<32x256xf32>
    %643 = arith.addf %639, %642 : vector<32x256xf32>
    %644 = vector.extract_strided_slice %590 {offsets = [0, 1], sizes = [32, 255], strides = [1, 1]} : vector<32x256xbf16> to vector<32x255xbf16>
    %645 = vector.extract_strided_slice %590 {offsets = [0, 0], sizes = [32, 1], strides = [1, 1]} : vector<32x256xbf16> to vector<32x1xbf16>
    %646 = tpu.concatenate %644, %645 in 1 : vector<32x255xbf16>, vector<32x1xbf16> -> vector<32x256xbf16>
    %c0_i32_248 = arith.constant 0 : i32
    %647 = arith.sitofp %c0_i32_248 : i32 to bf16
    %648 = vector.shape_cast %10 : vector<1x256xi1> to vector<1x256xi1>
    %649 = vector.broadcast %648 : vector<1x256xi1> to vector<32x256xi1>
    %650 = vector.broadcast %647 : bf16 to vector<32x256xbf16>
    %651 = arith.select %649, %646, %650 : vector<32x256xi1>, vector<32x256xbf16>
    %c50 = arith.constant 50 : index
    %c0_249 = arith.constant 0 : index
    %c0_250 = arith.constant 0 : index
    %652 = vector.load %arg3[%c50, %c0_249, %c0_250] : memref<90x32x32xbf16, #tpu.memory_space<vmem>>, vector<1x32x32xbf16>
    %653 = vector.shape_cast %652 : vector<1x32x32xbf16> to vector<32x32xbf16>
    %cst_251 = arith.constant dense<0.000000e+00> : vector<32x256xf32>
    %654 = tpu.matmul %653, %651, %cst_251 {dimension_numbers = #tpu.dot_dimension_numbers<[1], [0], [0], [1], [0, 0, 1, 1], [], []>} : vector<32x32xbf16>, vector<32x256xbf16>, vector<32x256xf32> -> vector<32x256xf32>
    %655 = arith.addf %643, %654 : vector<32x256xf32>
    %656 = vector.extract_strided_slice %590 {offsets = [0, 15], sizes = [32, 241], strides = [1, 1]} : vector<32x256xbf16> to vector<32x241xbf16>
    %657 = vector.extract_strided_slice %590 {offsets = [0, 0], sizes = [32, 15], strides = [1, 1]} : vector<32x256xbf16> to vector<32x15xbf16>
    %658 = tpu.concatenate %656, %657 in 1 : vector<32x241xbf16>, vector<32x15xbf16> -> vector<32x256xbf16>
    %659 = arith.andi %6, %8 : vector<1x256xi1>
    %c0_i32_252 = arith.constant 0 : i32
    %660 = arith.sitofp %c0_i32_252 : i32 to bf16
    %661 = vector.shape_cast %659 : vector<1x256xi1> to vector<1x256xi1>
    %662 = vector.broadcast %661 : vector<1x256xi1> to vector<32x256xi1>
    %663 = vector.broadcast %660 : bf16 to vector<32x256xbf16>
    %664 = arith.select %662, %658, %663 : vector<32x256xi1>, vector<32x256xbf16>
    %c51 = arith.constant 51 : index
    %c0_253 = arith.constant 0 : index
    %c0_254 = arith.constant 0 : index
    %665 = vector.load %arg3[%c51, %c0_253, %c0_254] : memref<90x32x32xbf16, #tpu.memory_space<vmem>>, vector<1x32x32xbf16>
    %666 = vector.shape_cast %665 : vector<1x32x32xbf16> to vector<32x32xbf16>
    %cst_255 = arith.constant dense<0.000000e+00> : vector<32x256xf32>
    %667 = tpu.matmul %666, %664, %cst_255 {dimension_numbers = #tpu.dot_dimension_numbers<[1], [0], [0], [1], [0, 0, 1, 1], [], []>} : vector<32x32xbf16>, vector<32x256xbf16>, vector<32x256xf32> -> vector<32x256xf32>
    %668 = arith.addf %655, %667 : vector<32x256xf32>
    %669 = vector.extract_strided_slice %590 {offsets = [0, 16], sizes = [32, 240], strides = [1, 1]} : vector<32x256xbf16> to vector<32x240xbf16>
    %670 = vector.extract_strided_slice %590 {offsets = [0, 0], sizes = [32, 16], strides = [1, 1]} : vector<32x256xbf16> to vector<32x16xbf16>
    %671 = tpu.concatenate %669, %670 in 1 : vector<32x240xbf16>, vector<32x16xbf16> -> vector<32x256xbf16>
    %c0_i32_256 = arith.constant 0 : i32
    %672 = arith.sitofp %c0_i32_256 : i32 to bf16
    %673 = vector.shape_cast %6 : vector<1x256xi1> to vector<1x256xi1>
    %674 = vector.broadcast %673 : vector<1x256xi1> to vector<32x256xi1>
    %675 = vector.broadcast %672 : bf16 to vector<32x256xbf16>
    %676 = arith.select %674, %671, %675 : vector<32x256xi1>, vector<32x256xbf16>
    %c52 = arith.constant 52 : index
    %c0_257 = arith.constant 0 : index
    %c0_258 = arith.constant 0 : index
    %677 = vector.load %arg3[%c52, %c0_257, %c0_258] : memref<90x32x32xbf16, #tpu.memory_space<vmem>>, vector<1x32x32xbf16>
    %678 = vector.shape_cast %677 : vector<1x32x32xbf16> to vector<32x32xbf16>
    %cst_259 = arith.constant dense<0.000000e+00> : vector<32x256xf32>
    %679 = tpu.matmul %678, %676, %cst_259 {dimension_numbers = #tpu.dot_dimension_numbers<[1], [0], [0], [1], [0, 0, 1, 1], [], []>} : vector<32x32xbf16>, vector<32x256xbf16>, vector<32x256xf32> -> vector<32x256xf32>
    %680 = arith.addf %668, %679 : vector<32x256xf32>
    %681 = vector.extract_strided_slice %590 {offsets = [0, 17], sizes = [32, 239], strides = [1, 1]} : vector<32x256xbf16> to vector<32x239xbf16>
    %682 = vector.extract_strided_slice %590 {offsets = [0, 0], sizes = [32, 17], strides = [1, 1]} : vector<32x256xbf16> to vector<32x17xbf16>
    %683 = tpu.concatenate %681, %682 in 1 : vector<32x239xbf16>, vector<32x17xbf16> -> vector<32x256xbf16>
    %684 = arith.andi %6, %10 : vector<1x256xi1>
    %c0_i32_260 = arith.constant 0 : i32
    %685 = arith.sitofp %c0_i32_260 : i32 to bf16
    %686 = vector.shape_cast %684 : vector<1x256xi1> to vector<1x256xi1>
    %687 = vector.broadcast %686 : vector<1x256xi1> to vector<32x256xi1>
    %688 = vector.broadcast %685 : bf16 to vector<32x256xbf16>
    %689 = arith.select %687, %683, %688 : vector<32x256xi1>, vector<32x256xbf16>
    %c53 = arith.constant 53 : index
    %c0_261 = arith.constant 0 : index
    %c0_262 = arith.constant 0 : index
    %690 = vector.load %arg3[%c53, %c0_261, %c0_262] : memref<90x32x32xbf16, #tpu.memory_space<vmem>>, vector<1x32x32xbf16>
    %691 = vector.shape_cast %690 : vector<1x32x32xbf16> to vector<32x32xbf16>
    %cst_263 = arith.constant dense<0.000000e+00> : vector<32x256xf32>
    %692 = tpu.matmul %691, %689, %cst_263 {dimension_numbers = #tpu.dot_dimension_numbers<[1], [0], [0], [1], [0, 0, 1, 1], [], []>} : vector<32x32xbf16>, vector<32x256xbf16>, vector<32x256xf32> -> vector<32x256xf32>
    %693 = arith.addf %680, %692 : vector<32x256xf32>
    %694 = arith.addf %589, %693 : vector<32x256xf32>
    %c6_264 = arith.constant 6 : index
    %c0_265 = arith.constant 0 : index
    %c0_266 = arith.constant 0 : index
    %695 = vector.load %arg4[%c6_264, %c0_265, %c0_266] : memref<11x32x1xf32, #tpu.memory_space<vmem>>, vector<1x32x1xf32>
    %696 = vector.shape_cast %695 : vector<1x32x1xf32> to vector<32x1xf32>
    %697 = vector.broadcast %696 : vector<32x1xf32> to vector<32x256xf32>
    %698 = arith.addf %694, %697 : vector<32x256xf32>
    %c0_267 = arith.constant 0 : index
    %c0_268 = arith.constant 0 : index
    %c0_269 = arith.constant 0 : index
    %699 = vector.load %arg5[%c0_267, %c0_268, %c0_269] : memref<1x32x256xf32, #tpu.memory_space<vmem>>, vector<1x32x256xf32>
    %700 = vector.shape_cast %699 : vector<1x32x256xf32> to vector<32x256xf32>
    %701 = vector.shape_cast %698 : vector<32x256xf32> to vector<1x32x256xf32>
    tpu.vector_store %arg5[%c0_267, %c0_268, %c0_269], %701 {strides = array<i32>} : memref<1x32x256xf32, #tpu.memory_space<vmem>>, vector<1x32x256xf32>,
    %c0_270 = arith.constant 0 : index
    %c0_271 = arith.constant 0 : index
    %c0_272 = arith.constant 0 : index
    %702 = vector.load %arg5[%c0_270, %c0_271, %c0_272] : memref<1x32x256xf32, #tpu.memory_space<vmem>>, vector<1x32x256xf32>
    %703 = vector.shape_cast %702 : vector<1x32x256xf32> to vector<32x256xf32>
    %704 = arith.truncf %703 : vector<32x256xf32> to vector<32x256xbf16>
    %705 = vector.extract_strided_slice %704 {offsets = [0, 239], sizes = [32, 17], strides = [1, 1]} : vector<32x256xbf16> to vector<32x17xbf16>
    %706 = vector.extract_strided_slice %704 {offsets = [0, 0], sizes = [32, 239], strides = [1, 1]} : vector<32x256xbf16> to vector<32x239xbf16>
    %707 = tpu.concatenate %705, %706 in 1 : vector<32x17xbf16>, vector<32x239xbf16> -> vector<32x256xbf16>
    %708 = arith.andi %4, %8 : vector<1x256xi1>
    %c0_i32_273 = arith.constant 0 : i32
    %709 = arith.sitofp %c0_i32_273 : i32 to bf16
    %710 = vector.shape_cast %708 : vector<1x256xi1> to vector<1x256xi1>
    %711 = vector.broadcast %710 : vector<1x256xi1> to vector<32x256xi1>
    %712 = vector.broadcast %709 : bf16 to vector<32x256xbf16>
    %713 = arith.select %711, %707, %712 : vector<32x256xi1>, vector<32x256xbf16>
    %c54 = arith.constant 54 : index
    %c0_274 = arith.constant 0 : index
    %c0_275 = arith.constant 0 : index
    %714 = vector.load %arg3[%c54, %c0_274, %c0_275] : memref<90x32x32xbf16, #tpu.memory_space<vmem>>, vector<1x32x32xbf16>
    %715 = vector.shape_cast %714 : vector<1x32x32xbf16> to vector<32x32xbf16>
    %cst_276 = arith.constant dense<0.000000e+00> : vector<32x256xf32>
    %716 = tpu.matmul %715, %713, %cst_276 {dimension_numbers = #tpu.dot_dimension_numbers<[1], [0], [0], [1], [0, 0, 1, 1], [], []>} : vector<32x32xbf16>, vector<32x256xbf16>, vector<32x256xf32> -> vector<32x256xf32>
    %717 = vector.extract_strided_slice %704 {offsets = [0, 240], sizes = [32, 16], strides = [1, 1]} : vector<32x256xbf16> to vector<32x16xbf16>
    %718 = vector.extract_strided_slice %704 {offsets = [0, 0], sizes = [32, 240], strides = [1, 1]} : vector<32x256xbf16> to vector<32x240xbf16>
    %719 = tpu.concatenate %717, %718 in 1 : vector<32x16xbf16>, vector<32x240xbf16> -> vector<32x256xbf16>
    %c0_i32_277 = arith.constant 0 : i32
    %720 = arith.sitofp %c0_i32_277 : i32 to bf16
    %721 = vector.shape_cast %4 : vector<1x256xi1> to vector<1x256xi1>
    %722 = vector.broadcast %721 : vector<1x256xi1> to vector<32x256xi1>
    %723 = vector.broadcast %720 : bf16 to vector<32x256xbf16>
    %724 = arith.select %722, %719, %723 : vector<32x256xi1>, vector<32x256xbf16>
    %c55 = arith.constant 55 : index
    %c0_278 = arith.constant 0 : index
    %c0_279 = arith.constant 0 : index
    %725 = vector.load %arg3[%c55, %c0_278, %c0_279] : memref<90x32x32xbf16, #tpu.memory_space<vmem>>, vector<1x32x32xbf16>
    %726 = vector.shape_cast %725 : vector<1x32x32xbf16> to vector<32x32xbf16>
    %cst_280 = arith.constant dense<0.000000e+00> : vector<32x256xf32>
    %727 = tpu.matmul %726, %724, %cst_280 {dimension_numbers = #tpu.dot_dimension_numbers<[1], [0], [0], [1], [0, 0, 1, 1], [], []>} : vector<32x32xbf16>, vector<32x256xbf16>, vector<32x256xf32> -> vector<32x256xf32>
    %728 = arith.addf %716, %727 : vector<32x256xf32>
    %729 = vector.extract_strided_slice %704 {offsets = [0, 241], sizes = [32, 15], strides = [1, 1]} : vector<32x256xbf16> to vector<32x15xbf16>
    %730 = vector.extract_strided_slice %704 {offsets = [0, 0], sizes = [32, 241], strides = [1, 1]} : vector<32x256xbf16> to vector<32x241xbf16>
    %731 = tpu.concatenate %729, %730 in 1 : vector<32x15xbf16>, vector<32x241xbf16> -> vector<32x256xbf16>
    %732 = arith.andi %4, %10 : vector<1x256xi1>
    %c0_i32_281 = arith.constant 0 : i32
    %733 = arith.sitofp %c0_i32_281 : i32 to bf16
    %734 = vector.shape_cast %732 : vector<1x256xi1> to vector<1x256xi1>
    %735 = vector.broadcast %734 : vector<1x256xi1> to vector<32x256xi1>
    %736 = vector.broadcast %733 : bf16 to vector<32x256xbf16>
    %737 = arith.select %735, %731, %736 : vector<32x256xi1>, vector<32x256xbf16>
    %c56 = arith.constant 56 : index
    %c0_282 = arith.constant 0 : index
    %c0_283 = arith.constant 0 : index
    %738 = vector.load %arg3[%c56, %c0_282, %c0_283] : memref<90x32x32xbf16, #tpu.memory_space<vmem>>, vector<1x32x32xbf16>
    %739 = vector.shape_cast %738 : vector<1x32x32xbf16> to vector<32x32xbf16>
    %cst_284 = arith.constant dense<0.000000e+00> : vector<32x256xf32>
    %740 = tpu.matmul %739, %737, %cst_284 {dimension_numbers = #tpu.dot_dimension_numbers<[1], [0], [0], [1], [0, 0, 1, 1], [], []>} : vector<32x32xbf16>, vector<32x256xbf16>, vector<32x256xf32> -> vector<32x256xf32>
    %741 = arith.addf %728, %740 : vector<32x256xf32>
    %742 = vector.extract_strided_slice %704 {offsets = [0, 255], sizes = [32, 1], strides = [1, 1]} : vector<32x256xbf16> to vector<32x1xbf16>
    %743 = vector.extract_strided_slice %704 {offsets = [0, 0], sizes = [32, 255], strides = [1, 1]} : vector<32x256xbf16> to vector<32x255xbf16>
    %744 = tpu.concatenate %742, %743 in 1 : vector<32x1xbf16>, vector<32x255xbf16> -> vector<32x256xbf16>
    %c0_i32_285 = arith.constant 0 : i32
    %745 = arith.sitofp %c0_i32_285 : i32 to bf16
    %746 = vector.shape_cast %8 : vector<1x256xi1> to vector<1x256xi1>
    %747 = vector.broadcast %746 : vector<1x256xi1> to vector<32x256xi1>
    %748 = vector.broadcast %745 : bf16 to vector<32x256xbf16>
    %749 = arith.select %747, %744, %748 : vector<32x256xi1>, vector<32x256xbf16>
    %c57 = arith.constant 57 : index
    %c0_286 = arith.constant 0 : index
    %c0_287 = arith.constant 0 : index
    %750 = vector.load %arg3[%c57, %c0_286, %c0_287] : memref<90x32x32xbf16, #tpu.memory_space<vmem>>, vector<1x32x32xbf16>
    %751 = vector.shape_cast %750 : vector<1x32x32xbf16> to vector<32x32xbf16>
    %cst_288 = arith.constant dense<0.000000e+00> : vector<32x256xf32>
    %752 = tpu.matmul %751, %749, %cst_288 {dimension_numbers = #tpu.dot_dimension_numbers<[1], [0], [0], [1], [0, 0, 1, 1], [], []>} : vector<32x32xbf16>, vector<32x256xbf16>, vector<32x256xf32> -> vector<32x256xf32>
    %753 = arith.addf %741, %752 : vector<32x256xf32>
    %c58 = arith.constant 58 : index
    %c0_289 = arith.constant 0 : index
    %c0_290 = arith.constant 0 : index
    %754 = vector.load %arg3[%c58, %c0_289, %c0_290] : memref<90x32x32xbf16, #tpu.memory_space<vmem>>, vector<1x32x32xbf16>
    %755 = vector.shape_cast %754 : vector<1x32x32xbf16> to vector<32x32xbf16>
    %cst_291 = arith.constant dense<0.000000e+00> : vector<32x256xf32>
    %756 = tpu.matmul %755, %704, %cst_291 {dimension_numbers = #tpu.dot_dimension_numbers<[1], [0], [0], [1], [0, 0, 1, 1], [], []>} : vector<32x32xbf16>, vector<32x256xbf16>, vector<32x256xf32> -> vector<32x256xf32>
    %757 = arith.addf %753, %756 : vector<32x256xf32>
    %758 = vector.extract_strided_slice %704 {offsets = [0, 1], sizes = [32, 255], strides = [1, 1]} : vector<32x256xbf16> to vector<32x255xbf16>
    %759 = vector.extract_strided_slice %704 {offsets = [0, 0], sizes = [32, 1], strides = [1, 1]} : vector<32x256xbf16> to vector<32x1xbf16>
    %760 = tpu.concatenate %758, %759 in 1 : vector<32x255xbf16>, vector<32x1xbf16> -> vector<32x256xbf16>
    %c0_i32_292 = arith.constant 0 : i32
    %761 = arith.sitofp %c0_i32_292 : i32 to bf16
    %762 = vector.shape_cast %10 : vector<1x256xi1> to vector<1x256xi1>
    %763 = vector.broadcast %762 : vector<1x256xi1> to vector<32x256xi1>
    %764 = vector.broadcast %761 : bf16 to vector<32x256xbf16>
    %765 = arith.select %763, %760, %764 : vector<32x256xi1>, vector<32x256xbf16>
    %c59 = arith.constant 59 : index
    %c0_293 = arith.constant 0 : index
    %c0_294 = arith.constant 0 : index
    %766 = vector.load %arg3[%c59, %c0_293, %c0_294] : memref<90x32x32xbf16, #tpu.memory_space<vmem>>, vector<1x32x32xbf16>
    %767 = vector.shape_cast %766 : vector<1x32x32xbf16> to vector<32x32xbf16>
    %cst_295 = arith.constant dense<0.000000e+00> : vector<32x256xf32>
    %768 = tpu.matmul %767, %765, %cst_295 {dimension_numbers = #tpu.dot_dimension_numbers<[1], [0], [0], [1], [0, 0, 1, 1], [], []>} : vector<32x32xbf16>, vector<32x256xbf16>, vector<32x256xf32> -> vector<32x256xf32>
    %769 = arith.addf %757, %768 : vector<32x256xf32>
    %770 = vector.extract_strided_slice %704 {offsets = [0, 15], sizes = [32, 241], strides = [1, 1]} : vector<32x256xbf16> to vector<32x241xbf16>
    %771 = vector.extract_strided_slice %704 {offsets = [0, 0], sizes = [32, 15], strides = [1, 1]} : vector<32x256xbf16> to vector<32x15xbf16>
    %772 = tpu.concatenate %770, %771 in 1 : vector<32x241xbf16>, vector<32x15xbf16> -> vector<32x256xbf16>
    %773 = arith.andi %6, %8 : vector<1x256xi1>
    %c0_i32_296 = arith.constant 0 : i32
    %774 = arith.sitofp %c0_i32_296 : i32 to bf16
    %775 = vector.shape_cast %773 : vector<1x256xi1> to vector<1x256xi1>
    %776 = vector.broadcast %775 : vector<1x256xi1> to vector<32x256xi1>
    %777 = vector.broadcast %774 : bf16 to vector<32x256xbf16>
    %778 = arith.select %776, %772, %777 : vector<32x256xi1>, vector<32x256xbf16>
    %c60 = arith.constant 60 : index
    %c0_297 = arith.constant 0 : index
    %c0_298 = arith.constant 0 : index
    %779 = vector.load %arg3[%c60, %c0_297, %c0_298] : memref<90x32x32xbf16, #tpu.memory_space<vmem>>, vector<1x32x32xbf16>
    %780 = vector.shape_cast %779 : vector<1x32x32xbf16> to vector<32x32xbf16>
    %cst_299 = arith.constant dense<0.000000e+00> : vector<32x256xf32>
    %781 = tpu.matmul %780, %778, %cst_299 {dimension_numbers = #tpu.dot_dimension_numbers<[1], [0], [0], [1], [0, 0, 1, 1], [], []>} : vector<32x32xbf16>, vector<32x256xbf16>, vector<32x256xf32> -> vector<32x256xf32>
    %782 = arith.addf %769, %781 : vector<32x256xf32>
    %783 = vector.extract_strided_slice %704 {offsets = [0, 16], sizes = [32, 240], strides = [1, 1]} : vector<32x256xbf16> to vector<32x240xbf16>
    %784 = vector.extract_strided_slice %704 {offsets = [0, 0], sizes = [32, 16], strides = [1, 1]} : vector<32x256xbf16> to vector<32x16xbf16>
    %785 = tpu.concatenate %783, %784 in 1 : vector<32x240xbf16>, vector<32x16xbf16> -> vector<32x256xbf16>
    %c0_i32_300 = arith.constant 0 : i32
    %786 = arith.sitofp %c0_i32_300 : i32 to bf16
    %787 = vector.shape_cast %6 : vector<1x256xi1> to vector<1x256xi1>
    %788 = vector.broadcast %787 : vector<1x256xi1> to vector<32x256xi1>
    %789 = vector.broadcast %786 : bf16 to vector<32x256xbf16>
    %790 = arith.select %788, %785, %789 : vector<32x256xi1>, vector<32x256xbf16>
    %c61 = arith.constant 61 : index
    %c0_301 = arith.constant 0 : index
    %c0_302 = arith.constant 0 : index
    %791 = vector.load %arg3[%c61, %c0_301, %c0_302] : memref<90x32x32xbf16, #tpu.memory_space<vmem>>, vector<1x32x32xbf16>
    %792 = vector.shape_cast %791 : vector<1x32x32xbf16> to vector<32x32xbf16>
    %cst_303 = arith.constant dense<0.000000e+00> : vector<32x256xf32>
    %793 = tpu.matmul %792, %790, %cst_303 {dimension_numbers = #tpu.dot_dimension_numbers<[1], [0], [0], [1], [0, 0, 1, 1], [], []>} : vector<32x32xbf16>, vector<32x256xbf16>, vector<32x256xf32> -> vector<32x256xf32>
    %794 = arith.addf %782, %793 : vector<32x256xf32>
    %795 = vector.extract_strided_slice %704 {offsets = [0, 17], sizes = [32, 239], strides = [1, 1]} : vector<32x256xbf16> to vector<32x239xbf16>
    %796 = vector.extract_strided_slice %704 {offsets = [0, 0], sizes = [32, 17], strides = [1, 1]} : vector<32x256xbf16> to vector<32x17xbf16>
    %797 = tpu.concatenate %795, %796 in 1 : vector<32x239xbf16>, vector<32x17xbf16> -> vector<32x256xbf16>
    %798 = arith.andi %6, %10 : vector<1x256xi1>
    %c0_i32_304 = arith.constant 0 : i32
    %799 = arith.sitofp %c0_i32_304 : i32 to bf16
    %800 = vector.shape_cast %798 : vector<1x256xi1> to vector<1x256xi1>
    %801 = vector.broadcast %800 : vector<1x256xi1> to vector<32x256xi1>
    %802 = vector.broadcast %799 : bf16 to vector<32x256xbf16>
    %803 = arith.select %801, %797, %802 : vector<32x256xi1>, vector<32x256xbf16>
    %c62 = arith.constant 62 : index
    %c0_305 = arith.constant 0 : index
    %c0_306 = arith.constant 0 : index
    %804 = vector.load %arg3[%c62, %c0_305, %c0_306] : memref<90x32x32xbf16, #tpu.memory_space<vmem>>, vector<1x32x32xbf16>
    %805 = vector.shape_cast %804 : vector<1x32x32xbf16> to vector<32x32xbf16>
    %cst_307 = arith.constant dense<0.000000e+00> : vector<32x256xf32>
    %806 = tpu.matmul %805, %803, %cst_307 {dimension_numbers = #tpu.dot_dimension_numbers<[1], [0], [0], [1], [0, 0, 1, 1], [], []>} : vector<32x32xbf16>, vector<32x256xbf16>, vector<32x256xf32> -> vector<32x256xf32>
    %807 = arith.addf %794, %806 : vector<32x256xf32>
    %c7_308 = arith.constant 7 : index
    %c0_309 = arith.constant 0 : index
    %c0_310 = arith.constant 0 : index
    %808 = vector.load %arg4[%c7_308, %c0_309, %c0_310] : memref<11x32x1xf32, #tpu.memory_space<vmem>>, vector<1x32x1xf32>
    %809 = vector.shape_cast %808 : vector<1x32x1xf32> to vector<32x1xf32>
    %810 = vector.broadcast %809 : vector<32x1xf32> to vector<32x256xf32>
    %811 = arith.addf %807, %810 : vector<32x256xf32>
    %cst_311 = arith.constant 0.000000e+00 : f32
    %812 = vector.broadcast %cst_311 : f32 to vector<32x256xf32>
    %813 = arith.maximumf %811, %812 : vector<32x256xf32>
    %c0_312 = arith.constant 0 : index
    %c0_313 = arith.constant 0 : index
    %c0_314 = arith.constant 0 : index
    %814 = vector.load %arg5[%c0_312, %c0_313, %c0_314] : memref<1x32x256xf32, #tpu.memory_space<vmem>>, vector<1x32x256xf32>
    %815 = vector.shape_cast %814 : vector<1x32x256xf32> to vector<32x256xf32>
    %816 = arith.truncf %813 : vector<32x256xf32> to vector<32x256xbf16>
    %817 = vector.extract_strided_slice %816 {offsets = [0, 239], sizes = [32, 17], strides = [1, 1]} : vector<32x256xbf16> to vector<32x17xbf16>
    %818 = vector.extract_strided_slice %816 {offsets = [0, 0], sizes = [32, 239], strides = [1, 1]} : vector<32x256xbf16> to vector<32x239xbf16>
    %819 = tpu.concatenate %817, %818 in 1 : vector<32x17xbf16>, vector<32x239xbf16> -> vector<32x256xbf16>
    %820 = arith.andi %4, %8 : vector<1x256xi1>
    %c0_i32_315 = arith.constant 0 : i32
    %821 = arith.sitofp %c0_i32_315 : i32 to bf16
    %822 = vector.shape_cast %820 : vector<1x256xi1> to vector<1x256xi1>
    %823 = vector.broadcast %822 : vector<1x256xi1> to vector<32x256xi1>
    %824 = vector.broadcast %821 : bf16 to vector<32x256xbf16>
    %825 = arith.select %823, %819, %824 : vector<32x256xi1>, vector<32x256xbf16>
    %c63 = arith.constant 63 : index
    %c0_316 = arith.constant 0 : index
    %c0_317 = arith.constant 0 : index
    %826 = vector.load %arg3[%c63, %c0_316, %c0_317] : memref<90x32x32xbf16, #tpu.memory_space<vmem>>, vector<1x32x32xbf16>
    %827 = vector.shape_cast %826 : vector<1x32x32xbf16> to vector<32x32xbf16>
    %cst_318 = arith.constant dense<0.000000e+00> : vector<32x256xf32>
    %828 = tpu.matmul %827, %825, %cst_318 {dimension_numbers = #tpu.dot_dimension_numbers<[1], [0], [0], [1], [0, 0, 1, 1], [], []>} : vector<32x32xbf16>, vector<32x256xbf16>, vector<32x256xf32> -> vector<32x256xf32>
    %829 = vector.extract_strided_slice %816 {offsets = [0, 240], sizes = [32, 16], strides = [1, 1]} : vector<32x256xbf16> to vector<32x16xbf16>
    %830 = vector.extract_strided_slice %816 {offsets = [0, 0], sizes = [32, 240], strides = [1, 1]} : vector<32x256xbf16> to vector<32x240xbf16>
    %831 = tpu.concatenate %829, %830 in 1 : vector<32x16xbf16>, vector<32x240xbf16> -> vector<32x256xbf16>
    %c0_i32_319 = arith.constant 0 : i32
    %832 = arith.sitofp %c0_i32_319 : i32 to bf16
    %833 = vector.shape_cast %4 : vector<1x256xi1> to vector<1x256xi1>
    %834 = vector.broadcast %833 : vector<1x256xi1> to vector<32x256xi1>
    %835 = vector.broadcast %832 : bf16 to vector<32x256xbf16>
    %836 = arith.select %834, %831, %835 : vector<32x256xi1>, vector<32x256xbf16>
    %c64 = arith.constant 64 : index
    %c0_320 = arith.constant 0 : index
    %c0_321 = arith.constant 0 : index
    %837 = vector.load %arg3[%c64, %c0_320, %c0_321] : memref<90x32x32xbf16, #tpu.memory_space<vmem>>, vector<1x32x32xbf16>
    %838 = vector.shape_cast %837 : vector<1x32x32xbf16> to vector<32x32xbf16>
    %cst_322 = arith.constant dense<0.000000e+00> : vector<32x256xf32>
    %839 = tpu.matmul %838, %836, %cst_322 {dimension_numbers = #tpu.dot_dimension_numbers<[1], [0], [0], [1], [0, 0, 1, 1], [], []>} : vector<32x32xbf16>, vector<32x256xbf16>, vector<32x256xf32> -> vector<32x256xf32>
    %840 = arith.addf %828, %839 : vector<32x256xf32>
    %841 = vector.extract_strided_slice %816 {offsets = [0, 241], sizes = [32, 15], strides = [1, 1]} : vector<32x256xbf16> to vector<32x15xbf16>
    %842 = vector.extract_strided_slice %816 {offsets = [0, 0], sizes = [32, 241], strides = [1, 1]} : vector<32x256xbf16> to vector<32x241xbf16>
    %843 = tpu.concatenate %841, %842 in 1 : vector<32x15xbf16>, vector<32x241xbf16> -> vector<32x256xbf16>
    %844 = arith.andi %4, %10 : vector<1x256xi1>
    %c0_i32_323 = arith.constant 0 : i32
    %845 = arith.sitofp %c0_i32_323 : i32 to bf16
    %846 = vector.shape_cast %844 : vector<1x256xi1> to vector<1x256xi1>
    %847 = vector.broadcast %846 : vector<1x256xi1> to vector<32x256xi1>
    %848 = vector.broadcast %845 : bf16 to vector<32x256xbf16>
    %849 = arith.select %847, %843, %848 : vector<32x256xi1>, vector<32x256xbf16>
    %c65 = arith.constant 65 : index
    %c0_324 = arith.constant 0 : index
    %c0_325 = arith.constant 0 : index
    %850 = vector.load %arg3[%c65, %c0_324, %c0_325] : memref<90x32x32xbf16, #tpu.memory_space<vmem>>, vector<1x32x32xbf16>
    %851 = vector.shape_cast %850 : vector<1x32x32xbf16> to vector<32x32xbf16>
    %cst_326 = arith.constant dense<0.000000e+00> : vector<32x256xf32>
    %852 = tpu.matmul %851, %849, %cst_326 {dimension_numbers = #tpu.dot_dimension_numbers<[1], [0], [0], [1], [0, 0, 1, 1], [], []>} : vector<32x32xbf16>, vector<32x256xbf16>, vector<32x256xf32> -> vector<32x256xf32>
    %853 = arith.addf %840, %852 : vector<32x256xf32>
    %854 = vector.extract_strided_slice %816 {offsets = [0, 255], sizes = [32, 1], strides = [1, 1]} : vector<32x256xbf16> to vector<32x1xbf16>
    %855 = vector.extract_strided_slice %816 {offsets = [0, 0], sizes = [32, 255], strides = [1, 1]} : vector<32x256xbf16> to vector<32x255xbf16>
    %856 = tpu.concatenate %854, %855 in 1 : vector<32x1xbf16>, vector<32x255xbf16> -> vector<32x256xbf16>
    %c0_i32_327 = arith.constant 0 : i32
    %857 = arith.sitofp %c0_i32_327 : i32 to bf16
    %858 = vector.shape_cast %8 : vector<1x256xi1> to vector<1x256xi1>
    %859 = vector.broadcast %858 : vector<1x256xi1> to vector<32x256xi1>
    %860 = vector.broadcast %857 : bf16 to vector<32x256xbf16>
    %861 = arith.select %859, %856, %860 : vector<32x256xi1>, vector<32x256xbf16>
    %c66 = arith.constant 66 : index
    %c0_328 = arith.constant 0 : index
    %c0_329 = arith.constant 0 : index
    %862 = vector.load %arg3[%c66, %c0_328, %c0_329] : memref<90x32x32xbf16, #tpu.memory_space<vmem>>, vector<1x32x32xbf16>
    %863 = vector.shape_cast %862 : vector<1x32x32xbf16> to vector<32x32xbf16>
    %cst_330 = arith.constant dense<0.000000e+00> : vector<32x256xf32>
    %864 = tpu.matmul %863, %861, %cst_330 {dimension_numbers = #tpu.dot_dimension_numbers<[1], [0], [0], [1], [0, 0, 1, 1], [], []>} : vector<32x32xbf16>, vector<32x256xbf16>, vector<32x256xf32> -> vector<32x256xf32>
    %865 = arith.addf %853, %864 : vector<32x256xf32>
    %c67 = arith.constant 67 : index
    %c0_331 = arith.constant 0 : index
    %c0_332 = arith.constant 0 : index
    %866 = vector.load %arg3[%c67, %c0_331, %c0_332] : memref<90x32x32xbf16, #tpu.memory_space<vmem>>, vector<1x32x32xbf16>
    %867 = vector.shape_cast %866 : vector<1x32x32xbf16> to vector<32x32xbf16>
    %cst_333 = arith.constant dense<0.000000e+00> : vector<32x256xf32>
    %868 = tpu.matmul %867, %816, %cst_333 {dimension_numbers = #tpu.dot_dimension_numbers<[1], [0], [0], [1], [0, 0, 1, 1], [], []>} : vector<32x32xbf16>, vector<32x256xbf16>, vector<32x256xf32> -> vector<32x256xf32>
    %869 = arith.addf %865, %868 : vector<32x256xf32>
    %870 = vector.extract_strided_slice %816 {offsets = [0, 1], sizes = [32, 255], strides = [1, 1]} : vector<32x256xbf16> to vector<32x255xbf16>
    %871 = vector.extract_strided_slice %816 {offsets = [0, 0], sizes = [32, 1], strides = [1, 1]} : vector<32x256xbf16> to vector<32x1xbf16>
    %872 = tpu.concatenate %870, %871 in 1 : vector<32x255xbf16>, vector<32x1xbf16> -> vector<32x256xbf16>
    %c0_i32_334 = arith.constant 0 : i32
    %873 = arith.sitofp %c0_i32_334 : i32 to bf16
    %874 = vector.shape_cast %10 : vector<1x256xi1> to vector<1x256xi1>
    %875 = vector.broadcast %874 : vector<1x256xi1> to vector<32x256xi1>
    %876 = vector.broadcast %873 : bf16 to vector<32x256xbf16>
    %877 = arith.select %875, %872, %876 : vector<32x256xi1>, vector<32x256xbf16>
    %c68 = arith.constant 68 : index
    %c0_335 = arith.constant 0 : index
    %c0_336 = arith.constant 0 : index
    %878 = vector.load %arg3[%c68, %c0_335, %c0_336] : memref<90x32x32xbf16, #tpu.memory_space<vmem>>, vector<1x32x32xbf16>
    %879 = vector.shape_cast %878 : vector<1x32x32xbf16> to vector<32x32xbf16>
    %cst_337 = arith.constant dense<0.000000e+00> : vector<32x256xf32>
    %880 = tpu.matmul %879, %877, %cst_337 {dimension_numbers = #tpu.dot_dimension_numbers<[1], [0], [0], [1], [0, 0, 1, 1], [], []>} : vector<32x32xbf16>, vector<32x256xbf16>, vector<32x256xf32> -> vector<32x256xf32>
    %881 = arith.addf %869, %880 : vector<32x256xf32>
    %882 = vector.extract_strided_slice %816 {offsets = [0, 15], sizes = [32, 241], strides = [1, 1]} : vector<32x256xbf16> to vector<32x241xbf16>
    %883 = vector.extract_strided_slice %816 {offsets = [0, 0], sizes = [32, 15], strides = [1, 1]} : vector<32x256xbf16> to vector<32x15xbf16>
    %884 = tpu.concatenate %882, %883 in 1 : vector<32x241xbf16>, vector<32x15xbf16> -> vector<32x256xbf16>
    %885 = arith.andi %6, %8 : vector<1x256xi1>
    %c0_i32_338 = arith.constant 0 : i32
    %886 = arith.sitofp %c0_i32_338 : i32 to bf16
    %887 = vector.shape_cast %885 : vector<1x256xi1> to vector<1x256xi1>
    %888 = vector.broadcast %887 : vector<1x256xi1> to vector<32x256xi1>
    %889 = vector.broadcast %886 : bf16 to vector<32x256xbf16>
    %890 = arith.select %888, %884, %889 : vector<32x256xi1>, vector<32x256xbf16>
    %c69 = arith.constant 69 : index
    %c0_339 = arith.constant 0 : index
    %c0_340 = arith.constant 0 : index
    %891 = vector.load %arg3[%c69, %c0_339, %c0_340] : memref<90x32x32xbf16, #tpu.memory_space<vmem>>, vector<1x32x32xbf16>
    %892 = vector.shape_cast %891 : vector<1x32x32xbf16> to vector<32x32xbf16>
    %cst_341 = arith.constant dense<0.000000e+00> : vector<32x256xf32>
    %893 = tpu.matmul %892, %890, %cst_341 {dimension_numbers = #tpu.dot_dimension_numbers<[1], [0], [0], [1], [0, 0, 1, 1], [], []>} : vector<32x32xbf16>, vector<32x256xbf16>, vector<32x256xf32> -> vector<32x256xf32>
    %894 = arith.addf %881, %893 : vector<32x256xf32>
    %895 = vector.extract_strided_slice %816 {offsets = [0, 16], sizes = [32, 240], strides = [1, 1]} : vector<32x256xbf16> to vector<32x240xbf16>
    %896 = vector.extract_strided_slice %816 {offsets = [0, 0], sizes = [32, 16], strides = [1, 1]} : vector<32x256xbf16> to vector<32x16xbf16>
    %897 = tpu.concatenate %895, %896 in 1 : vector<32x240xbf16>, vector<32x16xbf16> -> vector<32x256xbf16>
    %c0_i32_342 = arith.constant 0 : i32
    %898 = arith.sitofp %c0_i32_342 : i32 to bf16
    %899 = vector.shape_cast %6 : vector<1x256xi1> to vector<1x256xi1>
    %900 = vector.broadcast %899 : vector<1x256xi1> to vector<32x256xi1>
    %901 = vector.broadcast %898 : bf16 to vector<32x256xbf16>
    %902 = arith.select %900, %897, %901 : vector<32x256xi1>, vector<32x256xbf16>
    %c70 = arith.constant 70 : index
    %c0_343 = arith.constant 0 : index
    %c0_344 = arith.constant 0 : index
    %903 = vector.load %arg3[%c70, %c0_343, %c0_344] : memref<90x32x32xbf16, #tpu.memory_space<vmem>>, vector<1x32x32xbf16>
    %904 = vector.shape_cast %903 : vector<1x32x32xbf16> to vector<32x32xbf16>
    %cst_345 = arith.constant dense<0.000000e+00> : vector<32x256xf32>
    %905 = tpu.matmul %904, %902, %cst_345 {dimension_numbers = #tpu.dot_dimension_numbers<[1], [0], [0], [1], [0, 0, 1, 1], [], []>} : vector<32x32xbf16>, vector<32x256xbf16>, vector<32x256xf32> -> vector<32x256xf32>
    %906 = arith.addf %894, %905 : vector<32x256xf32>
    %907 = vector.extract_strided_slice %816 {offsets = [0, 17], sizes = [32, 239], strides = [1, 1]} : vector<32x256xbf16> to vector<32x239xbf16>
    %908 = vector.extract_strided_slice %816 {offsets = [0, 0], sizes = [32, 17], strides = [1, 1]} : vector<32x256xbf16> to vector<32x17xbf16>
    %909 = tpu.concatenate %907, %908 in 1 : vector<32x239xbf16>, vector<32x17xbf16> -> vector<32x256xbf16>
    %910 = arith.andi %6, %10 : vector<1x256xi1>
    %c0_i32_346 = arith.constant 0 : i32
    %911 = arith.sitofp %c0_i32_346 : i32 to bf16
    %912 = vector.shape_cast %910 : vector<1x256xi1> to vector<1x256xi1>
    %913 = vector.broadcast %912 : vector<1x256xi1> to vector<32x256xi1>
    %914 = vector.broadcast %911 : bf16 to vector<32x256xbf16>
    %915 = arith.select %913, %909, %914 : vector<32x256xi1>, vector<32x256xbf16>
    %c71 = arith.constant 71 : index
    %c0_347 = arith.constant 0 : index
    %c0_348 = arith.constant 0 : index
    %916 = vector.load %arg3[%c71, %c0_347, %c0_348] : memref<90x32x32xbf16, #tpu.memory_space<vmem>>, vector<1x32x32xbf16>
    %917 = vector.shape_cast %916 : vector<1x32x32xbf16> to vector<32x32xbf16>
    %cst_349 = arith.constant dense<0.000000e+00> : vector<32x256xf32>
    %918 = tpu.matmul %917, %915, %cst_349 {dimension_numbers = #tpu.dot_dimension_numbers<[1], [0], [0], [1], [0, 0, 1, 1], [], []>} : vector<32x32xbf16>, vector<32x256xbf16>, vector<32x256xf32> -> vector<32x256xf32>
    %919 = arith.addf %906, %918 : vector<32x256xf32>
    %920 = arith.addf %815, %919 : vector<32x256xf32>
    %c8_350 = arith.constant 8 : index
    %c0_351 = arith.constant 0 : index
    %c0_352 = arith.constant 0 : index
    %921 = vector.load %arg4[%c8_350, %c0_351, %c0_352] : memref<11x32x1xf32, #tpu.memory_space<vmem>>, vector<1x32x1xf32>
    %922 = vector.shape_cast %921 : vector<1x32x1xf32> to vector<32x1xf32>
    %923 = vector.broadcast %922 : vector<32x1xf32> to vector<32x256xf32>
    %924 = arith.addf %920, %923 : vector<32x256xf32>
    %c0_353 = arith.constant 0 : index
    %c0_354 = arith.constant 0 : index
    %c0_355 = arith.constant 0 : index
    %925 = vector.load %arg5[%c0_353, %c0_354, %c0_355] : memref<1x32x256xf32, #tpu.memory_space<vmem>>, vector<1x32x256xf32>
    %926 = vector.shape_cast %925 : vector<1x32x256xf32> to vector<32x256xf32>
    %927 = vector.shape_cast %924 : vector<32x256xf32> to vector<1x32x256xf32>
    tpu.vector_store %arg5[%c0_353, %c0_354, %c0_355], %927 {strides = array<i32>} : memref<1x32x256xf32, #tpu.memory_space<vmem>>, vector<1x32x256xf32>,
    %c0_356 = arith.constant 0 : index
    %c0_357 = arith.constant 0 : index
    %c0_358 = arith.constant 0 : index
    %928 = vector.load %arg5[%c0_356, %c0_357, %c0_358] : memref<1x32x256xf32, #tpu.memory_space<vmem>>, vector<1x32x256xf32>
    %929 = vector.shape_cast %928 : vector<1x32x256xf32> to vector<32x256xf32>
    %930 = arith.truncf %929 : vector<32x256xf32> to vector<32x256xbf16>
    %931 = vector.extract_strided_slice %930 {offsets = [0, 239], sizes = [32, 17], strides = [1, 1]} : vector<32x256xbf16> to vector<32x17xbf16>
    %932 = vector.extract_strided_slice %930 {offsets = [0, 0], sizes = [32, 239], strides = [1, 1]} : vector<32x256xbf16> to vector<32x239xbf16>
    %933 = tpu.concatenate %931, %932 in 1 : vector<32x17xbf16>, vector<32x239xbf16> -> vector<32x256xbf16>
    %934 = arith.andi %4, %8 : vector<1x256xi1>
    %c0_i32_359 = arith.constant 0 : i32
    %935 = arith.sitofp %c0_i32_359 : i32 to bf16
    %936 = vector.shape_cast %934 : vector<1x256xi1> to vector<1x256xi1>
    %937 = vector.broadcast %936 : vector<1x256xi1> to vector<32x256xi1>
    %938 = vector.broadcast %935 : bf16 to vector<32x256xbf16>
    %939 = arith.select %937, %933, %938 : vector<32x256xi1>, vector<32x256xbf16>
    %c72 = arith.constant 72 : index
    %c0_360 = arith.constant 0 : index
    %c0_361 = arith.constant 0 : index
    %940 = vector.load %arg3[%c72, %c0_360, %c0_361] : memref<90x32x32xbf16, #tpu.memory_space<vmem>>, vector<1x32x32xbf16>
    %941 = vector.shape_cast %940 : vector<1x32x32xbf16> to vector<32x32xbf16>
    %cst_362 = arith.constant dense<0.000000e+00> : vector<32x256xf32>
    %942 = tpu.matmul %941, %939, %cst_362 {dimension_numbers = #tpu.dot_dimension_numbers<[1], [0], [0], [1], [0, 0, 1, 1], [], []>} : vector<32x32xbf16>, vector<32x256xbf16>, vector<32x256xf32> -> vector<32x256xf32>
    %943 = vector.extract_strided_slice %930 {offsets = [0, 240], sizes = [32, 16], strides = [1, 1]} : vector<32x256xbf16> to vector<32x16xbf16>
    %944 = vector.extract_strided_slice %930 {offsets = [0, 0], sizes = [32, 240], strides = [1, 1]} : vector<32x256xbf16> to vector<32x240xbf16>
    %945 = tpu.concatenate %943, %944 in 1 : vector<32x16xbf16>, vector<32x240xbf16> -> vector<32x256xbf16>
    %c0_i32_363 = arith.constant 0 : i32
    %946 = arith.sitofp %c0_i32_363 : i32 to bf16
    %947 = vector.shape_cast %4 : vector<1x256xi1> to vector<1x256xi1>
    %948 = vector.broadcast %947 : vector<1x256xi1> to vector<32x256xi1>
    %949 = vector.broadcast %946 : bf16 to vector<32x256xbf16>
    %950 = arith.select %948, %945, %949 : vector<32x256xi1>, vector<32x256xbf16>
    %c73 = arith.constant 73 : index
    %c0_364 = arith.constant 0 : index
    %c0_365 = arith.constant 0 : index
    %951 = vector.load %arg3[%c73, %c0_364, %c0_365] : memref<90x32x32xbf16, #tpu.memory_space<vmem>>, vector<1x32x32xbf16>
    %952 = vector.shape_cast %951 : vector<1x32x32xbf16> to vector<32x32xbf16>
    %cst_366 = arith.constant dense<0.000000e+00> : vector<32x256xf32>
    %953 = tpu.matmul %952, %950, %cst_366 {dimension_numbers = #tpu.dot_dimension_numbers<[1], [0], [0], [1], [0, 0, 1, 1], [], []>} : vector<32x32xbf16>, vector<32x256xbf16>, vector<32x256xf32> -> vector<32x256xf32>
    %954 = arith.addf %942, %953 : vector<32x256xf32>
    %955 = vector.extract_strided_slice %930 {offsets = [0, 241], sizes = [32, 15], strides = [1, 1]} : vector<32x256xbf16> to vector<32x15xbf16>
    %956 = vector.extract_strided_slice %930 {offsets = [0, 0], sizes = [32, 241], strides = [1, 1]} : vector<32x256xbf16> to vector<32x241xbf16>
    %957 = tpu.concatenate %955, %956 in 1 : vector<32x15xbf16>, vector<32x241xbf16> -> vector<32x256xbf16>
    %958 = arith.andi %4, %10 : vector<1x256xi1>
    %c0_i32_367 = arith.constant 0 : i32
    %959 = arith.sitofp %c0_i32_367 : i32 to bf16
    %960 = vector.shape_cast %958 : vector<1x256xi1> to vector<1x256xi1>
    %961 = vector.broadcast %960 : vector<1x256xi1> to vector<32x256xi1>
    %962 = vector.broadcast %959 : bf16 to vector<32x256xbf16>
    %963 = arith.select %961, %957, %962 : vector<32x256xi1>, vector<32x256xbf16>
    %c74 = arith.constant 74 : index
    %c0_368 = arith.constant 0 : index
    %c0_369 = arith.constant 0 : index
    %964 = vector.load %arg3[%c74, %c0_368, %c0_369] : memref<90x32x32xbf16, #tpu.memory_space<vmem>>, vector<1x32x32xbf16>
    %965 = vector.shape_cast %964 : vector<1x32x32xbf16> to vector<32x32xbf16>
    %cst_370 = arith.constant dense<0.000000e+00> : vector<32x256xf32>
    %966 = tpu.matmul %965, %963, %cst_370 {dimension_numbers = #tpu.dot_dimension_numbers<[1], [0], [0], [1], [0, 0, 1, 1], [], []>} : vector<32x32xbf16>, vector<32x256xbf16>, vector<32x256xf32> -> vector<32x256xf32>
    %967 = arith.addf %954, %966 : vector<32x256xf32>
    %968 = vector.extract_strided_slice %930 {offsets = [0, 255], sizes = [32, 1], strides = [1, 1]} : vector<32x256xbf16> to vector<32x1xbf16>
    %969 = vector.extract_strided_slice %930 {offsets = [0, 0], sizes = [32, 255], strides = [1, 1]} : vector<32x256xbf16> to vector<32x255xbf16>
    %970 = tpu.concatenate %968, %969 in 1 : vector<32x1xbf16>, vector<32x255xbf16> -> vector<32x256xbf16>
    %c0_i32_371 = arith.constant 0 : i32
    %971 = arith.sitofp %c0_i32_371 : i32 to bf16
    %972 = vector.shape_cast %8 : vector<1x256xi1> to vector<1x256xi1>
    %973 = vector.broadcast %972 : vector<1x256xi1> to vector<32x256xi1>
    %974 = vector.broadcast %971 : bf16 to vector<32x256xbf16>
    %975 = arith.select %973, %970, %974 : vector<32x256xi1>, vector<32x256xbf16>
    %c75 = arith.constant 75 : index
    %c0_372 = arith.constant 0 : index
    %c0_373 = arith.constant 0 : index
    %976 = vector.load %arg3[%c75, %c0_372, %c0_373] : memref<90x32x32xbf16, #tpu.memory_space<vmem>>, vector<1x32x32xbf16>
    %977 = vector.shape_cast %976 : vector<1x32x32xbf16> to vector<32x32xbf16>
    %cst_374 = arith.constant dense<0.000000e+00> : vector<32x256xf32>
    %978 = tpu.matmul %977, %975, %cst_374 {dimension_numbers = #tpu.dot_dimension_numbers<[1], [0], [0], [1], [0, 0, 1, 1], [], []>} : vector<32x32xbf16>, vector<32x256xbf16>, vector<32x256xf32> -> vector<32x256xf32>
    %979 = arith.addf %967, %978 : vector<32x256xf32>
    %c76 = arith.constant 76 : index
    %c0_375 = arith.constant 0 : index
    %c0_376 = arith.constant 0 : index
    %980 = vector.load %arg3[%c76, %c0_375, %c0_376] : memref<90x32x32xbf16, #tpu.memory_space<vmem>>, vector<1x32x32xbf16>
    %981 = vector.shape_cast %980 : vector<1x32x32xbf16> to vector<32x32xbf16>
    %cst_377 = arith.constant dense<0.000000e+00> : vector<32x256xf32>
    %982 = tpu.matmul %981, %930, %cst_377 {dimension_numbers = #tpu.dot_dimension_numbers<[1], [0], [0], [1], [0, 0, 1, 1], [], []>} : vector<32x32xbf16>, vector<32x256xbf16>, vector<32x256xf32> -> vector<32x256xf32>
    %983 = arith.addf %979, %982 : vector<32x256xf32>
    %984 = vector.extract_strided_slice %930 {offsets = [0, 1], sizes = [32, 255], strides = [1, 1]} : vector<32x256xbf16> to vector<32x255xbf16>
    %985 = vector.extract_strided_slice %930 {offsets = [0, 0], sizes = [32, 1], strides = [1, 1]} : vector<32x256xbf16> to vector<32x1xbf16>
    %986 = tpu.concatenate %984, %985 in 1 : vector<32x255xbf16>, vector<32x1xbf16> -> vector<32x256xbf16>
    %c0_i32_378 = arith.constant 0 : i32
    %987 = arith.sitofp %c0_i32_378 : i32 to bf16
    %988 = vector.shape_cast %10 : vector<1x256xi1> to vector<1x256xi1>
    %989 = vector.broadcast %988 : vector<1x256xi1> to vector<32x256xi1>
    %990 = vector.broadcast %987 : bf16 to vector<32x256xbf16>
    %991 = arith.select %989, %986, %990 : vector<32x256xi1>, vector<32x256xbf16>
    %c77 = arith.constant 77 : index
    %c0_379 = arith.constant 0 : index
    %c0_380 = arith.constant 0 : index
    %992 = vector.load %arg3[%c77, %c0_379, %c0_380] : memref<90x32x32xbf16, #tpu.memory_space<vmem>>, vector<1x32x32xbf16>
    %993 = vector.shape_cast %992 : vector<1x32x32xbf16> to vector<32x32xbf16>
    %cst_381 = arith.constant dense<0.000000e+00> : vector<32x256xf32>
    %994 = tpu.matmul %993, %991, %cst_381 {dimension_numbers = #tpu.dot_dimension_numbers<[1], [0], [0], [1], [0, 0, 1, 1], [], []>} : vector<32x32xbf16>, vector<32x256xbf16>, vector<32x256xf32> -> vector<32x256xf32>
    %995 = arith.addf %983, %994 : vector<32x256xf32>
    %996 = vector.extract_strided_slice %930 {offsets = [0, 15], sizes = [32, 241], strides = [1, 1]} : vector<32x256xbf16> to vector<32x241xbf16>
    %997 = vector.extract_strided_slice %930 {offsets = [0, 0], sizes = [32, 15], strides = [1, 1]} : vector<32x256xbf16> to vector<32x15xbf16>
    %998 = tpu.concatenate %996, %997 in 1 : vector<32x241xbf16>, vector<32x15xbf16> -> vector<32x256xbf16>
    %999 = arith.andi %6, %8 : vector<1x256xi1>
    %c0_i32_382 = arith.constant 0 : i32
    %1000 = arith.sitofp %c0_i32_382 : i32 to bf16
    %1001 = vector.shape_cast %999 : vector<1x256xi1> to vector<1x256xi1>
    %1002 = vector.broadcast %1001 : vector<1x256xi1> to vector<32x256xi1>
    %1003 = vector.broadcast %1000 : bf16 to vector<32x256xbf16>
    %1004 = arith.select %1002, %998, %1003 : vector<32x256xi1>, vector<32x256xbf16>
    %c78 = arith.constant 78 : index
    %c0_383 = arith.constant 0 : index
    %c0_384 = arith.constant 0 : index
    %1005 = vector.load %arg3[%c78, %c0_383, %c0_384] : memref<90x32x32xbf16, #tpu.memory_space<vmem>>, vector<1x32x32xbf16>
    %1006 = vector.shape_cast %1005 : vector<1x32x32xbf16> to vector<32x32xbf16>
    %cst_385 = arith.constant dense<0.000000e+00> : vector<32x256xf32>
    %1007 = tpu.matmul %1006, %1004, %cst_385 {dimension_numbers = #tpu.dot_dimension_numbers<[1], [0], [0], [1], [0, 0, 1, 1], [], []>} : vector<32x32xbf16>, vector<32x256xbf16>, vector<32x256xf32> -> vector<32x256xf32>
    %1008 = arith.addf %995, %1007 : vector<32x256xf32>
    %1009 = vector.extract_strided_slice %930 {offsets = [0, 16], sizes = [32, 240], strides = [1, 1]} : vector<32x256xbf16> to vector<32x240xbf16>
    %1010 = vector.extract_strided_slice %930 {offsets = [0, 0], sizes = [32, 16], strides = [1, 1]} : vector<32x256xbf16> to vector<32x16xbf16>
    %1011 = tpu.concatenate %1009, %1010 in 1 : vector<32x240xbf16>, vector<32x16xbf16> -> vector<32x256xbf16>
    %c0_i32_386 = arith.constant 0 : i32
    %1012 = arith.sitofp %c0_i32_386 : i32 to bf16
    %1013 = vector.shape_cast %6 : vector<1x256xi1> to vector<1x256xi1>
    %1014 = vector.broadcast %1013 : vector<1x256xi1> to vector<32x256xi1>
    %1015 = vector.broadcast %1012 : bf16 to vector<32x256xbf16>
    %1016 = arith.select %1014, %1011, %1015 : vector<32x256xi1>, vector<32x256xbf16>
    %c79 = arith.constant 79 : index
    %c0_387 = arith.constant 0 : index
    %c0_388 = arith.constant 0 : index
    %1017 = vector.load %arg3[%c79, %c0_387, %c0_388] : memref<90x32x32xbf16, #tpu.memory_space<vmem>>, vector<1x32x32xbf16>
    %1018 = vector.shape_cast %1017 : vector<1x32x32xbf16> to vector<32x32xbf16>
    %cst_389 = arith.constant dense<0.000000e+00> : vector<32x256xf32>
    %1019 = tpu.matmul %1018, %1016, %cst_389 {dimension_numbers = #tpu.dot_dimension_numbers<[1], [0], [0], [1], [0, 0, 1, 1], [], []>} : vector<32x32xbf16>, vector<32x256xbf16>, vector<32x256xf32> -> vector<32x256xf32>
    %1020 = arith.addf %1008, %1019 : vector<32x256xf32>
    %1021 = vector.extract_strided_slice %930 {offsets = [0, 17], sizes = [32, 239], strides = [1, 1]} : vector<32x256xbf16> to vector<32x239xbf16>
    %1022 = vector.extract_strided_slice %930 {offsets = [0, 0], sizes = [32, 17], strides = [1, 1]} : vector<32x256xbf16> to vector<32x17xbf16>
    %1023 = tpu.concatenate %1021, %1022 in 1 : vector<32x239xbf16>, vector<32x17xbf16> -> vector<32x256xbf16>
    %1024 = arith.andi %6, %10 : vector<1x256xi1>
    %c0_i32_390 = arith.constant 0 : i32
    %1025 = arith.sitofp %c0_i32_390 : i32 to bf16
    %1026 = vector.shape_cast %1024 : vector<1x256xi1> to vector<1x256xi1>
    %1027 = vector.broadcast %1026 : vector<1x256xi1> to vector<32x256xi1>
    %1028 = vector.broadcast %1025 : bf16 to vector<32x256xbf16>
    %1029 = arith.select %1027, %1023, %1028 : vector<32x256xi1>, vector<32x256xbf16>
    %c80 = arith.constant 80 : index
    %c0_391 = arith.constant 0 : index
    %c0_392 = arith.constant 0 : index
    %1030 = vector.load %arg3[%c80, %c0_391, %c0_392] : memref<90x32x32xbf16, #tpu.memory_space<vmem>>, vector<1x32x32xbf16>
    %1031 = vector.shape_cast %1030 : vector<1x32x32xbf16> to vector<32x32xbf16>
    %cst_393 = arith.constant dense<0.000000e+00> : vector<32x256xf32>
    %1032 = tpu.matmul %1031, %1029, %cst_393 {dimension_numbers = #tpu.dot_dimension_numbers<[1], [0], [0], [1], [0, 0, 1, 1], [], []>} : vector<32x32xbf16>, vector<32x256xbf16>, vector<32x256xf32> -> vector<32x256xf32>
    %1033 = arith.addf %1020, %1032 : vector<32x256xf32>
    %c9_394 = arith.constant 9 : index
    %c0_395 = arith.constant 0 : index
    %c0_396 = arith.constant 0 : index
    %1034 = vector.load %arg4[%c9_394, %c0_395, %c0_396] : memref<11x32x1xf32, #tpu.memory_space<vmem>>, vector<1x32x1xf32>
    %1035 = vector.shape_cast %1034 : vector<1x32x1xf32> to vector<32x1xf32>
    %1036 = vector.broadcast %1035 : vector<32x1xf32> to vector<32x256xf32>
    %1037 = arith.addf %1033, %1036 : vector<32x256xf32>
    %cst_397 = arith.constant 0.000000e+00 : f32
    %1038 = vector.broadcast %cst_397 : f32 to vector<32x256xf32>
    %1039 = arith.maximumf %1037, %1038 : vector<32x256xf32>
    %c0_398 = arith.constant 0 : index
    %c0_399 = arith.constant 0 : index
    %c0_400 = arith.constant 0 : index
    %1040 = vector.load %arg5[%c0_398, %c0_399, %c0_400] : memref<1x32x256xf32, #tpu.memory_space<vmem>>, vector<1x32x256xf32>
    %1041 = vector.shape_cast %1040 : vector<1x32x256xf32> to vector<32x256xf32>
    %1042 = arith.truncf %1039 : vector<32x256xf32> to vector<32x256xbf16>
    %1043 = vector.extract_strided_slice %1042 {offsets = [0, 239], sizes = [32, 17], strides = [1, 1]} : vector<32x256xbf16> to vector<32x17xbf16>
    %1044 = vector.extract_strided_slice %1042 {offsets = [0, 0], sizes = [32, 239], strides = [1, 1]} : vector<32x256xbf16> to vector<32x239xbf16>
    %1045 = tpu.concatenate %1043, %1044 in 1 : vector<32x17xbf16>, vector<32x239xbf16> -> vector<32x256xbf16>
    %1046 = arith.andi %4, %8 : vector<1x256xi1>
    %c0_i32_401 = arith.constant 0 : i32
    %1047 = arith.sitofp %c0_i32_401 : i32 to bf16
    %1048 = vector.shape_cast %1046 : vector<1x256xi1> to vector<1x256xi1>
    %1049 = vector.broadcast %1048 : vector<1x256xi1> to vector<32x256xi1>
    %1050 = vector.broadcast %1047 : bf16 to vector<32x256xbf16>
    %1051 = arith.select %1049, %1045, %1050 : vector<32x256xi1>, vector<32x256xbf16>
    %c81 = arith.constant 81 : index
    %c0_402 = arith.constant 0 : index
    %c0_403 = arith.constant 0 : index
    %1052 = vector.load %arg3[%c81, %c0_402, %c0_403] : memref<90x32x32xbf16, #tpu.memory_space<vmem>>, vector<1x32x32xbf16>
    %1053 = vector.shape_cast %1052 : vector<1x32x32xbf16> to vector<32x32xbf16>
    %cst_404 = arith.constant dense<0.000000e+00> : vector<32x256xf32>
    %1054 = tpu.matmul %1053, %1051, %cst_404 {dimension_numbers = #tpu.dot_dimension_numbers<[1], [0], [0], [1], [0, 0, 1, 1], [], []>} : vector<32x32xbf16>, vector<32x256xbf16>, vector<32x256xf32> -> vector<32x256xf32>
    %1055 = vector.extract_strided_slice %1042 {offsets = [0, 240], sizes = [32, 16], strides = [1, 1]} : vector<32x256xbf16> to vector<32x16xbf16>
    %1056 = vector.extract_strided_slice %1042 {offsets = [0, 0], sizes = [32, 240], strides = [1, 1]} : vector<32x256xbf16> to vector<32x240xbf16>
    %1057 = tpu.concatenate %1055, %1056 in 1 : vector<32x16xbf16>, vector<32x240xbf16> -> vector<32x256xbf16>
    %c0_i32_405 = arith.constant 0 : i32
    %1058 = arith.sitofp %c0_i32_405 : i32 to bf16
    %1059 = vector.shape_cast %4 : vector<1x256xi1> to vector<1x256xi1>
    %1060 = vector.broadcast %1059 : vector<1x256xi1> to vector<32x256xi1>
    %1061 = vector.broadcast %1058 : bf16 to vector<32x256xbf16>
    %1062 = arith.select %1060, %1057, %1061 : vector<32x256xi1>, vector<32x256xbf16>
    %c82 = arith.constant 82 : index
    %c0_406 = arith.constant 0 : index
    %c0_407 = arith.constant 0 : index
    %1063 = vector.load %arg3[%c82, %c0_406, %c0_407] : memref<90x32x32xbf16, #tpu.memory_space<vmem>>, vector<1x32x32xbf16>
    %1064 = vector.shape_cast %1063 : vector<1x32x32xbf16> to vector<32x32xbf16>
    %cst_408 = arith.constant dense<0.000000e+00> : vector<32x256xf32>
    %1065 = tpu.matmul %1064, %1062, %cst_408 {dimension_numbers = #tpu.dot_dimension_numbers<[1], [0], [0], [1], [0, 0, 1, 1], [], []>} : vector<32x32xbf16>, vector<32x256xbf16>, vector<32x256xf32> -> vector<32x256xf32>
    %1066 = arith.addf %1054, %1065 : vector<32x256xf32>
    %1067 = vector.extract_strided_slice %1042 {offsets = [0, 241], sizes = [32, 15], strides = [1, 1]} : vector<32x256xbf16> to vector<32x15xbf16>
    %1068 = vector.extract_strided_slice %1042 {offsets = [0, 0], sizes = [32, 241], strides = [1, 1]} : vector<32x256xbf16> to vector<32x241xbf16>
    %1069 = tpu.concatenate %1067, %1068 in 1 : vector<32x15xbf16>, vector<32x241xbf16> -> vector<32x256xbf16>
    %1070 = arith.andi %4, %10 : vector<1x256xi1>
    %c0_i32_409 = arith.constant 0 : i32
    %1071 = arith.sitofp %c0_i32_409 : i32 to bf16
    %1072 = vector.shape_cast %1070 : vector<1x256xi1> to vector<1x256xi1>
    %1073 = vector.broadcast %1072 : vector<1x256xi1> to vector<32x256xi1>
    %1074 = vector.broadcast %1071 : bf16 to vector<32x256xbf16>
    %1075 = arith.select %1073, %1069, %1074 : vector<32x256xi1>, vector<32x256xbf16>
    %c83 = arith.constant 83 : index
    %c0_410 = arith.constant 0 : index
    %c0_411 = arith.constant 0 : index
    %1076 = vector.load %arg3[%c83, %c0_410, %c0_411] : memref<90x32x32xbf16, #tpu.memory_space<vmem>>, vector<1x32x32xbf16>
    %1077 = vector.shape_cast %1076 : vector<1x32x32xbf16> to vector<32x32xbf16>
    %cst_412 = arith.constant dense<0.000000e+00> : vector<32x256xf32>
    %1078 = tpu.matmul %1077, %1075, %cst_412 {dimension_numbers = #tpu.dot_dimension_numbers<[1], [0], [0], [1], [0, 0, 1, 1], [], []>} : vector<32x32xbf16>, vector<32x256xbf16>, vector<32x256xf32> -> vector<32x256xf32>
    %1079 = arith.addf %1066, %1078 : vector<32x256xf32>
    %1080 = vector.extract_strided_slice %1042 {offsets = [0, 255], sizes = [32, 1], strides = [1, 1]} : vector<32x256xbf16> to vector<32x1xbf16>
    %1081 = vector.extract_strided_slice %1042 {offsets = [0, 0], sizes = [32, 255], strides = [1, 1]} : vector<32x256xbf16> to vector<32x255xbf16>
    %1082 = tpu.concatenate %1080, %1081 in 1 : vector<32x1xbf16>, vector<32x255xbf16> -> vector<32x256xbf16>
    %c0_i32_413 = arith.constant 0 : i32
    %1083 = arith.sitofp %c0_i32_413 : i32 to bf16
    %1084 = vector.shape_cast %8 : vector<1x256xi1> to vector<1x256xi1>
    %1085 = vector.broadcast %1084 : vector<1x256xi1> to vector<32x256xi1>
    %1086 = vector.broadcast %1083 : bf16 to vector<32x256xbf16>
    %1087 = arith.select %1085, %1082, %1086 : vector<32x256xi1>, vector<32x256xbf16>
    %c84 = arith.constant 84 : index
    %c0_414 = arith.constant 0 : index
    %c0_415 = arith.constant 0 : index
    %1088 = vector.load %arg3[%c84, %c0_414, %c0_415] : memref<90x32x32xbf16, #tpu.memory_space<vmem>>, vector<1x32x32xbf16>
    %1089 = vector.shape_cast %1088 : vector<1x32x32xbf16> to vector<32x32xbf16>
    %cst_416 = arith.constant dense<0.000000e+00> : vector<32x256xf32>
    %1090 = tpu.matmul %1089, %1087, %cst_416 {dimension_numbers = #tpu.dot_dimension_numbers<[1], [0], [0], [1], [0, 0, 1, 1], [], []>} : vector<32x32xbf16>, vector<32x256xbf16>, vector<32x256xf32> -> vector<32x256xf32>
    %1091 = arith.addf %1079, %1090 : vector<32x256xf32>
    %c85 = arith.constant 85 : index
    %c0_417 = arith.constant 0 : index
    %c0_418 = arith.constant 0 : index
    %1092 = vector.load %arg3[%c85, %c0_417, %c0_418] : memref<90x32x32xbf16, #tpu.memory_space<vmem>>, vector<1x32x32xbf16>
    %1093 = vector.shape_cast %1092 : vector<1x32x32xbf16> to vector<32x32xbf16>
    %cst_419 = arith.constant dense<0.000000e+00> : vector<32x256xf32>
    %1094 = tpu.matmul %1093, %1042, %cst_419 {dimension_numbers = #tpu.dot_dimension_numbers<[1], [0], [0], [1], [0, 0, 1, 1], [], []>} : vector<32x32xbf16>, vector<32x256xbf16>, vector<32x256xf32> -> vector<32x256xf32>
    %1095 = arith.addf %1091, %1094 : vector<32x256xf32>
    %1096 = vector.extract_strided_slice %1042 {offsets = [0, 1], sizes = [32, 255], strides = [1, 1]} : vector<32x256xbf16> to vector<32x255xbf16>
    %1097 = vector.extract_strided_slice %1042 {offsets = [0, 0], sizes = [32, 1], strides = [1, 1]} : vector<32x256xbf16> to vector<32x1xbf16>
    %1098 = tpu.concatenate %1096, %1097 in 1 : vector<32x255xbf16>, vector<32x1xbf16> -> vector<32x256xbf16>
    %c0_i32_420 = arith.constant 0 : i32
    %1099 = arith.sitofp %c0_i32_420 : i32 to bf16
    %1100 = vector.shape_cast %10 : vector<1x256xi1> to vector<1x256xi1>
    %1101 = vector.broadcast %1100 : vector<1x256xi1> to vector<32x256xi1>
    %1102 = vector.broadcast %1099 : bf16 to vector<32x256xbf16>
    %1103 = arith.select %1101, %1098, %1102 : vector<32x256xi1>, vector<32x256xbf16>
    %c86 = arith.constant 86 : index
    %c0_421 = arith.constant 0 : index
    %c0_422 = arith.constant 0 : index
    %1104 = vector.load %arg3[%c86, %c0_421, %c0_422] : memref<90x32x32xbf16, #tpu.memory_space<vmem>>, vector<1x32x32xbf16>
    %1105 = vector.shape_cast %1104 : vector<1x32x32xbf16> to vector<32x32xbf16>
    %cst_423 = arith.constant dense<0.000000e+00> : vector<32x256xf32>
    %1106 = tpu.matmul %1105, %1103, %cst_423 {dimension_numbers = #tpu.dot_dimension_numbers<[1], [0], [0], [1], [0, 0, 1, 1], [], []>} : vector<32x32xbf16>, vector<32x256xbf16>, vector<32x256xf32> -> vector<32x256xf32>
    %1107 = arith.addf %1095, %1106 : vector<32x256xf32>
    %1108 = vector.extract_strided_slice %1042 {offsets = [0, 15], sizes = [32, 241], strides = [1, 1]} : vector<32x256xbf16> to vector<32x241xbf16>
    %1109 = vector.extract_strided_slice %1042 {offsets = [0, 0], sizes = [32, 15], strides = [1, 1]} : vector<32x256xbf16> to vector<32x15xbf16>
    %1110 = tpu.concatenate %1108, %1109 in 1 : vector<32x241xbf16>, vector<32x15xbf16> -> vector<32x256xbf16>
    %1111 = arith.andi %6, %8 : vector<1x256xi1>
    %c0_i32_424 = arith.constant 0 : i32
    %1112 = arith.sitofp %c0_i32_424 : i32 to bf16
    %1113 = vector.shape_cast %1111 : vector<1x256xi1> to vector<1x256xi1>
    %1114 = vector.broadcast %1113 : vector<1x256xi1> to vector<32x256xi1>
    %1115 = vector.broadcast %1112 : bf16 to vector<32x256xbf16>
    %1116 = arith.select %1114, %1110, %1115 : vector<32x256xi1>, vector<32x256xbf16>
    %c87 = arith.constant 87 : index
    %c0_425 = arith.constant 0 : index
    %c0_426 = arith.constant 0 : index
    %1117 = vector.load %arg3[%c87, %c0_425, %c0_426] : memref<90x32x32xbf16, #tpu.memory_space<vmem>>, vector<1x32x32xbf16>
    %1118 = vector.shape_cast %1117 : vector<1x32x32xbf16> to vector<32x32xbf16>
    %cst_427 = arith.constant dense<0.000000e+00> : vector<32x256xf32>
    %1119 = tpu.matmul %1118, %1116, %cst_427 {dimension_numbers = #tpu.dot_dimension_numbers<[1], [0], [0], [1], [0, 0, 1, 1], [], []>} : vector<32x32xbf16>, vector<32x256xbf16>, vector<32x256xf32> -> vector<32x256xf32>
    %1120 = arith.addf %1107, %1119 : vector<32x256xf32>
    %1121 = vector.extract_strided_slice %1042 {offsets = [0, 16], sizes = [32, 240], strides = [1, 1]} : vector<32x256xbf16> to vector<32x240xbf16>
    %1122 = vector.extract_strided_slice %1042 {offsets = [0, 0], sizes = [32, 16], strides = [1, 1]} : vector<32x256xbf16> to vector<32x16xbf16>
    %1123 = tpu.concatenate %1121, %1122 in 1 : vector<32x240xbf16>, vector<32x16xbf16> -> vector<32x256xbf16>
    %c0_i32_428 = arith.constant 0 : i32
    %1124 = arith.sitofp %c0_i32_428 : i32 to bf16
    %1125 = vector.shape_cast %6 : vector<1x256xi1> to vector<1x256xi1>
    %1126 = vector.broadcast %1125 : vector<1x256xi1> to vector<32x256xi1>
    %1127 = vector.broadcast %1124 : bf16 to vector<32x256xbf16>
    %1128 = arith.select %1126, %1123, %1127 : vector<32x256xi1>, vector<32x256xbf16>
    %c88 = arith.constant 88 : index
    %c0_429 = arith.constant 0 : index
    %c0_430 = arith.constant 0 : index
    %1129 = vector.load %arg3[%c88, %c0_429, %c0_430] : memref<90x32x32xbf16, #tpu.memory_space<vmem>>, vector<1x32x32xbf16>
    %1130 = vector.shape_cast %1129 : vector<1x32x32xbf16> to vector<32x32xbf16>
    %cst_431 = arith.constant dense<0.000000e+00> : vector<32x256xf32>
    %1131 = tpu.matmul %1130, %1128, %cst_431 {dimension_numbers = #tpu.dot_dimension_numbers<[1], [0], [0], [1], [0, 0, 1, 1], [], []>} : vector<32x32xbf16>, vector<32x256xbf16>, vector<32x256xf32> -> vector<32x256xf32>
    %1132 = arith.addf %1120, %1131 : vector<32x256xf32>
    %1133 = vector.extract_strided_slice %1042 {offsets = [0, 17], sizes = [32, 239], strides = [1, 1]} : vector<32x256xbf16> to vector<32x239xbf16>
    %1134 = vector.extract_strided_slice %1042 {offsets = [0, 0], sizes = [32, 17], strides = [1, 1]} : vector<32x256xbf16> to vector<32x17xbf16>
    %1135 = tpu.concatenate %1133, %1134 in 1 : vector<32x239xbf16>, vector<32x17xbf16> -> vector<32x256xbf16>
    %1136 = arith.andi %6, %10 : vector<1x256xi1>
    %c0_i32_432 = arith.constant 0 : i32
    %1137 = arith.sitofp %c0_i32_432 : i32 to bf16
    %1138 = vector.shape_cast %1136 : vector<1x256xi1> to vector<1x256xi1>
    %1139 = vector.broadcast %1138 : vector<1x256xi1> to vector<32x256xi1>
    %1140 = vector.broadcast %1137 : bf16 to vector<32x256xbf16>
    %1141 = arith.select %1139, %1135, %1140 : vector<32x256xi1>, vector<32x256xbf16>
    %c89 = arith.constant 89 : index
    %c0_433 = arith.constant 0 : index
    %c0_434 = arith.constant 0 : index
    %1142 = vector.load %arg3[%c89, %c0_433, %c0_434] : memref<90x32x32xbf16, #tpu.memory_space<vmem>>, vector<1x32x32xbf16>
    %1143 = vector.shape_cast %1142 : vector<1x32x32xbf16> to vector<32x32xbf16>
    %cst_435 = arith.constant dense<0.000000e+00> : vector<32x256xf32>
    %1144 = tpu.matmul %1143, %1141, %cst_435 {dimension_numbers = #tpu.dot_dimension_numbers<[1], [0], [0], [1], [0, 0, 1, 1], [], []>} : vector<32x32xbf16>, vector<32x256xbf16>, vector<32x256xf32> -> vector<32x256xf32>
    %1145 = arith.addf %1132, %1144 : vector<32x256xf32>
    %1146 = arith.addf %1041, %1145 : vector<32x256xf32>
    %c10_436 = arith.constant 10 : index
    %c0_437 = arith.constant 0 : index
    %c0_438 = arith.constant 0 : index
    %1147 = vector.load %arg4[%c10_436, %c0_437, %c0_438] : memref<11x32x1xf32, #tpu.memory_space<vmem>>, vector<1x32x1xf32>
    %1148 = vector.shape_cast %1147 : vector<1x32x1xf32> to vector<32x1xf32>
    %1149 = vector.broadcast %1148 : vector<32x1xf32> to vector<32x256xf32>
    %1150 = arith.addf %1146, %1149 : vector<32x256xf32>
    %c0_439 = arith.constant 0 : index
    %c0_440 = arith.constant 0 : index
    %c0_441 = arith.constant 0 : index
    %1151 = vector.load %arg5[%c0_439, %c0_440, %c0_441] : memref<1x32x256xf32, #tpu.memory_space<vmem>>, vector<1x32x256xf32>
    %1152 = vector.shape_cast %1151 : vector<1x32x256xf32> to vector<32x256xf32>
    %1153 = vector.shape_cast %1150 : vector<32x256xf32> to vector<1x32x256xf32>
    tpu.vector_store %arg5[%c0_439, %c0_440, %c0_441], %1153 {strides = array<i32>} : memref<1x32x256xf32, #tpu.memory_space<vmem>>, vector<1x32x256xf32>,
    return
  }
  func.func @transform_0(%arg0: i32) -> (i32, i32, i32) {
    %c0_i32 = arith.constant 0 : i32
    %c0_i32_0 = arith.constant 0 : i32
    %c0_i32_1 = arith.constant 0 : i32
    return %arg0, %c0_i32, %c0_i32_0 : i32, i32, i32
  }
  func.func @transform_1(%arg0: i32) -> (i32, i32) {
    %c0_i32 = arith.constant 0 : i32
    %c0_i32_0 = arith.constant 0 : i32
    %c0_i32_1 = arith.constant 0 : i32
    return %c0_i32, %c0_i32_0 : i32, i32
  }
  func.func @transform_2(%arg0: i32) -> (i32, i32, i32) {
    %c0_i32 = arith.constant 0 : i32
    %c0_i32_0 = arith.constant 0 : i32
    %c0_i32_1 = arith.constant 0 : i32
    %c0_i32_2 = arith.constant 0 : i32
    return %c0_i32, %c0_i32_0, %c0_i32_1 : i32, i32, i32
  }
  func.func @transform_3(%arg0: i32) -> (i32, i32, i32) {
    %c0_i32 = arith.constant 0 : i32
    %c0_i32_0 = arith.constant 0 : i32
    %c0_i32_1 = arith.constant 0 : i32
    %c0_i32_2 = arith.constant 0 : i32
    return %c0_i32, %c0_i32_0, %c0_i32_1 : i32, i32, i32
  }
  func.func @transform_4(%arg0: i32) -> (i32, i32, i32) {
    %c0_i32 = arith.constant 0 : i32
    %c0_i32_0 = arith.constant 0 : i32
    %c0_i32_1 = arith.constant 0 : i32
    return %arg0, %c0_i32, %c0_i32_0 : i32, i32, i32
  }
}

</mosaic_0001>

<bundles_post_ra>
// kernel: fea_extract_forward.1
= control target key start
LH: loop header
LB: loop body
LE: loop exit
PB: predicated region body
PF: predicated region fallthrough
CT: control target
= control target key end

     0   :  { %s11452_s15 = smov 0   ;;  %s14915_s0 = inlined_call_operand.vmem [shape: bf16[2,9,256], index: 0, kind: input, shape index: {}]   ;;  %s14916_s1 = inlined_call_operand.vmem [shape: bf16[32,9], index: 1, kind: input, shape index: {}]   ;;  %s14917_s2 = inlined_call_operand.vmem [shape: bf16[90,32,32], index: 2, kind: input, shape index: {}]   ;;  %s14918_s3 = inlined_call_operand.vmem [shape: f32[11,32,1], index: 3, kind: input, shape index: {}]   ;;  %s14919_s4 = inlined_call_operand.vmem [shape: f32[2,32,256], index: 4, kind: output, shape index: {}]  }
   0x1 LB: > { %s10265_s16 = sadd.s32 4294967295, %s11414_s15   ;;  %p10269_p0 = scmp.ge.s32.totalorder %s11414_s15, 1  ;;  %s11414_s15 = sphi %s11452_s15, %s14_s15  }
   0x2   : > { %p162_p1 = scmp.lt.s32.totalorder %s11414_s15, 3 }
   0x4   : > { %p163_p2 = pnand %p10269_p0, %p162_p1 }
   0x6   : > { %166 = sbr.rel (%p163_p2) target bundleno = 4257 (0x10a1), region = 36 }
   0xb   : > { %p188_p3 = scmp.lt.s32.totalorder %s10265_s16, 1  ;;  %vm269_vm0 = vcmask 1043456   ;;  %vm270_vm1 = vcmask 1044480   ;;  %v11416_v0 = vmov 65535   ;;  %v14946_v2 = vmov 0   ;;  %v222_v3 = vld [vmem:[%s14918_s3 + $0x10] sm:$0xff] }
   0xc   : > { %v271_v1 = vsel %vm269_vm0, 4294967295, %v11416_v0  ;;  %311 = vmatprep.mubr.bf16.mxu0 %v14946_v2  ;;  %321 = vmatprep.mubr.bf16.mxu1 %v14946_v2  ;;  %v220_v4 = vld [vmem:[%s14918_s3] sm:$0xff]  ;;  %v223_v6 = vld [vmem:[%s14918_s3 + $0x18] sm:$0xff]  ;;  %v221_v7 = vld [vmem:[%s14918_s3 + $0x8] sm:$0xff]  ;;  %vm262_vm2 = vcmask 72704   ;;  %s11418_s7 = smov 16   ;;  %v201_v50 = vlaneseq }
   0xd   : > { %s16110_s16 = smov (!%p188_p3, %s10265_s16), 1  ;;  %11221 = vset.pattern.permute.xlu0 %v14946_v2  ;;  %11222 = vset.pattern.permute.xlu1 %v14946_v2  ;;  %v272_v5 = vsel %vm270_vm1, %v271_v1, 0  ;;  %v11226_v11 = vld [vmem:[%s14916_s1] sm:$0xff]   ;;  %v11227_v12 = vld [vmem:[%s14916_s1 + $0x8] sm:$0xff]   ;;  %s11419_s8 = smov 17   ;;  %v10367_v46 = vld [vmem:[%s14918_s3 + $0x38] sm:$0xff] }
   0xe   : > { %s11198_s21 = sshll.u32 %s16110_s16, 4  ;;  %236 = vperm.xlu0 %11221, %v222_v3   ;;  %226 = vperm.xlu1 %11222, %v220_v4   ;;  %s11420_s9 = smov 15   ;;  %v10366_v47 = vld [vmem:[%s14918_s3 + $0x30] sm:$0xff]  ;;  %v10365_v48 = vld [vmem:[%s14918_s3 + $0x28] sm:$0xff]  ;;  %v10364_v49 = vld [vmem:[%s14918_s3 + $0x20] sm:$0xff]  ;;  %v202_v51 = vand.u32 127, %v201_v50 }
   0xf   : > { %s192_s28 = scalar_lea.vmem %s14915_s0, %s11198_s21  ;;  %s11421_s10 = smov 1   ;;  %v395_v53 = vshrl.u32 %v201_v50, 7  ;;  %vm14923_vm4 = vmmov 1   ;;  %vm14921_vm11 = vcmask 130048   ;;  %v15224_v4 = vmov 0 }
  0x10   : > { %v11223_v8 = vld [vmem:[%s192_s28 + $0x4] ss:$8 sps:$4 sm:$0x1f]   ;;  %v11225_v9 = vld [vmem:[%s192_s28] ss:$8 sps:$4 sm:$0x1f]  }
  0x11   : > { %v277_v10 = vand.u32 %v11223_v8, %v272_v5  ;;  %v274_v13 = vand.u32 %v11225_v9, %v272_v5  ;;  %s11422_s11 = smov 127   ;;  %s11423_s12 = smov 113   ;;  %vm206_vm3 = vcmp.ge.s32.totalorder %v202_v51, 16  ;;  %v11614_v52 = vadd.s32 128, %v202_v51 }
  0x12   : > { %241 = vperm.xlu0 %11221, %v223_v6   ;;  %231 = vperm.xlu1 %11222, %v221_v7   ;;  %s11424_s13 = smov 112   ;;  %s11425_s14 = smov 111   ;;  %v204_v54 = vand.u32 15, %v202_v51  ;;  %vm438_vm5 = vmpackc.low %vm14923_vm4, %vm206_vm3  ;;  %v11619_v56 = vsub.s32 0, %v395_v53  ;;  %v11621_v57 = vsub.s32 4, %v395_v53  ;;  %v15227_v5 = vmov 0 }
  0x13   : > { %293 = vmatprep.subr.bf16.mxu0 %v277_v10  ;;  %11200 = vmatprep.subr.bf16.mxu1 %v277_v10  ;;  %v205_v55 = vand.u32 15, %v11614_v52  ;;  %v439_v59 = vsel %vm438_vm5, 65537, %v14946_v2  ;;  %vm14920_vm1 = vcmask 138240   ;;  %v15236_v50 = vmov 0  ;;  %s11199_s25 = sshll.u32 %s16110_s16, 6 }
  0x14   : > { %294 = vmatpush1.bf16.msra.mxu0 %v274_v13  ;;  %11201 = vmatpush1.bf16.msra.mxu1 %v274_v13  ;;  %vm11623_vm6 = vcmp.ge.s32.totalorder %v204_v54, 1  ;;  %v443_v61 = vrot.slane %v439_v59, %v11619_v56  ;;  %v447_v62 = vrot.slane %v439_v59, %v11621_v57  ;;  %vm11637_vm9 = vcmp.lt.s32.totalorder %v204_v54, 15  ;;  %s14890_s27 = scalar_lea.vmem %s14919_s4, %s11199_s25 }
  0x15   : > { %vm11628_vm7 = vcmp.ge.s32.totalorder %v205_v55, 1  ;;  %vm386_vm8 = vmand %vm206_vm3, %vm11623_vm6  ;;  %vm11643_vm12 = vcmp.lt.s32.totalorder %v205_v55, 15  ;;  %v15239_v51 = vmov 0 }
  0x16   : > { %vm392_vm10 = vmpackc.low %vm11628_vm7, %vm386_vm8  ;;  %vm11654_vm14 = vcmp.ne.s16.totalorder %v443_v61, 0  ;;  %vm11658_vm15 = vcmp.ne.s16.totalorder %v447_v62, 0  ;;  %vm14922_vm8 = vcmask 121856   ;;  %v11229_v62 = vld [vmem:[%s14917_s2 + $0x18] sm:$0xff]  }
  0x17   : > { %10278 = vmatmul.mubr.msk.bf16.vlgmr.msra.gmra.mxu0 %vm262_vm2, %v11226_v11  ;;  %10279 = vmatmul.mubr.msk.bf16.vlgmr.msra.gmra.mxu1 %vm262_vm2, %v11227_v12  ;;  %vm11650_vm13 = vmand %vm206_vm3, %vm11637_vm9  ;;  %v15225_v4 = vsel %vm11654_vm14, 4294967295, %v15224_v4  ;;  %v15228_v5 = vsel %vm11658_vm15, 4294967295, %v15227_v5  ;;  %v393_v7 = vsel %vm392_vm10, 65537, %v14946_v2  ;;  %vm14924_vm2 = vcmask 261120  }
  0x18   : > { %508 = vmatprep.mubr.bf16.mxu1 %v14946_v2  ;;  %577 = vmatprep.mubr.bf16.mxu0 %v14946_v2  ;;  %15226 = vst [vmem:[#allocation10_spill] sm:$0xff] %v15225_v4  ;;  %15229 = vst [vmem:[#allocation11_spill] sm:$0xff] %v15228_v5  ;;  %v397_v12 = vrot.slane %v393_v7, %v11619_v56  ;;  %v401_v13 = vrot.slane %v393_v7, %v11621_v57 }
  0x19   : > { %vm626_vm0 = vmpackc.low %vm11643_vm12, %vm11650_vm13 }
  0x1a   : > { %vm11685_vm3 = vcmp.ne.s16.totalorder %v397_v12, 0  ;;  %vm11689_vm5 = vcmp.ne.s16.totalorder %v401_v13, 0 }
  0x89   : > { %v227_v14 = vpop.permute.xlu1 %226  ;;  %v237_v15 = vpop.permute.xlu0 %236 }
  0x8d   : > { %v232_v18 = vpop.permute.xlu1 %231  ;;  %v242_v22 = vpop.permute.xlu0 %241 }
  0xd7   : > { %v313_v16 = vpop.f32.mrf.mxu0  ;;  %v323_v17 = vpop.f32.mrf.mxu1 }
  0xd8   : > { %v11490_v21 = vadd.f32 %v323_v17, %v237_v15  ;;  %v11492_v23 = vadd.f32 %v313_v16, %v227_v14 }
  0xd9   : > { %v315_v19 = vpop.f32.mrf.mxu0  ;;  %v325_v20 = vpop.f32.mrf.mxu1 }
  0xda   : > { %15206 = vst [vmem:[#allocation2_spill] sm:$0xff] %v11490_v21  ;;  %15207 = vst [vmem:[#allocation3_spill] sm:$0xff] %v11492_v23  ;;  %v11494_v26 = vadd.f32 %v325_v20, %v237_v15  ;;  %v14945_v31 = vmax.f32 %v11490_v21, 0.0  ;;  %v14941_v35 = vmax.f32 %v11492_v23, 0.0  ;;  %v11507_v36 = vadd.f32 %v315_v19, %v227_v14  ;;  %v11228_v20 = vld [vmem:[%s14917_s2 + $0x10] sm:$0xff]  }
  0xdb   : > { %v317_v24 = vpop.f32.mrf.mxu0  ;;  %v327_v25 = vpop.f32.mrf.mxu1  ;;  %v627_v15 = vsel %vm626_vm0, 65537, %v14946_v2  ;;  %vm750_vm0 = vmpackc.low %vm11628_vm7, %vm11623_vm6 }
  0xdc   : > { %15208 = vst [vmem:[#allocation4_spill] sm:$0xff] %v11494_v26  ;;  %v11496_v27 = vadd.f32 %v317_v24, %v232_v18  ;;  %v11498_v28 = vadd.f32 %v327_v25, %v242_v22  ;;  %15213 = vst [vmem:[#allocation9_spill] sm:$0xff] %v11507_v36  ;;  %v14943_v37 = vmax.f32 %v11494_v26, 0.0  ;;  %v14938_v43 = vmax.f32 %v11507_v36, 0.0 }
  0xdd   : > { %v319_v29 = vpop.f32.mrf.mxu0  ;;  %v329_v30 = vpop.f32.mrf.mxu1  ;;  %v15233_v24 = vmov 0  ;;  %v631_v25 = vrot.slane %v627_v15, %v11619_v56  ;;  %v751_v3 = vsel %vm750_vm0, 65537, %v14946_v2  ;;  %vm14925_vm0 = vcmp.lt.s32.totalorder %v11614_v52, 240 }
  0xde   : > { %15209 = vst [vmem:[#allocation5_spill] sm:$0xff] %v11496_v27  ;;  %15210 = vst [vmem:[#allocation6_spill] sm:$0xff] %v11498_v28  ;;  %v14942_v32 = vmax.f32 %v11498_v28, 0.0  ;;  %v11502_v33 = vadd.f32 %v319_v29, %v232_v18  ;;  %v11504_v34 = vadd.f32 %v329_v30, %v242_v22  ;;  %v14944_v38 = vmax.f32 %v11496_v27, 0.0 }
  0xdf   : > { %v15230_v22 = vmov 0  ;;  %v15234_v24 = vsel %vm11689_vm5, 4294967295, %v15233_v24  ;;  %v635_v29 = vrot.slane %v627_v15, %v11621_v57  ;;  %vm11702_vm10 = vcmp.ne.s16.totalorder %v631_v25, 0 }
  0xe0   : > { %15211 = vst [vmem:[#allocation7_spill] sm:$0xff] %v11502_v33  ;;  %15212 = vst [vmem:[#allocation8_spill] sm:$0xff] %v11504_v34  ;;  %v11515_v39 = vpack.c.bf16 %v14942_v32, %v14945_v31  ;;  %v14939_v40 = vmax.f32 %v11504_v34, 0.0  ;;  %v14940_v41 = vmax.f32 %v11502_v33, 0.0  ;;  %v11532_v44 = vpack.c.bf16 %v14944_v38, %v14941_v35 }
  0xe1   : > { %v15231_v22 = vsel %vm11685_vm3, 4294967295, %v15230_v22  ;;  %15235 = vst [vmem:[#allocation13_spill] sm:$0xff] %v15234_v24  ;;  %v15237_v50 = vsel %vm11702_vm10, 4294967295, %v15236_v50  ;;  %vm11706_vm13 = vcmp.ne.s16.totalorder %v635_v29, 0  ;;  %v759_v12 = vrot.slane %v751_v3, %v11621_v57 }
  0xe2   : > { %v11523_v42 = vpack.c.bf16 %v14939_v40, %v14943_v37  ;;  %418 = vrot.lane.b32.xlu1 %v11515_v39, %s11418_s7  ;;  %v11540_v45 = vpack.c.bf16 %v14940_v41, %v14938_v43  ;;  %15232 = vst [vmem:[#allocation12_spill] sm:$0xff] %v15231_v22  ;;  %15238 = vst [vmem:[#allocation14_spill] sm:$0xff] %v15237_v50  ;;  %v15240_v51 = vsel %vm11706_vm13, 4294967295, %v15239_v51  ;;  %v15247_v25 = vmov 0 }
  0xe3   : > { %15241 = vst [vmem:[#allocation15_spill] sm:$0xff] %v15240_v51 }
  0xe4   : > { %414 = vrot.lane.b32.xlu0 %v11523_v42, %s11418_s7 }
  0xe6   : > { %416 = vrot.lane.b32.xlu1 %v11532_v44, %s11418_s7 }
  0xe8   : > { %412 = vrot.lane.b32.xlu0 %v11540_v45, %s11418_s7 }
  0xea   : > { %370 = vrot.lane.b32.xlu1 %v11515_v39, %s11419_s8 }
  0xec   : > { %364 = vrot.lane.b32.xlu0 %v11523_v42, %s11419_s8 }
  0xee   : > { %604 = vrot.lane.b32.xlu1 %v11515_v39, %s11420_s9 }
  0xf0   : > { %600 = vrot.lane.b32.xlu0 %v11523_v42, %s11420_s9 }
  0xf2   : > { %368 = vrot.lane.b32.xlu1 %v11532_v44, %s11419_s8 }
  0xf4   : > { %362 = vrot.lane.b32.xlu0 %v11540_v45, %s11419_s8 }
  0xf6   : > { %602 = vrot.lane.b32.xlu1 %v11532_v44, %s11420_s9 }
  0xf8   : > { %598 = vrot.lane.b32.xlu0 %v11540_v45, %s11420_s9 }
  0xfa   : > { %730 = vrot.lane.b32.xlu1 %v11515_v39, %s11421_s10 }
  0xfc   : > { %726 = vrot.lane.b32.xlu0 %v11523_v42, %s11421_s10 }
  0xfe   : > { %728 = vrot.lane.b32.xlu1 %v11532_v44, %s11421_s10 }
 0x100   : > { %724 = vrot.lane.b32.xlu0 %v11540_v45, %s11421_s10 }
 0x102   : > { %936 = vrot.lane.b32.xlu1 %v11523_v42, %s11422_s11 }
 0x104   : > { %934 = vrot.lane.b32.xlu0 %v11515_v39, %s11422_s11 }
 0x106   : > { %1060 = vrot.lane.b32.xlu1 %v11523_v42, %s11423_s12 }
 0x108   : > { %1058 = vrot.lane.b32.xlu0 %v11515_v39, %s11423_s12 }
 0x10a   : > { %932 = vrot.lane.b32.xlu1 %v11540_v45, %s11422_s11 }
 0x10c   : > { %930 = vrot.lane.b32.xlu0 %v11532_v44, %s11422_s11 }
 0x10e   : > { %1056 = vrot.lane.b32.xlu1 %v11540_v45, %s11423_s12 }
 0x110   : > { %1054 = vrot.lane.b32.xlu0 %v11532_v44, %s11423_s12 }
 0x112   : > { %1186 = vrot.lane.b32.xlu1 %v11523_v42, %s11424_s13 }
 0x114   : > { %1184 = vrot.lane.b32.xlu0 %v11515_v39, %s11424_s13 }
 0x116   : > { %1310 = vrot.lane.b32.xlu1 %v11523_v42, %s11425_s14 }
 0x118   : > { %1308 = vrot.lane.b32.xlu0 %v11515_v39, %s11425_s14 }
 0x11a   : > { %1182 = vrot.lane.b32.xlu1 %v11540_v45, %s11424_s13 }
 0x11c   : > { %1180 = vrot.lane.b32.xlu0 %v11532_v44, %s11424_s13 }
 0x11e   : > { %1306 = vrot.lane.b32.xlu1 %v11540_v45, %s11425_s14 }
 0x120   : > { %1304 = vrot.lane.b32.xlu0 %v11532_v44, %s11425_s14 }
 0x122   : > { %1452 = vperm.xlu1 %11222, %v10367_v46  }
 0x124   : > { %1447 = vperm.xlu0 %11221, %v10366_v47  }
 0x126   : > { %1442 = vperm.xlu1 %11222, %v10365_v48  }
 0x128   : > { %1437 = vperm.xlu0 %11221, %v10364_v49  }
 0x154   : > { %v419_v0 = vpop.permute.xlu1 %418 }
 0x156   : > { %v415_v6 = vpop.permute.xlu0 %414 }
 0x157   : > { %v432_v8 = vsel %vm14921_vm11, %v415_v6, %v419_v0  ;;  %v422_v9 = vsel %vm14921_vm11, %v419_v0, %v415_v6 }
 0x158   : > { %10286 = vmatprep.subr.msk.bf16.mxu1 %vm11658_vm15, %v422_v9  ;;  %v417_v10 = vpop.permute.xlu1 %416  ;;  %v452_v11 = vsel %vm11654_vm14, %v432_v8, 0 }
 0x159   : > { %489 = vmatpush1.bf16.msra.mxu1 %v452_v11  ;;  %v755_v11 = vrot.slane %v751_v3, %v11619_v56 }
 0x15a   : > { %v413_v14 = vpop.permute.xlu0 %412 }
 0x15b   : > { %v428_v16 = vsel %vm14921_vm11, %v413_v14, %v417_v10  ;;  %v421_v17 = vsel %vm14921_vm11, %v417_v10, %v413_v14  ;;  %v11230_v10 = vld [vmem:[%s14917_s2] sm:$0xff]   ;;  %vm14926_vm11 = vcmask 7168   ;;  %vm11761_vm4 = vcmp.ne.s16.totalorder %v755_v11, 0 }
 0x15c   : > { %10287 = vmatprep.subr.msk.bf16.mxu1 %vm11658_vm15, %v421_v17  ;;  %v371_v18 = vpop.permute.xlu1 %370  ;;  %v450_v19 = vsel %vm11654_vm14, %v428_v16, 0  ;;  %v15258_v11 = vmov 0 }
 0x15d   : > { %491 = vmatpush1.bf16.msra.mxu1 %v450_v19  ;;  %v15268_v19 = vmov 0 }
 0x15e   : > { %v365_v30 = vpop.permute.xlu0 %364 }
 0x15f   : > { %v384_v46 = vsel %vm14920_vm1, %v365_v30, %v371_v18  ;;  %v374_v47 = vsel %vm14920_vm1, %v371_v18, %v365_v30  ;;  %v11231_v18 = vld [vmem:[%s14917_s2 + $0x20] sm:$0xff]  }
 0x160   : > { %10288 = vmatmul.mubr.msk.bf16.vlgmr.msra.gmra.mxu1 %vm14924_vm2, %v11228_v20  ;;  %10292 = vmatprep.subr.msk.bf16.mxu0 %vm11689_vm5, %v374_v47  ;;  %v605_v48 = vpop.permute.xlu1 %604  ;;  %v406_v49 = vsel %vm11685_vm3, %v384_v46, 0  ;;  %v15244_v20 = vmov 0 }
 0x161   : > { %558 = vmatpush1.bf16.msra.mxu0 %v406_v49  ;;  %518 = vmatprep.mubr.bf16.mxu1 %v14946_v2  ;;  %v15245_v20 = vsel %vm11761_vm4, 4294967295, %v15244_v20 }
 0x162   : > { %v601_v53 = vpop.permute.xlu0 %600  ;;  %15246 = vst [vmem:[#allocation16_spill] sm:$0xff] %v15245_v20 }
 0x163   : > { %v618_v54 = vsel %vm14922_vm8, %v601_v53, %v605_v48  ;;  %v608_v55 = vsel %vm14922_vm8, %v605_v48, %v601_v53  ;;  %v11232_v48 = vld [vmem:[%s14917_s2 + $0x8] sm:$0xff]  }
 0x164   : > { %10302 = vmatprep.subr.msk.bf16.mxu1 %vm11706_vm13, %v608_v55  ;;  %v369_v59 = vpop.permute.xlu1 %368  ;;  %v640_v61 = vsel %vm11702_vm10, %v618_v54, 0 }
 0x165   : > { %676 = vmatpush1.bf16.msra.mxu1 %v640_v61 }
 0x166   : > { %v363_v0 = vpop.permute.xlu0 %362 }
 0x167   : > { %v380_v6 = vsel %vm14920_vm1, %v363_v0, %v369_v59  ;;  %v373_v7 = vsel %vm14920_vm1, %v369_v59, %v363_v0  ;;  %vm956_vm1 = vmpackc.low %vm11643_vm12, %vm11637_vm9 }
 0x168   : > { %10289 = vmatmul.mubr.msk.bf16.gmra.mxu1 %vm14924_vm2, %v11229_v62  ;;  %10293 = vmatprep.subr.msk.bf16.mxu0 %vm11689_vm5, %v373_v7  ;;  %v603_v8 = vpop.permute.xlu1 %602  ;;  %v404_v9 = vsel %vm11685_vm3, %v380_v6, 0  ;;  %v957_v60 = vsel %vm956_vm1, 65537, %v14946_v2  ;;  %vm14931_vm1 = vcmask 1039360   ;;  %v15252_v62 = vmov 0 }
 0x169   : > { %560 = vmatpush1.bf16.msra.mxu0 %v404_v9  ;;  %695 = vmatprep.mubr.bf16.mxu1 %v14946_v2  ;;  %v965_v58 = vrot.slane %v957_v60, %v11621_v57  ;;  %v961_v61 = vrot.slane %v957_v60, %v11619_v56  ;;  %v15255_v9 = vmov 0 }
 0x16a   : > { %v599_v13 = vpop.permute.xlu0 %598 }
 0x16b   : > { %v614_v14 = vsel %vm14922_vm8, %v599_v13, %v603_v8  ;;  %v607_v15 = vsel %vm14922_vm8, %v603_v8, %v599_v13  ;;  %vm11757_vm8 = vmand %vm14925_vm0, %vm11628_vm7  ;;  %vm15250_vm0 = vcmask 261120  }
 0x16c   : > { %10294 = vmatmul.mubr.msk.bf16.vlgmr.msra.gmra.mxu0 %vm14924_vm2, %v11230_v10  ;;  %10303 = vmatprep.subr.msk.bf16.mxu1 %vm11706_vm13, %v607_v15  ;;  %v731_v16 = vpop.permute.xlu1 %730  ;;  %v638_v17 = vsel %vm11702_vm10, %v614_v14, 0  ;;  %vm11765_vm2 = vcmp.ne.s16.totalorder %v759_v12, 0  ;;  %vm1082_vm7 = vmpackc.low %vm11757_vm8, %vm11623_vm6  ;;  %vm11803_vm8 = vcmp.ne.s16.totalorder %v965_v58, 0 }
 0x16d   : > { %678 = vmatpush1.bf16.msra.mxu1 %v638_v17  ;;  %v15248_v25 = vsel %vm11765_vm2, 4294967295, %v15247_v25  ;;  %587 = vmatprep.mubr.bf16.mxu0 %v14946_v2  ;;  %v1083_v53 = vsel %vm1082_vm7, 65537, %v14946_v2  ;;  %vm15251_vm6 = vmmov %vm15250_vm0  ;;  %v15253_v62 = vsel %vm11803_vm8, 4294967295, %v15252_v62  ;;  %vm14932_vm7 = vcmask 924672  }
 0x16e   : > { %15249 = vst [vmem:[#allocation17_spill] sm:$0xff] %v15248_v25  ;;  %v727_v29 = vpop.permute.xlu0 %726  ;;  %881 = vmatprep.subr.bf16.mxu1 %v11523_v42  ;;  %15254 = vst [vmem:[#allocation18_spill] sm:$0xff] %v15253_v62  ;;  %v1091_v0 = vrot.slane %v1083_v53, %v11621_v57  ;;  %v1087_v10 = vrot.slane %v1083_v53, %v11619_v56  ;;  %v15288_v17 = vmov 0 }
 0x16f   : > { %v744_v30 = vsel %vm14926_vm11, %v727_v29, %v731_v16  ;;  %v734_v46 = vsel %vm14926_vm11, %v731_v16, %v727_v29  ;;  %v11235_v16 = vld [vmem:[%s14917_s2 + $0x40] sm:$0xff]  }
 0x170   : > { %10304 = vmatmul.mubr.msk.bf16.vlgmr.msra.gmra.mxu1 %vm15250_vm0, %v11231_v18  ;;  %10312 = vmatprep.subr.msk.bf16.mxu0 %vm11765_vm2, %v734_v46  ;;  %v729_v47 = vpop.permute.xlu1 %728  ;;  %v764_v42 = vsel %vm11761_vm4, %v744_v30, 0 }
 0x171   : > { %800 = vmatpush1.bf16.msra.mxu0 %v764_v42  ;;  %882 = vmatpush1.bf16.msra.mxu1 %v11515_v39  ;;  %v11236_v42 = vld [vmem:[%s14917_s2 + $0x38] sm:$0xff]  }
 0x172   : > { %v725_v49 = vpop.permute.xlu0 %724  ;;  %883 = vmatprep.subr.bf16.mxu1 %v11540_v45  ;;  %705 = vmatprep.mubr.bf16.mxu1 %v14946_v2  ;;  %v11233_v45 = vld [vmem:[%s14917_s2 + $0x28] sm:$0xff]  }
 0x173   : > { %v740_v54 = vsel %vm14926_vm11, %v725_v49, %v729_v47  ;;  %v733_v55 = vsel %vm14926_vm11, %v729_v47, %v725_v49  ;;  %vm11822_vm11 = vcmp.ne.s16.totalorder %v1091_v0, 0 }
 0x174   : > { %10295 = vmatmul.mubr.msk.bf16.gmra.mxu0 %vm15251_vm6, %v11232_v48  ;;  %10313 = vmatprep.subr.msk.bf16.mxu0 %vm11765_vm2, %v733_v55  ;;  %v937_v59 = vpop.permute.xlu1 %936  ;;  %v762_v39 = vsel %vm11761_vm4, %v740_v54, 0  ;;  %vm11817_vm6 = vcmp.ne.s16.totalorder %v961_v61, 0  ;;  %v15259_v11 = vsel %vm11822_vm11, 4294967295, %v15258_v11  ;;  %vm15262_vm4 = vcmp.lt.s32.totalorder %v11614_v52, 240 }
 0x175   : > { %802 = vmatpush1.bf16.msra.mxu0 %v762_v39  ;;  %884 = vmatpush1.bf16.msra.mxu1 %v11532_v44  ;;  %v11234_v44 = vld [vmem:[%s14917_s2 + $0x30] sm:$0xff]   ;;  %v15256_v9 = vsel %vm11817_vm6, 4294967295, %v15255_v9  ;;  %15260 = vst [vmem:[#allocation20_spill] sm:$0xff] %v15259_v11 }
 0x176   : > { %v935_v3 = vpop.permute.xlu0 %934  ;;  %819 = vmatprep.mubr.bf16.mxu0 %v14946_v2  ;;  %15257 = vst [vmem:[#allocation19_spill] sm:$0xff] %v15256_v9 }
 0x177   : > { %v950_v6 = vsel %vm14931_vm1, %v937_v59, %v935_v3  ;;  %v940_v8 = vsel %vm14931_vm1, %v935_v3, %v937_v59  ;;  %vm15263_vm1 = vcmask 261120   ;;  %v11237_v59 = vld [vmem:[%s14917_s2 + $0x48] sm:$0xff]  }
 0x178   : > { %10305 = vmatmul.mubr.msk.bf16.gmra.mxu1 %vm15250_vm0, %v11233_v45  ;;  %10330 = vmatprep.subr.msk.bf16.mxu0 %vm11803_vm8, %v950_v6  ;;  %v1061_v7 = vpop.permute.xlu1 %1060  ;;  %vm15261_vm0 = vmmov 1   ;;  %v970_v14 = vsel %vm11817_vm6, %v940_v8, 0  ;;  %v15277_v45 = vmov 0  ;;  %v15281_v8 = vmov 0 }
 0x179   : > { %901 = vmatprep.mubr.bf16.mxu1 %v14946_v2  ;;  %vm1206_vm2 = vmpackc.low %vm15262_vm4, %vm15261_vm0  ;;  %vm15271_vm0 = vcmask 1039360  }
 0x17a   : > { %v1059_v12 = vpop.permute.xlu0 %1058  ;;  %v1207_v60 = vsel %vm1206_vm2, 65537, %v14946_v2  ;;  %vm15272_vm13 = vmmov %vm15271_vm0 }
 0x17b   : > { %v1074_v13 = vsel %vm14932_vm7, %v1061_v7, %v1059_v12  ;;  %vm15264_vm7 = vmmov %vm15262_vm4  ;;  %vm15267_vm4 = vcmask 924672   ;;  %v1215_v63 = vrot.slane %v1207_v60, %v11621_v57  ;;  %v1211_v39 = vrot.slane %v1207_v60, %v11619_v56 }
 0x17c   : > { %10314 = vmatmul.mubr.msk.bf16.vlgmr.msra.gmra.mxu0 %vm15263_vm1, %v11234_v44  ;;  %10340 = vmatprep.subr.msk.bf16.mxu1 %vm11822_vm11, %v1074_v13  ;;  %v933_v15 = vpop.permute.xlu1 %932  ;;  %vm11843_vm10 = vmand %vm15264_vm7, %vm11643_vm12  ;;  %v1064_v18 = vsel %vm15267_vm4, %v1059_v12, %v1061_v7  ;;  %vm11848_vm1 = vcmp.ne.s16.totalorder %v1087_v10, 0  ;;  %vm15273_vm7 = vcmask 261120   ;;  %v11238_v7 = vld [vmem:[%s14917_s2 + $0x50] sm:$0xff]   ;;  %v15284_v10 = vmov 0 }
 0x17d   : > { %1006 = vmatpush1.bf16.msra.mxu0 %v970_v14  ;;  %v15269_v19 = vsel %vm11848_vm1, 4294967295, %v15268_v19  ;;  %829 = vmatprep.mubr.bf16.mxu0 %v14946_v2  ;;  %vm1332_vm12 = vmpackc.low %vm11843_vm10, %vm11637_vm9  ;;  %v1096_v30 = vsel %vm11848_vm1, %v1064_v18, 0 }
 0x17e   : > { %15270 = vst [vmem:[#allocation21_spill] sm:$0xff] %v15269_v19  ;;  %v931_v29 = vpop.permute.xlu0 %930  ;;  %v1333_v58 = vsel %vm1332_vm12, 65537, %v14946_v2  ;;  %vm15274_vm9 = vmmov %vm15267_vm4  ;;  %vm14937_vm12 = vcmask 908288  }
 0x17f   : > { %v939_v1 = vsel %vm15271_vm0, %v931_v29, %v933_v15  ;;  %v946_v52 = vsel %vm15272_vm13, %v933_v15, %v931_v29  ;;  %vm15275_vm2 = vmmov %vm15267_vm4  ;;  %vm14988_vm13 = vcmask 916480   ;;  %vm11884_vm4 = vcmp.ne.s16.totalorder %v1215_v63, 0 }
 0x180   : > { %10322 = vmatmul.mubr.msk.bf16.vlgmr.msra.gmra.mxu1 %vm15273_vm7, %v11235_v16  ;;  %10331 = vmatprep.subr.msk.bf16.mxu0 %vm11803_vm8, %v946_v52  ;;  %v1057_v46 = vpop.permute.xlu1 %1056  ;;  %v968_v47 = vsel %vm11817_vm6, %v939_v1, 0  ;;  %vm15276_vm10 = vmmov %vm15273_vm7  ;;  %v15278_v45 = vsel %vm11884_vm4, 4294967295, %v15277_v45  ;;  %v1341_v61 = vrot.slane %v1333_v58, %v11621_v57  ;;  %v1337_v57 = vrot.slane %v1333_v58, %v11619_v56  ;;  %v11239_v56 = vld [vmem:[%s14917_s2 + $0x60] sm:$0xff]   ;;  %v11241_v58 = vld [vmem:[%s14917_s2 + $0x68] sm:$0xff]  }
 0x181   : > { %1132 = vmatpush1.bf16.msra.mxu1 %v1096_v30  ;;  %1008 = vmatpush1.bf16.msra.mxu0 %v968_v47  ;;  %15279 = vst [vmem:[#allocation22_spill] sm:$0xff] %v15278_v45  ;;  %vm15280_vm0 = vmmov %vm15273_vm7  ;;  %vm11898_vm7 = vcmp.ne.s16.totalorder %v1211_v39, 0  ;;  %v11240_v30 = vld [vmem:[%s14917_s2 + $0x58] sm:$0xff]  }
 0x182   : > { %v1055_v48 = vpop.permute.xlu0 %1054  ;;  %911 = vmatprep.mubr.bf16.mxu1 %v14946_v2  ;;  %v15282_v8 = vsel %vm11898_vm7, 4294967295, %v15281_v8 }
 0x183   : > { %v1063_v49 = vsel %vm15274_vm9, %v1055_v48, %v1057_v46  ;;  %v1070_v53 = vsel %vm15275_vm2, %v1057_v46, %v1055_v48  ;;  %15283 = vst [vmem:[#allocation23_spill] sm:$0xff] %v15282_v8  ;;  %vm11903_vm9 = vcmp.ne.s16.totalorder %v1341_v61, 0  ;;  %vm15287_vm2 = vmmov %vm15280_vm0 }
 0x184   : > { %10315 = vmatmul.mubr.msk.bf16.gmra.mxu0 %vm15276_vm10, %v11236_v42  ;;  %10341 = vmatprep.subr.msk.bf16.mxu1 %vm11822_vm11, %v1070_v53  ;;  %v1187_v54 = vpop.permute.xlu1 %1186  ;;  %v1094_v55 = vsel %vm11848_vm1, %v1063_v49, 0  ;;  %v15285_v10 = vsel %vm11903_vm9, 4294967295, %v15284_v10  ;;  %vm11918_vm10 = vcmp.ne.s16.totalorder %v1337_v57, 0  ;;  %v11242_v49 = vld [vmem:[%s14917_s2 + $0x70] sm:$0xff]   ;;  %v11243_v53 = vld [vmem:[%s14917_s2 + $0x80] sm:$0xff]  }
 0x185   : > { %1134 = vmatpush1.bf16.msra.mxu1 %v1094_v55  ;;  %1025 = vmatprep.mubr.bf16.mxu0 %v14946_v2  ;;  %15286 = vst [vmem:[#allocation24_spill] sm:$0xff] %v15285_v10  ;;  %v15289_v17 = vsel %vm11918_vm10, 4294967295, %v15288_v17  ;;  %v11245_v55 = vld [vmem:[%s14917_s2 + $0x88] sm:$0xff]  }
 0x186   : > { %v1185_v0 = vpop.permute.xlu0 %1184  ;;  %15290 = vst [vmem:[#allocation25_spill] sm:$0xff] %v15289_v17 }
 0x187   : > { %v1200_v3 = vsel %vm14988_vm13, %v1187_v54, %v1185_v0  ;;  %v1190_v44 = vsel %vm14988_vm13, %v1185_v0, %v1187_v54  ;;  %v11244_v54 = vld [vmem:[%s14917_s2 + $0x78] sm:$0xff]  }
 0x188   : > { %10323 = vmatmul.mubr.msk.bf16.gmra.mxu1 %vm15280_vm0, %v11237_v59  ;;  %10350 = vmatprep.subr.msk.bf16.mxu0 %vm11884_vm4, %v1200_v3  ;;  %v1311_v6 = vpop.permute.xlu1 %1310  ;;  %v1220_v14 = vsel %vm11898_vm7, %v1190_v44, 0 }
 0x189   : > { %1151 = vmatprep.mubr.bf16.mxu1 %v14946_v2 }
 0x18a   : > { %v1309_v12 = vpop.permute.xlu0 %1308 }
 0x18b   : > { %v1324_v13 = vsel %vm14937_vm12, %v1311_v6, %v1309_v12  ;;  %v1314_v16 = vsel %vm14937_vm12, %v1309_v12, %v1311_v6 }
 0x18c   : > { %10332 = vmatmul.mubr.msk.bf16.vlgmr.msra.gmra.mxu0 %vm15287_vm2, %v11238_v7  ;;  %10360 = vmatprep.subr.msk.bf16.mxu1 %vm11903_vm9, %v1324_v13  ;;  %v1183_v15 = vpop.permute.xlu1 %1182  ;;  %v1346_v1 = vsel %vm11918_vm10, %v1314_v16, 0  ;;  %vm15291_vm2 = vmmov %vm15280_vm0 }
 0x18d   : > { %1256 = vmatpush1.bf16.msra.mxu0 %v1220_v14  ;;  %1035 = vmatprep.mubr.bf16.mxu0 %v14946_v2 }
 0x18e   : > { %v1181_v18 = vpop.permute.xlu0 %1180 }
 0x18f   : > { %v1189_v29 = vsel %vm14988_vm13, %v1181_v18, %v1183_v15  ;;  %v1196_v60 = vsel %vm14988_vm13, %v1183_v15, %v1181_v18 }
 0x190   : > { %10342 = vmatmul.mubr.msk.bf16.vlgmr.msra.gmra.mxu1 %vm15280_vm0, %v11239_v56  ;;  %10351 = vmatprep.subr.msk.bf16.mxu0 %vm11884_vm4, %v1196_v60  ;;  %v1218_v52 = vsel %vm11898_vm7, %v1189_v29, 0  ;;  %v1307_v46 = vpop.permute.xlu1 %1306 }
 0x191   : > { %1382 = vmatpush1.bf16.msra.mxu1 %v1346_v1  ;;  %1258 = vmatpush1.bf16.msra.mxu0 %v1218_v52 }
 0x192   : > { %v1305_v47 = vpop.permute.xlu0 %1304  ;;  %1161 = vmatprep.mubr.bf16.mxu1 %v14946_v2 }
 0x193   : > { %v1313_v42 = vsel %vm14937_vm12, %v1305_v47, %v1307_v46  ;;  %v1320_v63 = vsel %vm14937_vm12, %v1307_v46, %v1305_v47  ;;  %vm15293_vm12 = vmmov %vm15280_vm0 }
 0x194   : > { %10333 = vmatmul.mubr.msk.bf16.gmra.mxu0 %vm15291_vm2, %v11240_v30  ;;  %10361 = vmatprep.subr.msk.bf16.mxu1 %vm11903_vm9, %v1320_v63  ;;  %v1344_v48 = vsel %vm11918_vm10, %v1313_v42, 0  ;;  %vm15292_vm2 = vmmov %vm15280_vm0 }
 0x195   : > { %1384 = vmatpush1.bf16.msra.mxu1 %v1344_v48  ;;  %1275 = vmatprep.mubr.bf16.mxu0 %v14946_v2 }
 0x198   : > { %10343 = vmatmul.mubr.msk.bf16.gmra.mxu1 %vm15280_vm0, %v11241_v58 }
 0x199   : > { %1401 = vmatprep.mubr.bf16.mxu1 %v14946_v2 }
 0x19c   : > { %10352 = vmatmul.mubr.msk.bf16.vlgmr.msra.gmra.mxu0 %vm15292_vm2, %v11242_v49  ;;  %vm15294_vm2 = vmmov %vm15280_vm0 }
 0x19d   : > { %1285 = vmatprep.mubr.bf16.mxu0 %v14946_v2 }
 0x1a0   : > { %10362 = vmatmul.mubr.msk.bf16.vlgmr.msra.gmra.mxu1 %vm15293_vm12, %v11243_v53  ;;  %vm15311_vm12 = vcmask 130048  }
 0x1a1   : > { %1411 = vmatprep.mubr.bf16.mxu1 %v14946_v2 }
 0x1a4   : > { %10353 = vmatmul.mubr.msk.bf16.gmra.mxu0 %vm15280_vm0, %v11244_v54  ;;  %vm15312_vm0 = vmmov %vm15311_vm12 }
 0x1a5   : > { %1585 = vmatprep.mubr.bf16.mxu0 %v14946_v2  ;;  %vm15316_vm13 = vmmov %vm15312_vm0 }
 0x1a8   : > { %10363 = vmatmul.mubr.msk.bf16.gmra.mxu1 %vm15294_vm2, %v11245_v55  ;;  %vm15315_vm2 = vmmov %vm15312_vm0 }
 0x1a9   : > { %1654 = vmatprep.mubr.bf16.mxu1 %v14946_v2 }
 0x220   : > { %v510_v59 = vpop.f32.mrf.mxu1 }
 0x222   : > { %v11969_v39 = vpop.f32.mrf.mxu1 }
 0x224   : > { %v514_v61 = vpop.f32.mrf.mxu1 }
 0x226   : > { %v516_v0 = vpop.f32.mrf.mxu1 }
 0x228   : > { %v520_v3 = vpop.f32.mrf.mxu1 }
 0x22a   : > { %v522_v6 = vpop.f32.mrf.mxu1 }
 0x22c   : > { %v524_v7 = vpop.f32.mrf.mxu1  ;;  %v579_v44 = vpop.f32.mrf.mxu0 }
 0x22d   : > { %v580_v51 = vadd.f32 %v579_v44, %v510_v59 }
 0x22e   : > { %v11971_v57 = vpop.f32.mrf.mxu1  ;;  %v581_v12 = vpop.f32.mrf.mxu0 }
 0x230   : > { %v583_v13 = vpop.f32.mrf.mxu0  ;;  %v697_v14 = vpop.f32.mrf.mxu1 }
 0x231   : > { %v584_v25 = vadd.f32 %v583_v13, %v514_v61 }
 0x232   : > { %v585_v15 = vpop.f32.mrf.mxu0  ;;  %v11973_v56 = vpop.f32.mrf.mxu1 }
 0x233   : > { %15295 = vst [vmem:[#allocation26_spill] sm:$0xff] %v11973_v56  ;;  %v586_v22 = vadd.f32 %v585_v15, %v516_v0 }
 0x234   : > { %v589_v16 = vpop.f32.mrf.mxu0  ;;  %v701_v18 = vpop.f32.mrf.mxu1 }
 0x235   : > { %v590_v9 = vadd.f32 %v589_v16, %v520_v3 }
 0x236   : > { %v591_v29 = vpop.f32.mrf.mxu0  ;;  %v703_v60 = vpop.f32.mrf.mxu1 }
 0x237   : > { %v592_v24 = vadd.f32 %v591_v29, %v522_v6 }
 0x238   : > { %v593_v1 = vpop.f32.mrf.mxu0  ;;  %v707_v52 = vpop.f32.mrf.mxu1 }
 0x239   : > { %v720_v50 = vadd.f32 %v707_v52, %v590_v9 }
 0x23a   : > { %v595_v30 = vpop.f32.mrf.mxu0  ;;  %v709_v46 = vpop.f32.mrf.mxu1  ;;  %v15303_v0 = vld [vmem:[#allocation26_spill] sm:$0xff] }
 0x23b   : > { %v721_v56 = vadd.f32 %v709_v46, %v592_v24 }
 0x23c   : > { %v711_v47 = vpop.f32.mrf.mxu1  ;;  %v821_v42 = vpop.f32.mrf.mxu0 }
 0x23e   : > { %v713_v63 = vpop.f32.mrf.mxu1  ;;  %v823_v48 = vpop.f32.mrf.mxu0 }
 0x240   : > { %v825_v58 = vpop.f32.mrf.mxu0  ;;  %v903_v49 = vpop.f32.mrf.mxu1 }
 0x242   : > { %v827_v53 = vpop.f32.mrf.mxu0  ;;  %v11975_v54 = vpop.f32.mrf.mxu1 }
 0x243   : > { %15296 = vst [vmem:[#allocation27_spill] sm:$0xff] %v11975_v54  ;;  %v716_v54 = vadd.f32 %v697_v14, %v580_v51 }
 0x244   : > { %v831_v55 = vpop.f32.mrf.mxu0  ;;  %v907_v43 = vpop.f32.mrf.mxu1 }
 0x245   : > { %v840_v44 = vadd.f32 %v821_v42, %v716_v54 }
 0x246   : > { %v833_v40 = vpop.f32.mrf.mxu0  ;;  %v909_v41 = vpop.f32.mrf.mxu1 }
 0x247   : > { %v845_v15 = vadd.f32 %v833_v40, %v721_v56  ;;  %v922_v24 = vadd.f32 %v903_v49, %v840_v44 }
 0x248   : > { %v835_v35 = vpop.f32.mrf.mxu0  ;;  %v913_v32 = vpop.f32.mrf.mxu1 }
 0x24a   : > { %v837_v37 = vpop.f32.mrf.mxu0  ;;  %v915_v38 = vpop.f32.mrf.mxu1 }
 0x24b   : > { %v927_v14 = vadd.f32 %v915_v38, %v845_v15 }
 0x24c   : > { %v917_v31 = vpop.f32.mrf.mxu1  ;;  %v1027_v2 = vpop.f32.mrf.mxu0 }
 0x24e   : > { %v11977_v36 = vpop.f32.mrf.mxu1  ;;  %v11979_v34 = vpop.f32.mrf.mxu0 }
 0x24f   : > { %15297 = vst [vmem:[#allocation28_spill] sm:$0xff] %v11977_v36  ;;  %15298 = vst [vmem:[#allocation29_spill] sm:$0xff] %v11979_v34  ;;  %v844_v34 = vadd.f32 %v831_v55, %v720_v50  ;;  %v582_v36 = vadd.f32 %v581_v12, %v11969_v39 }
 0x250   : > { %v1031_v33 = vpop.f32.mrf.mxu0  ;;  %v11981_v23 = vpop.f32.mrf.mxu1 }
 0x251   : > { %15299 = vst [vmem:[#allocation30_spill] sm:$0xff] %v11981_v23  ;;  %v594_v23 = vadd.f32 %v593_v1, %v524_v7  ;;  %v926_v59 = vadd.f32 %v913_v32, %v844_v34  ;;  %v717_v6 = vadd.f32 %v15303_v0, %v582_v36  ;;  %v15304_v36 = vld [vmem:[#allocation27_spill] sm:$0xff] }
 0x252   : > { %v1033_v28 = vpop.f32.mrf.mxu0  ;;  %v11983_v26 = vpop.f32.mrf.mxu1 }
 0x253   : > { %15300 = vst [vmem:[#allocation31_spill] sm:$0xff] %v11983_v26  ;;  %v718_v26 = vadd.f32 %v701_v18, %v584_v25  ;;  %v722_v61 = vadd.f32 %v711_v47, %v594_v23 }
 0x254   : > { %v1037_v27 = vpop.f32.mrf.mxu0  ;;  %v1157_v21 = vpop.f32.mrf.mxu1 }
 0x255   : > { %v842_v9 = vadd.f32 %v825_v58, %v718_v26  ;;  %v846_v39 = vadd.f32 %v835_v35, %v722_v61  ;;  %v1050_v51 = vadd.f32 %v1037_v27, %v926_v59 }
 0x256   : > { %v1039_v17 = vpop.f32.mrf.mxu0  ;;  %v1159_v10 = vpop.f32.mrf.mxu1  ;;  %v15305_v35 = vld [vmem:[#allocation28_spill] sm:$0xff]  ;;  %v15306_v38 = vld [vmem:[#allocation29_spill] sm:$0xff] }
 0x257   : > { %v924_v18 = vadd.f32 %v907_v43, %v842_v9  ;;  %v928_v26 = vadd.f32 %v917_v31, %v846_v39  ;;  %v1051_v56 = vadd.f32 %v1039_v17, %v927_v14  ;;  %v1453_v43 = vpop.permute.xlu1 %1452 }
 0x258   : > { %v1041_v8 = vpop.f32.mrf.mxu0  ;;  %v1163_v45 = vpop.f32.mrf.mxu1  ;;  %v15307_v47 = vld [vmem:[#allocation30_spill] sm:$0xff] }
 0x259   : > { %v1048_v32 = vadd.f32 %v1031_v33, %v924_v18  ;;  %v1176_v34 = vadd.f32 %v1163_v45, %v1050_v51 }
 0x25a   : > { %v11985_v19 = vpop.f32.mrf.mxu0  ;;  %v1165_v11 = vpop.f32.mrf.mxu1  ;;  %v15309_v49 = vld [vmem:[#allocation31_spill] sm:$0xff] }
 0x25b   : > { %15301 = vst [vmem:[#allocation32_spill] sm:$0xff] %v11985_v19  ;;  %v719_v19 = vadd.f32 %v703_v60, %v586_v22  ;;  %v841_v22 = vadd.f32 %v823_v48, %v717_v6  ;;  %v1174_v52 = vadd.f32 %v1157_v21, %v1048_v32  ;;  %v1177_v33 = vadd.f32 %v1165_v11, %v1051_v56  ;;  %v1443_v18 = vpop.permute.xlu1 %1442 }
 0x25c   : > { %v1167_v62 = vpop.f32.mrf.mxu1  ;;  %v11987_v20 = vpop.f32.mrf.mxu0 }
 0x25d   : > { %15302 = vst [vmem:[#allocation33_spill] sm:$0xff] %v11987_v20  ;;  %v596_v20 = vadd.f32 %v595_v30, %v11971_v57  ;;  %v843_v13 = vadd.f32 %v827_v53, %v719_v19  ;;  %v923_v60 = vadd.f32 %v15304_v36, %v841_v22  ;;  %v1046_v19 = vadd.f32 %v1027_v2, %v922_v24 }
 0x25e   : > { %v1169_v4 = vpop.f32.mrf.mxu1  ;;  %v11989_v5 = vpop.f32.mrf.mxu0  ;;  %v1052_v30 = vadd.f32 %v1041_v8, %v928_v26 }
 0x25f   : > { %v723_v50 = vadd.f32 %v713_v63, %v596_v20  ;;  %v925_v12 = vadd.f32 %v909_v41, %v843_v13  ;;  %v1047_v46 = vadd.f32 %v15306_v38, %v923_v60  ;;  %v1448_v63 = vpop.permute.xlu0 %1447 }
 0x260   : > { %v1281_v3 = vpop.f32.mrf.mxu0  ;;  %v1403_v16 = vpop.f32.mrf.mxu1  ;;  %v1178_v17 = vadd.f32 %v1167_v62, %v1052_v30 }
 0x261   : > { %v847_v23 = vadd.f32 %v837_v37, %v723_v50  ;;  %v1049_v40 = vadd.f32 %v1033_v28, %v925_v12  ;;  %v1172_v37 = vadd.f32 %v15307_v47, %v1046_v19  ;;  %v1298_v48 = vadd.f32 %v1281_v3, %v1174_v52 }
 0x262   : > { %v1283_v25 = vpop.f32.mrf.mxu0  ;;  %v1405_v7 = vpop.f32.mrf.mxu1  ;;  %v15308_v2 = vld [vmem:[#allocation32_spill] sm:$0xff]  ;;  %v1173_v53 = vadd.f32 %v15309_v49, %v1047_v46 }
 0x263   : > { %v929_v27 = vadd.f32 %v15305_v35, %v847_v23  ;;  %v1175_v31 = vadd.f32 %v1159_v10, %v1049_v40  ;;  %v1438_v22 = vpop.permute.xlu0 %1437  ;;  %v10457_v35 = vld [vmem:[%s14918_s3 + $0x48] sm:$0xff] }
 0x264   : > { %v1287_v29 = vpop.f32.mrf.mxu0  ;;  %v1407_v57 = vpop.f32.mrf.mxu1  ;;  %v15310_v54 = vld [vmem:[#allocation33_spill] sm:$0xff]  ;;  %v1297_v11 = vadd.f32 %v11989_v5, %v1173_v53 }
 0x265   : > { %v1300_v41 = vadd.f32 %v1287_v29, %v1176_v34  ;;  %v1053_v28 = vadd.f32 %v15308_v2, %v929_v27  ;;  %v1296_v21 = vadd.f32 %v15310_v54, %v1172_v37  ;;  %v1299_v59 = vadd.f32 %v1283_v25, %v1175_v31  ;;  %v10456_v27 = vld [vmem:[%s14918_s3 + $0x40] sm:$0xff] }
 0x266   : > { %v1289_v1 = vpop.f32.mrf.mxu0  ;;  %v1409_v20 = vpop.f32.mrf.mxu1  ;;  %v1424_v0 = vadd.f32 %v1407_v57, %v1298_v48  ;;  %v1423_v39 = vadd.f32 %v1405_v7, %v1297_v11 }
 0x267   : > { %v1301_v8 = vadd.f32 %v1289_v1, %v1177_v33  ;;  %v1179_v9 = vadd.f32 %v1169_v4, %v1053_v28  ;;  %v1422_v6 = vadd.f32 %v1403_v16, %v1296_v21  ;;  %v1425_v15 = vadd.f32 %v1409_v20, %v1299_v59  ;;  %v10459_v20 = vld [vmem:[%s14918_s3 + $0x58] sm:$0xff]  ;;  %v11246_v28 = vld [vmem:[%s14917_s2 + $0xa0] sm:$0xff]  }
 0x268   : > { %v1291_v45 = vpop.f32.mrf.mxu0  ;;  %v1413_v42 = vpop.f32.mrf.mxu1  ;;  %v1457_v24 = vadd.f32 %v1443_v18, %v1424_v0  ;;  %v1456_v16 = vadd.f32 %v1438_v22, %v1423_v39 }
 0x269   : > { %v1426_v58 = vadd.f32 %v1413_v42, %v1300_v41  ;;  %v1302_v10 = vadd.f32 %v1291_v45, %v1178_v17  ;;  %v1455_v25 = vadd.f32 %v1438_v22, %v1422_v6  ;;  %v1458_v29 = vadd.f32 %v1443_v18, %v1425_v15 }
 0x26a   : > { %v1293_v55 = vpop.f32.mrf.mxu0  ;;  %v1415_v61 = vpop.f32.mrf.mxu1  ;;  %v1465_v26 = vmax.f32 %v1457_v24, 0.0  ;;  %v1464_v40 = vmax.f32 %v1456_v16, 0.0  ;;  %v11250_v16 = vld [vmem:[%s14917_s2 + $0x98] sm:$0xff]  }
 0x26b   : > { %v1427_v44 = vadd.f32 %v1415_v61, %v1301_v8  ;;  %v1459_v62 = vadd.f32 %v1448_v63, %v1426_v58  ;;  %v1303_v3 = vadd.f32 %v1293_v55, %v1179_v9  ;;  %v1463_v60 = vmax.f32 %v1455_v25, 0.0  ;;  %v11247_v9 = vld [vmem:[%s14917_s2 + $0xa8] sm:$0xff]  }
 0x26c   : > { %v1417_v13 = vpop.f32.mrf.mxu1  ;;  %v1466_v19 = vmax.f32 %v1458_v29, 0.0  ;;  %v15318_v58 = vmov 0   ;;  %v15338_v29 = vld [vmem:[#allocation17_spill] sm:$0xff] }
 0x26d   : > { %v1428_v50 = vadd.f32 %v1417_v13, %v1302_v10  ;;  %v1460_v12 = vadd.f32 %v1448_v63, %v1427_v44  ;;  %v1467_v57 = vmax.f32 %v1459_v62, 0.0  ;;  %v12008_v56 = vpack.c.bf16 %v1465_v26, %v1463_v60  ;;  %v15328_v44 = vld [vmem:[#allocation15_spill] sm:$0xff]  ;;  %v15330_v62 = vld [vmem:[#allocation14_spill] sm:$0xff] }
 0x26e   : > { %v1419_v51 = vpop.f32.mrf.mxu1  ;;  %v12012_v1 = vpack.c.bf16 %v1466_v19, %v1464_v40 }
 0x26f   : > { %v1461_v14 = vadd.f32 %v1453_v43, %v1428_v50  ;;  %v1429_v4 = vadd.f32 %v1419_v51, %v1303_v3  ;;  %v1468_v32 = vmax.f32 %v1460_v12, 0.0  ;;  %v11248_v50 = vld [vmem:[%s14917_s2 + $0x90] sm:$0xff]  }
 0x270   : > { %v11249_v12 = vld [vmem:[%s14917_s2 + $0xb0] sm:$0xff]  }
 0x271   : > { %v1469_v23 = vmax.f32 %v1461_v14, 0.0  ;;  %v1462_v5 = vadd.f32 %v1453_v43, %v1429_v4  ;;  %v10458_v43 = vld [vmem:[%s14918_s3 + $0x50] sm:$0xff] }
 0x273   : > { %v12002_v34 = vpack.c.bf16 %v1469_v23, %v1467_v57  ;;  %v1470_v36 = vmax.f32 %v1462_v5, 0.0  ;;  %v15340_v23 = vld [vmem:[#allocation16_spill] sm:$0xff] }
 0x275   : > { %v12004_v7 = vpack.c.bf16 %v1470_v36, %v1468_v32  ;;  %1514 = vrot.lane.b32.xlu1 %v12002_v34, %s11418_s7 }
 0x277   : > { %1510 = vrot.lane.b32.xlu0 %v12004_v7, %s11418_s7 }
 0x279   : > { %1512 = vrot.lane.b32.xlu1 %v12008_v56, %s11418_s7 }
 0x27b   : > { %1508 = vrot.lane.b32.xlu0 %v12012_v1, %s11418_s7 }
 0x27d   : > { %1485 = vrot.lane.b32.xlu1 %v12002_v34, %s11419_s8 }
 0x27f   : > { %1477 = vrot.lane.b32.xlu0 %v12012_v1, %s11419_s8 }
 0x281   : > { %1681 = vrot.lane.b32.xlu1 %v12002_v34, %s11420_s9 }
 0x283   : > { %1479 = vrot.lane.b32.xlu0 %v12004_v7, %s11419_s8 }
 0x285   : > { %1483 = vrot.lane.b32.xlu1 %v12008_v56, %s11419_s8 }
 0x287   : > { %1677 = vrot.lane.b32.xlu0 %v12004_v7, %s11420_s9 }
 0x289   : > { %1679 = vrot.lane.b32.xlu1 %v12008_v56, %s11420_s9 }
 0x28b   : > { %1675 = vrot.lane.b32.xlu0 %v12012_v1, %s11420_s9 }
 0x28d   : > { %1787 = vrot.lane.b32.xlu1 %v12002_v34, %s11421_s10 }
 0x28f   : > { %1783 = vrot.lane.b32.xlu0 %v12004_v7, %s11421_s10 }
 0x291   : > { %1785 = vrot.lane.b32.xlu1 %v12008_v56, %s11421_s10 }
 0x293   : > { %1781 = vrot.lane.b32.xlu0 %v12012_v1, %s11421_s10 }
 0x295   : > { %1971 = vrot.lane.b32.xlu1 %v12012_v1, %s11422_s11 }
 0x297   : > { %1973 = vrot.lane.b32.xlu0 %v12002_v34, %s11422_s11 }
 0x299   : > { %1975 = vrot.lane.b32.xlu1 %v12004_v7, %s11422_s11 }
 0x29b   : > { %2079 = vrot.lane.b32.xlu0 %v12002_v34, %s11423_s12 }
 0x29d   : > { %2081 = vrot.lane.b32.xlu1 %v12004_v7, %s11423_s12 }
 0x29f   : > { %1969 = vrot.lane.b32.xlu0 %v12008_v56, %s11422_s11 }
 0x2a1   : > { %2077 = vrot.lane.b32.xlu1 %v12012_v1, %s11423_s12 }
 0x2a3   : > { %2075 = vrot.lane.b32.xlu0 %v12008_v56, %s11423_s12 }
 0x2a5   : > { %2183 = vrot.lane.b32.xlu1 %v12012_v1, %s11424_s13 }
 0x2a7   : > { %2185 = vrot.lane.b32.xlu0 %v12002_v34, %s11424_s13 }
 0x2a9   : > { %2187 = vrot.lane.b32.xlu1 %v12004_v7, %s11424_s13 }
 0x2ab   : > { %2291 = vrot.lane.b32.xlu0 %v12002_v34, %s11425_s14 }
 0x2ad   : > { %2293 = vrot.lane.b32.xlu1 %v12004_v7, %s11425_s14 }
 0x2af   : > { %2181 = vrot.lane.b32.xlu0 %v12008_v56, %s11424_s13 }
 0x2b1   : > { %2289 = vrot.lane.b32.xlu1 %v12012_v1, %s11425_s14 }
 0x2b3   : > { %2287 = vrot.lane.b32.xlu0 %v12008_v56, %s11425_s14 }
 0x2b5   : > { %2423 = vperm.xlu1 %11222, %v10459_v20  }
 0x2b7   : > { %2418 = vperm.xlu0 %11221, %v10458_v43  }
 0x2b9   : > { %2413 = vperm.xlu1 %11222, %v10457_v35  }
 0x2bb   : > { %2408 = vperm.xlu0 %11221, %v10456_v27  }
 0x2e7   : > { %v1515_v52 = vpop.permute.xlu1 %1514 }
 0x2e9   : > { %v1511_v30 = vpop.permute.xlu0 %1510 }
 0x2ea   : > { %v1526_v41 = vsel %vm15311_vm12, %v1511_v30, %v1515_v52  ;;  %v1517_v38 = vsel %vm15312_vm0, %v1515_v52, %v1511_v30  ;;  %vm15317_vm12 = vcmask 261120  }
 0x2eb   : > { %10378 = vmatprep.subr.msk.bf16.mxu0 %vm11658_vm15, %v1517_v38  ;;  %v1513_v47 = vpop.permute.xlu1 %1512  ;;  %v1530_v31 = vsel %vm11654_vm14, %v1526_v41, 0  ;;  %v11253_v41 = vld [vmem:[%s14917_s2 + $0xd0] sm:$0xff]  }
 0x2ec   : > { %1566 = vmatpush1.bf16.msra.mxu0 %v1530_v31 }
 0x2ed   : > { %v1509_v33 = vpop.permute.xlu0 %1508 }
 0x2ee   : > { %v1522_v45 = vsel %vm15315_vm2, %v1509_v33, %v1513_v47  ;;  %v1516_v42 = vsel %vm15316_vm13, %v1513_v47, %v1509_v33  ;;  %vm15319_vm13 = vcmask 138240  }
 0x2ef   : > { %10379 = vmatprep.subr.msk.bf16.mxu0 %vm11658_vm15, %v1516_v42  ;;  %v1486_v63 = vpop.permute.xlu1 %1485  ;;  %v1528_v2 = vsel %vm11654_vm14, %v1522_v45, 0  ;;  %vm15320_vm0 = vmmov %vm15319_vm13  ;;  %vm15327_vm14 = vcmask 261120   ;;  %vm15329_vm15 = vnez %v15328_v44 }
 0x2f0   : > { %1568 = vmatpush1.bf16.msra.mxu0 %v1528_v2  ;;  %vm15323_vm2 = vmmov %vm15320_vm0 }
 0x2f1   : > { %v1478_v17 = vpop.permute.xlu0 %1477 }
 0x2f3   : > { %10380 = vmatmul.mubr.msk.bf16.vlgmr.msra.gmra.mxu0 %vm15317_vm12, %v11246_v28  ;;  %v1682_v48 = vpop.permute.xlu1 %1681  ;;  %vm15324_vm12 = vmmov %vm15320_vm0 }
 0x2f4   : > { %1595 = vmatprep.mubr.bf16.mxu0 %v15318_v58 }
 0x2f5   : > { %v1480_v49 = vpop.permute.xlu0 %1479 }
 0x2f6   : > { %v1497_v53 = vsel %vm15319_vm13, %v1480_v49, %v1486_v63  ;;  %v1488_v54 = vsel %vm15320_vm0, %v1486_v63, %v1480_v49  ;;  %vm15325_vm13 = vcmask 121856  }
 0x2f7   : > { %10384 = vmatprep.subr.msk.bf16.mxu1 %vm11689_vm5, %v1488_v54  ;;  %v1484_v8 = vpop.permute.xlu1 %1483  ;;  %v1501_v61 = vsel %vm11685_vm3, %v1497_v53, 0  ;;  %vm15326_vm0 = vmmov %vm15325_vm13 }
 0x2f8   : > { %v1493_v59 = vsel %vm15323_vm2, %v1478_v17, %v1484_v8  ;;  %1635 = vmatpush1.bf16.msra.mxu1 %v1501_v61  ;;  %v1487_v0 = vsel %vm15324_vm12, %v1484_v8, %v1478_v17  ;;  %vm15331_vm2 = vnez %v15330_v62  ;;  %vm15333_vm12 = vmmov %vm15326_vm0 }
 0x2f9   : > { %v1678_v10 = vpop.permute.xlu0 %1677  ;;  %10385 = vmatprep.subr.msk.bf16.mxu1 %vm11689_vm5, %v1487_v0  ;;  %v1499_v15 = vsel %vm11685_vm3, %v1493_v59, 0 }
 0x2fa   : > { %v1693_v11 = vsel %vm15325_vm13, %v1678_v10, %v1682_v48  ;;  %v1684_v6 = vsel %vm15326_vm0, %v1682_v48, %v1678_v10  ;;  %vm15334_vm13 = vcmask 261120   ;;  %v11254_v48 = vld [vmem:[%s14917_s2 + $0xc8] sm:$0xff]   ;;  %v11256_v10 = vld [vmem:[%s14917_s2 + $0xe0] sm:$0xff]  }
 0x2fb   : > { %10381 = vmatmul.mubr.msk.bf16.gmra.mxu0 %vm15327_vm14, %v11247_v9  ;;  %10394 = vmatprep.subr.msk.bf16.mxu0 %vm15329_vm15, %v1684_v6  ;;  %v1680_v13 = vpop.permute.xlu1 %1679  ;;  %v1697_v3 = vsel %vm15331_vm2, %v1693_v11, 0  ;;  %vm15332_vm14 = vmmov %vm15326_vm0  ;;  %vm15335_vm0 = vcmask 7168   ;;  %v11255_v9 = vld [vmem:[%s14917_s2 + $0xd8] sm:$0xff]  }
 0x2fc   : > { %1637 = vmatpush1.bf16.msra.mxu1 %v1499_v15  ;;  %1733 = vmatpush1.bf16.msra.mxu0 %v1697_v3 }
 0x2fd   : > { %v1676_v18 = vpop.permute.xlu0 %1675  ;;  %1752 = vmatprep.mubr.bf16.mxu0 %v15318_v58 }
 0x2fe   : > { %v1689_v39 = vsel %vm15332_vm14, %v1676_v18, %v1680_v13  ;;  %v1683_v51 = vsel %vm15333_vm12, %v1680_v13, %v1676_v18  ;;  %vm15336_vm14 = vmmov %vm15335_vm0 }
 0x2ff   : > { %10386 = vmatmul.mubr.msk.bf16.vlgmr.msra.gmra.mxu1 %vm15334_vm13, %v11248_v50  ;;  %10395 = vmatprep.subr.msk.bf16.mxu0 %vm15329_vm15, %v1683_v51  ;;  %v1788_v22 = vpop.permute.xlu1 %1787  ;;  %v1695_v24 = vsel %vm15331_vm2, %v1689_v39, 0  ;;  %vm15337_vm12 = vmmov %vm15334_vm13  ;;  %vm15339_vm13 = vnez %v15338_v29  ;;  %vm15341_vm2 = vnez %v15340_v23  ;;  %v11257_v39 = vld [vmem:[%s14917_s2 + $0xf0] sm:$0xff]  }
 0x300   : > { %1735 = vmatpush1.bf16.msra.mxu0 %v1695_v24  ;;  %1664 = vmatprep.mubr.bf16.mxu1 %v15318_v58 }
 0x301   : > { %v1784_v14 = vpop.permute.xlu0 %1783  ;;  %1920 = vmatprep.subr.bf16.mxu0 %v12004_v7 }
 0x302   : > { %v1799_v4 = vsel %vm15335_vm0, %v1784_v14, %v1788_v22  ;;  %v1790_v25 = vsel %vm15336_vm14, %v1788_v22, %v1784_v14  ;;  %vm15342_vm14 = vmmov %vm15335_vm0 }
 0x303   : > { %10396 = vmatmul.mubr.msk.bf16.vlgmr.msra.gmra.mxu0 %vm15337_vm12, %v11249_v12  ;;  %10404 = vmatprep.subr.msk.bf16.mxu1 %vm15339_vm13, %v1790_v25  ;;  %v1786_v57 = vpop.permute.xlu1 %1785  ;;  %v1803_v5 = vsel %vm15341_vm2, %v1799_v4, 0 }
 0x304   : > { %1839 = vmatpush1.bf16.msra.mxu1 %v1803_v5  ;;  %1921 = vmatpush1.bf16.msra.mxu0 %v12002_v34  ;;  %v11251_v34 = vld [vmem:[%s14917_s2 + $0xb8] sm:$0xff]  }
 0x305   : > { %v1782_v26 = vpop.permute.xlu0 %1781  ;;  %1922 = vmatprep.subr.bf16.mxu0 %v12012_v1  ;;  %1762 = vmatprep.mubr.bf16.mxu0 %v15318_v58  ;;  %v11252_v1 = vld [vmem:[%s14917_s2 + $0xc0] sm:$0xff]  }
 0x306   : > { %v1795_v32 = vsel %vm15335_vm0, %v1782_v26, %v1786_v57  ;;  %v1789_v36 = vsel %vm15342_vm14, %v1786_v57, %v1782_v26  ;;  %vm15343_vm0 = vmmov %vm15337_vm12  ;;  %vm15344_vm14 = vcmask 1039360  }
 0x307   : > { %10387 = vmatmul.mubr.msk.bf16.gmra.mxu1 %vm15337_vm12, %v11250_v16  ;;  %10405 = vmatprep.subr.msk.bf16.mxu1 %vm15339_vm13, %v1789_v36  ;;  %v1972_v60 = vpop.permute.xlu1 %1971  ;;  %v1801_v19 = vsel %vm15341_vm2, %v1795_v32, 0  ;;  %vm15345_vm12 = vmmov %vm15344_vm14  ;;  %vm15355_vm13 = vcmask 261120   ;;  %v11258_v16 = vld [vmem:[%s14917_s2 + $0xe8] sm:$0xff]  }
 0x308   : > { %1841 = vmatpush1.bf16.msra.mxu1 %v1801_v19  ;;  %1923 = vmatpush1.bf16.msra.mxu0 %v12008_v56  ;;  %vm15348_vm2 = vmmov %vm15343_vm0 }
 0x309   : > { %v1974_v7 = vpop.permute.xlu0 %1973  ;;  %1858 = vmatprep.mubr.bf16.mxu1 %v15318_v58 }
 0x30b   : > { %10397 = vmatmul.mubr.msk.bf16.gmra.mxu0 %vm15343_vm0, %v11251_v34  ;;  %v1976_v40 = vpop.permute.xlu1 %1975  ;;  %vm15349_vm0 = vcmask 924672   ;;  %v11259_v34 = vld [vmem:[%s14917_s2 + $0xf8] sm:$0xff]  }
 0x30c   : > { %v1978_v20 = vsel %vm15344_vm14, %v1974_v7, %v1976_v40  ;;  %v1987_v43 = vsel %vm15345_vm12, %v1976_v40, %v1974_v7  ;;  %1940 = vmatprep.mubr.bf16.mxu0 %v15318_v58  ;;  %vm15350_vm14 = vmmov %vm15349_vm0  ;;  %v11260_v7 = vld [vmem:[%s14917_s2 + $0x100] sm:$0xff]   ;;  %v11261_v40 = vld [vmem:[%s14917_s2 + $0x110] sm:$0xff]  }
 0x30d   : > { %v2080_v35 = vpop.permute.xlu0 %2079  ;;  %10422 = vmatprep.subr.msk.bf16.mxu1 %vm11803_vm8, %v1987_v43  ;;  %v1991_v52 = vsel %vm11817_vm6, %v1978_v20, 0  ;;  %v11263_v20 = vld [vmem:[%s14917_s2 + $0x118] sm:$0xff]  }
 0x30f   : > { %10406 = vmatmul.mubr.msk.bf16.vlgmr.msra.gmra.mxu1 %vm15348_vm2, %v11252_v1  ;;  %v2082_v30 = vpop.permute.xlu1 %2081  ;;  %vm15353_vm2 = vmmov %vm15345_vm12  ;;  %v11262_v1 = vld [vmem:[%s14917_s2 + $0x108] sm:$0xff]  }
 0x310   : > { %2027 = vmatpush1.bf16.msra.mxu1 %v1991_v52  ;;  %v2084_v38 = vsel %vm15349_vm0, %v2080_v35, %v2082_v30  ;;  %v2093_v47 = vsel %vm15350_vm14, %v2082_v30, %v2080_v35  ;;  %1868 = vmatprep.mubr.bf16.mxu1 %v15318_v58  ;;  %vm15354_vm12 = vmmov %vm15353_vm2 }
 0x311   : > { %v1970_v31 = vpop.permute.xlu0 %1969  ;;  %10432 = vmatprep.subr.msk.bf16.mxu0 %vm11822_vm11, %v2093_v47  ;;  %v2097_v42 = vsel %vm11848_vm1, %v2084_v38, 0  ;;  %vm15356_vm14 = vmmov %vm15349_vm0 }
 0x312   : > { %v1977_v63 = vsel %vm15353_vm2, %v1970_v31, %v1972_v60  ;;  %v1983_v2 = vsel %vm15354_vm12, %v1972_v60, %v1970_v31  ;;  %vm15357_vm2 = vmmov %vm15355_vm13  ;;  %vm15358_vm12 = vcmask 916480  }
 0x313   : > { %10414 = vmatmul.mubr.msk.bf16.vlgmr.msra.gmra.mxu0 %vm15355_vm13, %v11253_v41  ;;  %10423 = vmatprep.subr.msk.bf16.mxu1 %vm11803_vm8, %v1983_v2  ;;  %v2078_v28 = vpop.permute.xlu1 %2077  ;;  %v1989_v17 = vsel %vm11817_vm6, %v1977_v63, 0 }
 0x314   : > { %2133 = vmatpush1.bf16.msra.mxu0 %v2097_v42  ;;  %2029 = vmatpush1.bf16.msra.mxu1 %v1989_v17 }
 0x315   : > { %v2076_v49 = vpop.permute.xlu0 %2075  ;;  %1950 = vmatprep.mubr.bf16.mxu0 %v15318_v58 }
 0x316   : > { %v2083_v53 = vsel %vm15349_vm0, %v2076_v49, %v2078_v28  ;;  %v2089_v54 = vsel %vm15356_vm14, %v2078_v28, %v2076_v49  ;;  %vm15359_vm0 = vmmov %vm15358_vm12 }
 0x317   : > { %10407 = vmatmul.mubr.msk.bf16.gmra.mxu1 %vm15355_vm13, %v11254_v48  ;;  %10433 = vmatprep.subr.msk.bf16.mxu0 %vm11822_vm11, %v2089_v54  ;;  %v2184_v8 = vpop.permute.xlu1 %2183  ;;  %v2095_v61 = vsel %vm11848_vm1, %v2083_v53, 0  ;;  %vm15362_vm14 = vmmov %vm15357_vm2  ;;  %vm15363_vm13 = vcmask 908288  }
 0x318   : > { %2135 = vmatpush1.bf16.msra.mxu0 %v2095_v61  ;;  %2046 = vmatprep.mubr.bf16.mxu1 %v15318_v58 }
 0x319   : > { %v2186_v59 = vpop.permute.xlu0 %2185 }
 0x31b   : > { %10415 = vmatmul.mubr.msk.bf16.gmra.mxu0 %vm15357_vm2, %v11255_v9  ;;  %v2188_v0 = vpop.permute.xlu1 %2187  ;;  %vm15364_vm2 = vmmov %vm15363_vm13 }
 0x31c   : > { %v2190_v11 = vsel %vm15358_vm12, %v2186_v59, %v2188_v0  ;;  %v2199_v6 = vsel %vm15359_vm0, %v2188_v0, %v2186_v59  ;;  %2152 = vmatprep.mubr.bf16.mxu0 %v15318_v58  ;;  %vm15367_vm12 = vmmov %vm15359_vm0 }
 0x31d   : > { %v2292_v13 = vpop.permute.xlu0 %2291  ;;  %10442 = vmatprep.subr.msk.bf16.mxu1 %vm11884_vm4, %v2199_v6  ;;  %v2203_v50 = vsel %vm11898_vm7, %v2190_v11, 0 }
 0x31f   : > { %10424 = vmatmul.mubr.msk.bf16.vlgmr.msra.gmra.mxu1 %vm15362_vm14, %v11256_v10  ;;  %v2294_v18 = vpop.permute.xlu1 %2293 }
 0x320   : > { %2239 = vmatpush1.bf16.msra.mxu1 %v2203_v50  ;;  %v2296_v51 = vsel %vm15363_vm13, %v2292_v13, %v2294_v18  ;;  %v2305_v22 = vsel %vm15364_vm2, %v2294_v18, %v2292_v13  ;;  %2056 = vmatprep.mubr.bf16.mxu1 %v15318_v58  ;;  %vm15368_vm13 = vmmov %vm15364_vm2 }
 0x321   : > { %v2182_v24 = vpop.permute.xlu0 %2181  ;;  %10452 = vmatprep.subr.msk.bf16.mxu0 %vm11903_vm9, %v2305_v22  ;;  %v2309_v4 = vsel %vm11918_vm10, %v2296_v51, 0 }
 0x322   : > { %v2189_v25 = vsel %vm15367_vm12, %v2182_v24, %v2184_v8  ;;  %v2195_v57 = vsel %vm15359_vm0, %v2184_v8, %v2182_v24  ;;  %vm15369_vm12 = vmmov %vm15362_vm14 }
 0x323   : > { %10434 = vmatmul.mubr.msk.bf16.vlgmr.msra.gmra.mxu0 %vm15362_vm14, %v11257_v39  ;;  %10443 = vmatprep.subr.msk.bf16.mxu1 %vm11884_vm4, %v2195_v57  ;;  %v2201_v5 = vsel %vm11898_vm7, %v2189_v25, 0  ;;  %v2290_v26 = vpop.permute.xlu1 %2289  ;;  %vm15370_vm0 = vmmov %vm15369_vm12 }
 0x324   : > { %2345 = vmatpush1.bf16.msra.mxu0 %v2309_v4  ;;  %2241 = vmatpush1.bf16.msra.mxu1 %v2201_v5  ;;  %vm15371_vm14 = vmmov %vm15370_vm0 }
 0x325   : > { %v2288_v32 = vpop.permute.xlu0 %2287  ;;  %2162 = vmatprep.mubr.bf16.mxu0 %v15318_v58 }
 0x326   : > { %v2295_v36 = vsel %vm15368_vm13, %v2288_v32, %v2290_v26  ;;  %v2301_v60 = vsel %vm15364_vm2, %v2290_v26, %v2288_v32  ;;  %vm15372_vm13 = vmmov %vm15370_vm0 }
 0x327   : > { %10425 = vmatmul.mubr.msk.bf16.gmra.mxu1 %vm15369_vm12, %v11258_v16  ;;  %10453 = vmatprep.subr.msk.bf16.mxu0 %vm11903_vm9, %v2301_v60  ;;  %v2307_v19 = vsel %vm11918_vm10, %v2295_v36, 0  ;;  %vm15373_vm2 = vmmov %vm15370_vm0 }
 0x328   : > { %2347 = vmatpush1.bf16.msra.mxu0 %v2307_v19  ;;  %2258 = vmatprep.mubr.bf16.mxu1 %v15318_v58  ;;  %vm15374_vm12 = vmmov %vm15370_vm0 }
 0x32b   : > { %10435 = vmatmul.mubr.msk.bf16.gmra.mxu0 %vm15370_vm0, %v11259_v34  ;;  %vm15415_vm0 = vcmask 130048  }
 0x32c   : > { %2364 = vmatprep.mubr.bf16.mxu0 %v15318_v58  ;;  %vm15422_vm10 = vmmov %vm15415_vm0 }
 0x32f   : > { %10444 = vmatmul.mubr.msk.bf16.vlgmr.msra.gmra.mxu1 %vm15371_vm14, %v11260_v7  ;;  %vm15416_vm14 = vmmov %vm15415_vm0 }
 0x330   : > { %2268 = vmatprep.mubr.bf16.mxu1 %v15318_v58 }
 0x333   : > { %10454 = vmatmul.mubr.msk.bf16.vlgmr.msra.gmra.mxu0 %vm15372_vm13, %v11261_v40 }
 0x334   : > { %2374 = vmatprep.mubr.bf16.mxu0 %v15318_v58 }
 0x337   : > { %10445 = vmatmul.mubr.msk.bf16.gmra.mxu1 %vm15373_vm2, %v11262_v1 }
 0x338   : > { %2564 = vmatprep.mubr.bf16.mxu1 %v15318_v58 }
 0x33b   : > { %10455 = vmatmul.mubr.msk.bf16.gmra.mxu0 %vm15374_vm12, %v11263_v20  ;;  %vm15421_vm12 = vmmov %vm15415_vm0 }
 0x33c   : > { %2633 = vmatprep.mubr.bf16.mxu0 %v15318_v58 }
 0x3b3   : > { %v1587_v43 = vpop.f32.mrf.mxu0 }
 0x3b5   : > { %v12276_v35 = vpop.f32.mrf.mxu0 }
 0x3b7   : > { %v1591_v52 = vpop.f32.mrf.mxu0 }
 0x3b9   : > { %v1593_v30 = vpop.f32.mrf.mxu0 }
 0x3bb   : > { %v1597_v41 = vpop.f32.mrf.mxu0 }
 0x3bd   : > { %v1599_v38 = vpop.f32.mrf.mxu0 }
 0x3bf   : > { %v1601_v47 = vpop.f32.mrf.mxu0  ;;  %v1656_v31 = vpop.f32.mrf.mxu1 }
 0x3c0   : > { %v1657_v21 = vadd.f32 %v1656_v31, %v1587_v43 }
 0x3c1   : > { %v12278_v42 = vpop.f32.mrf.mxu0  ;;  %v1658_v63 = vpop.f32.mrf.mxu1 }
 0x3c2   : > { %15375 = vst [vmem:[#allocation26_spill] sm:$0xff] %v12278_v42 }
 0x3c3   : > { %v1660_v2 = vpop.f32.mrf.mxu1  ;;  %v1754_v28 = vpop.f32.mrf.mxu0 }
 0x3c4   : > { %v1661_v62 = vadd.f32 %v1660_v2, %v1591_v52 }
 0x3c5   : > { %v1662_v17 = vpop.f32.mrf.mxu1  ;;  %v12280_v48 = vpop.f32.mrf.mxu0 }
 0x3c6   : > { %15376 = vst [vmem:[#allocation27_spill] sm:$0xff] %v12280_v48  ;;  %v1663_v58 = vadd.f32 %v1662_v17, %v1593_v30  ;;  %v1773_v48 = vadd.f32 %v1754_v28, %v1657_v21 }
 0x3c7   : > { %v1666_v49 = vpop.f32.mrf.mxu1  ;;  %v1758_v53 = vpop.f32.mrf.mxu0 }
 0x3c8   : > { %v1667_v27 = vadd.f32 %v1666_v49, %v1597_v41 }
 0x3c9   : > { %v1668_v54 = vpop.f32.mrf.mxu1  ;;  %v1760_v8 = vpop.f32.mrf.mxu0  ;;  %v15383_v41 = vld [vmem:[#allocation26_spill] sm:$0xff] }
 0x3ca   : > { %v1669_v44 = vadd.f32 %v1668_v54, %v1599_v38  ;;  %v1776_v42 = vadd.f32 %v1760_v8, %v1663_v58 }
 0x3cb   : > { %v1670_v61 = vpop.f32.mrf.mxu1  ;;  %v1764_v9 = vpop.f32.mrf.mxu0 }
 0x3cc   : > { %v1777_v55 = vadd.f32 %v1764_v9, %v1667_v27 }
 0x3cd   : > { %v1672_v59 = vpop.f32.mrf.mxu1  ;;  %v1766_v0 = vpop.f32.mrf.mxu0  ;;  %v15384_v30 = vld [vmem:[#allocation27_spill] sm:$0xff] }
 0x3ce   : > { %v1673_v49 = vadd.f32 %v1672_v59, %v15383_v41 }
 0x3cf   : > { %v1768_v10 = vpop.f32.mrf.mxu0  ;;  %v1860_v11 = vpop.f32.mrf.mxu1 }
 0x3d0   : > { %v1879_v17 = vadd.f32 %v1860_v11, %v1773_v48 }
 0x3d1   : > { %v1770_v6 = vpop.f32.mrf.mxu0  ;;  %v12282_v13 = vpop.f32.mrf.mxu1 }
 0x3d2   : > { %15377 = vst [vmem:[#allocation28_spill] sm:$0xff] %v12282_v13  ;;  %v1659_v13 = vadd.f32 %v1658_v63, %v12276_v35  ;;  %v1780_v54 = vadd.f32 %v1770_v6, %v1673_v49 }
 0x3d3   : > { %v1864_v50 = vpop.f32.mrf.mxu1  ;;  %v1942_v18 = vpop.f32.mrf.mxu0 }
 0x3d4   : > { %v1774_v31 = vadd.f32 %v15384_v30, %v1659_v13  ;;  %v1961_v28 = vadd.f32 %v1942_v18, %v1879_v17 }
 0x3d5   : > { %v1866_v39 = vpop.f32.mrf.mxu1  ;;  %v12284_v51 = vpop.f32.mrf.mxu0 }
 0x3d6   : > { %15378 = vst [vmem:[#allocation29_spill] sm:$0xff] %v12284_v51 }
 0x3d7   : > { %v1870_v22 = vpop.f32.mrf.mxu1  ;;  %v1946_v24 = vpop.f32.mrf.mxu0 }
 0x3d8   : > { %v1883_v51 = vadd.f32 %v1870_v22, %v1777_v55 }
 0x3d9   : > { %v1872_v4 = vpop.f32.mrf.mxu1  ;;  %v1948_v25 = vpop.f32.mrf.mxu0  ;;  %v15385_v58 = vld [vmem:[#allocation28_spill] sm:$0xff] }
 0x3da   : > { %v1880_v63 = vadd.f32 %v15385_v58, %v1774_v31  ;;  %v15395_v58 = vld [vmem:[#allocation4_spill] sm:$0xff] }
 0x3db   : > { %v1874_v57 = vpop.f32.mrf.mxu1  ;;  %v1952_v5 = vpop.f32.mrf.mxu0 }
 0x3dc   : > { %v1965_v43 = vadd.f32 %v1952_v5, %v1883_v51 }
 0x3dd   : > { %v1876_v16 = vpop.f32.mrf.mxu1  ;;  %v1954_v26 = vpop.f32.mrf.mxu0  ;;  %v15386_v48 = vld [vmem:[#allocation29_spill] sm:$0xff] }
 0x3de   : > { %v1962_v11 = vadd.f32 %v15386_v48, %v1880_v63  ;;  %v15396_v63 = vmax.f32 %v15395_v58, 0.0 }
 0x3df   : > { %v1956_v32 = vpop.f32.mrf.mxu0  ;;  %v2048_v36 = vpop.f32.mrf.mxu1 }
 0x3e1   : > { %v1958_v60 = vpop.f32.mrf.mxu0  ;;  %v12286_v19 = vpop.f32.mrf.mxu1 }
 0x3e2   : > { %15379 = vst [vmem:[#allocation30_spill] sm:$0xff] %v12286_v19  ;;  %v1778_v19 = vadd.f32 %v1766_v0, %v1669_v44 }
 0x3e3   : > { %v2052_v34 = vpop.f32.mrf.mxu1  ;;  %v12288_v7 = vpop.f32.mrf.mxu0 }
 0x3e4   : > { %15380 = vst [vmem:[#allocation32_spill] sm:$0xff] %v12288_v7  ;;  %v1671_v7 = vadd.f32 %v1670_v61, %v1601_v47  ;;  %v1884_v27 = vadd.f32 %v1872_v4, %v1778_v19  ;;  %v1886_v61 = vadd.f32 %v1876_v16, %v1780_v54 }
 0x3e5   : > { %v2054_v40 = vpop.f32.mrf.mxu1  ;;  %v12290_v1 = vpop.f32.mrf.mxu0 }
 0x3e6   : > { %15381 = vst [vmem:[#allocation31_spill] sm:$0xff] %v12290_v1  ;;  %v1775_v1 = vadd.f32 %v1758_v53, %v1661_v62  ;;  %v1779_v52 = vadd.f32 %v1768_v10, %v1671_v7  ;;  %v1882_v62 = vadd.f32 %v1866_v39, %v1776_v42  ;;  %v1966_v35 = vadd.f32 %v1954_v26, %v1884_v27 }
 0x3e7   : > { %v2058_v20 = vpop.f32.mrf.mxu1  ;;  %v2158_v14 = vpop.f32.mrf.mxu0  ;;  %v2067_v42 = vadd.f32 %v2048_v36, %v1961_v28  ;;  %v1968_v6 = vadd.f32 %v1958_v60, %v1886_v61 }
 0x3e8   : > { %v1881_v38 = vadd.f32 %v1864_v50, %v1775_v1  ;;  %v1885_v53 = vadd.f32 %v1874_v57, %v1779_v52  ;;  %v2071_v21 = vadd.f32 %v2058_v20, %v1965_v43  ;;  %v1964_v8 = vadd.f32 %v1948_v25, %v1882_v62  ;;  %v2424_v43 = vpop.permute.xlu1 %2423 }
 0x3e9   : > { %v2060_v12 = vpop.f32.mrf.mxu1  ;;  %v2160_v3 = vpop.f32.mrf.mxu0  ;;  %v15387_v18 = vld [vmem:[#allocation30_spill] sm:$0xff] }
 0x3ea   : > { %v1963_v55 = vadd.f32 %v1946_v24, %v1881_v38  ;;  %v1967_v0 = vadd.f32 %v1956_v32, %v1885_v53  ;;  %v2072_v50 = vadd.f32 %v2060_v12, %v1966_v35  ;;  %v2070_v39 = vadd.f32 %v2054_v40, %v1964_v8  ;;  %v15393_v35 = vld [vmem:[#allocation5_spill] sm:$0xff]  ;;  %v15397_v8 = vld [vmem:[#allocation6_spill] sm:$0xff] }
 0x3eb   : > { %v2062_v15 = vpop.f32.mrf.mxu1  ;;  %v2164_v45 = vpop.f32.mrf.mxu0  ;;  %v2068_v25 = vadd.f32 %v15387_v18, %v1962_v11  ;;  %v15388_v16 = vld [vmem:[#allocation32_spill] sm:$0xff]  ;;  %v15398_v61 = vmax.f32 %v15397_v8, 0.0 }
 0x3ec   : > { %v2069_v10 = vadd.f32 %v2052_v34, %v1963_v55  ;;  %v2177_v13 = vadd.f32 %v2164_v45, %v2071_v21  ;;  %v2073_v4 = vadd.f32 %v2062_v15, %v1967_v0  ;;  %v2173_v26 = vadd.f32 %v15388_v16, %v2067_v42  ;;  %v2419_v55 = vpop.permute.xlu0 %2418  ;;  %v15405_v11 = vld [vmem:[#allocation8_spill] sm:$0xff] }
 0x3ed   : > { %v2064_v33 = vpop.f32.mrf.mxu1  ;;  %v2166_v56 = vpop.f32.mrf.mxu0  ;;  %v2176_v19 = vadd.f32 %v2160_v3, %v2070_v39  ;;  %v15389_v60 = vld [vmem:[#allocation31_spill] sm:$0xff]  ;;  %v15394_v21 = vmax.f32 %v15393_v35, 0.0  ;;  %v15406_v42 = vmax.f32 %v15405_v11, 0.0  ;;  %v11265_v35 = vld [vmem:[%s14917_s2 + $0x138] sm:$0xff]  }
 0x3ee   : > { %v2175_v24 = vadd.f32 %v2158_v14, %v2069_v10  ;;  %v2178_v57 = vadd.f32 %v2166_v56, %v2072_v50  ;;  %v2074_v32 = vadd.f32 %v2064_v33, %v1968_v6  ;;  %v2174_v40 = vadd.f32 %v15389_v60, %v2068_v25  ;;  %v15401_v10 = vld [vmem:[#allocation7_spill] sm:$0xff]  ;;  %v2414_v39 = vpop.permute.xlu1 %2413 }
 0x3ef   : > { %v2168_v23 = vpop.f32.mrf.mxu0  ;;  %v12292_v29 = vpop.f32.mrf.mxu1  ;;  %v15402_v50 = vmax.f32 %v15401_v10, 0.0 }
 0x3f0   : > { %15382 = vst [vmem:[#allocation33_spill] sm:$0xff] %v12292_v29  ;;  %v2179_v45 = vadd.f32 %v2168_v23, %v2073_v4  ;;  %v2409_v25 = vpop.permute.xlu0 %2408 }
 0x3f1   : > { %v2170_v37 = vpop.f32.mrf.mxu0  ;;  %v12294_v46 = vpop.f32.mrf.mxu1 }
 0x3f2   : > { %v2180_v14 = vadd.f32 %v2170_v37, %v2074_v32  ;;  %v2280_v33 = vadd.f32 %v12294_v46, %v2174_v40 }
 0x3f3   : > { %v2264_v29 = vpop.f32.mrf.mxu1  ;;  %v2366_v2 = vpop.f32.mrf.mxu0 }
 0x3f4   : > { %v2281_v7 = vadd.f32 %v2264_v29, %v2175_v24  ;;  %v15391_v29 = vld [vmem:[#allocation2_spill] sm:$0xff] }
 0x3f5   : > { %v2266_v47 = vpop.f32.mrf.mxu1  ;;  %v2368_v44 = vpop.f32.mrf.mxu0  ;;  %v15392_v31 = vmax.f32 %v15391_v29, 0.0  ;;  %v15424_v29 = vmov 0  }
 0x3f6   : > { %v2282_v49 = vadd.f32 %v2266_v47, %v2176_v19  ;;  %v2386_v53 = vadd.f32 %v2368_v44, %v2280_v33 }
 0x3f7   : > { %v2270_v9 = vpop.f32.mrf.mxu1  ;;  %v2370_v59 = vpop.f32.mrf.mxu0  ;;  %v15390_v20 = vld [vmem:[#allocation33_spill] sm:$0xff] }
 0x3f8   : > { %v2283_v5 = vadd.f32 %v2270_v9, %v2177_v13  ;;  %v2279_v41 = vadd.f32 %v15390_v20, %v2173_v26  ;;  %v2387_v52 = vadd.f32 %v2370_v59, %v2281_v7  ;;  %v15399_v9 = vld [vmem:[#allocation3_spill] sm:$0xff]  ;;  %v10550_v7 = vld [vmem:[%s14918_s3 + $0x70] sm:$0xff] }
 0x3f9   : > { %v2272_v51 = vpop.f32.mrf.mxu1  ;;  %v2372_v22 = vpop.f32.mrf.mxu0  ;;  %v15400_v59 = vmax.f32 %v15399_v9, 0.0 }
 0x3fa   : > { %v2284_v1 = vadd.f32 %v2272_v51, %v2178_v57  ;;  %v2385_v3 = vadd.f32 %v2366_v2, %v2279_v41  ;;  %v2388_v23 = vadd.f32 %v2372_v22, %v2282_v49  ;;  %v2395_v47 = vadd.f32 %v2387_v52, %v15394_v21  ;;  %v15407_v51 = vld [vmem:[#allocation9_spill] sm:$0xff] }
 0x3fb   : > { %v2274_v34 = vpop.f32.mrf.mxu1  ;;  %v2376_v12 = vpop.f32.mrf.mxu0  ;;  %v15408_v22 = vmax.f32 %v15407_v51, 0.0 }
 0x3fc   : > { %v2389_v36 = vadd.f32 %v2376_v12, %v2283_v5  ;;  %v2285_v38 = vadd.f32 %v2274_v34, %v2179_v45  ;;  %v2393_v0 = vadd.f32 %v2385_v3, %v15400_v59  ;;  %v2396_v13 = vadd.f32 %v2388_v23, %v15402_v50  ;;  %v10551_v45 = vld [vmem:[%s14918_s3 + $0x78] sm:$0xff]  ;;  %v11264_v3 = vld [vmem:[%s14917_s2 + $0x130] sm:$0xff]   ;;  %v11266_v59 = vld [vmem:[%s14917_s2 + $0x120] sm:$0xff]  }
 0x3fd   : > { %v2276_v15 = vpop.f32.mrf.mxu1  ;;  %v2378_v56 = vpop.f32.mrf.mxu0  ;;  %v2394_v24 = vadd.f32 %v2386_v53, %v15408_v22  ;;  %v12326_v4 = vadd.f32 %v2414_v39, %v2395_v47  ;;  %v15443_v22 = vld [vmem:[#allocation17_spill] sm:$0xff] }
 0x3fe   : > { %v2390_v27 = vadd.f32 %v2378_v56, %v2284_v1  ;;  %v2397_v17 = vadd.f32 %v2389_v36, %v15392_v31  ;;  %v2286_v54 = vadd.f32 %v2276_v15, %v2180_v14  ;;  %v12336_v16 = vadd.f32 %v2409_v25, %v2393_v0  ;;  %v10549_v1 = vld [vmem:[%s14918_s3 + $0x68] sm:$0xff]  ;;  %v10548_v36 = vld [vmem:[%s14918_s3 + $0x60] sm:$0xff] }
 0x3ff   : > { %v2380_v30 = vpop.f32.mrf.mxu0  ;;  %15409 = vst [vmem:[#allocation28_spill] sm:$0xff] %v12326_v4  ;;  %v12338_v26 = vadd.f32 %v2414_v39, %v2396_v13  ;;  %v12346_v32 = vadd.f32 %v2409_v25, %v2394_v24  ;;  %v15417_v14 = vld [vmem:[#allocation11_spill] sm:$0xff]  ;;  %v15419_v56 = vld [vmem:[#allocation10_spill] sm:$0xff]  ;;  %v15445_v25 = vld [vmem:[#allocation16_spill] sm:$0xff] }
 0x400   : > { %v2391_v62 = vadd.f32 %v2380_v30, %v2285_v38  ;;  %v2398_v28 = vadd.f32 %v2390_v27, %v15396_v63  ;;  %v12318_v48 = vadd.f32 %v2419_v55, %v2397_v17  ;;  %15412 = vst [vmem:[#allocation32_spill] sm:$0xff] %v12336_v16  ;;  %v12352_v34 = vpack.c.bf16 %v12326_v4, %v12336_v16 }
 0x401   : > { %v2382_v37 = vpop.f32.mrf.mxu0  ;;  %15413 = vst [vmem:[#allocation31_spill] sm:$0xff] %v12338_v26  ;;  %15414 = vst [vmem:[#allocation33_spill] sm:$0xff] %v12346_v32  ;;  %v12358_v12 = vpack.c.bf16 %v12338_v26, %v12346_v32  ;;  %vm15418_vm13 = vnez %v15417_v14  ;;  %vm15420_vm2 = vnez %v15419_v56 }
 0x402   : > { %v2399_v46 = vadd.f32 %v2391_v62, %v15398_v61  ;;  %v2392_v2 = vadd.f32 %v2382_v37, %v2286_v54  ;;  %15403 = vst [vmem:[#allocation26_spill] sm:$0xff] %v12318_v48  ;;  %v12328_v57 = vadd.f32 %v2419_v55, %v2398_v28 }
 0x404   : > { %v12320_v44 = vadd.f32 %v2424_v43, %v2399_v46  ;;  %v2400_v6 = vadd.f32 %v2392_v2, %v15406_v42  ;;  %15410 = vst [vmem:[#allocation29_spill] sm:$0xff] %v12328_v57  ;;  %v15435_v2 = vld [vmem:[#allocation14_spill] sm:$0xff] }
 0x405   : > { %v11267_v42 = vld [vmem:[%s14917_s2 + $0x140] sm:$0xff]  }
 0x406   : > { %15404 = vst [vmem:[#allocation27_spill] sm:$0xff] %v12320_v44  ;;  %v12330_v5 = vadd.f32 %v2424_v43, %v2400_v6  ;;  %v12334_v18 = vpack.c.bf16 %v12320_v44, %v12318_v48 }
 0x408   : > { %15411 = vst [vmem:[#allocation30_spill] sm:$0xff] %v12330_v5  ;;  %2493 = vrot.lane.b32.xlu1 %v12334_v18, %s11418_s7  ;;  %v12344_v19 = vpack.c.bf16 %v12330_v5, %v12328_v57 }
 0x40a   : > { %2489 = vrot.lane.b32.xlu0 %v12344_v19, %s11418_s7 }
 0x40c   : > { %2491 = vrot.lane.b32.xlu1 %v12352_v34, %s11418_s7 }
 0x40e   : > { %2487 = vrot.lane.b32.xlu0 %v12358_v12, %s11418_s7 }
 0x410   : > { %2464 = vrot.lane.b32.xlu1 %v12334_v18, %s11419_s8 }
 0x412   : > { %2456 = vrot.lane.b32.xlu0 %v12358_v12, %s11419_s8 }
 0x414   : > { %2660 = vrot.lane.b32.xlu1 %v12334_v18, %s11420_s9 }
 0x416   : > { %2458 = vrot.lane.b32.xlu0 %v12344_v19, %s11419_s8 }
 0x418   : > { %2462 = vrot.lane.b32.xlu1 %v12352_v34, %s11419_s8 }
 0x41a   : > { %2656 = vrot.lane.b32.xlu0 %v12344_v19, %s11420_s9 }
 0x41c   : > { %2658 = vrot.lane.b32.xlu1 %v12352_v34, %s11420_s9 }
 0x41e   : > { %2654 = vrot.lane.b32.xlu0 %v12358_v12, %s11420_s9 }
 0x420   : > { %2766 = vrot.lane.b32.xlu1 %v12334_v18, %s11421_s10 }
 0x422   : > { %2762 = vrot.lane.b32.xlu0 %v12344_v19, %s11421_s10 }
 0x424   : > { %2764 = vrot.lane.b32.xlu1 %v12352_v34, %s11421_s10 }
 0x426   : > { %2760 = vrot.lane.b32.xlu0 %v12358_v12, %s11421_s10 }
 0x428   : > { %2950 = vrot.lane.b32.xlu1 %v12358_v12, %s11422_s11 }
 0x42a   : > { %2952 = vrot.lane.b32.xlu0 %v12334_v18, %s11422_s11 }
 0x42c   : > { %2954 = vrot.lane.b32.xlu1 %v12344_v19, %s11422_s11 }
 0x42e   : > { %3058 = vrot.lane.b32.xlu0 %v12334_v18, %s11423_s12 }
 0x430   : > { %3060 = vrot.lane.b32.xlu1 %v12344_v19, %s11423_s12 }
 0x432   : > { %2948 = vrot.lane.b32.xlu0 %v12352_v34, %s11422_s11 }
 0x434   : > { %3056 = vrot.lane.b32.xlu1 %v12358_v12, %s11423_s12 }
 0x436   : > { %3054 = vrot.lane.b32.xlu0 %v12352_v34, %s11423_s12 }
 0x438   : > { %3162 = vrot.lane.b32.xlu1 %v12358_v12, %s11424_s13 }
 0x43a   : > { %3164 = vrot.lane.b32.xlu0 %v12334_v18, %s11424_s13 }
 0x43c   : > { %3166 = vrot.lane.b32.xlu1 %v12344_v19, %s11424_s13 }
 0x43e   : > { %3270 = vrot.lane.b32.xlu0 %v12334_v18, %s11425_s14 }
 0x440   : > { %3272 = vrot.lane.b32.xlu1 %v12344_v19, %s11425_s14 }
 0x442   : > { %3160 = vrot.lane.b32.xlu0 %v12352_v34, %s11424_s13 }
 0x444   : > { %3268 = vrot.lane.b32.xlu1 %v12358_v12, %s11425_s14 }
 0x446   : > { %3266 = vrot.lane.b32.xlu0 %v12352_v34, %s11425_s14 }
 0x448   : > { %3394 = vperm.xlu1 %11222, %v10551_v45  }
 0x44a   : > { %3389 = vperm.xlu0 %11221, %v10550_v7   ;;  %v11268_v7 = vld [vmem:[%s14917_s2 + $0x128] sm:$0xff]  }
 0x44c   : > { %3384 = vperm.xlu1 %11222, %v10549_v1  }
 0x44e   : > { %3379 = vperm.xlu0 %11221, %v10548_v36  }
 0x47a   : > { %v2494_v60 = vpop.permute.xlu1 %2493 }
 0x47c   : > { %v2490_v40 = vpop.permute.xlu0 %2489 }
 0x47d   : > { %v2505_v20 = vsel %vm15415_vm0, %v2490_v40, %v2494_v60  ;;  %v2496_v41 = vsel %vm15416_vm14, %v2494_v60, %v2490_v40  ;;  %vm15423_vm0 = vcmask 261120  }
 0x47e   : > { %10470 = vmatprep.subr.msk.bf16.mxu1 %vm15418_vm13, %v2496_v41  ;;  %v2492_v15 = vpop.permute.xlu1 %2491  ;;  %v2509_v49 = vsel %vm15420_vm2, %v2505_v20, 0  ;;  %v11270_v41 = vld [vmem:[%s14917_s2 + $0x150] sm:$0xff]  }
 0x47f   : > { %2545 = vmatpush1.bf16.msra.mxu1 %v2509_v49 }
 0x480   : > { %v2488_v52 = vpop.permute.xlu0 %2487 }
 0x481   : > { %v2501_v38 = vsel %vm15421_vm12, %v2488_v52, %v2492_v15  ;;  %v2495_v27 = vsel %vm15422_vm10, %v2492_v15, %v2488_v52  ;;  %vm15425_vm10 = vcmask 138240  }
 0x482   : > { %10471 = vmatprep.subr.msk.bf16.mxu1 %vm15418_vm13, %v2495_v27  ;;  %v2465_v43 = vpop.permute.xlu1 %2464  ;;  %v2507_v33 = vsel %vm15420_vm2, %v2501_v38, 0  ;;  %vm15426_vm14 = vmmov %vm15425_vm10  ;;  %vm15433_vm2 = vcmask 261120  }
 0x483   : > { %2547 = vmatpush1.bf16.msra.mxu1 %v2507_v33  ;;  %vm15429_vm12 = vmmov %vm15425_vm10  ;;  %v11271_v33 = vld [vmem:[%s14917_s2 + $0x160] sm:$0xff]  }
 0x484   : > { %v2457_v30 = vpop.permute.xlu0 %2456 }
 0x486   : > { %10472 = vmatmul.mubr.msk.bf16.vlgmr.msra.gmra.mxu1 %vm15423_vm0, %v11264_v3  ;;  %v2661_v23 = vpop.permute.xlu1 %2660  ;;  %vm15430_vm0 = vmmov %vm15425_vm10 }
 0x487   : > { %2574 = vmatprep.mubr.bf16.mxu1 %v15424_v29 }
 0x488   : > { %v2459_v31 = vpop.permute.xlu0 %2458 }
 0x489   : > { %v2476_v17 = vsel %vm15425_vm10, %v2459_v31, %v2465_v43  ;;  %v2467_v54 = vsel %vm15426_vm14, %v2465_v43, %v2459_v31  ;;  %vm15431_vm10 = vcmask 121856  }
 0x48a   : > { %10476 = vmatprep.subr.msk.bf16.mxu0 %vm11689_vm5, %v2467_v54  ;;  %v2463_v55 = vpop.permute.xlu1 %2462  ;;  %v2480_v37 = vsel %vm11685_vm3, %v2476_v17, 0  ;;  %vm15432_vm14 = vmmov %vm15431_vm10 }
 0x48b   : > { %v2472_v21 = vsel %vm15429_vm12, %v2457_v30, %v2463_v55  ;;  %2614 = vmatpush1.bf16.msra.mxu0 %v2480_v37  ;;  %v2466_v47 = vsel %vm15430_vm0, %v2463_v55, %v2457_v30  ;;  %vm15436_vm12 = vnez %v15435_v2 }
 0x48c   : > { %v2657_v58 = vpop.permute.xlu0 %2656  ;;  %10477 = vmatprep.subr.msk.bf16.mxu0 %vm11689_vm5, %v2466_v47  ;;  %v2478_v46 = vsel %vm11685_vm3, %v2472_v21, 0  ;;  %v11272_v47 = vld [vmem:[%s14917_s2 + $0x158] sm:$0xff]  }
 0x48d   : > { %v2672_v63 = vsel %vm15431_vm10, %v2657_v58, %v2661_v23  ;;  %v2663_v28 = vsel %vm15432_vm14, %v2661_v23, %v2657_v58  ;;  %vm15440_vm14 = vcmask 7168  }
 0x48e   : > { %10473 = vmatmul.mubr.msk.bf16.gmra.mxu1 %vm15433_vm2, %v11265_v35  ;;  %10486 = vmatprep.subr.msk.bf16.mxu1 %vm15329_vm15, %v2663_v28  ;;  %v2659_v61 = vpop.permute.xlu1 %2658  ;;  %v2676_v9 = vsel %vm15436_vm12, %v2672_v63, 0  ;;  %vm15437_vm2 = vmmov %vm15431_vm10  ;;  %vm15439_vm10 = vcmask 261120  }
 0x48f   : > { %2616 = vmatpush1.bf16.msra.mxu0 %v2478_v46  ;;  %2712 = vmatpush1.bf16.msra.mxu1 %v2676_v9  ;;  %vm15438_vm0 = vmmov %vm15437_vm2  ;;  %v11273_v9 = vld [vmem:[%s14917_s2 + $0x168] sm:$0xff]  }
 0x490   : > { %v2655_v0 = vpop.permute.xlu0 %2654  ;;  %2731 = vmatprep.mubr.bf16.mxu1 %v15424_v29 }
 0x491   : > { %v2668_v10 = vsel %vm15437_vm2, %v2655_v0, %v2659_v61  ;;  %v2662_v50 = vsel %vm15438_vm0, %v2659_v61, %v2655_v0  ;;  %vm15441_vm2 = vmmov %vm15440_vm14 }
 0x492   : > { %10478 = vmatmul.mubr.msk.bf16.vlgmr.msra.gmra.mxu0 %vm15439_vm10, %v11266_v59  ;;  %10487 = vmatprep.subr.msk.bf16.mxu1 %vm15329_vm15, %v2662_v50  ;;  %v2767_v13 = vpop.permute.xlu1 %2766  ;;  %v2674_v11 = vsel %vm15436_vm12, %v2668_v10, 0  ;;  %vm15442_vm0 = vmmov %vm15439_vm10  ;;  %vm15444_vm10 = vnez %v15443_v22  ;;  %vm15446_vm12 = vnez %v15445_v25  ;;  %v11274_v10 = vld [vmem:[%s14917_s2 + $0x170] sm:$0xff]  }
 0x493   : > { %2714 = vmatpush1.bf16.msra.mxu1 %v2674_v11  ;;  %2643 = vmatprep.mubr.bf16.mxu0 %v15424_v29 }
 0x494   : > { %v2763_v6 = vpop.permute.xlu0 %2762  ;;  %2899 = vmatprep.subr.bf16.mxu1 %v12344_v19 }
 0x495   : > { %v2778_v39 = vsel %vm15440_vm14, %v2763_v6, %v2767_v13  ;;  %v2769_v51 = vsel %vm15441_vm2, %v2767_v13, %v2763_v6  ;;  %vm15447_vm14 = vmmov %vm15441_vm2 }
 0x496   : > { %10488 = vmatmul.mubr.msk.bf16.vlgmr.msra.gmra.mxu1 %vm15442_vm0, %v11267_v42  ;;  %10496 = vmatprep.subr.msk.bf16.mxu0 %vm15444_vm10, %v2769_v51  ;;  %v2765_v24 = vpop.permute.xlu1 %2764  ;;  %v2782_v45 = vsel %vm15446_vm12, %v2778_v39, 0 }
 0x497   : > { %2818 = vmatpush1.bf16.msra.mxu0 %v2782_v45  ;;  %2900 = vmatpush1.bf16.msra.mxu1 %v12334_v18  ;;  %v11269_v18 = vld [vmem:[%s14917_s2 + $0x148] sm:$0xff]  }
 0x498   : > { %v2761_v19 = vpop.permute.xlu0 %2760  ;;  %2901 = vmatprep.subr.bf16.mxu1 %v12358_v12  ;;  %2741 = vmatprep.mubr.bf16.mxu1 %v15424_v29 }
 0x499   : > { %v2774_v1 = vsel %vm15447_vm14, %v2761_v19, %v2765_v24  ;;  %v2768_v36 = vsel %vm15441_vm2, %v2765_v24, %v2761_v19  ;;  %vm15448_vm14 = vmmov %vm15442_vm0  ;;  %vm15449_vm2 = vcmask 1039360   ;;  %v11275_v24 = vld [vmem:[%s14917_s2 + $0x180] sm:$0xff]  }
 0x49a   : > { %10479 = vmatmul.mubr.msk.bf16.gmra.mxu0 %vm15442_vm0, %v11268_v7  ;;  %10497 = vmatprep.subr.msk.bf16.mxu0 %vm15444_vm10, %v2768_v36  ;;  %v2951_v60 = vpop.permute.xlu1 %2950  ;;  %v2780_v40 = vsel %vm15446_vm12, %v2774_v1, 0  ;;  %vm15450_vm0 = vmmov %vm15449_vm2  ;;  %vm15459_vm10 = vcmask 261120   ;;  %v15470_v36 = vld [vmem:[#allocation25_spill] sm:$0xff] }
 0x49b   : > { %2820 = vmatpush1.bf16.msra.mxu0 %v2780_v40  ;;  %2902 = vmatpush1.bf16.msra.mxu1 %v12352_v34  ;;  %vm15453_vm12 = vmmov %vm15448_vm14 }
 0x49c   : > { %v2953_v12 = vpop.permute.xlu0 %2952  ;;  %2837 = vmatprep.mubr.bf16.mxu0 %v15424_v29 }
 0x49e   : > { %10489 = vmatmul.mubr.msk.bf16.gmra.mxu1 %vm15448_vm14, %v11269_v18  ;;  %v2955_v20 = vpop.permute.xlu1 %2954  ;;  %vm15454_vm14 = vcmask 924672  }
 0x49f   : > { %v2957_v15 = vsel %vm15449_vm2, %v2953_v12, %v2955_v20  ;;  %v2966_v49 = vsel %vm15450_vm0, %v2955_v20, %v2953_v12  ;;  %2919 = vmatprep.mubr.bf16.mxu1 %v15424_v29  ;;  %vm15455_vm2 = vmmov %vm15454_vm14  ;;  %v11276_v20 = vld [vmem:[%s14917_s2 + $0x178] sm:$0xff]  }
 0x4a0   : > { %v3059_v52 = vpop.permute.xlu0 %3058  ;;  %10514 = vmatprep.subr.msk.bf16.mxu0 %vm11803_vm8, %v2966_v49  ;;  %v2970_v27 = vsel %vm11817_vm6, %v2957_v15, 0 }
 0x4a2   : > { %10498 = vmatmul.mubr.msk.bf16.vlgmr.msra.gmra.mxu0 %vm15453_vm12, %v11270_v41  ;;  %v3061_v43 = vpop.permute.xlu1 %3060  ;;  %vm15458_vm12 = vmmov %vm15450_vm0 }
 0x4a3   : > { %3006 = vmatpush1.bf16.msra.mxu0 %v2970_v27  ;;  %v3063_v3 = vsel %vm15454_vm14, %v3059_v52, %v3061_v43  ;;  %v3072_v30 = vsel %vm15455_vm2, %v3061_v43, %v3059_v52  ;;  %2847 = vmatprep.mubr.bf16.mxu0 %v15424_v29  ;;  %vm15460_vm14 = vmmov %vm15455_vm2  ;;  %v11277_v43 = vld [vmem:[%s14917_s2 + $0x188] sm:$0xff]  }
 0x4a4   : > { %v2949_v23 = vpop.permute.xlu0 %2948  ;;  %10524 = vmatprep.subr.msk.bf16.mxu1 %vm11822_vm11, %v3072_v30  ;;  %v3076_v54 = vsel %vm11848_vm1, %v3063_v3, 0  ;;  %v11279_v3 = vld [vmem:[%s14917_s2 + $0x1a0] sm:$0xff]   ;;  %v11280_v30 = vld [vmem:[%s14917_s2 + $0x198] sm:$0xff]  }
 0x4a5   : > { %v2956_v55 = vsel %vm15458_vm12, %v2949_v23, %v2951_v60  ;;  %v2962_v37 = vsel %vm15450_vm0, %v2951_v60, %v2949_v23  ;;  %vm15461_vm12 = vmmov %vm15459_vm10  ;;  %vm15462_vm0 = vcmask 916480   ;;  %v11281_v23 = vld [vmem:[%s14917_s2 + $0x1a8] sm:$0xff]  }
 0x4a6   : > { %10506 = vmatmul.mubr.msk.bf16.vlgmr.msra.gmra.mxu1 %vm15459_vm10, %v11271_v33  ;;  %10515 = vmatprep.subr.msk.bf16.mxu0 %vm11803_vm8, %v2962_v37  ;;  %v3057_v35 = vpop.permute.xlu1 %3056  ;;  %v2968_v21 = vsel %vm11817_vm6, %v2956_v55, 0  ;;  %v11278_v33 = vld [vmem:[%s14917_s2 + $0x190] sm:$0xff]  }
 0x4a7   : > { %3112 = vmatpush1.bf16.msra.mxu1 %v3076_v54  ;;  %3008 = vmatpush1.bf16.msra.mxu0 %v2968_v21 }
 0x4a8   : > { %v3055_v58 = vpop.permute.xlu0 %3054  ;;  %2929 = vmatprep.mubr.bf16.mxu1 %v15424_v29 }
 0x4a9   : > { %v3062_v63 = vsel %vm15460_vm14, %v3055_v58, %v3057_v35  ;;  %v3068_v28 = vsel %vm15455_vm2, %v3057_v35, %v3055_v58  ;;  %vm15463_vm14 = vmmov %vm15462_vm0 }
 0x4aa   : > { %10499 = vmatmul.mubr.msk.bf16.gmra.mxu0 %vm15459_vm10, %v11272_v47  ;;  %10525 = vmatprep.subr.msk.bf16.mxu1 %vm11822_vm11, %v3068_v28  ;;  %v3163_v61 = vpop.permute.xlu1 %3162  ;;  %v3074_v46 = vsel %vm11848_vm1, %v3062_v63, 0  ;;  %vm15466_vm2 = vmmov %vm15459_vm10  ;;  %vm15467_vm10 = vcmask 908288   ;;  %vm15473_vm1 = vcmask 261120  }
 0x4ab   : > { %3114 = vmatpush1.bf16.msra.mxu1 %v3074_v46  ;;  %3025 = vmatprep.mubr.bf16.mxu0 %v15424_v29 }
 0x4ac   : > { %v3165_v59 = vpop.permute.xlu0 %3164 }
 0x4ae   : > { %10507 = vmatmul.mubr.msk.bf16.gmra.mxu1 %vm15461_vm12, %v11273_v9  ;;  %v3167_v0 = vpop.permute.xlu1 %3166  ;;  %vm15468_vm12 = vmmov %vm15467_vm10 }
 0x4af   : > { %v3169_v50 = vsel %vm15462_vm0, %v3165_v59, %v3167_v0  ;;  %v3178_v13 = vsel %vm15463_vm14, %v3167_v0, %v3165_v59  ;;  %3131 = vmatprep.mubr.bf16.mxu1 %v15424_v29  ;;  %vm15471_vm0 = vnez %v15470_v36 }
 0x4b0   : > { %v3271_v11 = vpop.permute.xlu0 %3270  ;;  %10534 = vmatprep.subr.msk.bf16.mxu0 %vm11884_vm4, %v3178_v13  ;;  %v3182_v39 = vsel %vm11898_vm7, %v3169_v50, 0 }
 0x4b2   : > { %10516 = vmatmul.mubr.msk.bf16.vlgmr.msra.gmra.mxu0 %vm15466_vm2, %v11274_v10  ;;  %v3273_v51 = vpop.permute.xlu1 %3272  ;;  %vm15472_vm2 = vmmov %vm15463_vm14 }
 0x4b3   : > { %3218 = vmatpush1.bf16.msra.mxu0 %v3182_v39  ;;  %v3275_v45 = vsel %vm15467_vm10, %v3271_v11, %v3273_v51  ;;  %v3284_v7 = vsel %vm15468_vm12, %v3273_v51, %v3271_v11  ;;  %3035 = vmatprep.mubr.bf16.mxu0 %v15424_v29  ;;  %vm15474_vm12 = vmmov %vm15467_vm10 }
 0x4b4   : > { %v3161_v19 = vpop.permute.xlu0 %3160  ;;  %10544 = vmatprep.subr.msk.bf16.mxu1 %vm11903_vm9, %v3284_v7  ;;  %v3288_v60 = vsel %vm15471_vm0, %v3275_v45, 0 }
 0x4b5   : > { %v3168_v40 = vsel %vm15463_vm14, %v3161_v19, %v3163_v61  ;;  %v3174_v18 = vsel %vm15472_vm2, %v3163_v61, %v3161_v19  ;;  %vm15475_vm14 = vmmov %vm15473_vm1 }
 0x4b6   : > { %10526 = vmatmul.mubr.msk.bf16.vlgmr.msra.gmra.mxu1 %vm15473_vm1, %v11275_v24  ;;  %10535 = vmatprep.subr.msk.bf16.mxu0 %vm11884_vm4, %v3174_v18  ;;  %v3180_v12 = vsel %vm11898_vm7, %v3168_v40, 0  ;;  %v3269_v41 = vpop.permute.xlu1 %3268  ;;  %vm15476_vm2 = vmmov %vm15473_vm1 }
 0x4b7   : > { %3324 = vmatpush1.bf16.msra.mxu1 %v3288_v60  ;;  %3220 = vmatpush1.bf16.msra.mxu0 %v3180_v12 }
 0x4b8   : > { %v3267_v15 = vpop.permute.xlu0 %3266  ;;  %3141 = vmatprep.mubr.bf16.mxu1 %v15424_v29 }
 0x4b9   : > { %v3274_v49 = vsel %vm15467_vm10, %v3267_v15, %v3269_v41  ;;  %v3280_v52 = vsel %vm15474_vm12, %v3269_v41, %v3267_v15  ;;  %vm15477_vm10 = vmmov %vm15473_vm1 }
 0x4ba   : > { %10517 = vmatmul.mubr.msk.bf16.gmra.mxu0 %vm15473_vm1, %v11276_v20  ;;  %10545 = vmatprep.subr.msk.bf16.mxu1 %vm11903_vm9, %v3280_v52  ;;  %v3286_v27 = vsel %vm15471_vm0, %v3274_v49, 0  ;;  %vm15478_vm12 = vmmov %vm15473_vm1 }
 0x4bb   : > { %3326 = vmatpush1.bf16.msra.mxu1 %v3286_v27  ;;  %3237 = vmatprep.mubr.bf16.mxu0 %v15424_v29 }
 0x4be   : > { %10527 = vmatmul.mubr.msk.bf16.gmra.mxu1 %vm15475_vm14, %v11277_v43  ;;  %vm15495_vm14 = vcmask 130048  }
 0x4bf   : > { %3343 = vmatprep.mubr.bf16.mxu1 %v15424_v29 }
 0x4c2   : > { %10536 = vmatmul.mubr.msk.bf16.vlgmr.msra.gmra.mxu0 %vm15476_vm2, %v11278_v33  ;;  %vm15496_vm2 = vmmov %vm15495_vm14 }
 0x4c3   : > { %3247 = vmatprep.mubr.bf16.mxu0 %v15424_v29 }
 0x4c6   : > { %10546 = vmatmul.mubr.msk.bf16.vlgmr.msra.gmra.mxu1 %vm15477_vm10, %v11279_v3 }
 0x4c7   : > { %3353 = vmatprep.mubr.bf16.mxu1 %v15424_v29 }
 0x4ca   : > { %10537 = vmatmul.mubr.msk.bf16.gmra.mxu0 %vm15478_vm12, %v11280_v30  ;;  %vm15500_vm12 = vmmov %vm15496_vm2 }
 0x4cb   : > { %3527 = vmatprep.mubr.bf16.mxu0 %v15424_v29 }
 0x4ce   : > { %10547 = vmatmul.mubr.msk.bf16.gmra.mxu1 %vm15473_vm1, %v11281_v23  ;;  %vm15501_vm1 = vmmov %vm15496_vm2 }
 0x4cf   : > { %3596 = vmatprep.mubr.bf16.mxu1 %v15424_v29 }
 0x546   : > { %v2566_v54 = vpop.f32.mrf.mxu1 }
 0x548   : > { %v12620_v55 = vpop.f32.mrf.mxu1 }
 0x54a   : > { %v2570_v37 = vpop.f32.mrf.mxu1 }
 0x54c   : > { %v2572_v35 = vpop.f32.mrf.mxu1 }
 0x54e   : > { %v2576_v21 = vpop.f32.mrf.mxu1 }
 0x550   : > { %v2578_v47 = vpop.f32.mrf.mxu1 }
 0x552   : > { %v2580_v58 = vpop.f32.mrf.mxu1  ;;  %v2635_v63 = vpop.f32.mrf.mxu0 }
 0x553   : > { %v2636_v53 = vadd.f32 %v2635_v63, %v2566_v54 }
 0x554   : > { %v12622_v28 = vpop.f32.mrf.mxu1  ;;  %v2637_v61 = vpop.f32.mrf.mxu0 }
 0x556   : > { %v2639_v46 = vpop.f32.mrf.mxu0  ;;  %v2733_v9 = vpop.f32.mrf.mxu1 }
 0x557   : > { %v2640_v2 = vadd.f32 %v2639_v46, %v2570_v37 }
 0x558   : > { %v2641_v59 = vpop.f32.mrf.mxu0  ;;  %v12624_v0 = vpop.f32.mrf.mxu1 }
 0x559   : > { %15479 = vst [vmem:[#allocation2_spill] sm:$0xff] %v12624_v0  ;;  %v2642_v62 = vadd.f32 %v2641_v59, %v2572_v35 }
 0x55a   : > { %v2645_v10 = vpop.f32.mrf.mxu0  ;;  %v2737_v50 = vpop.f32.mrf.mxu1 }
 0x55b   : > { %v2646_v38 = vadd.f32 %v2645_v10, %v2576_v21 }
 0x55c   : > { %v2647_v13 = vpop.f32.mrf.mxu0  ;;  %v2739_v11 = vpop.f32.mrf.mxu1 }
 0x55d   : > { %v2648_v29 = vadd.f32 %v2647_v13, %v2578_v47 }
 0x55e   : > { %v2649_v39 = vpop.f32.mrf.mxu0  ;;  %v2743_v51 = vpop.f32.mrf.mxu1 }
 0x55f   : > { %v2756_v8 = vadd.f32 %v2743_v51, %v2646_v38 }
 0x560   : > { %v2651_v24 = vpop.f32.mrf.mxu0  ;;  %v2745_v45 = vpop.f32.mrf.mxu1  ;;  %v15487_v35 = vld [vmem:[#allocation2_spill] sm:$0xff] }
 0x561   : > { %v2757_v0 = vadd.f32 %v2745_v45, %v2648_v29  ;;  %v3395_v45 = vpop.permute.xlu1 %3394 }
 0x562   : > { %v2747_v7 = vpop.f32.mrf.mxu1  ;;  %v2839_v19 = vpop.f32.mrf.mxu0 }
 0x564   : > { %v2749_v60 = vpop.f32.mrf.mxu1  ;;  %v2841_v40 = vpop.f32.mrf.mxu0 }
 0x566   : > { %v2843_v18 = vpop.f32.mrf.mxu0  ;;  %v2921_v12 = vpop.f32.mrf.mxu1 }
 0x568   : > { %v2845_v20 = vpop.f32.mrf.mxu0  ;;  %v12626_v41 = vpop.f32.mrf.mxu1 }
 0x569   : > { %15480 = vst [vmem:[#allocation5_spill] sm:$0xff] %v12626_v41  ;;  %v2752_v41 = vadd.f32 %v2733_v9, %v2636_v53 }
 0x56a   : > { %v2849_v15 = vpop.f32.mrf.mxu0  ;;  %v2925_v49 = vpop.f32.mrf.mxu1 }
 0x56b   : > { %v2858_v63 = vadd.f32 %v2839_v19, %v2752_v41 }
 0x56c   : > { %v2851_v52 = vpop.f32.mrf.mxu0  ;;  %v2927_v27 = vpop.f32.mrf.mxu1 }
 0x56d   : > { %v2863_v59 = vadd.f32 %v2851_v52, %v2757_v0  ;;  %v2940_v29 = vadd.f32 %v2921_v12, %v2858_v63  ;;  %v3390_v52 = vpop.permute.xlu0 %3389 }
 0x56e   : > { %v2853_v43 = vpop.f32.mrf.mxu0  ;;  %v2931_v33 = vpop.f32.mrf.mxu1 }
 0x570   : > { %v2855_v3 = vpop.f32.mrf.mxu0  ;;  %v2933_v30 = vpop.f32.mrf.mxu1 }
 0x571   : > { %v2945_v9 = vadd.f32 %v2933_v30, %v2863_v59 }
 0x572   : > { %v2935_v23 = vpop.f32.mrf.mxu1  ;;  %v3027_v32 = vpop.f32.mrf.mxu0 }
 0x574   : > { %v12628_v5 = vpop.f32.mrf.mxu1  ;;  %v12630_v26 = vpop.f32.mrf.mxu0 }
 0x575   : > { %15481 = vst [vmem:[#allocation4_spill] sm:$0xff] %v12628_v5  ;;  %15482 = vst [vmem:[#allocation6_spill] sm:$0xff] %v12630_v26  ;;  %v2862_v26 = vadd.f32 %v2849_v15, %v2756_v8  ;;  %v2638_v5 = vadd.f32 %v2637_v61, %v12620_v55 }
 0x576   : > { %v3031_v16 = vpop.f32.mrf.mxu0  ;;  %v12632_v44 = vpop.f32.mrf.mxu1 }
 0x577   : > { %15483 = vst [vmem:[#allocation3_spill] sm:$0xff] %v12632_v44  ;;  %v2650_v44 = vadd.f32 %v2649_v39, %v2580_v58  ;;  %v2944_v54 = vadd.f32 %v2931_v33, %v2862_v26  ;;  %v2753_v47 = vadd.f32 %v15487_v35, %v2638_v5  ;;  %v15488_v5 = vld [vmem:[#allocation5_spill] sm:$0xff] }
 0x578   : > { %v3033_v57 = vpop.f32.mrf.mxu0  ;;  %v12634_v4 = vpop.f32.mrf.mxu1 }
 0x579   : > { %15484 = vst [vmem:[#allocation7_spill] sm:$0xff] %v12634_v4  ;;  %v2754_v4 = vadd.f32 %v2737_v50, %v2640_v2  ;;  %v2758_v37 = vadd.f32 %v2747_v7, %v2650_v44 }
 0x57a   : > { %v3037_v48 = vpop.f32.mrf.mxu0  ;;  %v3137_v36 = vpop.f32.mrf.mxu1 }
 0x57b   : > { %v2860_v38 = vadd.f32 %v2843_v18, %v2754_v4  ;;  %v2864_v55 = vadd.f32 %v2853_v43, %v2758_v37  ;;  %v3050_v53 = vadd.f32 %v3037_v48, %v2944_v54 }
 0x57c   : > { %v3039_v1 = vpop.f32.mrf.mxu0  ;;  %v3139_v6 = vpop.f32.mrf.mxu1  ;;  %v15489_v7 = vld [vmem:[#allocation4_spill] sm:$0xff]  ;;  %v15490_v18 = vld [vmem:[#allocation6_spill] sm:$0xff] }
 0x57d   : > { %v2942_v50 = vadd.f32 %v2925_v49, %v2860_v38  ;;  %v2946_v4 = vadd.f32 %v2935_v23, %v2864_v55  ;;  %v3051_v51 = vadd.f32 %v3039_v1, %v2945_v9 }
 0x57e   : > { %v3041_v42 = vpop.f32.mrf.mxu0  ;;  %v3143_v17 = vpop.f32.mrf.mxu1 }
 0x57f   : > { %v3048_v26 = vadd.f32 %v3031_v16, %v2942_v50  ;;  %v3385_v50 = vpop.permute.xlu1 %3384 }
 0x580   : > { %v12636_v31 = vpop.f32.mrf.mxu0  ;;  %v3145_v34 = vpop.f32.mrf.mxu1  ;;  %v15493_v33 = vld [vmem:[#allocation7_spill] sm:$0xff] }
 0x581   : > { %15485 = vst [vmem:[#allocation8_spill] sm:$0xff] %v12636_v31  ;;  %v2755_v31 = vadd.f32 %v2739_v11, %v2642_v62  ;;  %v2859_v62 = vadd.f32 %v2841_v40, %v2753_v47  ;;  %v3156_v11 = vadd.f32 %v3143_v17, %v3050_v53  ;;  %v3154_v19 = vadd.f32 %v3137_v36, %v3048_v26 }
 0x582   : > { %v3147_v25 = vpop.f32.mrf.mxu1  ;;  %v12638_v22 = vpop.f32.mrf.mxu0  ;;  %v3157_v16 = vadd.f32 %v3145_v34, %v3051_v51 }
 0x583   : > { %15486 = vst [vmem:[#allocation9_spill] sm:$0xff] %v12638_v22  ;;  %v2652_v22 = vadd.f32 %v2651_v24, %v12622_v28  ;;  %v2861_v46 = vadd.f32 %v2845_v20, %v2755_v31  ;;  %v2941_v39 = vadd.f32 %v15488_v5, %v2859_v62  ;;  %v3046_v31 = vadd.f32 %v3027_v32, %v2940_v29  ;;  %v15491_v20 = vld [vmem:[#allocation3_spill] sm:$0xff]  ;;  %v3380_v62 = vpop.permute.xlu0 %3379 }
 0x584   : > { %v3149_v56 = vpop.f32.mrf.mxu1  ;;  %v12640_v14 = vpop.f32.mrf.mxu0 }
 0x585   : > { %v2759_v8 = vadd.f32 %v2749_v60, %v2652_v22  ;;  %v2943_v61 = vadd.f32 %v2927_v27, %v2861_v46  ;;  %v3052_v60 = vadd.f32 %v3041_v42, %v2946_v4  ;;  %v3047_v12 = vadd.f32 %v15490_v18, %v2941_v39 }
 0x586   : > { %v3243_v21 = vpop.f32.mrf.mxu0  ;;  %v3345_v10 = vpop.f32.mrf.mxu1  ;;  %v3152_v41 = vadd.f32 %v15491_v20, %v3046_v31 }
 0x587   : > { %v2865_v44 = vadd.f32 %v2855_v3, %v2759_v8  ;;  %v3049_v0 = vadd.f32 %v3033_v57, %v2943_v61  ;;  %v3158_v1 = vadd.f32 %v3147_v25, %v3052_v60  ;;  %v3260_v27 = vadd.f32 %v3243_v21, %v3154_v19 }
 0x588   : > { %v3245_v2 = vpop.f32.mrf.mxu0  ;;  %v3347_v58 = vpop.f32.mrf.mxu1  ;;  %v15492_v32 = vld [vmem:[#allocation8_spill] sm:$0xff]  ;;  %v3153_v3 = vadd.f32 %v15493_v33, %v3047_v12 }
 0x589   : > { %v2947_v48 = vadd.f32 %v15489_v7, %v2865_v44  ;;  %v3155_v15 = vadd.f32 %v3139_v6, %v3049_v0  ;;  %v10641_v7 = vld [vmem:[%s14918_s3 + $0x88] sm:$0xff] }
 0x58a   : > { %v3249_v13 = vpop.f32.mrf.mxu0  ;;  %v3349_v28 = vpop.f32.mrf.mxu1  ;;  %v15494_v30 = vld [vmem:[#allocation9_spill] sm:$0xff]  ;;  %v3259_v34 = vadd.f32 %v12640_v14, %v3153_v3 }
 0x58b   : > { %v3262_v40 = vadd.f32 %v3249_v13, %v3156_v11  ;;  %v3053_v57 = vadd.f32 %v15492_v32, %v2947_v48  ;;  %v3258_v36 = vadd.f32 %v15494_v30, %v3152_v41  ;;  %v3261_v54 = vadd.f32 %v3245_v2, %v3155_v15  ;;  %v10640_v48 = vld [vmem:[%s14918_s3 + $0x80] sm:$0xff] }
 0x58c   : > { %v3251_v24 = vpop.f32.mrf.mxu0  ;;  %v3351_v22 = vpop.f32.mrf.mxu1  ;;  %v3366_v35 = vadd.f32 %v3349_v28, %v3260_v27  ;;  %v3365_v55 = vadd.f32 %v3347_v58, %v3259_v34  ;;  %v15498_v41 = vld [vmem:[#allocation10_spill] sm:$0xff] }
 0x58d   : > { %v3263_v42 = vadd.f32 %v3251_v24, %v3157_v16  ;;  %v3159_v38 = vadd.f32 %v3149_v56, %v3053_v57  ;;  %v3364_v47 = vadd.f32 %v3345_v10, %v3258_v36  ;;  %v3367_v59 = vadd.f32 %v3351_v22, %v3261_v54  ;;  %v10643_v22 = vld [vmem:[%s14918_s3 + $0x98] sm:$0xff]  ;;  %v11282_v57 = vld [vmem:[%s14917_s2 + $0x1c0] sm:$0xff]  }
 0x58e   : > { %v3253_v17 = vpop.f32.mrf.mxu0  ;;  %v3355_v49 = vpop.f32.mrf.mxu1  ;;  %v3399_v29 = vadd.f32 %v3385_v50, %v3366_v35  ;;  %v3398_v10 = vadd.f32 %v3380_v62, %v3365_v55  ;;  %vm15499_vm10 = vnez %v15498_v41 }
 0x58f   : > { %v3368_v43 = vadd.f32 %v3355_v49, %v3262_v40  ;;  %v3264_v6 = vadd.f32 %v3253_v17, %v3158_v1  ;;  %v3397_v2 = vadd.f32 %v3380_v62, %v3364_v47  ;;  %v3400_v13 = vadd.f32 %v3385_v50, %v3367_v59 }
 0x590   : > { %v3255_v23 = vpop.f32.mrf.mxu0  ;;  %v3357_v37 = vpop.f32.mrf.mxu1  ;;  %v3407_v4 = vmax.f32 %v3399_v29, 0.0  ;;  %v3406_v0 = vmax.f32 %v3398_v10, 0.0  ;;  %v11286_v10 = vld [vmem:[%s14917_s2 + $0x1b8] sm:$0xff]  }
 0x591   : > { %v3369_v63 = vadd.f32 %v3357_v37, %v3263_v42  ;;  %v3401_v25 = vadd.f32 %v3390_v52, %v3368_v43  ;;  %v3265_v21 = vadd.f32 %v3255_v23, %v3159_v38  ;;  %v3405_v39 = vmax.f32 %v3397_v2, 0.0  ;;  %v11283_v38 = vld [vmem:[%s14917_s2 + $0x1c8] sm:$0xff]  }
 0x592   : > { %v3359_v46 = vpop.f32.mrf.mxu1  ;;  %v3408_v31 = vmax.f32 %v3400_v13, 0.0  ;;  %v15503_v43 = vmov 0   ;;  %v15522_v13 = vld [vmem:[#allocation17_spill] sm:$0xff] }
 0x593   : > { %v3370_v8 = vadd.f32 %v3359_v46, %v3264_v6  ;;  %v3402_v61 = vadd.f32 %v3390_v52, %v3369_v63  ;;  %v3409_v28 = vmax.f32 %v3401_v25, 0.0  ;;  %v12659_v51 = vpack.c.bf16 %v3407_v4, %v3405_v39  ;;  %v15514_v25 = vld [vmem:[#allocation14_spill] sm:$0xff] }
 0x594   : > { %v3361_v53 = vpop.f32.mrf.mxu1  ;;  %v12663_v24 = vpack.c.bf16 %v3408_v31, %v3406_v0 }
 0x595   : > { %v3403_v9 = vadd.f32 %v3395_v45, %v3370_v8  ;;  %v3371_v56 = vadd.f32 %v3361_v53, %v3265_v21  ;;  %v3410_v26 = vmax.f32 %v3402_v61, 0.0  ;;  %v11284_v8 = vld [vmem:[%s14917_s2 + $0x1b0] sm:$0xff]  }
 0x596   : > { %v11285_v61 = vld [vmem:[%s14917_s2 + $0x1d0] sm:$0xff]  }
 0x597   : > { %v3411_v44 = vmax.f32 %v3403_v9, 0.0  ;;  %v3404_v14 = vadd.f32 %v3395_v45, %v3371_v56  ;;  %v10642_v45 = vld [vmem:[%s14918_s3 + $0x90] sm:$0xff] }
 0x599   : > { %v12653_v11 = vpack.c.bf16 %v3411_v44, %v3409_v28  ;;  %v3412_v5 = vmax.f32 %v3404_v14, 0.0  ;;  %v15524_v44 = vld [vmem:[#allocation16_spill] sm:$0xff] }
 0x59b   : > { %v12655_v58 = vpack.c.bf16 %v3412_v5, %v3410_v26  ;;  %3456 = vrot.lane.b32.xlu1 %v12653_v11, %s11418_s7 }
 0x59d   : > { %3452 = vrot.lane.b32.xlu0 %v12655_v58, %s11418_s7 }
 0x59f   : > { %3454 = vrot.lane.b32.xlu1 %v12659_v51, %s11418_s7 }
 0x5a1   : > { %3450 = vrot.lane.b32.xlu0 %v12663_v24, %s11418_s7 }
 0x5a3   : > { %3427 = vrot.lane.b32.xlu1 %v12653_v11, %s11419_s8 }
 0x5a5   : > { %3419 = vrot.lane.b32.xlu0 %v12663_v24, %s11419_s8 }
 0x5a7   : > { %3623 = vrot.lane.b32.xlu1 %v12653_v11, %s11420_s9 }
 0x5a9   : > { %3421 = vrot.lane.b32.xlu0 %v12655_v58, %s11419_s8 }
 0x5ab   : > { %3425 = vrot.lane.b32.xlu1 %v12659_v51, %s11419_s8 }
 0x5ad   : > { %3619 = vrot.lane.b32.xlu0 %v12655_v58, %s11420_s9 }
 0x5af   : > { %3621 = vrot.lane.b32.xlu1 %v12659_v51, %s11420_s9 }
 0x5b1   : > { %3617 = vrot.lane.b32.xlu0 %v12663_v24, %s11420_s9 }
 0x5b3   : > { %3729 = vrot.lane.b32.xlu1 %v12653_v11, %s11421_s10 }
 0x5b5   : > { %3725 = vrot.lane.b32.xlu0 %v12655_v58, %s11421_s10 }
 0x5b7   : > { %3727 = vrot.lane.b32.xlu1 %v12659_v51, %s11421_s10 }
 0x5b9   : > { %3723 = vrot.lane.b32.xlu0 %v12663_v24, %s11421_s10 }
 0x5bb   : > { %3913 = vrot.lane.b32.xlu1 %v12663_v24, %s11422_s11 }
 0x5bd   : > { %3915 = vrot.lane.b32.xlu0 %v12653_v11, %s11422_s11 }
 0x5bf   : > { %3917 = vrot.lane.b32.xlu1 %v12655_v58, %s11422_s11 }
 0x5c1   : > { %4021 = vrot.lane.b32.xlu0 %v12653_v11, %s11423_s12 }
 0x5c3   : > { %4023 = vrot.lane.b32.xlu1 %v12655_v58, %s11423_s12 }
 0x5c5   : > { %3911 = vrot.lane.b32.xlu0 %v12659_v51, %s11422_s11 }
 0x5c7   : > { %4019 = vrot.lane.b32.xlu1 %v12663_v24, %s11423_s12 }
 0x5c9   : > { %4017 = vrot.lane.b32.xlu0 %v12659_v51, %s11423_s12 }
 0x5cb   : > { %4125 = vrot.lane.b32.xlu1 %v12663_v24, %s11424_s13 }
 0x5cd   : > { %4127 = vrot.lane.b32.xlu0 %v12653_v11, %s11424_s13 }
 0x5cf   : > { %4129 = vrot.lane.b32.xlu1 %v12655_v58, %s11424_s13 }
 0x5d1   : > { %4233 = vrot.lane.b32.xlu0 %v12653_v11, %s11425_s14 }
 0x5d3   : > { %4235 = vrot.lane.b32.xlu1 %v12655_v58, %s11425_s14 }
 0x5d5   : > { %4123 = vrot.lane.b32.xlu0 %v12659_v51, %s11424_s13 }
 0x5d7   : > { %4231 = vrot.lane.b32.xlu1 %v12663_v24, %s11425_s14 }
 0x5d9   : > { %4229 = vrot.lane.b32.xlu0 %v12659_v51, %s11425_s14 }
 0x5db   : > { %4365 = vperm.xlu1 %11222, %v10643_v22  }
 0x5dd   : > { %4360 = vperm.xlu0 %11221, %v10642_v45  }
 0x5df   : > { %4355 = vperm.xlu1 %11222, %v10641_v7  }
 0x5e1   : > { %4350 = vperm.xlu0 %11221, %v10640_v48  }
 0x60d   : > { %v3457_v19 = vpop.permute.xlu1 %3456 }
 0x60f   : > { %v3453_v60 = vpop.permute.xlu0 %3452 }
 0x610   : > { %v3468_v40 = vsel %vm15495_vm14, %v3453_v60, %v3457_v19  ;;  %v3459_v18 = vsel %vm15496_vm2, %v3457_v19, %v3453_v60  ;;  %vm15502_vm14 = vcmask 261120   ;;  %vm15504_vm2 = vcmask 138240  }
 0x611   : > { %10562 = vmatprep.subr.msk.bf16.mxu0 %vm15418_vm13, %v3459_v18  ;;  %v3455_v20 = vpop.permute.xlu1 %3454  ;;  %v3472_v15 = vsel %vm15499_vm10, %v3468_v40, 0  ;;  %v11289_v40 = vld [vmem:[%s14917_s2 + $0x1f0] sm:$0xff]  }
 0x612   : > { %3508 = vmatpush1.bf16.msra.mxu0 %v3472_v15 }
 0x613   : > { %v3451_v16 = vpop.permute.xlu0 %3450 }
 0x614   : > { %v3464_v17 = vsel %vm15500_vm12, %v3451_v16, %v3455_v20  ;;  %v3458_v49 = vsel %vm15501_vm1, %v3455_v20, %v3451_v16  ;;  %vm15505_vm12 = vmmov %vm15504_vm2 }
 0x615   : > { %10563 = vmatprep.subr.msk.bf16.mxu0 %vm15418_vm13, %v3458_v49  ;;  %v3428_v52 = vpop.permute.xlu1 %3427  ;;  %v3470_v32 = vsel %vm15499_vm10, %v3464_v17, 0  ;;  %vm15508_vm1 = vmmov %vm15504_vm2  ;;  %vm15512_vm10 = vcmask 261120   ;;  %v15536_v17 = vld [vmem:[#allocation21_spill] sm:$0xff] }
 0x616   : > { %3510 = vmatpush1.bf16.msra.mxu0 %v3470_v32 }
 0x617   : > { %v3420_v1 = vpop.permute.xlu0 %3419 }
 0x619   : > { %10564 = vmatmul.mubr.msk.bf16.vlgmr.msra.gmra.mxu0 %vm15502_vm14, %v11282_v57  ;;  %v3624_v27 = vpop.permute.xlu1 %3623  ;;  %vm15509_vm14 = vmmov %vm15508_vm1 }
 0x61a   : > { %3537 = vmatprep.mubr.bf16.mxu0 %v15503_v43 }
 0x61b   : > { %v3422_v33 = vpop.permute.xlu0 %3421 }
 0x61c   : > { %v3439_v3 = vsel %vm15504_vm2, %v3422_v33, %v3428_v52  ;;  %v3430_v30 = vsel %vm15505_vm12, %v3428_v52, %v3422_v33  ;;  %vm15510_vm2 = vcmask 121856  }
 0x61d   : > { %10568 = vmatprep.subr.msk.bf16.mxu1 %vm11689_vm5, %v3430_v30  ;;  %v3426_v42 = vpop.permute.xlu1 %3425  ;;  %v3443_v37 = vsel %vm11685_vm3, %v3439_v3, 0  ;;  %vm15511_vm12 = vmmov %vm15510_vm2 }
 0x61e   : > { %v3435_v54 = vsel %vm15508_vm1, %v3420_v1, %v3426_v42  ;;  %3577 = vmatpush1.bf16.msra.mxu1 %v3443_v37  ;;  %v3429_v35 = vsel %vm15509_vm14, %v3426_v42, %v3420_v1  ;;  %vm15515_vm1 = vnez %v15514_v25  ;;  %vm15517_vm14 = vmmov %vm15510_vm2 }
 0x61f   : > { %v3620_v6 = vpop.permute.xlu0 %3619  ;;  %10569 = vmatprep.subr.msk.bf16.mxu1 %vm11689_vm5, %v3429_v35  ;;  %v3441_v59 = vsel %vm11685_vm3, %v3435_v54, 0 }
 0x620   : > { %v3635_v34 = vsel %vm15510_vm2, %v3620_v6, %v3624_v27  ;;  %v3626_v47 = vsel %vm15511_vm12, %v3624_v27, %v3620_v6  ;;  %vm15519_vm12 = vcmask 7168   ;;  %v11290_v27 = vld [vmem:[%s14917_s2 + $0x1e8] sm:$0xff]   ;;  %v11292_v6 = vld [vmem:[%s14917_s2 + $0x200] sm:$0xff]  }
 0x621   : > { %10565 = vmatmul.mubr.msk.bf16.gmra.mxu0 %vm15512_vm10, %v11283_v38  ;;  %10578 = vmatprep.subr.msk.bf16.mxu0 %vm15329_vm15, %v3626_v47  ;;  %v3622_v46 = vpop.permute.xlu1 %3621  ;;  %v3639_v21 = vsel %vm15515_vm1, %v3635_v34, 0  ;;  %vm15516_vm10 = vmmov %vm15510_vm2  ;;  %vm15518_vm2 = vcmask 261120   ;;  %v11291_v38 = vld [vmem:[%s14917_s2 + $0x1f8] sm:$0xff]  }
 0x622   : > { %3579 = vmatpush1.bf16.msra.mxu1 %v3441_v59  ;;  %3675 = vmatpush1.bf16.msra.mxu0 %v3639_v21 }
 0x623   : > { %v3618_v50 = vpop.permute.xlu0 %3617  ;;  %3694 = vmatprep.mubr.bf16.mxu0 %v15503_v43 }
 0x624   : > { %v3631_v55 = vsel %vm15516_vm10, %v3618_v50, %v3622_v46  ;;  %v3625_v53 = vsel %vm15517_vm14, %v3622_v46, %v3618_v50  ;;  %vm15520_vm10 = vmmov %vm15519_vm12 }
 0x625   : > { %10570 = vmatmul.mubr.msk.bf16.vlgmr.msra.gmra.mxu1 %vm15518_vm2, %v11284_v8  ;;  %10579 = vmatprep.subr.msk.bf16.mxu0 %vm15329_vm15, %v3625_v53  ;;  %v3730_v62 = vpop.permute.xlu1 %3729  ;;  %v3637_v29 = vsel %vm15515_vm1, %v3631_v55, 0  ;;  %vm15521_vm14 = vmmov %vm15518_vm2  ;;  %vm15523_vm2 = vnez %v15522_v13  ;;  %vm15525_vm1 = vnez %v15524_v44  ;;  %vm15540_vm15 = vcmask 261120   ;;  %v11293_v55 = vld [vmem:[%s14917_s2 + $0x210] sm:$0xff]  }
 0x626   : > { %3677 = vmatpush1.bf16.msra.mxu0 %v3637_v29  ;;  %3606 = vmatprep.mubr.bf16.mxu1 %v15503_v43 }
 0x627   : > { %v3726_v9 = vpop.permute.xlu0 %3725  ;;  %3862 = vmatprep.subr.bf16.mxu0 %v12655_v58 }
 0x628   : > { %v3741_v56 = vsel %vm15519_vm12, %v3726_v9, %v3730_v62  ;;  %v3732_v2 = vsel %vm15520_vm10, %v3730_v62, %v3726_v9  ;;  %vm15526_vm12 = vmmov %vm15520_vm10 }
 0x629   : > { %10580 = vmatmul.mubr.msk.bf16.vlgmr.msra.gmra.mxu0 %vm15521_vm14, %v11285_v61  ;;  %10588 = vmatprep.subr.msk.bf16.mxu1 %vm15523_vm2, %v3732_v2  ;;  %v3728_v28 = vpop.permute.xlu1 %3727  ;;  %v3745_v14 = vsel %vm15525_vm1, %v3741_v56, 0 }
 0x62a   : > { %3781 = vmatpush1.bf16.msra.mxu1 %v3745_v14  ;;  %3863 = vmatpush1.bf16.msra.mxu0 %v12653_v11  ;;  %v11287_v11 = vld [vmem:[%s14917_s2 + $0x1d8] sm:$0xff]  }
 0x62b   : > { %v3724_v4 = vpop.permute.xlu0 %3723  ;;  %3864 = vmatprep.subr.bf16.mxu0 %v12663_v24  ;;  %3704 = vmatprep.mubr.bf16.mxu0 %v15503_v43  ;;  %v11288_v24 = vld [vmem:[%s14917_s2 + $0x1e0] sm:$0xff]  }
 0x62c   : > { %v3737_v26 = vsel %vm15526_vm12, %v3724_v4, %v3728_v28  ;;  %v3731_v5 = vsel %vm15520_vm10, %v3728_v28, %v3724_v4  ;;  %vm15527_vm12 = vmmov %vm15521_vm14  ;;  %vm15528_vm10 = vcmask 1039360  }
 0x62d   : > { %10571 = vmatmul.mubr.msk.bf16.gmra.mxu1 %vm15521_vm14, %v11286_v10  ;;  %10589 = vmatprep.subr.msk.bf16.mxu1 %vm15523_vm2, %v3731_v5  ;;  %v3914_v39 = vpop.permute.xlu1 %3913  ;;  %v3743_v31 = vsel %vm15525_vm1, %v3737_v26, 0  ;;  %vm15529_vm14 = vmmov %vm15528_vm10  ;;  %v11294_v10 = vld [vmem:[%s14917_s2 + $0x208] sm:$0xff]  }
 0x62e   : > { %3783 = vmatpush1.bf16.msra.mxu1 %v3743_v31  ;;  %3865 = vmatpush1.bf16.msra.mxu0 %v12659_v51  ;;  %vm15532_vm1 = vmmov %vm15527_vm12 }
 0x62f   : > { %v3916_v58 = vpop.permute.xlu0 %3915  ;;  %3800 = vmatprep.mubr.bf16.mxu1 %v15503_v43 }
 0x631   : > { %10581 = vmatmul.mubr.msk.bf16.gmra.mxu0 %vm15527_vm12, %v11287_v11  ;;  %v3918_v0 = vpop.permute.xlu1 %3917  ;;  %vm15533_vm12 = vcmask 924672   ;;  %v11295_v11 = vld [vmem:[%s14917_s2 + $0x218] sm:$0xff]  }
 0x632   : > { %v3920_v22 = vsel %vm15528_vm10, %v3916_v58, %v3918_v0  ;;  %v3929_v45 = vsel %vm15529_vm14, %v3918_v0, %v3916_v58  ;;  %3882 = vmatprep.mubr.bf16.mxu0 %v15503_v43  ;;  %vm15534_vm10 = vmmov %vm15533_vm12  ;;  %vm15537_vm14 = vnez %v15536_v17  ;;  %v11296_v58 = vld [vmem:[%s14917_s2 + $0x220] sm:$0xff]   ;;  %v11297_v0 = vld [vmem:[%s14917_s2 + $0x230] sm:$0xff]  }
 0x633   : > { %v4022_v7 = vpop.permute.xlu0 %4021  ;;  %10606 = vmatprep.subr.msk.bf16.mxu1 %vm11803_vm8, %v3929_v45  ;;  %v3933_v19 = vsel %vm11817_vm6, %v3920_v22, 0  ;;  %v11299_v22 = vld [vmem:[%s14917_s2 + $0x238] sm:$0xff]  }
 0x635   : > { %10590 = vmatmul.mubr.msk.bf16.vlgmr.msra.gmra.mxu1 %vm15532_vm1, %v11288_v24  ;;  %v4024_v60 = vpop.permute.xlu1 %4023  ;;  %vm15538_vm1 = vcmask 1039360   ;;  %v11298_v24 = vld [vmem:[%s14917_s2 + $0x228] sm:$0xff]  }
 0x636   : > { %3969 = vmatpush1.bf16.msra.mxu1 %v3933_v19  ;;  %v4026_v18 = vsel %vm15533_vm12, %v4022_v7, %v4024_v60  ;;  %v4035_v20 = vsel %vm15534_vm10, %v4024_v60, %v4022_v7  ;;  %3810 = vmatprep.mubr.bf16.mxu1 %v15503_v43  ;;  %vm15539_vm2 = vmmov %vm15538_vm1 }
 0x637   : > { %v3912_v15 = vpop.permute.xlu0 %3911  ;;  %10616 = vmatprep.subr.msk.bf16.mxu0 %vm11822_vm11, %v4035_v20  ;;  %v4039_v49 = vsel %vm15537_vm14, %v4026_v18, 0  ;;  %vm15541_vm12 = vmmov %vm15534_vm10 }
 0x638   : > { %v3919_v52 = vsel %vm15538_vm1, %v3912_v15, %v3914_v39  ;;  %v3925_v32 = vsel %vm15539_vm2, %v3914_v39, %v3912_v15  ;;  %vm15542_vm2 = vmmov %vm15534_vm10  ;;  %vm15544_vm1 = vcmask 916480  }
 0x639   : > { %10598 = vmatmul.mubr.msk.bf16.vlgmr.msra.gmra.mxu0 %vm15540_vm15, %v11289_v40  ;;  %10607 = vmatprep.subr.msk.bf16.mxu1 %vm11803_vm8, %v3925_v32  ;;  %v4020_v57 = vpop.permute.xlu1 %4019  ;;  %v3931_v1 = vsel %vm11817_vm6, %v3919_v52, 0  ;;  %vm15543_vm10 = vmmov %vm15540_vm15 }
 0x63a   : > { %4075 = vmatpush1.bf16.msra.mxu0 %v4039_v49  ;;  %3971 = vmatpush1.bf16.msra.mxu1 %v3931_v1 }
 0x63b   : > { %v4018_v33 = vpop.permute.xlu0 %4017  ;;  %3892 = vmatprep.mubr.bf16.mxu0 %v15503_v43 }
 0x63c   : > { %v4025_v3 = vsel %vm15541_vm12, %v4018_v33, %v4020_v57  ;;  %v4031_v30 = vsel %vm15542_vm2, %v4020_v57, %v4018_v33  ;;  %vm15545_vm12 = vmmov %vm15544_vm1 }
 0x63d   : > { %10591 = vmatmul.mubr.msk.bf16.gmra.mxu1 %vm15540_vm15, %v11290_v27  ;;  %10617 = vmatprep.subr.msk.bf16.mxu0 %vm11822_vm11, %v4031_v30  ;;  %v4126_v42 = vpop.permute.xlu1 %4125  ;;  %v4037_v37 = vsel %vm15537_vm14, %v4025_v3, 0  ;;  %vm15548_vm2 = vmmov %vm15543_vm10  ;;  %vm15549_vm15 = vcmask 908288  }
 0x63e   : > { %4077 = vmatpush1.bf16.msra.mxu0 %v4037_v37  ;;  %3988 = vmatprep.mubr.bf16.mxu1 %v15503_v43 }
 0x63f   : > { %v4128_v54 = vpop.permute.xlu0 %4127 }
 0x641   : > { %10599 = vmatmul.mubr.msk.bf16.gmra.mxu0 %vm15543_vm10, %v11291_v38  ;;  %v4130_v35 = vpop.permute.xlu1 %4129  ;;  %vm15550_vm10 = vmmov %vm15549_vm15 }
 0x642   : > { %v4132_v34 = vsel %vm15544_vm1, %v4128_v54, %v4130_v35  ;;  %v4141_v47 = vsel %vm15545_vm12, %v4130_v35, %v4128_v54  ;;  %4094 = vmatprep.mubr.bf16.mxu0 %v15503_v43  ;;  %vm15553_vm12 = vmmov %vm15544_vm1 }
 0x643   : > { %v4234_v46 = vpop.permute.xlu0 %4233  ;;  %10626 = vmatprep.subr.msk.bf16.mxu1 %vm11884_vm4, %v4141_v47  ;;  %v4145_v8 = vsel %vm11898_vm7, %v4132_v34, 0 }
 0x645   : > { %10608 = vmatmul.mubr.msk.bf16.vlgmr.msra.gmra.mxu1 %vm15548_vm2, %v11292_v6  ;;  %v4236_v50 = vpop.permute.xlu1 %4235 }
 0x646   : > { %4181 = vmatpush1.bf16.msra.mxu1 %v4145_v8  ;;  %v4238_v53 = vsel %vm15549_vm15, %v4234_v46, %v4236_v50  ;;  %v4247_v62 = vsel %vm15550_vm10, %v4236_v50, %v4234_v46  ;;  %3998 = vmatprep.mubr.bf16.mxu1 %v15503_v43  ;;  %vm15554_vm15 = vmmov %vm15550_vm10 }
 0x647   : > { %v4124_v29 = vpop.permute.xlu0 %4123  ;;  %10636 = vmatprep.subr.msk.bf16.mxu0 %vm11903_vm9, %v4247_v62  ;;  %v4251_v56 = vsel %vm15471_vm0, %v4238_v53, 0 }
 0x648   : > { %v4131_v2 = vsel %vm15544_vm1, %v4124_v29, %v4126_v42  ;;  %v4137_v28 = vsel %vm15553_vm12, %v4126_v42, %v4124_v29  ;;  %vm15555_vm1 = vmmov %vm15548_vm2 }
 0x649   : > { %10618 = vmatmul.mubr.msk.bf16.vlgmr.msra.gmra.mxu0 %vm15548_vm2, %v11293_v55  ;;  %10627 = vmatprep.subr.msk.bf16.mxu1 %vm11884_vm4, %v4137_v28  ;;  %v4143_v14 = vsel %vm11898_vm7, %v4131_v2, 0  ;;  %v4232_v4 = vpop.permute.xlu1 %4231  ;;  %vm15556_vm12 = vmmov %vm15555_vm1 }
 0x64a   : > { %4287 = vmatpush1.bf16.msra.mxu0 %v4251_v56  ;;  %4183 = vmatpush1.bf16.msra.mxu1 %v4143_v14  ;;  %vm15557_vm2 = vmmov %vm15555_vm1 }
 0x64b   : > { %v4230_v26 = vpop.permute.xlu0 %4229  ;;  %4104 = vmatprep.mubr.bf16.mxu0 %v15503_v43 }
 0x64c   : > { %v4237_v5 = vsel %vm15554_vm15, %v4230_v26, %v4232_v4  ;;  %v4243_v39 = vsel %vm15550_vm10, %v4232_v4, %v4230_v26  ;;  %vm15558_vm15 = vmmov %vm15555_vm1 }
 0x64d   : > { %10609 = vmatmul.mubr.msk.bf16.gmra.mxu1 %vm15555_vm1, %v11294_v10  ;;  %10637 = vmatprep.subr.msk.bf16.mxu0 %vm11903_vm9, %v4243_v39  ;;  %v4249_v31 = vsel %vm15471_vm0, %v4237_v5, 0  ;;  %vm15559_vm10 = vmmov %vm15555_vm1 }
 0x64e   : > { %4289 = vmatpush1.bf16.msra.mxu0 %v4249_v31  ;;  %4200 = vmatprep.mubr.bf16.mxu1 %v15503_v43 }
 0x651   : > { %10619 = vmatmul.mubr.msk.bf16.gmra.mxu0 %vm15556_vm12, %v11295_v11  ;;  %vm15592_vm12 = vcmask 130048  }
 0x652   : > { %4306 = vmatprep.mubr.bf16.mxu0 %v15503_v43 }
 0x655   : > { %10628 = vmatmul.mubr.msk.bf16.vlgmr.msra.gmra.mxu1 %vm15557_vm2, %v11296_v58  ;;  %vm15593_vm2 = vmmov %vm15592_vm12 }
 0x656   : > { %4210 = vmatprep.mubr.bf16.mxu1 %v15503_v43 }
 0x659   : > { %10638 = vmatmul.mubr.msk.bf16.vlgmr.msra.gmra.mxu0 %vm15558_vm15, %v11297_v0 }
 0x65a   : > { %4316 = vmatprep.mubr.bf16.mxu0 %v15503_v43 }
 0x65d   : > { %10629 = vmatmul.mubr.msk.bf16.gmra.mxu1 %vm15559_vm10, %v11298_v24  ;;  %vm15597_vm10 = vmmov %vm15593_vm2 }
 0x65e   : > { %4506 = vmatprep.mubr.bf16.mxu1 %v15503_v43 }
 0x661   : > { %10639 = vmatmul.mubr.msk.bf16.gmra.mxu0 %vm15555_vm1, %v11299_v22  ;;  %vm15598_vm1 = vmmov %vm15593_vm2 }
 0x662   : > { %4575 = vmatprep.mubr.bf16.mxu0 %v15503_v43 }
 0x6d9   : > { %v3529_v45 = vpop.f32.mrf.mxu0 }
 0x6db   : > { %v12927_v7 = vpop.f32.mrf.mxu0 }
 0x6dd   : > { %v3533_v19 = vpop.f32.mrf.mxu0 }
 0x6df   : > { %v3535_v60 = vpop.f32.mrf.mxu0 }
 0x6e1   : > { %v3539_v40 = vpop.f32.mrf.mxu0 }
 0x6e3   : > { %v3541_v18 = vpop.f32.mrf.mxu0 }
 0x6e5   : > { %v3543_v20 = vpop.f32.mrf.mxu0  ;;  %v3598_v15 = vpop.f32.mrf.mxu1 }
 0x6e6   : > { %v3599_v36 = vadd.f32 %v3598_v15, %v3529_v45 }
 0x6e7   : > { %v12929_v49 = vpop.f32.mrf.mxu0  ;;  %v3600_v52 = vpop.f32.mrf.mxu1 }
 0x6e8   : > { %15560 = vst [vmem:[#allocation2_spill] sm:$0xff] %v12929_v49 }
 0x6e9   : > { %v3602_v32 = vpop.f32.mrf.mxu1  ;;  %v3696_v57 = vpop.f32.mrf.mxu0 }
 0x6ea   : > { %v3603_v25 = vadd.f32 %v3602_v32, %v3533_v19 }
 0x6eb   : > { %v3604_v1 = vpop.f32.mrf.mxu1  ;;  %v12931_v27 = vpop.f32.mrf.mxu0 }
 0x6ec   : > { %15561 = vst [vmem:[#allocation5_spill] sm:$0xff] %v12931_v27  ;;  %v3605_v43 = vadd.f32 %v3604_v1, %v3535_v60  ;;  %v3715_v27 = vadd.f32 %v3696_v57, %v3599_v36 }
 0x6ed   : > { %v3608_v33 = vpop.f32.mrf.mxu1  ;;  %v3700_v3 = vpop.f32.mrf.mxu0 }
 0x6ee   : > { %v3609_v48 = vadd.f32 %v3608_v33, %v3539_v40 }
 0x6ef   : > { %v3610_v30 = vpop.f32.mrf.mxu1  ;;  %v3702_v42 = vpop.f32.mrf.mxu0  ;;  %v15568_v40 = vld [vmem:[#allocation2_spill] sm:$0xff] }
 0x6f0   : > { %v3611_v63 = vadd.f32 %v3610_v30, %v3541_v18  ;;  %v3718_v49 = vadd.f32 %v3702_v42, %v3605_v43 }
 0x6f1   : > { %v3612_v37 = vpop.f32.mrf.mxu1  ;;  %v3706_v38 = vpop.f32.mrf.mxu0 }
 0x6f2   : > { %v3719_v23 = vadd.f32 %v3706_v38, %v3609_v48 }
 0x6f3   : > { %v3614_v54 = vpop.f32.mrf.mxu1  ;;  %v3708_v35 = vpop.f32.mrf.mxu0  ;;  %v15569_v60 = vld [vmem:[#allocation5_spill] sm:$0xff] }
 0x6f4   : > { %v3615_v33 = vadd.f32 %v3614_v54, %v15568_v40 }
 0x6f5   : > { %v3710_v6 = vpop.f32.mrf.mxu0  ;;  %v3802_v34 = vpop.f32.mrf.mxu1 }
 0x6f6   : > { %v3821_v1 = vadd.f32 %v3802_v34, %v3715_v27 }
 0x6f7   : > { %v3712_v47 = vpop.f32.mrf.mxu0  ;;  %v12933_v46 = vpop.f32.mrf.mxu1 }
 0x6f8   : > { %15562 = vst [vmem:[#allocation4_spill] sm:$0xff] %v12933_v46  ;;  %v3601_v46 = vadd.f32 %v3600_v52, %v12927_v7  ;;  %v3722_v30 = vadd.f32 %v3712_v47, %v3615_v33 }
 0x6f9   : > { %v3806_v8 = vpop.f32.mrf.mxu1  ;;  %v3884_v50 = vpop.f32.mrf.mxu0 }
 0x6fa   : > { %v3716_v15 = vadd.f32 %v15569_v60, %v3601_v46  ;;  %v3903_v57 = vadd.f32 %v3884_v50, %v3821_v1 }
 0x6fb   : > { %v3808_v55 = vpop.f32.mrf.mxu1  ;;  %v12935_v53 = vpop.f32.mrf.mxu0 }
 0x6fc   : > { %15563 = vst [vmem:[#allocation6_spill] sm:$0xff] %v12935_v53 }
 0x6fd   : > { %v3812_v62 = vpop.f32.mrf.mxu1  ;;  %v3888_v29 = vpop.f32.mrf.mxu0 }
 0x6fe   : > { %v3825_v53 = vadd.f32 %v3812_v62, %v3719_v23 }
 0x6ff   : > { %v3814_v56 = vpop.f32.mrf.mxu1  ;;  %v3890_v2 = vpop.f32.mrf.mxu0  ;;  %v15570_v43 = vld [vmem:[#allocation4_spill] sm:$0xff] }
 0x700   : > { %v3822_v52 = vadd.f32 %v15570_v43, %v3716_v15  ;;  %v15579_v43 = vld [vmem:[#allocation27_spill] sm:$0xff] }
 0x701   : > { %v3816_v28 = vpop.f32.mrf.mxu1  ;;  %v3894_v14 = vpop.f32.mrf.mxu0 }
 0x702   : > { %v3907_v45 = vadd.f32 %v3894_v14, %v3825_v53 }
 0x703   : > { %v3818_v10 = vpop.f32.mrf.mxu1  ;;  %v3896_v4 = vpop.f32.mrf.mxu0  ;;  %v15571_v27 = vld [vmem:[#allocation6_spill] sm:$0xff] }
 0x704   : > { %v3904_v34 = vadd.f32 %v15571_v27, %v3822_v52 }
 0x705   : > { %v3898_v26 = vpop.f32.mrf.mxu0  ;;  %v3990_v5 = vpop.f32.mrf.mxu1 }
 0x707   : > { %v3900_v39 = vpop.f32.mrf.mxu0  ;;  %v12937_v31 = vpop.f32.mrf.mxu1 }
 0x708   : > { %15564 = vst [vmem:[#allocation3_spill] sm:$0xff] %v12937_v31  ;;  %v3720_v31 = vadd.f32 %v3708_v35, %v3611_v63 }
 0x709   : > { %v3994_v11 = vpop.f32.mrf.mxu1  ;;  %v12939_v58 = vpop.f32.mrf.mxu0 }
 0x70a   : > { %15565 = vst [vmem:[#allocation8_spill] sm:$0xff] %v12939_v58  ;;  %v3613_v58 = vadd.f32 %v3612_v37, %v3543_v20  ;;  %v3826_v48 = vadd.f32 %v3814_v56, %v3720_v31  ;;  %v3828_v37 = vadd.f32 %v3818_v10, %v3722_v30 }
 0x70b   : > { %v3996_v0 = vpop.f32.mrf.mxu1  ;;  %v12941_v24 = vpop.f32.mrf.mxu0 }
 0x70c   : > { %15566 = vst [vmem:[#allocation7_spill] sm:$0xff] %v12941_v24  ;;  %v3717_v24 = vadd.f32 %v3700_v3, %v3603_v25  ;;  %v3721_v32 = vadd.f32 %v3710_v6, %v3613_v58  ;;  %v3824_v25 = vadd.f32 %v3808_v55, %v3718_v49  ;;  %v3908_v7 = vadd.f32 %v3896_v4, %v3826_v48 }
 0x70d   : > { %v4000_v22 = vpop.f32.mrf.mxu1  ;;  %v4100_v9 = vpop.f32.mrf.mxu0  ;;  %v4009_v49 = vadd.f32 %v3990_v5, %v3903_v57  ;;  %v3910_v47 = vadd.f32 %v3900_v39, %v3828_v37 }
 0x70e   : > { %v3823_v18 = vadd.f32 %v3806_v8, %v3717_v24  ;;  %v3827_v3 = vadd.f32 %v3816_v28, %v3721_v32  ;;  %v4013_v36 = vadd.f32 %v4000_v22, %v3907_v45  ;;  %v3906_v42 = vadd.f32 %v3890_v2, %v3824_v25  ;;  %v4366_v45 = vpop.permute.xlu1 %4365  ;;  %v4361_v25 = vpop.permute.xlu0 %4360 }
 0x70f   : > { %v4002_v61 = vpop.f32.mrf.mxu1  ;;  %v4102_v21 = vpop.f32.mrf.mxu0  ;;  %v15572_v50 = vld [vmem:[#allocation3_spill] sm:$0xff] }
 0x710   : > { %v3905_v23 = vadd.f32 %v3888_v29, %v3823_v18  ;;  %v3909_v35 = vadd.f32 %v3898_v26, %v3827_v3  ;;  %v4014_v8 = vadd.f32 %v4002_v61, %v3908_v7  ;;  %v4012_v55 = vadd.f32 %v3996_v0, %v3906_v42  ;;  %v15580_v42 = vld [vmem:[#allocation32_spill] sm:$0xff] }
 0x711   : > { %v4004_v59 = vpop.f32.mrf.mxu1  ;;  %v4106_v17 = vpop.f32.mrf.mxu0  ;;  %v4010_v2 = vadd.f32 %v15572_v50, %v3904_v34  ;;  %v15573_v10 = vld [vmem:[#allocation8_spill] sm:$0xff]  ;;  %v10735_v50 = vld [vmem:[%s14918_s3 + $0xb8] sm:$0xff] }
 0x712   : > { %v4011_v6 = vadd.f32 %v3994_v11, %v3905_v23  ;;  %v4119_v46 = vadd.f32 %v4106_v17, %v4013_v36  ;;  %v4015_v56 = vadd.f32 %v4004_v59, %v3909_v35  ;;  %v4115_v4 = vadd.f32 %v15573_v10, %v4009_v49  ;;  %v15578_v36 = vld [vmem:[#allocation29_spill] sm:$0xff]  ;;  %v15584_v35 = vld [vmem:[#allocation30_spill] sm:$0xff]  ;;  %v10733_v10 = vld [vmem:[%s14918_s3 + $0xa8] sm:$0xff] }
 0x713   : > { %v4006_v16 = vpop.f32.mrf.mxu1  ;;  %v4108_v51 = vpop.f32.mrf.mxu0  ;;  %v4118_v31 = vadd.f32 %v4102_v21, %v4012_v55  ;;  %v15574_v39 = vld [vmem:[#allocation7_spill] sm:$0xff] }
 0x714   : > { %v4117_v29 = vadd.f32 %v4100_v9, %v4011_v6  ;;  %v4120_v28 = vadd.f32 %v4108_v51, %v4014_v8  ;;  %v4016_v26 = vadd.f32 %v4006_v16, %v3910_v47  ;;  %v4116_v0 = vadd.f32 %v15574_v39, %v4010_v2  ;;  %v4356_v8 = vpop.permute.xlu1 %4355  ;;  %v4351_v55 = vpop.permute.xlu0 %4350  ;;  %v10734_v2 = vld [vmem:[%s14918_s3 + $0xb0] sm:$0xff] }
 0x715   : > { %v4110_v44 = vpop.f32.mrf.mxu0  ;;  %v12943_v13 = vpop.f32.mrf.mxu1 }
 0x716   : > { %15567 = vst [vmem:[#allocation9_spill] sm:$0xff] %v12943_v13  ;;  %v4121_v17 = vadd.f32 %v4110_v44, %v4015_v56 }
 0x717   : > { %v4112_v41 = vpop.f32.mrf.mxu0  ;;  %v12945_v12 = vpop.f32.mrf.mxu1 }
 0x718   : > { %v4122_v9 = vadd.f32 %v4112_v41, %v4016_v26  ;;  %v4222_v16 = vadd.f32 %v12945_v12, %v4116_v0  ;;  %v15577_v41 = vld [vmem:[#allocation28_spill] sm:$0xff]  ;;  %v15581_v12 = vld [vmem:[#allocation31_spill] sm:$0xff] }
 0x719   : > { %v4206_v13 = vpop.f32.mrf.mxu1  ;;  %v4308_v19 = vpop.f32.mrf.mxu0 }
 0x71a   : > { %v4223_v58 = vadd.f32 %v4206_v13, %v4117_v29  ;;  %v15576_v13 = vld [vmem:[#allocation26_spill] sm:$0xff] }
 0x71b   : > { %v4208_v20 = vpop.f32.mrf.mxu1  ;;  %v4310_v63 = vpop.f32.mrf.mxu0 }
 0x71c   : > { %v4224_v33 = vadd.f32 %v4208_v20, %v4118_v31  ;;  %v4328_v23 = vadd.f32 %v4310_v63, %v4222_v16  ;;  %v15585_v63 = vld [vmem:[#allocation33_spill] sm:$0xff] }
 0x71d   : > { %v4212_v38 = vpop.f32.mrf.mxu1  ;;  %v4312_v54 = vpop.f32.mrf.mxu0  ;;  %v15575_v22 = vld [vmem:[#allocation9_spill] sm:$0xff] }
 0x71e   : > { %v4225_v14 = vadd.f32 %v4212_v38, %v4119_v46  ;;  %v4221_v40 = vadd.f32 %v15575_v22, %v4115_v4  ;;  %v4329_v32 = vadd.f32 %v4312_v54, %v4223_v58  ;;  %v4336_v46 = vadd.f32 %v4328_v23, %v15585_v63  ;;  %v10732_v4 = vld [vmem:[%s14918_s3 + $0xa0] sm:$0xff]  ;;  %v15620_v63 = vld [vmem:[#allocation17_spill] sm:$0xff] }
 0x71f   : > { %v4214_v53 = vpop.f32.mrf.mxu1  ;;  %v4314_v62 = vpop.f32.mrf.mxu0 }
 0x720   : > { %v4226_v24 = vadd.f32 %v4214_v53, %v4120_v28  ;;  %v4327_v21 = vadd.f32 %v4308_v19, %v4221_v40  ;;  %v4330_v44 = vadd.f32 %v4314_v62, %v4224_v33  ;;  %v4337_v7 = vadd.f32 %v4329_v32, %v15577_v41 }
 0x721   : > { %v4216_v11 = vpop.f32.mrf.mxu1  ;;  %v4318_v61 = vpop.f32.mrf.mxu0  ;;  %v12989_v56 = vadd.f32 %v4351_v55, %v4336_v46  ;;  %v15600_v32 = vmov 0  }
 0x722   : > { %v4331_v5 = vadd.f32 %v4318_v61, %v4225_v14  ;;  %v4227_v18 = vadd.f32 %v4216_v11, %v4121_v17  ;;  %v4335_v37 = vadd.f32 %v4327_v21, %v15580_v42  ;;  %v4338_v19 = vadd.f32 %v4330_v44, %v15581_v12 }
 0x723   : > { %v4218_v59 = vpop.f32.mrf.mxu1  ;;  %v4320_v51 = vpop.f32.mrf.mxu0  ;;  %v12969_v27 = vadd.f32 %v4356_v8, %v4337_v7  ;;  %15591 = vst [vmem:[#allocation9_spill] sm:$0xff] %v12989_v56 }
 0x724   : > { %v4332_v48 = vadd.f32 %v4320_v51, %v4226_v24  ;;  %v4339_v15 = vadd.f32 %v4331_v5, %v15576_v13  ;;  %v4228_v1 = vadd.f32 %v4218_v59, %v4122_v9  ;;  %v12979_v53 = vadd.f32 %v4351_v55, %v4335_v37  ;;  %v15595_v24 = vld [vmem:[#allocation10_spill] sm:$0xff]  ;;  %v11300_v59 = vld [vmem:[%s14917_s2 + $0x250] sm:$0xff]   ;;  %v11301_v13 = vld [vmem:[%s14917_s2 + $0x258] sm:$0xff]  }
 0x725   : > { %v4322_v60 = vpop.f32.mrf.mxu0  ;;  %15586 = vst [vmem:[#allocation4_spill] sm:$0xff] %v12969_v27  ;;  %v12981_v62 = vadd.f32 %v4356_v8, %v4338_v19  ;;  %vm15596_vm15 = vnez %v15595_v24  ;;  %v11303_v19 = vld [vmem:[%s14917_s2 + $0x260] sm:$0xff]   ;;  %v15622_v55 = vld [vmem:[#allocation16_spill] sm:$0xff] }
 0x726   : > { %v4333_v30 = vadd.f32 %v4322_v60, %v4227_v18  ;;  %v4340_v20 = vadd.f32 %v4332_v48, %v15578_v36  ;;  %v12963_v38 = vadd.f32 %v4361_v25, %v4339_v15  ;;  %15589 = vst [vmem:[#allocation8_spill] sm:$0xff] %v12979_v53  ;;  %v12995_v28 = vpack.c.bf16 %v12969_v27, %v12979_v53  ;;  %v15612_v36 = vld [vmem:[#allocation14_spill] sm:$0xff] }
 0x727   : > { %v4324_v3 = vpop.f32.mrf.mxu0  ;;  %15590 = vst [vmem:[#allocation7_spill] sm:$0xff] %v12981_v62  ;;  %v13001_v14 = vpack.c.bf16 %v12981_v62, %v12989_v56 }
 0x728   : > { %v4341_v52 = vadd.f32 %v4333_v30, %v15579_v43  ;;  %v4334_v57 = vadd.f32 %v4324_v3, %v4228_v1  ;;  %15582 = vst [vmem:[#allocation2_spill] sm:$0xff] %v12963_v38  ;;  %v12971_v34 = vadd.f32 %v4361_v25, %v4340_v20  ;;  %v15610_v3 = vld [vmem:[#allocation15_spill] sm:$0xff]  ;;  %v11302_v43 = vld [vmem:[%s14917_s2 + $0x240] sm:$0xff]  }
 0x72a   : > { %v12965_v54 = vadd.f32 %v4366_v45, %v4341_v52  ;;  %v4342_v6 = vadd.f32 %v4334_v57, %v15584_v35  ;;  %15587 = vst [vmem:[#allocation6_spill] sm:$0xff] %v12971_v34 }
 0x72c   : > { %15583 = vst [vmem:[#allocation5_spill] sm:$0xff] %v12965_v54  ;;  %v12973_v49 = vadd.f32 %v4366_v45, %v4342_v6  ;;  %v12977_v47 = vpack.c.bf16 %v12965_v54, %v12963_v38 }
 0x72e   : > { %15588 = vst [vmem:[#allocation3_spill] sm:$0xff] %v12973_v49  ;;  %4435 = vrot.lane.b32.xlu1 %v12977_v47, %s11418_s7  ;;  %v12987_v29 = vpack.c.bf16 %v12973_v49, %v12971_v34 }
 0x730   : > { %4431 = vrot.lane.b32.xlu0 %v12987_v29, %s11418_s7 }
 0x732   : > { %4433 = vrot.lane.b32.xlu1 %v12995_v28, %s11418_s7 }
 0x734   : > { %4429 = vrot.lane.b32.xlu0 %v13001_v14, %s11418_s7 }
 0x736   : > { %4406 = vrot.lane.b32.xlu1 %v12977_v47, %s11419_s8 }
 0x738   : > { %4398 = vrot.lane.b32.xlu0 %v13001_v14, %s11419_s8 }
 0x73a   : > { %4602 = vrot.lane.b32.xlu1 %v12977_v47, %s11420_s9 }
 0x73c   : > { %4400 = vrot.lane.b32.xlu0 %v12987_v29, %s11419_s8 }
 0x73e   : > { %4404 = vrot.lane.b32.xlu1 %v12995_v28, %s11419_s8 }
 0x740   : > { %4598 = vrot.lane.b32.xlu0 %v12987_v29, %s11420_s9 }
 0x742   : > { %4600 = vrot.lane.b32.xlu1 %v12995_v28, %s11420_s9 }
 0x744   : > { %4596 = vrot.lane.b32.xlu0 %v13001_v14, %s11420_s9 }
 0x746   : > { %4708 = vrot.lane.b32.xlu1 %v12977_v47, %s11421_s10 }
 0x748   : > { %4704 = vrot.lane.b32.xlu0 %v12987_v29, %s11421_s10 }
 0x74a   : > { %4706 = vrot.lane.b32.xlu1 %v12995_v28, %s11421_s10 }
 0x74c   : > { %4702 = vrot.lane.b32.xlu0 %v13001_v14, %s11421_s10 }
 0x74e   : > { %4892 = vrot.lane.b32.xlu1 %v13001_v14, %s11422_s11 }
 0x750   : > { %4894 = vrot.lane.b32.xlu0 %v12977_v47, %s11422_s11 }
 0x752   : > { %4896 = vrot.lane.b32.xlu1 %v12987_v29, %s11422_s11 }
 0x754   : > { %5000 = vrot.lane.b32.xlu0 %v12977_v47, %s11423_s12 }
 0x756   : > { %5002 = vrot.lane.b32.xlu1 %v12987_v29, %s11423_s12 }
 0x758   : > { %4890 = vrot.lane.b32.xlu0 %v12995_v28, %s11422_s11 }
 0x75a   : > { %4998 = vrot.lane.b32.xlu1 %v13001_v14, %s11423_s12 }
 0x75c   : > { %4996 = vrot.lane.b32.xlu0 %v12995_v28, %s11423_s12 }
 0x75e   : > { %5104 = vrot.lane.b32.xlu1 %v13001_v14, %s11424_s13 }
 0x760   : > { %5106 = vrot.lane.b32.xlu0 %v12977_v47, %s11424_s13 }
 0x762   : > { %5108 = vrot.lane.b32.xlu1 %v12987_v29, %s11424_s13 }
 0x764   : > { %5212 = vrot.lane.b32.xlu0 %v12977_v47, %s11425_s14 }
 0x766   : > { %5214 = vrot.lane.b32.xlu1 %v12987_v29, %s11425_s14 }
 0x768   : > { %5102 = vrot.lane.b32.xlu0 %v12995_v28, %s11424_s13 }
 0x76a   : > { %5210 = vrot.lane.b32.xlu1 %v13001_v14, %s11425_s14 }
 0x76c   : > { %5208 = vrot.lane.b32.xlu0 %v12995_v28, %s11425_s14 }
 0x76e   : > { %5336 = vperm.xlu1 %11222, %v10735_v50  }
 0x770   : > { %5331 = vperm.xlu0 %11221, %v10734_v2   ;;  %v11304_v2 = vld [vmem:[%s14917_s2 + $0x248] sm:$0xff]  }
 0x772   : > { %5326 = vperm.xlu1 %11222, %v10733_v10  }
 0x774   : > { %5321 = vperm.xlu0 %11221, %v10732_v4  }
 0x7a0   : > { %v4436_v31 = vpop.permute.xlu1 %4435 }
 0x7a2   : > { %v4432_v26 = vpop.permute.xlu0 %4431 }
 0x7a3   : > { %v4447_v11 = vsel %vm15592_vm12, %v4432_v26, %v4436_v31  ;;  %v4438_v61 = vsel %vm15593_vm2, %v4436_v31, %v4432_v26  ;;  %vm15599_vm12 = vcmask 261120   ;;  %vm15601_vm2 = vcmask 138240  }
 0x7a4   : > { %10654 = vmatprep.subr.msk.bf16.mxu1 %vm15418_vm13, %v4438_v61  ;;  %v4434_v58 = vpop.permute.xlu1 %4433  ;;  %v4451_v5 = vsel %vm15596_vm15, %v4447_v11, 0  ;;  %v11306_v61 = vld [vmem:[%s14917_s2 + $0x270] sm:$0xff]  }
 0x7a5   : > { %4487 = vmatpush1.bf16.msra.mxu1 %v4451_v5 }
 0x7a6   : > { %v4430_v39 = vpop.permute.xlu0 %4429 }
 0x7a7   : > { %v4443_v0 = vsel %vm15597_vm10, %v4430_v39, %v4434_v58  ;;  %v4437_v22 = vsel %vm15598_vm1, %v4434_v58, %v4430_v39  ;;  %vm15602_vm10 = vmmov %vm15601_vm2 }
 0x7a8   : > { %10655 = vmatprep.subr.msk.bf16.mxu1 %vm15418_vm13, %v4437_v22  ;;  %v4407_v40 = vpop.permute.xlu1 %4406  ;;  %v4449_v9 = vsel %vm15596_vm15, %v4443_v0, 0  ;;  %vm15605_vm1 = vmmov %vm15601_vm2  ;;  %vm15609_vm15 = vcmask 261120   ;;  %vm15611_vm13 = vnez %v15610_v3 }
 0x7a9   : > { %4489 = vmatpush1.bf16.msra.mxu1 %v4449_v9  ;;  %v11307_v9 = vld [vmem:[%s14917_s2 + $0x280] sm:$0xff]  }
 0x7aa   : > { %v4399_v51 = vpop.permute.xlu0 %4398 }
 0x7ac   : > { %10656 = vmatmul.mubr.msk.bf16.vlgmr.msra.gmra.mxu1 %vm15599_vm12, %v11300_v59  ;;  %v4603_v33 = vpop.permute.xlu1 %4602  ;;  %vm15606_vm12 = vmmov %vm15605_vm1 }
 0x7ad   : > { %4516 = vmatprep.mubr.bf16.mxu1 %v15600_v32 }
 0x7ae   : > { %v4401_v18 = vpop.permute.xlu0 %4400 }
 0x7af   : > { %v4418_v48 = vsel %vm15601_vm2, %v4401_v18, %v4407_v40  ;;  %v4409_v45 = vsel %vm15602_vm10, %v4407_v40, %v4401_v18  ;;  %vm15607_vm2 = vcmask 121856  }
 0x7b0   : > { %10660 = vmatprep.subr.msk.bf16.mxu0 %vm11689_vm5, %v4409_v45  ;;  %v4405_v21 = vpop.permute.xlu1 %4404  ;;  %v4422_v44 = vsel %vm11685_vm3, %v4418_v48, 0  ;;  %vm15608_vm10 = vmmov %vm15607_vm2 }
 0x7b1   : > { %v4414_v15 = vsel %vm15605_vm1, %v4399_v51, %v4405_v21  ;;  %4556 = vmatpush1.bf16.msra.mxu0 %v4422_v44  ;;  %v4408_v1 = vsel %vm15606_vm12, %v4405_v21, %v4399_v51  ;;  %vm15613_vm1 = vnez %v15612_v36  ;;  %vm15615_vm12 = vmmov %vm15607_vm2 }
 0x7b2   : > { %v4599_v30 = vpop.permute.xlu0 %4598  ;;  %10661 = vmatprep.subr.msk.bf16.mxu0 %vm11689_vm5, %v4408_v1  ;;  %v4420_v7 = vsel %vm11685_vm3, %v4414_v15, 0  ;;  %v11308_v1 = vld [vmem:[%s14917_s2 + $0x278] sm:$0xff]  }
 0x7b3   : > { %v4614_v25 = vsel %vm15607_vm2, %v4599_v30, %v4603_v33  ;;  %v4605_v23 = vsel %vm15608_vm10, %v4603_v33, %v4599_v30  ;;  %vm15617_vm10 = vcmask 7168  }
 0x7b4   : > { %10657 = vmatmul.mubr.msk.bf16.gmra.mxu1 %vm15609_vm15, %v11301_v13  ;;  %10670 = vmatprep.subr.msk.bf16.mxu1 %vm15611_vm13, %v4605_v23  ;;  %v4601_v41 = vpop.permute.xlu1 %4600  ;;  %v4618_v20 = vsel %vm15613_vm1, %v4614_v25, 0  ;;  %vm15614_vm15 = vmmov %vm15607_vm2  ;;  %vm15616_vm2 = vcmask 261120  }
 0x7b5   : > { %4558 = vmatpush1.bf16.msra.mxu0 %v4420_v7  ;;  %4654 = vmatpush1.bf16.msra.mxu1 %v4618_v20  ;;  %v11309_v20 = vld [vmem:[%s14917_s2 + $0x288] sm:$0xff]  }
 0x7b6   : > { %v4597_v52 = vpop.permute.xlu0 %4596  ;;  %4673 = vmatprep.mubr.bf16.mxu1 %v15600_v32 }
 0x7b7   : > { %v4610_v57 = vsel %vm15614_vm15, %v4597_v52, %v4601_v41  ;;  %v4604_v42 = vsel %vm15615_vm12, %v4601_v41, %v4597_v52  ;;  %vm15618_vm15 = vmmov %vm15617_vm10 }
 0x7b8   : > { %10662 = vmatmul.mubr.msk.bf16.vlgmr.msra.gmra.mxu0 %vm15616_vm2, %v11302_v43  ;;  %10671 = vmatprep.subr.msk.bf16.mxu1 %vm15611_vm13, %v4604_v42  ;;  %v4709_v37 = vpop.permute.xlu1 %4708  ;;  %v4616_v12 = vsel %vm15613_vm1, %v4610_v57, 0  ;;  %vm15619_vm12 = vmmov %vm15616_vm2  ;;  %vm15621_vm2 = vnez %v15620_v63  ;;  %vm15623_vm1 = vnez %v15622_v55  ;;  %v11310_v57 = vld [vmem:[%s14917_s2 + $0x290] sm:$0xff]  }
 0x7b9   : > { %4656 = vmatpush1.bf16.msra.mxu1 %v4616_v12  ;;  %4585 = vmatprep.mubr.bf16.mxu0 %v15600_v32 }
 0x7ba   : > { %v4705_v35 = vpop.permute.xlu0 %4704  ;;  %4841 = vmatprep.subr.bf16.mxu1 %v12987_v29 }
 0x7bb   : > { %v4720_v6 = vsel %vm15617_vm10, %v4705_v35, %v4709_v37  ;;  %v4711_v8 = vsel %vm15618_vm15, %v4709_v37, %v4705_v35  ;;  %vm15624_vm15 = vmmov %vm15617_vm10 }
 0x7bc   : > { %10672 = vmatmul.mubr.msk.bf16.vlgmr.msra.gmra.mxu1 %vm15619_vm12, %v11303_v19  ;;  %10680 = vmatprep.subr.msk.bf16.mxu0 %vm15621_vm2, %v4711_v8  ;;  %v4707_v46 = vpop.permute.xlu1 %4706  ;;  %v4724_v50 = vsel %vm15623_vm1, %v4720_v6, 0 }
 0x7bd   : > { %4760 = vmatpush1.bf16.msra.mxu0 %v4724_v50  ;;  %4842 = vmatpush1.bf16.msra.mxu1 %v12977_v47  ;;  %v11305_v47 = vld [vmem:[%s14917_s2 + $0x268] sm:$0xff]  }
 0x7be   : > { %v4703_v29 = vpop.permute.xlu0 %4702  ;;  %4843 = vmatprep.subr.bf16.mxu1 %v13001_v14  ;;  %4683 = vmatprep.mubr.bf16.mxu1 %v15600_v32 }
 0x7bf   : > { %v4716_v10 = vsel %vm15617_vm10, %v4703_v29, %v4707_v46  ;;  %v4710_v4 = vsel %vm15624_vm15, %v4707_v46, %v4703_v29  ;;  %vm15625_vm10 = vmmov %vm15619_vm12  ;;  %vm15626_vm15 = vcmask 1039360   ;;  %v11311_v46 = vld [vmem:[%s14917_s2 + $0x2a0] sm:$0xff]  }
 0x7c0   : > { %10663 = vmatmul.mubr.msk.bf16.gmra.mxu0 %vm15619_vm12, %v11304_v2  ;;  %10681 = vmatprep.subr.msk.bf16.mxu0 %vm15621_vm2, %v4710_v4  ;;  %v4893_v31 = vpop.permute.xlu1 %4892  ;;  %v4722_v26 = vsel %vm15623_vm1, %v4716_v10, 0  ;;  %vm15627_vm12 = vmmov %vm15626_vm15  ;;  %vm15637_vm2 = vcmask 261120  }
 0x7c1   : > { %4762 = vmatpush1.bf16.msra.mxu0 %v4722_v26  ;;  %4844 = vmatpush1.bf16.msra.mxu1 %v12995_v28  ;;  %vm15630_vm1 = vmmov %vm15625_vm10 }
 0x7c2   : > { %v4895_v14 = vpop.permute.xlu0 %4894  ;;  %4779 = vmatprep.mubr.bf16.mxu0 %v15600_v32 }
 0x7c4   : > { %10673 = vmatmul.mubr.msk.bf16.gmra.mxu1 %vm15625_vm10, %v11305_v47  ;;  %v4897_v11 = vpop.permute.xlu1 %4896  ;;  %vm15631_vm10 = vcmask 924672  }
 0x7c5   : > { %v4899_v58 = vsel %vm15626_vm15, %v4895_v14, %v4897_v11  ;;  %v4908_v5 = vsel %vm15627_vm12, %v4897_v11, %v4895_v14  ;;  %4861 = vmatprep.mubr.bf16.mxu1 %v15600_v32  ;;  %vm15632_vm15 = vmmov %vm15631_vm10  ;;  %v11312_v11 = vld [vmem:[%s14917_s2 + $0x298] sm:$0xff]  }
 0x7c6   : > { %v5001_v39 = vpop.permute.xlu0 %5000  ;;  %10698 = vmatprep.subr.msk.bf16.mxu0 %vm11803_vm8, %v4908_v5  ;;  %v4912_v22 = vsel %vm11817_vm6, %v4899_v58, 0 }
 0x7c8   : > { %10682 = vmatmul.mubr.msk.bf16.vlgmr.msra.gmra.mxu0 %vm15630_vm1, %v11306_v61  ;;  %v5003_v40 = vpop.permute.xlu1 %5002  ;;  %vm15635_vm1 = vmmov %vm15627_vm12 }
 0x7c9   : > { %4948 = vmatpush1.bf16.msra.mxu0 %v4912_v22  ;;  %v5005_v59 = vsel %vm15631_vm10, %v5001_v39, %v5003_v40  ;;  %v5014_v51 = vsel %vm15632_vm15, %v5003_v40, %v5001_v39  ;;  %4789 = vmatprep.mubr.bf16.mxu0 %v15600_v32  ;;  %vm15636_vm12 = vmmov %vm15635_vm1  ;;  %v11313_v40 = vld [vmem:[%s14917_s2 + $0x2a8] sm:$0xff]  }
 0x7ca   : > { %v4891_v33 = vpop.permute.xlu0 %4890  ;;  %10708 = vmatprep.subr.msk.bf16.mxu1 %vm11822_vm11, %v5014_v51  ;;  %v5018_v45 = vsel %vm15537_vm14, %v5005_v59, 0  ;;  %vm15638_vm15 = vmmov %vm15631_vm10  ;;  %v11315_v59 = vld [vmem:[%s14917_s2 + $0x2c0] sm:$0xff]   ;;  %v11316_v51 = vld [vmem:[%s14917_s2 + $0x2b8] sm:$0xff]  }
 0x7cb   : > { %v4898_v21 = vsel %vm15635_vm1, %v4891_v33, %v4893_v31  ;;  %v4904_v44 = vsel %vm15636_vm12, %v4893_v31, %v4891_v33  ;;  %vm15639_vm1 = vmmov %vm15637_vm2  ;;  %vm15640_vm12 = vcmask 916480   ;;  %v11317_v33 = vld [vmem:[%s14917_s2 + $0x2c8] sm:$0xff]  }
 0x7cc   : > { %10690 = vmatmul.mubr.msk.bf16.vlgmr.msra.gmra.mxu1 %vm15637_vm2, %v11307_v9  ;;  %10699 = vmatprep.subr.msk.bf16.mxu0 %vm11803_vm8, %v4904_v44  ;;  %v4999_v13 = vpop.permute.xlu1 %4998  ;;  %v4910_v15 = vsel %vm11817_vm6, %v4898_v21, 0  ;;  %v11314_v9 = vld [vmem:[%s14917_s2 + $0x2b0] sm:$0xff]  }
 0x7cd   : > { %5054 = vmatpush1.bf16.msra.mxu1 %v5018_v45  ;;  %4950 = vmatpush1.bf16.msra.mxu0 %v4910_v15 }
 0x7ce   : > { %v4997_v30 = vpop.permute.xlu0 %4996  ;;  %4871 = vmatprep.mubr.bf16.mxu1 %v15600_v32 }
 0x7cf   : > { %v5004_v25 = vsel %vm15631_vm10, %v4997_v30, %v4999_v13  ;;  %v5010_v23 = vsel %vm15638_vm15, %v4999_v13, %v4997_v30  ;;  %vm15641_vm10 = vmmov %vm15640_vm12 }
 0x7d0   : > { %10683 = vmatmul.mubr.msk.bf16.gmra.mxu0 %vm15637_vm2, %v11308_v1  ;;  %10709 = vmatprep.subr.msk.bf16.mxu1 %vm11822_vm11, %v5010_v23  ;;  %v5105_v41 = vpop.permute.xlu1 %5104  ;;  %v5016_v7 = vsel %vm15537_vm14, %v5004_v25, 0  ;;  %vm15644_vm15 = vmmov %vm15639_vm1  ;;  %vm15645_vm2 = vcmask 908288  }
 0x7d1   : > { %5056 = vmatpush1.bf16.msra.mxu1 %v5016_v7  ;;  %4967 = vmatprep.mubr.bf16.mxu0 %v15600_v32 }
 0x7d2   : > { %v5107_v43 = vpop.permute.xlu0 %5106 }
 0x7d4   : > { %10691 = vmatmul.mubr.msk.bf16.gmra.mxu1 %vm15639_vm1, %v11309_v20  ;;  %v5109_v52 = vpop.permute.xlu1 %5108  ;;  %vm15646_vm1 = vmmov %vm15645_vm2 }
 0x7d5   : > { %v5111_v42 = vsel %vm15640_vm12, %v5107_v43, %v5109_v52  ;;  %v5120_v37 = vsel %vm15641_vm10, %v5109_v52, %v5107_v43  ;;  %5073 = vmatprep.mubr.bf16.mxu1 %v15600_v32  ;;  %vm15649_vm12 = vmmov %vm15641_vm10 }
 0x7d6   : > { %v5213_v12 = vpop.permute.xlu0 %5212  ;;  %10718 = vmatprep.subr.msk.bf16.mxu0 %vm11884_vm4, %v5120_v37  ;;  %v5124_v6 = vsel %vm11898_vm7, %v5111_v42, 0 }
 0x7d8   : > { %10700 = vmatmul.mubr.msk.bf16.vlgmr.msra.gmra.mxu0 %vm15644_vm15, %v11310_v57  ;;  %v5215_v8 = vpop.permute.xlu1 %5214 }
 0x7d9   : > { %5160 = vmatpush1.bf16.msra.mxu0 %v5124_v6  ;;  %v5217_v50 = vsel %vm15645_vm2, %v5213_v12, %v5215_v8  ;;  %v5226_v2 = vsel %vm15646_vm1, %v5215_v8, %v5213_v12  ;;  %4977 = vmatprep.mubr.bf16.mxu0 %v15600_v32  ;;  %vm15650_vm2 = vmmov %vm15646_vm1 }
 0x7da   : > { %v5103_v29 = vpop.permute.xlu0 %5102  ;;  %10728 = vmatprep.subr.msk.bf16.mxu1 %vm11903_vm9, %v5226_v2  ;;  %v5230_v31 = vsel %vm15471_vm0, %v5217_v50, 0 }
 0x7db   : > { %v5110_v26 = vsel %vm15649_vm12, %v5103_v29, %v5105_v41  ;;  %v5116_v47 = vsel %vm15641_vm10, %v5105_v41, %v5103_v29  ;;  %vm15651_vm12 = vmmov %vm15644_vm15 }
 0x7dc   : > { %10710 = vmatmul.mubr.msk.bf16.vlgmr.msra.gmra.mxu1 %vm15644_vm15, %v11311_v46  ;;  %10719 = vmatprep.subr.msk.bf16.mxu0 %vm11884_vm4, %v5116_v47  ;;  %v5122_v14 = vsel %vm11898_vm7, %v5110_v26, 0  ;;  %v5211_v61 = vpop.permute.xlu1 %5210  ;;  %vm15652_vm10 = vmmov %vm15651_vm12 }
 0x7dd   : > { %5266 = vmatpush1.bf16.msra.mxu1 %v5230_v31  ;;  %5162 = vmatpush1.bf16.msra.mxu0 %v5122_v14  ;;  %vm15653_vm15 = vmmov %vm15652_vm10 }
 0x7de   : > { %v5209_v58 = vpop.permute.xlu0 %5208  ;;  %5083 = vmatprep.mubr.bf16.mxu1 %v15600_v32 }
 0x7df   : > { %v5216_v5 = vsel %vm15650_vm2, %v5209_v58, %v5211_v61  ;;  %v5222_v39 = vsel %vm15646_vm1, %v5211_v61, %v5209_v58  ;;  %vm15654_vm2 = vmmov %vm15652_vm10 }
 0x7e0   : > { %10701 = vmatmul.mubr.msk.bf16.gmra.mxu0 %vm15651_vm12, %v11312_v11  ;;  %10729 = vmatprep.subr.msk.bf16.mxu1 %vm11903_vm9, %v5222_v39  ;;  %v5228_v22 = vsel %vm15471_vm0, %v5216_v5, 0  ;;  %vm15655_vm1 = vmmov %vm15654_vm2 }
 0x7e1   : > { %5268 = vmatpush1.bf16.msra.mxu1 %v5228_v22  ;;  %5179 = vmatprep.mubr.bf16.mxu0 %v15600_v32  ;;  %vm15656_vm12 = vmmov %vm15655_vm1 }
 0x7e4   : > { %10711 = vmatmul.mubr.msk.bf16.gmra.mxu1 %vm15652_vm10, %v11313_v40  ;;  %vm15673_vm10 = vcmask 130048  }
 0x7e5   : > { %5285 = vmatprep.mubr.bf16.mxu1 %v15600_v32  ;;  %vm15680_vm0 = vmmov %vm15673_vm10 }
 0x7e8   : > { %10720 = vmatmul.mubr.msk.bf16.vlgmr.msra.gmra.mxu0 %vm15653_vm15, %v11314_v9  ;;  %vm15674_vm15 = vmmov %vm15673_vm10 }
 0x7e9   : > { %5189 = vmatprep.mubr.bf16.mxu0 %v15600_v32 }
 0x7ec   : > { %10730 = vmatmul.mubr.msk.bf16.vlgmr.msra.gmra.mxu1 %vm15654_vm2, %v11315_v59 }
 0x7ed   : > { %5295 = vmatprep.mubr.bf16.mxu1 %v15600_v32 }
 0x7f0   : > { %10721 = vmatmul.mubr.msk.bf16.gmra.mxu0 %vm15655_vm1, %v11316_v51 }
 0x7f1   : > { %5469 = vmatprep.mubr.bf16.mxu0 %v15600_v32 }
 0x7f4   : > { %10731 = vmatmul.mubr.msk.bf16.gmra.mxu1 %vm15656_vm12, %v11317_v33  ;;  %vm15679_vm12 = vmmov %vm15673_vm10 }
 0x7f5   : > { %5538 = vmatprep.mubr.bf16.mxu1 %v15600_v32 }
 0x86c   : > { %v4508_v45 = vpop.f32.mrf.mxu1 }
 0x86e   : > { %v13263_v21 = vpop.f32.mrf.mxu1 }
 0x870   : > { %v4512_v44 = vpop.f32.mrf.mxu1 }
 0x872   : > { %v4514_v13 = vpop.f32.mrf.mxu1 }
 0x874   : > { %v4518_v15 = vpop.f32.mrf.mxu1 }
 0x876   : > { %v4520_v1 = vpop.f32.mrf.mxu1 }
 0x878   : > { %v4522_v30 = vpop.f32.mrf.mxu1  ;;  %v4577_v25 = vpop.f32.mrf.mxu0 }
 0x879   : > { %v4578_v60 = vadd.f32 %v4577_v25, %v4508_v45 }
 0x87a   : > { %v13265_v23 = vpop.f32.mrf.mxu1  ;;  %v4579_v41 = vpop.f32.mrf.mxu0 }
 0x87c   : > { %v4581_v7 = vpop.f32.mrf.mxu0  ;;  %v4675_v20 = vpop.f32.mrf.mxu1 }
 0x87d   : > { %v4582_v36 = vadd.f32 %v4581_v7, %v4512_v44 }
 0x87e   : > { %v4583_v43 = vpop.f32.mrf.mxu0  ;;  %v13267_v52 = vpop.f32.mrf.mxu1 }
 0x87f   : > { %15657 = vst [vmem:[#allocation26_spill] sm:$0xff] %v13267_v52  ;;  %v4584_v16 = vadd.f32 %v4583_v43, %v4514_v13 }
 0x880   : > { %v4587_v57 = vpop.f32.mrf.mxu0  ;;  %v4679_v42 = vpop.f32.mrf.mxu1 }
 0x881   : > { %v4588_v0 = vadd.f32 %v4587_v57, %v4518_v15 }
 0x882   : > { %v4589_v37 = vpop.f32.mrf.mxu0  ;;  %v4681_v12 = vpop.f32.mrf.mxu1 }
 0x883   : > { %v4590_v32 = vadd.f32 %v4589_v37, %v4520_v1 }
 0x884   : > { %v4591_v6 = vpop.f32.mrf.mxu0  ;;  %v4685_v8 = vpop.f32.mrf.mxu1 }
 0x885   : > { %v4698_v3 = vadd.f32 %v4685_v8, %v4588_v0 }
 0x886   : > { %v4593_v46 = vpop.f32.mrf.mxu0  ;;  %v4687_v50 = vpop.f32.mrf.mxu1  ;;  %v15665_v13 = vld [vmem:[#allocation26_spill] sm:$0xff] }
 0x887   : > { %v4699_v52 = vadd.f32 %v4687_v50, %v4590_v32  ;;  %v5337_v50 = vpop.permute.xlu1 %5336 }
 0x888   : > { %v4689_v2 = vpop.f32.mrf.mxu1  ;;  %v4781_v29 = vpop.f32.mrf.mxu0 }
 0x88a   : > { %v4691_v31 = vpop.f32.mrf.mxu1  ;;  %v4783_v26 = vpop.f32.mrf.mxu0 }
 0x88c   : > { %v4785_v47 = vpop.f32.mrf.mxu0  ;;  %v4863_v14 = vpop.f32.mrf.mxu1 }
 0x88e   : > { %v4787_v11 = vpop.f32.mrf.mxu0  ;;  %v13269_v61 = vpop.f32.mrf.mxu1 }
 0x88f   : > { %15658 = vst [vmem:[#allocation28_spill] sm:$0xff] %v13269_v61  ;;  %v4694_v61 = vadd.f32 %v4675_v20, %v4578_v60 }
 0x890   : > { %v4791_v58 = vpop.f32.mrf.mxu0  ;;  %v4867_v5 = vpop.f32.mrf.mxu1 }
 0x891   : > { %v4800_v25 = vadd.f32 %v4781_v29, %v4694_v61 }
 0x892   : > { %v4793_v39 = vpop.f32.mrf.mxu0  ;;  %v4869_v22 = vpop.f32.mrf.mxu1 }
 0x893   : > { %v4805_v43 = vadd.f32 %v4793_v39, %v4699_v52  ;;  %v4882_v32 = vadd.f32 %v4863_v14, %v4800_v25  ;;  %v5332_v39 = vpop.permute.xlu0 %5331 }
 0x894   : > { %v4795_v40 = vpop.f32.mrf.mxu0  ;;  %v4873_v9 = vpop.f32.mrf.mxu1 }
 0x896   : > { %v4797_v59 = vpop.f32.mrf.mxu0  ;;  %v4875_v51 = vpop.f32.mrf.mxu1 }
 0x897   : > { %v4887_v20 = vadd.f32 %v4875_v51, %v4805_v43 }
 0x898   : > { %v4877_v33 = vpop.f32.mrf.mxu1  ;;  %v4969_v56 = vpop.f32.mrf.mxu0 }
 0x89a   : > { %v13271_v49 = vpop.f32.mrf.mxu1  ;;  %v13273_v62 = vpop.f32.mrf.mxu0 }
 0x89b   : > { %15659 = vst [vmem:[#allocation29_spill] sm:$0xff] %v13271_v49  ;;  %15660 = vst [vmem:[#allocation27_spill] sm:$0xff] %v13273_v62  ;;  %v4804_v62 = vadd.f32 %v4791_v58, %v4698_v3  ;;  %v4580_v49 = vadd.f32 %v4579_v41, %v13263_v21 }
 0x89c   : > { %v4973_v53 = vpop.f32.mrf.mxu0  ;;  %v13275_v54 = vpop.f32.mrf.mxu1 }
 0x89d   : > { %15661 = vst [vmem:[#allocation32_spill] sm:$0xff] %v13275_v54  ;;  %v4592_v54 = vadd.f32 %v4591_v6, %v4522_v30  ;;  %v4886_v45 = vadd.f32 %v4873_v9, %v4804_v62  ;;  %v4695_v1 = vadd.f32 %v15665_v13, %v4580_v49  ;;  %v15666_v49 = vld [vmem:[#allocation28_spill] sm:$0xff] }
 0x89e   : > { %v4975_v34 = vpop.f32.mrf.mxu0  ;;  %v13277_v27 = vpop.f32.mrf.mxu1 }
 0x89f   : > { %15662 = vst [vmem:[#allocation31_spill] sm:$0xff] %v13277_v27  ;;  %v4696_v27 = vadd.f32 %v4679_v42, %v4582_v36  ;;  %v4700_v44 = vadd.f32 %v4689_v2, %v4592_v54 }
 0x8a0   : > { %v4979_v38 = vpop.f32.mrf.mxu0  ;;  %v5079_v4 = vpop.f32.mrf.mxu1 }
 0x8a1   : > { %v4802_v0 = vadd.f32 %v4785_v47, %v4696_v27  ;;  %v4806_v21 = vadd.f32 %v4795_v40, %v4700_v44  ;;  %v4992_v60 = vadd.f32 %v4979_v38, %v4886_v45 }
 0x8a2   : > { %v4981_v10 = vpop.f32.mrf.mxu0  ;;  %v5081_v35 = vpop.f32.mrf.mxu1  ;;  %v15667_v2 = vld [vmem:[#allocation29_spill] sm:$0xff]  ;;  %v15668_v47 = vld [vmem:[#allocation27_spill] sm:$0xff] }
 0x8a3   : > { %v4884_v42 = vadd.f32 %v4867_v5, %v4802_v0  ;;  %v4888_v27 = vadd.f32 %v4877_v33, %v4806_v21  ;;  %v4993_v8 = vadd.f32 %v4981_v10, %v4887_v20 }
 0x8a4   : > { %v4983_v19 = vpop.f32.mrf.mxu0  ;;  %v5085_v48 = vpop.f32.mrf.mxu1 }
 0x8a5   : > { %v4990_v62 = vadd.f32 %v4973_v53, %v4884_v42  ;;  %v5327_v42 = vpop.permute.xlu1 %5326 }
 0x8a6   : > { %v13279_v18 = vpop.f32.mrf.mxu0  ;;  %v5087_v28 = vpop.f32.mrf.mxu1  ;;  %v15671_v9 = vld [vmem:[#allocation31_spill] sm:$0xff] }
 0x8a7   : > { %15663 = vst [vmem:[#allocation30_spill] sm:$0xff] %v13279_v18  ;;  %v4697_v18 = vadd.f32 %v4681_v12, %v4584_v16  ;;  %v4801_v16 = vadd.f32 %v4783_v26, %v4695_v1  ;;  %v5098_v12 = vadd.f32 %v5085_v48, %v4992_v60  ;;  %v5096_v29 = vadd.f32 %v5079_v4, %v4990_v62 }
 0x8a8   : > { %v5089_v55 = vpop.f32.mrf.mxu1  ;;  %v13281_v63 = vpop.f32.mrf.mxu0  ;;  %v5099_v53 = vadd.f32 %v5087_v28, %v4993_v8 }
 0x8a9   : > { %15664 = vst [vmem:[#allocation33_spill] sm:$0xff] %v13281_v63  ;;  %v4594_v63 = vadd.f32 %v4593_v46, %v13265_v23  ;;  %v4803_v7 = vadd.f32 %v4787_v11, %v4697_v18  ;;  %v4883_v6 = vadd.f32 %v15666_v49, %v4801_v16  ;;  %v4988_v18 = vadd.f32 %v4969_v56, %v4882_v32  ;;  %v15669_v11 = vld [vmem:[#allocation32_spill] sm:$0xff]  ;;  %v5322_v16 = vpop.permute.xlu0 %5321 }
 0x8aa   : > { %v5091_v24 = vpop.f32.mrf.mxu1  ;;  %v13283_v17 = vpop.f32.mrf.mxu0 }
 0x8ab   : > { %v4701_v3 = vadd.f32 %v4691_v31, %v4594_v63  ;;  %v4885_v41 = vadd.f32 %v4869_v22, %v4803_v7  ;;  %v4994_v31 = vadd.f32 %v4983_v19, %v4888_v27  ;;  %v4989_v14 = vadd.f32 %v15668_v47, %v4883_v6 }
 0x8ac   : > { %v5185_v15 = vpop.f32.mrf.mxu0  ;;  %v5287_v57 = vpop.f32.mrf.mxu1  ;;  %v5094_v61 = vadd.f32 %v15669_v11, %v4988_v18 }
 0x8ad   : > { %v4807_v54 = vadd.f32 %v4797_v59, %v4701_v3  ;;  %v4991_v52 = vadd.f32 %v4975_v34, %v4885_v41  ;;  %v5100_v10 = vadd.f32 %v5089_v55, %v4994_v31  ;;  %v5202_v22 = vadd.f32 %v5185_v15, %v5096_v29 }
 0x8ae   : > { %v5187_v36 = vpop.f32.mrf.mxu0  ;;  %v5289_v30 = vpop.f32.mrf.mxu1  ;;  %v15670_v56 = vld [vmem:[#allocation30_spill] sm:$0xff]  ;;  %v5095_v59 = vadd.f32 %v15671_v9, %v4989_v14  ;;  %v15675_v14 = vld [vmem:[#allocation11_spill] sm:$0xff] }
 0x8af   : > { %v4889_v38 = vadd.f32 %v15667_v2, %v4807_v54  ;;  %v5097_v58 = vadd.f32 %v5081_v35, %v4991_v52  ;;  %v10825_v2 = vld [vmem:[%s14918_s3 + $0xc8] sm:$0xff]  ;;  %vm15676_vm2 = vnez %v15675_v14 }
 0x8b0   : > { %v5191_v37 = vpop.f32.mrf.mxu0  ;;  %v5291_v23 = vpop.f32.mrf.mxu1  ;;  %v15672_v51 = vld [vmem:[#allocation33_spill] sm:$0xff]  ;;  %v5201_v28 = vadd.f32 %v13283_v17, %v5095_v59 }
 0x8b1   : > { %v5204_v26 = vadd.f32 %v5191_v37, %v5098_v12  ;;  %v4995_v34 = vadd.f32 %v15670_v56, %v4889_v38  ;;  %v5200_v4 = vadd.f32 %v15672_v51, %v5094_v61  ;;  %v5203_v45 = vadd.f32 %v5187_v36, %v5097_v58  ;;  %v10824_v38 = vld [vmem:[%s14918_s3 + $0xc0] sm:$0xff] }
 0x8b2   : > { %v5193_v46 = vpop.f32.mrf.mxu0  ;;  %v5293_v63 = vpop.f32.mrf.mxu1  ;;  %v5308_v13 = vadd.f32 %v5291_v23, %v5202_v22  ;;  %v5307_v21 = vadd.f32 %v5289_v30, %v5201_v28  ;;  %v15677_v61 = vld [vmem:[#allocation10_spill] sm:$0xff] }
 0x8b3   : > { %v5205_v19 = vadd.f32 %v5193_v46, %v5099_v53  ;;  %v5101_v0 = vadd.f32 %v5091_v24, %v4995_v34  ;;  %v5306_v1 = vadd.f32 %v5287_v57, %v5200_v4  ;;  %v5309_v43 = vadd.f32 %v5293_v63, %v5203_v45  ;;  %v10827_v63 = vld [vmem:[%s14918_s3 + $0xd8] sm:$0xff]  ;;  %v11318_v34 = vld [vmem:[%s14917_s2 + $0x2e0] sm:$0xff]  }
 0x8b4   : > { %v5195_v48 = vpop.f32.mrf.mxu0  ;;  %v5297_v5 = vpop.f32.mrf.mxu1  ;;  %v5341_v32 = vadd.f32 %v5327_v42, %v5308_v13  ;;  %v5340_v57 = vadd.f32 %v5322_v16, %v5307_v21  ;;  %vm15678_vm1 = vnez %v15677_v61 }
 0x8b5   : > { %v5310_v40 = vadd.f32 %v5297_v5, %v5204_v26  ;;  %v5206_v35 = vadd.f32 %v5195_v48, %v5100_v10  ;;  %v5339_v36 = vadd.f32 %v5322_v16, %v5306_v1  ;;  %v5342_v37 = vadd.f32 %v5327_v42, %v5309_v43 }
 0x8b6   : > { %v5197_v33 = vpop.f32.mrf.mxu0  ;;  %v5299_v44 = vpop.f32.mrf.mxu1  ;;  %v5349_v27 = vmax.f32 %v5341_v32, 0.0  ;;  %v5348_v52 = vmax.f32 %v5340_v57, 0.0  ;;  %v11322_v57 = vld [vmem:[%s14917_s2 + $0x2d8] sm:$0xff]  }
 0x8b7   : > { %v5311_v25 = vadd.f32 %v5299_v44, %v5205_v19  ;;  %v5343_v55 = vadd.f32 %v5332_v39, %v5310_v40  ;;  %v5207_v15 = vadd.f32 %v5197_v33, %v5101_v0  ;;  %v5347_v6 = vmax.f32 %v5339_v36, 0.0  ;;  %v11319_v0 = vld [vmem:[%s14917_s2 + $0x2e8] sm:$0xff]  }
 0x8b8   : > { %v5301_v7 = vpop.f32.mrf.mxu1  ;;  %v5350_v18 = vmax.f32 %v5342_v37, 0.0  ;;  %v15682_v40 = vmov 0   ;;  %v15701_v37 = vld [vmem:[#allocation17_spill] sm:$0xff] }
 0x8b9   : > { %v5312_v3 = vadd.f32 %v5301_v7, %v5206_v35  ;;  %v5344_v41 = vadd.f32 %v5332_v39, %v5311_v25  ;;  %v5351_v23 = vmax.f32 %v5343_v55, 0.0  ;;  %v13302_v8 = vpack.c.bf16 %v5349_v27, %v5347_v6  ;;  %v15693_v55 = vld [vmem:[#allocation14_spill] sm:$0xff] }
 0x8ba   : > { %v5303_v60 = vpop.f32.mrf.mxu1  ;;  %v13306_v46 = vpack.c.bf16 %v5350_v18, %v5348_v52 }
 0x8bb   : > { %v5345_v20 = vadd.f32 %v5337_v50, %v5312_v3  ;;  %v5313_v24 = vadd.f32 %v5303_v60, %v5207_v15  ;;  %v5352_v62 = vmax.f32 %v5344_v41, 0.0  ;;  %v11320_v3 = vld [vmem:[%s14917_s2 + $0x2d0] sm:$0xff]  }
 0x8bc   : > { %v11321_v41 = vld [vmem:[%s14917_s2 + $0x2f0] sm:$0xff]  }
 0x8bd   : > { %v5353_v54 = vmax.f32 %v5345_v20, 0.0  ;;  %v5346_v17 = vadd.f32 %v5337_v50, %v5313_v24  ;;  %v10826_v50 = vld [vmem:[%s14918_s3 + $0xd0] sm:$0xff] }
 0x8bf   : > { %v13296_v12 = vpack.c.bf16 %v5353_v54, %v5351_v23  ;;  %v5354_v49 = vmax.f32 %v5346_v17, 0.0  ;;  %v15703_v54 = vld [vmem:[#allocation16_spill] sm:$0xff] }
 0x8c1   : > { %v13298_v30 = vpack.c.bf16 %v5354_v49, %v5352_v62  ;;  %5398 = vrot.lane.b32.xlu1 %v13296_v12, %s11418_s7 }
 0x8c3   : > { %5394 = vrot.lane.b32.xlu0 %v13298_v30, %s11418_s7 }
 0x8c5   : > { %5396 = vrot.lane.b32.xlu1 %v13302_v8, %s11418_s7 }
 0x8c7   : > { %5392 = vrot.lane.b32.xlu0 %v13306_v46, %s11418_s7 }
 0x8c9   : > { %5369 = vrot.lane.b32.xlu1 %v13296_v12, %s11419_s8 }
 0x8cb   : > { %5361 = vrot.lane.b32.xlu0 %v13306_v46, %s11419_s8 }
 0x8cd   : > { %5565 = vrot.lane.b32.xlu1 %v13296_v12, %s11420_s9 }
 0x8cf   : > { %5363 = vrot.lane.b32.xlu0 %v13298_v30, %s11419_s8 }
 0x8d1   : > { %5367 = vrot.lane.b32.xlu1 %v13302_v8, %s11419_s8 }
 0x8d3   : > { %5561 = vrot.lane.b32.xlu0 %v13298_v30, %s11420_s9 }
 0x8d5   : > { %5563 = vrot.lane.b32.xlu1 %v13302_v8, %s11420_s9 }
 0x8d7   : > { %5559 = vrot.lane.b32.xlu0 %v13306_v46, %s11420_s9 }
 0x8d9   : > { %5671 = vrot.lane.b32.xlu1 %v13296_v12, %s11421_s10 }
 0x8db   : > { %5667 = vrot.lane.b32.xlu0 %v13298_v30, %s11421_s10 }
 0x8dd   : > { %5669 = vrot.lane.b32.xlu1 %v13302_v8, %s11421_s10 }
 0x8df   : > { %5665 = vrot.lane.b32.xlu0 %v13306_v46, %s11421_s10 }
 0x8e1   : > { %5855 = vrot.lane.b32.xlu1 %v13306_v46, %s11422_s11 }
 0x8e3   : > { %5857 = vrot.lane.b32.xlu0 %v13296_v12, %s11422_s11 }
 0x8e5   : > { %5859 = vrot.lane.b32.xlu1 %v13298_v30, %s11422_s11 }
 0x8e7   : > { %5963 = vrot.lane.b32.xlu0 %v13296_v12, %s11423_s12 }
 0x8e9   : > { %5965 = vrot.lane.b32.xlu1 %v13298_v30, %s11423_s12 }
 0x8eb   : > { %5853 = vrot.lane.b32.xlu0 %v13302_v8, %s11422_s11 }
 0x8ed   : > { %5961 = vrot.lane.b32.xlu1 %v13306_v46, %s11423_s12 }
 0x8ef   : > { %5959 = vrot.lane.b32.xlu0 %v13302_v8, %s11423_s12 }
 0x8f1   : > { %6067 = vrot.lane.b32.xlu1 %v13306_v46, %s11424_s13 }
 0x8f3   : > { %6069 = vrot.lane.b32.xlu0 %v13296_v12, %s11424_s13 }
 0x8f5   : > { %6071 = vrot.lane.b32.xlu1 %v13298_v30, %s11424_s13 }
 0x8f7   : > { %6175 = vrot.lane.b32.xlu0 %v13296_v12, %s11425_s14 }
 0x8f9   : > { %6177 = vrot.lane.b32.xlu1 %v13298_v30, %s11425_s14 }
 0x8fb   : > { %6065 = vrot.lane.b32.xlu0 %v13302_v8, %s11424_s13 }
 0x8fd   : > { %6173 = vrot.lane.b32.xlu1 %v13306_v46, %s11425_s14 }
 0x8ff   : > { %6171 = vrot.lane.b32.xlu0 %v13302_v8, %s11425_s14 }
 0x901   : > { %6307 = vperm.xlu1 %11222, %v10827_v63  }
 0x903   : > { %6302 = vperm.xlu0 %11221, %v10826_v50  }
 0x905   : > { %6297 = vperm.xlu1 %11222, %v10825_v2  }
 0x907   : > { %6292 = vperm.xlu0 %11221, %v10824_v38  }
 0x933   : > { %v5399_v29 = vpop.permute.xlu1 %5398 }
 0x935   : > { %v5395_v31 = vpop.permute.xlu0 %5394 }
 0x936   : > { %v5410_v26 = vsel %vm15673_vm10, %v5395_v31, %v5399_v29  ;;  %v5401_v47 = vsel %vm15674_vm15, %v5399_v29, %v5395_v31  ;;  %vm15681_vm10 = vcmask 261120  }
 0x937   : > { %10746 = vmatprep.subr.msk.bf16.mxu0 %vm15676_vm2, %v5401_v47  ;;  %v5397_v11 = vpop.permute.xlu1 %5396  ;;  %v5414_v58 = vsel %vm15678_vm1, %v5410_v26, 0  ;;  %v11325_v26 = vld [vmem:[%s14917_s2 + $0x310] sm:$0xff]  }
 0x938   : > { %5450 = vmatpush1.bf16.msra.mxu0 %v5414_v58 }
 0x939   : > { %v5393_v53 = vpop.permute.xlu0 %5392 }
 0x93a   : > { %v5406_v48 = vsel %vm15679_vm12, %v5393_v53, %v5397_v11  ;;  %v5400_v5 = vsel %vm15680_vm0, %v5397_v11, %v5393_v53  ;;  %vm15683_vm0 = vcmask 138240  }
 0x93b   : > { %10747 = vmatprep.subr.msk.bf16.mxu0 %vm15676_vm2, %v5400_v5  ;;  %v5370_v39 = vpop.permute.xlu1 %5369  ;;  %v5412_v56 = vsel %vm15678_vm1, %v5406_v48, 0  ;;  %vm15684_vm15 = vmmov %vm15683_vm0  ;;  %vm15691_vm1 = vcmask 261120  }
 0x93c   : > { %5452 = vmatpush1.bf16.msra.mxu0 %v5412_v56  ;;  %vm15687_vm12 = vmmov %vm15683_vm0 }
 0x93d   : > { %v5362_v10 = vpop.permute.xlu0 %5361 }
 0x93f   : > { %10748 = vmatmul.mubr.msk.bf16.vlgmr.msra.gmra.mxu0 %vm15681_vm10, %v11318_v34  ;;  %v5566_v22 = vpop.permute.xlu1 %5565  ;;  %vm15688_vm10 = vmmov %vm15683_vm0 }
 0x940   : > { %5479 = vmatprep.mubr.bf16.mxu0 %v15682_v40 }
 0x941   : > { %v5364_v9 = vpop.permute.xlu0 %5363 }
 0x942   : > { %v5381_v59 = vsel %vm15683_vm0, %v5364_v9, %v5370_v39  ;;  %v5372_v51 = vsel %vm15684_vm15, %v5370_v39, %v5364_v9  ;;  %vm15689_vm0 = vcmask 121856  }
 0x943   : > { %10752 = vmatprep.subr.msk.bf16.mxu1 %vm11689_vm5, %v5372_v51  ;;  %v5368_v19 = vpop.permute.xlu1 %5367  ;;  %v5385_v44 = vsel %vm11685_vm3, %v5381_v59, 0  ;;  %vm15690_vm15 = vmmov %vm15689_vm0 }
 0x944   : > { %v5377_v45 = vsel %vm15687_vm12, %v5362_v10, %v5368_v19  ;;  %5519 = vmatpush1.bf16.msra.mxu1 %v5385_v44  ;;  %v5371_v13 = vsel %vm15688_vm10, %v5368_v19, %v5362_v10  ;;  %vm15694_vm12 = vnez %v15693_v55  ;;  %vm15696_vm10 = vmmov %vm15689_vm0 }
 0x945   : > { %v5562_v35 = vpop.permute.xlu0 %5561  ;;  %10753 = vmatprep.subr.msk.bf16.mxu1 %vm11689_vm5, %v5371_v13  ;;  %v5383_v43 = vsel %vm11685_vm3, %v5377_v45, 0 }
 0x946   : > { %v5577_v28 = vsel %vm15689_vm0, %v5562_v35, %v5566_v22  ;;  %v5568_v1 = vsel %vm15690_vm15, %v5566_v22, %v5562_v35  ;;  %vm15698_vm15 = vcmask 7168   ;;  %v11326_v22 = vld [vmem:[%s14917_s2 + $0x308] sm:$0xff]   ;;  %v11328_v35 = vld [vmem:[%s14917_s2 + $0x320] sm:$0xff]  }
 0x947   : > { %10749 = vmatmul.mubr.msk.bf16.gmra.mxu0 %vm15691_vm1, %v11319_v0  ;;  %10762 = vmatprep.subr.msk.bf16.mxu0 %vm15611_vm13, %v5568_v1  ;;  %v5564_v7 = vpop.permute.xlu1 %5563  ;;  %v5581_v15 = vsel %vm15694_vm12, %v5577_v28, 0  ;;  %vm15695_vm1 = vmmov %vm15689_vm0  ;;  %vm15697_vm0 = vcmask 261120   ;;  %v11327_v0 = vld [vmem:[%s14917_s2 + $0x318] sm:$0xff]  }
 0x948   : > { %5521 = vmatpush1.bf16.msra.mxu1 %v5383_v43  ;;  %5617 = vmatpush1.bf16.msra.mxu0 %v5581_v15 }
 0x949   : > { %v5560_v42 = vpop.permute.xlu0 %5559  ;;  %5636 = vmatprep.mubr.bf16.mxu0 %v15682_v40 }
 0x94a   : > { %v5573_v21 = vsel %vm15695_vm1, %v5560_v42, %v5564_v7  ;;  %v5567_v60 = vsel %vm15696_vm10, %v5564_v7, %v5560_v42  ;;  %vm15699_vm1 = vmmov %vm15698_vm15 }
 0x94b   : > { %10754 = vmatmul.mubr.msk.bf16.vlgmr.msra.gmra.mxu1 %vm15697_vm0, %v11320_v3  ;;  %10763 = vmatprep.subr.msk.bf16.mxu0 %vm15611_vm13, %v5567_v60  ;;  %v5672_v16 = vpop.permute.xlu1 %5671  ;;  %v5579_v32 = vsel %vm15694_vm12, %v5573_v21, 0  ;;  %vm15700_vm10 = vmmov %vm15697_vm0  ;;  %vm15702_vm0 = vnez %v15701_v37  ;;  %vm15704_vm12 = vnez %v15703_v54  ;;  %v11329_v21 = vld [vmem:[%s14917_s2 + $0x330] sm:$0xff]  }
 0x94c   : > { %5619 = vmatpush1.bf16.msra.mxu0 %v5579_v32  ;;  %5548 = vmatprep.mubr.bf16.mxu1 %v15682_v40 }
 0x94d   : > { %v5668_v20 = vpop.permute.xlu0 %5667  ;;  %5804 = vmatprep.subr.bf16.mxu0 %v13298_v30 }
 0x94e   : > { %v5683_v24 = vsel %vm15698_vm15, %v5668_v20, %v5672_v16  ;;  %v5674_v36 = vsel %vm15699_vm1, %v5672_v16, %v5668_v20  ;;  %vm15705_vm15 = vmmov %vm15699_vm1  ;;  %v15728_v20 = vld [vmem:[#allocation25_spill] sm:$0xff] }
 0x94f   : > { %10764 = vmatmul.mubr.msk.bf16.vlgmr.msra.gmra.mxu0 %vm15700_vm10, %v11321_v41  ;;  %10772 = vmatprep.subr.msk.bf16.mxu1 %vm15702_vm0, %v5674_v36  ;;  %v5670_v23 = vpop.permute.xlu1 %5669  ;;  %v5687_v17 = vsel %vm15704_vm12, %v5683_v24, 0 }
 0x950   : > { %5723 = vmatpush1.bf16.msra.mxu1 %v5687_v17  ;;  %5805 = vmatpush1.bf16.msra.mxu0 %v13296_v12  ;;  %v11323_v12 = vld [vmem:[%s14917_s2 + $0x2f8] sm:$0xff]  }
 0x951   : > { %v5666_v27 = vpop.permute.xlu0 %5665  ;;  %5806 = vmatprep.subr.bf16.mxu0 %v13306_v46  ;;  %5646 = vmatprep.mubr.bf16.mxu0 %v15682_v40  ;;  %v11324_v46 = vld [vmem:[%s14917_s2 + $0x300] sm:$0xff]  }
 0x952   : > { %v5679_v62 = vsel %vm15705_vm15, %v5666_v27, %v5670_v23  ;;  %v5673_v49 = vsel %vm15699_vm1, %v5670_v23, %v5666_v27  ;;  %vm15706_vm15 = vmmov %vm15700_vm10  ;;  %vm15707_vm1 = vcmask 1039360  }
 0x953   : > { %10755 = vmatmul.mubr.msk.bf16.gmra.mxu1 %vm15700_vm10, %v11322_v57  ;;  %10773 = vmatprep.subr.msk.bf16.mxu1 %vm15702_vm0, %v5673_v49  ;;  %v5856_v6 = vpop.permute.xlu1 %5855  ;;  %v5685_v18 = vsel %vm15704_vm12, %v5679_v62, 0  ;;  %vm15708_vm10 = vmmov %vm15707_vm1  ;;  %vm15717_vm0 = vcmask 261120   ;;  %v11330_v57 = vld [vmem:[%s14917_s2 + $0x328] sm:$0xff]  }
 0x954   : > { %5725 = vmatpush1.bf16.msra.mxu1 %v5685_v18  ;;  %5807 = vmatpush1.bf16.msra.mxu0 %v13302_v8  ;;  %vm15711_vm12 = vmmov %vm15706_vm15 }
 0x955   : > { %v5858_v30 = vpop.permute.xlu0 %5857  ;;  %5742 = vmatprep.mubr.bf16.mxu1 %v15682_v40 }
 0x957   : > { %10765 = vmatmul.mubr.msk.bf16.gmra.mxu0 %vm15706_vm15, %v11323_v12  ;;  %v5860_v52 = vpop.permute.xlu1 %5859  ;;  %vm15712_vm15 = vcmask 924672   ;;  %v11331_v12 = vld [vmem:[%s14917_s2 + $0x338] sm:$0xff]  }
 0x958   : > { %v5862_v63 = vsel %vm15707_vm1, %v5858_v30, %v5860_v52  ;;  %v5871_v50 = vsel %vm15708_vm10, %v5860_v52, %v5858_v30  ;;  %5824 = vmatprep.mubr.bf16.mxu0 %v15682_v40  ;;  %vm15713_vm1 = vmmov %vm15712_vm15  ;;  %v11332_v30 = vld [vmem:[%s14917_s2 + $0x340] sm:$0xff]   ;;  %v11333_v52 = vld [vmem:[%s14917_s2 + $0x350] sm:$0xff]  }
 0x959   : > { %v5964_v2 = vpop.permute.xlu0 %5963  ;;  %10790 = vmatprep.subr.msk.bf16.mxu1 %vm11803_vm8, %v5871_v50  ;;  %v5875_v29 = vsel %vm11817_vm6, %v5862_v63, 0  ;;  %v11335_v63 = vld [vmem:[%s14917_s2 + $0x358] sm:$0xff]  }
 0x95b   : > { %10774 = vmatmul.mubr.msk.bf16.vlgmr.msra.gmra.mxu1 %vm15711_vm12, %v11324_v46  ;;  %v5966_v31 = vpop.permute.xlu1 %5965  ;;  %vm15716_vm12 = vmmov %vm15708_vm10  ;;  %v11334_v46 = vld [vmem:[%s14917_s2 + $0x348] sm:$0xff]  }
 0x95c   : > { %5911 = vmatpush1.bf16.msra.mxu1 %v5875_v29  ;;  %v5968_v47 = vsel %vm15712_vm15, %v5964_v2, %v5966_v31  ;;  %v5977_v11 = vsel %vm15713_vm1, %v5966_v31, %v5964_v2  ;;  %5752 = vmatprep.mubr.bf16.mxu1 %v15682_v40  ;;  %vm15718_vm15 = vmmov %vm15713_vm1 }
 0x95d   : > { %v5854_v58 = vpop.permute.xlu0 %5853  ;;  %10800 = vmatprep.subr.msk.bf16.mxu0 %vm11822_vm11, %v5977_v11  ;;  %v5981_v5 = vsel %vm15537_vm14, %v5968_v47, 0 }
 0x95e   : > { %v5861_v39 = vsel %vm15716_vm12, %v5854_v58, %v5856_v6  ;;  %v5867_v56 = vsel %vm15708_vm10, %v5856_v6, %v5854_v58  ;;  %vm15719_vm12 = vmmov %vm15717_vm0  ;;  %vm15720_vm10 = vcmask 916480  }
 0x95f   : > { %10782 = vmatmul.mubr.msk.bf16.vlgmr.msra.gmra.mxu0 %vm15717_vm0, %v11325_v26  ;;  %10791 = vmatprep.subr.msk.bf16.mxu1 %vm11803_vm8, %v5867_v56  ;;  %v5962_v34 = vpop.permute.xlu1 %5961  ;;  %v5873_v10 = vsel %vm11817_vm6, %v5861_v39, 0 }
 0x960   : > { %6017 = vmatpush1.bf16.msra.mxu0 %v5981_v5  ;;  %5913 = vmatpush1.bf16.msra.mxu1 %v5873_v10 }
 0x961   : > { %v5960_v9 = vpop.permute.xlu0 %5959  ;;  %5834 = vmatprep.mubr.bf16.mxu0 %v15682_v40 }
 0x962   : > { %v5967_v59 = vsel %vm15718_vm15, %v5960_v9, %v5962_v34  ;;  %v5973_v51 = vsel %vm15713_vm1, %v5962_v34, %v5960_v9  ;;  %vm15721_vm15 = vmmov %vm15720_vm10 }
 0x963   : > { %10775 = vmatmul.mubr.msk.bf16.gmra.mxu1 %vm15717_vm0, %v11326_v22  ;;  %10801 = vmatprep.subr.msk.bf16.mxu0 %vm11822_vm11, %v5973_v51  ;;  %v6068_v19 = vpop.permute.xlu1 %6067  ;;  %v5979_v44 = vsel %vm15537_vm14, %v5967_v59, 0  ;;  %vm15724_vm1 = vmmov %vm15717_vm0  ;;  %vm15725_vm0 = vcmask 908288   ;;  %vm15731_vm14 = vcmask 261120  }
 0x964   : > { %6019 = vmatpush1.bf16.msra.mxu0 %v5979_v44  ;;  %5930 = vmatprep.mubr.bf16.mxu1 %v15682_v40 }
 0x965   : > { %v6070_v45 = vpop.permute.xlu0 %6069 }
 0x967   : > { %10783 = vmatmul.mubr.msk.bf16.gmra.mxu0 %vm15719_vm12, %v11327_v0  ;;  %v6072_v13 = vpop.permute.xlu1 %6071  ;;  %vm15726_vm12 = vmmov %vm15725_vm0 }
 0x968   : > { %v6074_v28 = vsel %vm15720_vm10, %v6070_v45, %v6072_v13  ;;  %v6083_v1 = vsel %vm15721_vm15, %v6072_v13, %v6070_v45  ;;  %6036 = vmatprep.mubr.bf16.mxu0 %v15682_v40  ;;  %vm15729_vm10 = vnez %v15728_v20 }
 0x969   : > { %v6176_v7 = vpop.permute.xlu0 %6175  ;;  %10810 = vmatprep.subr.msk.bf16.mxu1 %vm11884_vm4, %v6083_v1  ;;  %v6087_v3 = vsel %vm11898_vm7, %v6074_v28, 0 }
 0x96b   : > { %10792 = vmatmul.mubr.msk.bf16.vlgmr.msra.gmra.mxu1 %vm15724_vm1, %v11328_v35  ;;  %v6178_v42 = vpop.permute.xlu1 %6177  ;;  %vm15730_vm1 = vmmov %vm15721_vm15 }
 0x96c   : > { %6123 = vmatpush1.bf16.msra.mxu1 %v6087_v3  ;;  %v6180_v60 = vsel %vm15725_vm0, %v6176_v7, %v6178_v42  ;;  %v6189_v16 = vsel %vm15726_vm12, %v6178_v42, %v6176_v7  ;;  %5940 = vmatprep.mubr.bf16.mxu1 %v15682_v40  ;;  %vm15732_vm12 = vmmov %vm15725_vm0 }
 0x96d   : > { %v6066_v32 = vpop.permute.xlu0 %6065  ;;  %10820 = vmatprep.subr.msk.bf16.mxu0 %vm11903_vm9, %v6189_v16  ;;  %v6193_v24 = vsel %vm15729_vm10, %v6180_v60, 0 }
 0x96e   : > { %v6073_v36 = vsel %vm15721_vm15, %v6066_v32, %v6068_v19  ;;  %v6079_v23 = vsel %vm15730_vm1, %v6068_v19, %v6066_v32  ;;  %vm15733_vm15 = vmmov %vm15731_vm14 }
 0x96f   : > { %10802 = vmatmul.mubr.msk.bf16.vlgmr.msra.gmra.mxu0 %vm15731_vm14, %v11329_v21  ;;  %10811 = vmatprep.subr.msk.bf16.mxu1 %vm11884_vm4, %v6079_v23  ;;  %v6085_v17 = vsel %vm11898_vm7, %v6073_v36, 0  ;;  %v6174_v27 = vpop.permute.xlu1 %6173  ;;  %vm15734_vm1 = vmmov %vm15731_vm14 }
 0x970   : > { %6229 = vmatpush1.bf16.msra.mxu0 %v6193_v24  ;;  %6125 = vmatpush1.bf16.msra.mxu1 %v6085_v17 }
 0x971   : > { %v6172_v62 = vpop.permute.xlu0 %6171  ;;  %6046 = vmatprep.mubr.bf16.mxu0 %v15682_v40 }
 0x972   : > { %v6179_v49 = vsel %vm15725_vm0, %v6172_v62, %v6174_v27  ;;  %v6185_v6 = vsel %vm15732_vm12, %v6174_v27, %v6172_v62  ;;  %vm15735_vm0 = vmmov %vm15734_vm1 }
 0x973   : > { %10793 = vmatmul.mubr.msk.bf16.gmra.mxu1 %vm15731_vm14, %v11330_v57  ;;  %10821 = vmatprep.subr.msk.bf16.mxu0 %vm11903_vm9, %v6185_v6  ;;  %v6191_v18 = vsel %vm15729_vm10, %v6179_v49, 0  ;;  %vm15736_vm12 = vmmov %vm15735_vm0 }
 0x974   : > { %6231 = vmatpush1.bf16.msra.mxu0 %v6191_v18  ;;  %6142 = vmatprep.mubr.bf16.mxu1 %v15682_v40  ;;  %vm15737_vm14 = vmmov %vm15735_vm0 }
 0x977   : > { %10803 = vmatmul.mubr.msk.bf16.gmra.mxu0 %vm15733_vm15, %v11331_v12  ;;  %vm15770_vm15 = vcmask 130048  }
 0x978   : > { %6248 = vmatprep.mubr.bf16.mxu0 %v15682_v40 }
 0x97b   : > { %10812 = vmatmul.mubr.msk.bf16.vlgmr.msra.gmra.mxu1 %vm15734_vm1, %v11332_v30  ;;  %vm15771_vm1 = vmmov %vm15770_vm15 }
 0x97c   : > { %6152 = vmatprep.mubr.bf16.mxu1 %v15682_v40 }
 0x97f   : > { %10822 = vmatmul.mubr.msk.bf16.vlgmr.msra.gmra.mxu0 %vm15735_vm0, %v11333_v52 }
 0x980   : > { %6258 = vmatprep.mubr.bf16.mxu0 %v15682_v40 }
 0x983   : > { %10813 = vmatmul.mubr.msk.bf16.gmra.mxu1 %vm15736_vm12, %v11334_v46  ;;  %vm15775_vm12 = vmmov %vm15771_vm1 }
 0x984   : > { %6448 = vmatprep.mubr.bf16.mxu1 %v15682_v40 }
 0x987   : > { %10823 = vmatmul.mubr.msk.bf16.gmra.mxu0 %vm15737_vm14, %v11335_v63  ;;  %vm15776_vm14 = vmmov %vm15771_vm1 }
 0x988   : > { %6517 = vmatprep.mubr.bf16.mxu0 %v15682_v40 }
 0x9ff   : > { %v5471_v50 = vpop.f32.mrf.mxu0 }
 0xa01   : > { %v13570_v2 = vpop.f32.mrf.mxu0 }
 0xa03   : > { %v5475_v29 = vpop.f32.mrf.mxu0 }
 0xa05   : > { %v5477_v31 = vpop.f32.mrf.mxu0 }
 0xa07   : > { %v5481_v26 = vpop.f32.mrf.mxu0 }
 0xa09   : > { %v5483_v47 = vpop.f32.mrf.mxu0 }
 0xa0b   : > { %v5485_v11 = vpop.f32.mrf.mxu0  ;;  %v5540_v58 = vpop.f32.mrf.mxu1 }
 0xa0c   : > { %v5541_v4 = vadd.f32 %v5540_v58, %v5471_v50 }
 0xa0d   : > { %v13572_v5 = vpop.f32.mrf.mxu0  ;;  %v5542_v39 = vpop.f32.mrf.mxu1 }
 0xa0e   : > { %15738 = vst [vmem:[#allocation26_spill] sm:$0xff] %v13572_v5 }
 0xa0f   : > { %v5544_v56 = vpop.f32.mrf.mxu1  ;;  %v5638_v34 = vpop.f32.mrf.mxu0 }
 0xa10   : > { %v5545_v55 = vadd.f32 %v5544_v56, %v5475_v29 }
 0xa11   : > { %v5546_v10 = vpop.f32.mrf.mxu1  ;;  %v13574_v22 = vpop.f32.mrf.mxu0 }
 0xa12   : > { %15739 = vst [vmem:[#allocation28_spill] sm:$0xff] %v13574_v22  ;;  %v5547_v40 = vadd.f32 %v5546_v10, %v5477_v31  ;;  %v5657_v22 = vadd.f32 %v5638_v34, %v5541_v4 }
 0xa13   : > { %v5550_v9 = vpop.f32.mrf.mxu1  ;;  %v5642_v59 = vpop.f32.mrf.mxu0 }
 0xa14   : > { %v5551_v38 = vadd.f32 %v5550_v9, %v5481_v26 }
 0xa15   : > { %v5552_v51 = vpop.f32.mrf.mxu1  ;;  %v5644_v19 = vpop.f32.mrf.mxu0  ;;  %v15746_v26 = vld [vmem:[#allocation26_spill] sm:$0xff] }
 0xa16   : > { %v5553_v25 = vadd.f32 %v5552_v51, %v5483_v47  ;;  %v5660_v5 = vadd.f32 %v5644_v19, %v5547_v40 }
 0xa17   : > { %v5554_v44 = vpop.f32.mrf.mxu1  ;;  %v5648_v0 = vpop.f32.mrf.mxu0 }
 0xa18   : > { %v5661_v33 = vadd.f32 %v5648_v0, %v5551_v38 }
 0xa19   : > { %v5556_v45 = vpop.f32.mrf.mxu1  ;;  %v5650_v13 = vpop.f32.mrf.mxu0  ;;  %v15747_v31 = vld [vmem:[#allocation28_spill] sm:$0xff] }
 0xa1a   : > { %v5557_v9 = vadd.f32 %v5556_v45, %v15746_v26 }
 0xa1b   : > { %v5652_v35 = vpop.f32.mrf.mxu0  ;;  %v5744_v28 = vpop.f32.mrf.mxu1 }
 0xa1c   : > { %v5763_v10 = vadd.f32 %v5744_v28, %v5657_v22 }
 0xa1d   : > { %v5654_v1 = vpop.f32.mrf.mxu0  ;;  %v13576_v7 = vpop.f32.mrf.mxu1 }
 0xa1e   : > { %15740 = vst [vmem:[#allocation29_spill] sm:$0xff] %v13576_v7  ;;  %v5543_v7 = vadd.f32 %v5542_v39, %v13570_v2  ;;  %v5664_v51 = vadd.f32 %v5654_v1, %v5557_v9 }
 0xa1f   : > { %v5748_v3 = vpop.f32.mrf.mxu1  ;;  %v5826_v42 = vpop.f32.mrf.mxu0 }
 0xa20   : > { %v5658_v58 = vadd.f32 %v15747_v31, %v5543_v7  ;;  %v5845_v34 = vadd.f32 %v5826_v42, %v5763_v10 }
 0xa21   : > { %v5750_v21 = vpop.f32.mrf.mxu1  ;;  %v13578_v60 = vpop.f32.mrf.mxu0 }
 0xa22   : > { %15741 = vst [vmem:[#allocation27_spill] sm:$0xff] %v13578_v60 }
 0xa23   : > { %v5754_v16 = vpop.f32.mrf.mxu1  ;;  %v5830_v32 = vpop.f32.mrf.mxu0 }
 0xa24   : > { %v5767_v60 = vadd.f32 %v5754_v16, %v5661_v33 }
 0xa25   : > { %v5756_v24 = vpop.f32.mrf.mxu1  ;;  %v5832_v36 = vpop.f32.mrf.mxu0  ;;  %v15748_v40 = vld [vmem:[#allocation29_spill] sm:$0xff] }
 0xa26   : > { %v5764_v39 = vadd.f32 %v15748_v40, %v5658_v58  ;;  %v15757_v40 = vld [vmem:[#allocation5_spill] sm:$0xff] }
 0xa27   : > { %v5758_v23 = vpop.f32.mrf.mxu1  ;;  %v5836_v17 = vpop.f32.mrf.mxu0 }
 0xa28   : > { %v5849_v50 = vadd.f32 %v5836_v17, %v5767_v60 }
 0xa29   : > { %v5760_v57 = vpop.f32.mrf.mxu1  ;;  %v5838_v27 = vpop.f32.mrf.mxu0  ;;  %v15749_v22 = vld [vmem:[#allocation27_spill] sm:$0xff] }
 0xa2a   : > { %v5846_v28 = vadd.f32 %v15749_v22, %v5764_v39 }
 0xa2b   : > { %v5840_v62 = vpop.f32.mrf.mxu0  ;;  %v5932_v49 = vpop.f32.mrf.mxu1 }
 0xa2d   : > { %v5842_v6 = vpop.f32.mrf.mxu0  ;;  %v13580_v18 = vpop.f32.mrf.mxu1 }
 0xa2e   : > { %15742 = vst [vmem:[#allocation32_spill] sm:$0xff] %v13580_v18  ;;  %v5662_v18 = vadd.f32 %v5650_v13, %v5553_v25 }
 0xa2f   : > { %v5936_v12 = vpop.f32.mrf.mxu1  ;;  %v13582_v30 = vpop.f32.mrf.mxu0 }
 0xa30   : > { %15743 = vst [vmem:[#allocation30_spill] sm:$0xff] %v13582_v30  ;;  %v5555_v30 = vadd.f32 %v5554_v44, %v5485_v11  ;;  %v5768_v38 = vadd.f32 %v5756_v24, %v5662_v18  ;;  %v5770_v44 = vadd.f32 %v5760_v57, %v5664_v51 }
 0xa31   : > { %v5938_v52 = vpop.f32.mrf.mxu1  ;;  %v13584_v46 = vpop.f32.mrf.mxu0 }
 0xa32   : > { %15744 = vst [vmem:[#allocation31_spill] sm:$0xff] %v13584_v46  ;;  %v5659_v46 = vadd.f32 %v5642_v59, %v5545_v55  ;;  %v5663_v56 = vadd.f32 %v5652_v35, %v5555_v30  ;;  %v5766_v55 = vadd.f32 %v5750_v21, %v5660_v5  ;;  %v5850_v2 = vadd.f32 %v5838_v27, %v5768_v38 }
 0xa33   : > { %v5942_v63 = vpop.f32.mrf.mxu1  ;;  %v6042_v20 = vpop.f32.mrf.mxu0  ;;  %v5951_v5 = vadd.f32 %v5932_v49, %v5845_v34  ;;  %v5852_v1 = vadd.f32 %v5842_v6, %v5770_v44 }
 0xa34   : > { %v5765_v47 = vadd.f32 %v5748_v3, %v5659_v46  ;;  %v5769_v59 = vadd.f32 %v5758_v23, %v5663_v56  ;;  %v5955_v4 = vadd.f32 %v5942_v63, %v5849_v50  ;;  %v5848_v19 = vadd.f32 %v5832_v36, %v5766_v55  ;;  %v6308_v50 = vpop.permute.xlu1 %6307  ;;  %v6303_v55 = vpop.permute.xlu0 %6302 }
 0xa35   : > { %v5944_v41 = vpop.f32.mrf.mxu1  ;;  %v6044_v15 = vpop.f32.mrf.mxu0  ;;  %v15750_v42 = vld [vmem:[#allocation32_spill] sm:$0xff] }
 0xa36   : > { %v5847_v33 = vadd.f32 %v5830_v32, %v5765_v47  ;;  %v5851_v13 = vadd.f32 %v5840_v62, %v5769_v59  ;;  %v5956_v3 = vadd.f32 %v5944_v41, %v5850_v2  ;;  %v5954_v21 = vadd.f32 %v5938_v52, %v5848_v19  ;;  %v15758_v19 = vld [vmem:[#allocation8_spill] sm:$0xff] }
 0xa37   : > { %v5946_v43 = vpop.f32.mrf.mxu1  ;;  %v6048_v48 = vpop.f32.mrf.mxu0  ;;  %v5952_v36 = vadd.f32 %v15750_v42, %v5846_v28  ;;  %v15751_v57 = vld [vmem:[#allocation30_spill] sm:$0xff]  ;;  %v10919_v42 = vld [vmem:[%s14918_s3 + $0xf8] sm:$0xff] }
 0xa38   : > { %v5953_v35 = vadd.f32 %v5936_v12, %v5847_v33  ;;  %v6061_v7 = vadd.f32 %v6048_v48, %v5955_v4  ;;  %v5957_v24 = vadd.f32 %v5946_v43, %v5851_v13  ;;  %v6057_v27 = vadd.f32 %v15751_v57, %v5951_v5  ;;  %v15756_v4 = vld [vmem:[#allocation6_spill] sm:$0xff]  ;;  %v15762_v13 = vld [vmem:[#allocation3_spill] sm:$0xff] }
 0xa39   : > { %v5948_v53 = vpop.f32.mrf.mxu1  ;;  %v6050_v8 = vpop.f32.mrf.mxu0  ;;  %v6060_v18 = vadd.f32 %v6044_v15, %v5954_v21  ;;  %v15752_v6 = vld [vmem:[#allocation31_spill] sm:$0xff] }
 0xa3a   : > { %v6059_v32 = vadd.f32 %v6042_v20, %v5953_v35  ;;  %v6062_v23 = vadd.f32 %v6050_v8, %v5956_v3  ;;  %v5958_v62 = vadd.f32 %v5948_v53, %v5852_v1  ;;  %v6058_v52 = vadd.f32 %v15752_v6, %v5952_v36  ;;  %v6298_v3 = vpop.permute.xlu1 %6297  ;;  %v6293_v21 = vpop.permute.xlu0 %6292  ;;  %v10918_v36 = vld [vmem:[%s14918_s3 + $0xf0] sm:$0xff]  ;;  %v10917_v57 = vld [vmem:[%s14918_s3 + $0xe8] sm:$0xff] }
 0xa3b   : > { %v6052_v54 = vpop.f32.mrf.mxu0  ;;  %v13586_v37 = vpop.f32.mrf.mxu1 }
 0xa3c   : > { %15745 = vst [vmem:[#allocation33_spill] sm:$0xff] %v13586_v37  ;;  %v6063_v48 = vadd.f32 %v6052_v54, %v5957_v24 }
 0xa3d   : > { %v6054_v61 = vpop.f32.mrf.mxu0  ;;  %v13588_v14 = vpop.f32.mrf.mxu1 }
 0xa3e   : > { %v6064_v20 = vadd.f32 %v6054_v61, %v5958_v62  ;;  %v6164_v53 = vadd.f32 %v13588_v14, %v6058_v52  ;;  %v15755_v61 = vld [vmem:[#allocation4_spill] sm:$0xff]  ;;  %v15759_v14 = vld [vmem:[#allocation7_spill] sm:$0xff] }
 0xa3f   : > { %v6148_v37 = vpop.f32.mrf.mxu1  ;;  %v6250_v29 = vpop.f32.mrf.mxu0 }
 0xa40   : > { %v6165_v30 = vadd.f32 %v6148_v37, %v6059_v32  ;;  %v15754_v37 = vld [vmem:[#allocation2_spill] sm:$0xff] }
 0xa41   : > { %v6150_v11 = vpop.f32.mrf.mxu1  ;;  %v6252_v25 = vpop.f32.mrf.mxu0 }
 0xa42   : > { %v6166_v9 = vadd.f32 %v6150_v11, %v6060_v18  ;;  %v6270_v33 = vadd.f32 %v6252_v25, %v6164_v53  ;;  %v15763_v25 = vld [vmem:[#allocation9_spill] sm:$0xff] }
 0xa43   : > { %v6154_v0 = vpop.f32.mrf.mxu1  ;;  %v6254_v45 = vpop.f32.mrf.mxu0  ;;  %v15753_v63 = vld [vmem:[#allocation33_spill] sm:$0xff] }
 0xa44   : > { %v6167_v17 = vadd.f32 %v6154_v0, %v6061_v7  ;;  %v6163_v26 = vadd.f32 %v15753_v63, %v6057_v27  ;;  %v6271_v56 = vadd.f32 %v6254_v45, %v6165_v30  ;;  %v6278_v7 = vadd.f32 %v6270_v33, %v15763_v25  ;;  %v10916_v27 = vld [vmem:[%s14918_s3 + $0xe0] sm:$0xff]  ;;  %v15797_v25 = vld [vmem:[#allocation17_spill] sm:$0xff] }
 0xa45   : > { %v6156_v60 = vpop.f32.mrf.mxu1  ;;  %v6256_v16 = vpop.f32.mrf.mxu0 }
 0xa46   : > { %v6168_v46 = vadd.f32 %v6156_v60, %v6062_v23  ;;  %v6269_v15 = vadd.f32 %v6250_v29, %v6163_v26  ;;  %v6272_v54 = vadd.f32 %v6256_v16, %v6166_v9  ;;  %v6279_v2 = vadd.f32 %v6271_v56, %v15755_v61 }
 0xa47   : > { %v6158_v12 = vpop.f32.mrf.mxu1  ;;  %v6260_v41 = vpop.f32.mrf.mxu0  ;;  %v13632_v24 = vadd.f32 %v6293_v21, %v6278_v7  ;;  %v15778_v56 = vmov 0  }
 0xa48   : > { %v6273_v49 = vadd.f32 %v6260_v41, %v6167_v17  ;;  %v6169_v47 = vadd.f32 %v6158_v12, %v6063_v48  ;;  %v6277_v44 = vadd.f32 %v6269_v15, %v15758_v19  ;;  %v6280_v29 = vadd.f32 %v6272_v54, %v15759_v14 }
 0xa49   : > { %v6160_v43 = vpop.f32.mrf.mxu1  ;;  %v6262_v8 = vpop.f32.mrf.mxu0  ;;  %v13612_v22 = vadd.f32 %v6298_v3, %v6279_v2  ;;  %15769 = vst [vmem:[#allocation33_spill] sm:$0xff] %v13632_v24 }
 0xa4a   : > { %v6274_v38 = vadd.f32 %v6262_v8, %v6168_v46  ;;  %v6281_v58 = vadd.f32 %v6273_v49, %v15754_v37  ;;  %v6170_v10 = vadd.f32 %v6160_v43, %v6064_v20  ;;  %v13622_v60 = vadd.f32 %v6293_v21, %v6277_v44  ;;  %v15773_v46 = vld [vmem:[#allocation10_spill] sm:$0xff]  ;;  %v11336_v43 = vld [vmem:[%s14917_s2 + $0x370] sm:$0xff]   ;;  %v11337_v37 = vld [vmem:[%s14917_s2 + $0x378] sm:$0xff]  }
 0xa4b   : > { %v6264_v31 = vpop.f32.mrf.mxu0  ;;  %15764 = vst [vmem:[#allocation29_spill] sm:$0xff] %v13612_v22  ;;  %v13624_v16 = vadd.f32 %v6298_v3, %v6280_v29  ;;  %vm15774_vm0 = vnez %v15773_v46  ;;  %v11339_v29 = vld [vmem:[%s14917_s2 + $0x380] sm:$0xff]   ;;  %v15799_v21 = vld [vmem:[#allocation16_spill] sm:$0xff] }
 0xa4c   : > { %v6275_v51 = vadd.f32 %v6264_v31, %v6169_v47  ;;  %v6282_v11 = vadd.f32 %v6274_v38, %v15756_v4  ;;  %v13606_v0 = vadd.f32 %v6303_v55, %v6281_v58  ;;  %15767 = vst [vmem:[#allocation30_spill] sm:$0xff] %v13622_v60  ;;  %v13638_v23 = vpack.c.bf16 %v13612_v22, %v13622_v60  ;;  %v15789_v4 = vld [vmem:[#allocation14_spill] sm:$0xff] }
 0xa4d   : > { %v6266_v59 = vpop.f32.mrf.mxu0  ;;  %15768 = vst [vmem:[#allocation31_spill] sm:$0xff] %v13624_v16  ;;  %v13644_v17 = vpack.c.bf16 %v13624_v16, %v13632_v24 }
 0xa4e   : > { %v6283_v39 = vadd.f32 %v6275_v51, %v15757_v40  ;;  %v6276_v34 = vadd.f32 %v6266_v59, %v6170_v10  ;;  %15760 = vst [vmem:[#allocation26_spill] sm:$0xff] %v13606_v0  ;;  %v13614_v28 = vadd.f32 %v6303_v55, %v6282_v11  ;;  %v11338_v40 = vld [vmem:[%s14917_s2 + $0x360] sm:$0xff]  }
 0xa50   : > { %v13608_v45 = vadd.f32 %v6308_v50, %v6283_v39  ;;  %v6284_v35 = vadd.f32 %v6276_v34, %v15762_v13  ;;  %15765 = vst [vmem:[#allocation27_spill] sm:$0xff] %v13614_v28 }
 0xa52   : > { %15761 = vst [vmem:[#allocation28_spill] sm:$0xff] %v13608_v45  ;;  %v13616_v5 = vadd.f32 %v6308_v50, %v6284_v35  ;;  %v13620_v1 = vpack.c.bf16 %v13608_v45, %v13606_v0 }
 0xa54   : > { %15766 = vst [vmem:[#allocation32_spill] sm:$0xff] %v13616_v5  ;;  %6377 = vrot.lane.b32.xlu1 %v13620_v1, %s11418_s7  ;;  %v13630_v32 = vpack.c.bf16 %v13616_v5, %v13614_v28 }
 0xa56   : > { %6373 = vrot.lane.b32.xlu0 %v13630_v32, %s11418_s7 }
 0xa58   : > { %6375 = vrot.lane.b32.xlu1 %v13638_v23, %s11418_s7 }
 0xa5a   : > { %6371 = vrot.lane.b32.xlu0 %v13644_v17, %s11418_s7 }
 0xa5c   : > { %6348 = vrot.lane.b32.xlu1 %v13620_v1, %s11419_s8 }
 0xa5e   : > { %6340 = vrot.lane.b32.xlu0 %v13644_v17, %s11419_s8 }
 0xa60   : > { %6544 = vrot.lane.b32.xlu1 %v13620_v1, %s11420_s9 }
 0xa62   : > { %6342 = vrot.lane.b32.xlu0 %v13630_v32, %s11419_s8 }
 0xa64   : > { %6346 = vrot.lane.b32.xlu1 %v13638_v23, %s11419_s8 }
 0xa66   : > { %6540 = vrot.lane.b32.xlu0 %v13630_v32, %s11420_s9 }
 0xa68   : > { %6542 = vrot.lane.b32.xlu1 %v13638_v23, %s11420_s9 }
 0xa6a   : > { %6538 = vrot.lane.b32.xlu0 %v13644_v17, %s11420_s9 }
 0xa6c   : > { %6650 = vrot.lane.b32.xlu1 %v13620_v1, %s11421_s10 }
 0xa6e   : > { %6646 = vrot.lane.b32.xlu0 %v13630_v32, %s11421_s10 }
 0xa70   : > { %6648 = vrot.lane.b32.xlu1 %v13638_v23, %s11421_s10 }
 0xa72   : > { %6644 = vrot.lane.b32.xlu0 %v13644_v17, %s11421_s10 }
 0xa74   : > { %6834 = vrot.lane.b32.xlu1 %v13644_v17, %s11422_s11 }
 0xa76   : > { %6836 = vrot.lane.b32.xlu0 %v13620_v1, %s11422_s11 }
 0xa78   : > { %6838 = vrot.lane.b32.xlu1 %v13630_v32, %s11422_s11 }
 0xa7a   : > { %6942 = vrot.lane.b32.xlu0 %v13620_v1, %s11423_s12 }
 0xa7c   : > { %6944 = vrot.lane.b32.xlu1 %v13630_v32, %s11423_s12 }
 0xa7e   : > { %6832 = vrot.lane.b32.xlu0 %v13638_v23, %s11422_s11 }
 0xa80   : > { %6940 = vrot.lane.b32.xlu1 %v13644_v17, %s11423_s12 }
 0xa82   : > { %6938 = vrot.lane.b32.xlu0 %v13638_v23, %s11423_s12 }
 0xa84   : > { %7046 = vrot.lane.b32.xlu1 %v13644_v17, %s11424_s13 }
 0xa86   : > { %7048 = vrot.lane.b32.xlu0 %v13620_v1, %s11424_s13 }
 0xa88   : > { %7050 = vrot.lane.b32.xlu1 %v13630_v32, %s11424_s13 }
 0xa8a   : > { %7154 = vrot.lane.b32.xlu0 %v13620_v1, %s11425_s14 }
 0xa8c   : > { %7156 = vrot.lane.b32.xlu1 %v13630_v32, %s11425_s14 }
 0xa8e   : > { %7044 = vrot.lane.b32.xlu0 %v13638_v23, %s11424_s13 }
 0xa90   : > { %7152 = vrot.lane.b32.xlu1 %v13644_v17, %s11425_s14 }
 0xa92   : > { %7150 = vrot.lane.b32.xlu0 %v13638_v23, %s11425_s14 }
 0xa94   : > { %7278 = vperm.xlu1 %11222, %v10919_v42  }
 0xa96   : > { %7273 = vperm.xlu0 %11221, %v10918_v36   ;;  %v11340_v36 = vld [vmem:[%s14917_s2 + $0x368] sm:$0xff]  }
 0xa98   : > { %7268 = vperm.xlu1 %11222, %v10917_v57  }
 0xa9a   : > { %7263 = vperm.xlu0 %11221, %v10916_v27  }
 0xac6   : > { %v6378_v18 = vpop.permute.xlu1 %6377 }
 0xac8   : > { %v6374_v62 = vpop.permute.xlu0 %6373 }
 0xac9   : > { %v6389_v12 = vsel %vm15770_vm15, %v6374_v62, %v6378_v18  ;;  %v6380_v41 = vsel %vm15771_vm1, %v6378_v18, %v6374_v62  ;;  %vm15777_vm15 = vcmask 261120   ;;  %vm15779_vm1 = vcmask 138240  }
 0xaca   : > { %10838 = vmatprep.subr.msk.bf16.mxu1 %vm15676_vm2, %v6380_v41  ;;  %v6376_v30 = vpop.permute.xlu1 %6375  ;;  %v6393_v49 = vsel %vm15774_vm0, %v6389_v12, 0  ;;  %v11342_v41 = vld [vmem:[%s14917_s2 + $0x390] sm:$0xff]  }
 0xacb   : > { %6429 = vmatpush1.bf16.msra.mxu1 %v6393_v49 }
 0xacc   : > { %v6372_v6 = vpop.permute.xlu0 %6371 }
 0xacd   : > { %v6385_v52 = vsel %vm15775_vm12, %v6372_v6, %v6376_v30  ;;  %v6379_v63 = vsel %vm15776_vm14, %v6376_v30, %v6372_v6  ;;  %vm15780_vm12 = vmmov %vm15779_vm1 }
 0xace   : > { %10839 = vmatprep.subr.msk.bf16.mxu1 %vm15676_vm2, %v6379_v63  ;;  %v6349_v26 = vpop.permute.xlu1 %6348  ;;  %v6391_v20 = vsel %vm15774_vm0, %v6385_v52, 0  ;;  %vm15783_vm14 = vmmov %vm15779_vm1  ;;  %vm15787_vm0 = vcmask 261120  }
 0xacf   : > { %6431 = vmatpush1.bf16.msra.mxu1 %v6391_v20  ;;  %v11343_v20 = vld [vmem:[%s14917_s2 + $0x3a0] sm:$0xff]  }
 0xad0   : > { %v6341_v8 = vpop.permute.xlu0 %6340 }
 0xad2   : > { %10840 = vmatmul.mubr.msk.bf16.vlgmr.msra.gmra.mxu1 %vm15777_vm15, %v11336_v43  ;;  %v6545_v9 = vpop.permute.xlu1 %6544  ;;  %vm15784_vm15 = vmmov %vm15779_vm1 }
 0xad3   : > { %6458 = vmatprep.mubr.bf16.mxu1 %v15778_v56 }
 0xad4   : > { %v6343_v47 = vpop.permute.xlu0 %6342 }
 0xad5   : > { %v6360_v38 = vsel %vm15779_vm1, %v6343_v47, %v6349_v26  ;;  %v6351_v50 = vsel %vm15780_vm12, %v6349_v26, %v6343_v47  ;;  %vm15785_vm1 = vcmask 121856  }
 0xad6   : > { %10844 = vmatprep.subr.msk.bf16.mxu0 %vm11689_vm5, %v6351_v50  ;;  %v6347_v15 = vpop.permute.xlu1 %6346  ;;  %v6364_v54 = vsel %vm11685_vm3, %v6360_v38, 0  ;;  %vm15786_vm12 = vmmov %vm15785_vm1  ;;  %v15811_v38 = vld [vmem:[#allocation21_spill] sm:$0xff] }
 0xad7   : > { %v6356_v58 = vsel %vm15783_vm14, %v6341_v8, %v6347_v15  ;;  %6498 = vmatpush1.bf16.msra.mxu0 %v6364_v54  ;;  %v6350_v10 = vsel %vm15784_vm15, %v6347_v15, %v6341_v8  ;;  %vm15790_vm14 = vnez %v15789_v4 }
 0xad8   : > { %v6541_v51 = vpop.permute.xlu0 %6540  ;;  %10845 = vmatprep.subr.msk.bf16.mxu0 %vm11689_vm5, %v6350_v10  ;;  %v6362_v2 = vsel %vm11685_vm3, %v6356_v58, 0  ;;  %v11344_v10 = vld [vmem:[%s14917_s2 + $0x398] sm:$0xff]  }
 0xad9   : > { %v6556_v55 = vsel %vm15785_vm1, %v6541_v51, %v6545_v9  ;;  %v6547_v33 = vsel %vm15786_vm12, %v6545_v9, %v6541_v51  ;;  %vm15794_vm12 = vcmask 7168  }
 0xada   : > { %10841 = vmatmul.mubr.msk.bf16.gmra.mxu1 %vm15787_vm0, %v11337_v37  ;;  %10854 = vmatprep.subr.msk.bf16.mxu1 %vm15611_vm13, %v6547_v33  ;;  %v6543_v61 = vpop.permute.xlu1 %6542  ;;  %v6560_v11 = vsel %vm15790_vm14, %v6556_v55, 0  ;;  %vm15791_vm0 = vmmov %vm15785_vm1  ;;  %vm15793_vm1 = vcmask 261120  }
 0xadb   : > { %6500 = vmatpush1.bf16.msra.mxu0 %v6362_v2  ;;  %6596 = vmatpush1.bf16.msra.mxu1 %v6560_v11  ;;  %vm15792_vm15 = vmmov %vm15791_vm0  ;;  %v11345_v11 = vld [vmem:[%s14917_s2 + $0x3a8] sm:$0xff]  }
 0xadc   : > { %v6539_v39 = vpop.permute.xlu0 %6538  ;;  %6615 = vmatprep.mubr.bf16.mxu1 %v15778_v56 }
 0xadd   : > { %v6552_v34 = vsel %vm15791_vm0, %v6539_v39, %v6543_v61  ;;  %v6546_v19 = vsel %vm15792_vm15, %v6543_v61, %v6539_v39  ;;  %vm15795_vm0 = vmmov %vm15794_vm12 }
 0xade   : > { %10846 = vmatmul.mubr.msk.bf16.vlgmr.msra.gmra.mxu0 %vm15793_vm1, %v11338_v40  ;;  %10855 = vmatprep.subr.msk.bf16.mxu1 %vm15611_vm13, %v6546_v19  ;;  %v6651_v44 = vpop.permute.xlu1 %6650  ;;  %v6558_v14 = vsel %vm15790_vm14, %v6552_v34, 0  ;;  %vm15796_vm15 = vmmov %vm15793_vm1  ;;  %vm15798_vm1 = vnez %v15797_v25  ;;  %vm15800_vm14 = vnez %v15799_v21  ;;  %vm15815_vm13 = vcmask 261120   ;;  %v11346_v34 = vld [vmem:[%s14917_s2 + $0x3b0] sm:$0xff]  }
 0xadf   : > { %6598 = vmatpush1.bf16.msra.mxu1 %v6558_v14  ;;  %6527 = vmatprep.mubr.bf16.mxu0 %v15778_v56 }
 0xae0   : > { %v6647_v13 = vpop.permute.xlu0 %6646  ;;  %6783 = vmatprep.subr.bf16.mxu1 %v13630_v32 }
 0xae1   : > { %v6662_v35 = vsel %vm15794_vm12, %v6647_v13, %v6651_v44  ;;  %v6653_v3 = vsel %vm15795_vm0, %v6651_v44, %v6647_v13  ;;  %vm15801_vm12 = vmmov %vm15795_vm0 }
 0xae2   : > { %10856 = vmatmul.mubr.msk.bf16.vlgmr.msra.gmra.mxu1 %vm15796_vm15, %v11339_v29  ;;  %10864 = vmatprep.subr.msk.bf16.mxu0 %vm15798_vm1, %v6653_v3  ;;  %v6649_v7 = vpop.permute.xlu1 %6648  ;;  %v6666_v42 = vsel %vm15800_vm14, %v6662_v35, 0 }
 0xae3   : > { %6702 = vmatpush1.bf16.msra.mxu0 %v6666_v42  ;;  %6784 = vmatpush1.bf16.msra.mxu1 %v13620_v1  ;;  %v11341_v1 = vld [vmem:[%s14917_s2 + $0x388] sm:$0xff]  }
 0xae4   : > { %v6645_v32 = vpop.permute.xlu0 %6644  ;;  %6785 = vmatprep.subr.bf16.mxu1 %v13644_v17  ;;  %6625 = vmatprep.mubr.bf16.mxu1 %v15778_v56 }
 0xae5   : > { %v6658_v57 = vsel %vm15801_vm12, %v6645_v32, %v6649_v7  ;;  %v6652_v27 = vsel %vm15795_vm0, %v6649_v7, %v6645_v32  ;;  %vm15802_vm12 = vmmov %vm15796_vm15  ;;  %vm15803_vm0 = vcmask 1039360   ;;  %v11347_v7 = vld [vmem:[%s14917_s2 + $0x3c0] sm:$0xff]  }
 0xae6   : > { %10847 = vmatmul.mubr.msk.bf16.gmra.mxu0 %vm15796_vm15, %v11340_v36  ;;  %10865 = vmatprep.subr.msk.bf16.mxu0 %vm15798_vm1, %v6652_v27  ;;  %v6835_v18 = vpop.permute.xlu1 %6834  ;;  %v6664_v62 = vsel %vm15800_vm14, %v6658_v57, 0  ;;  %vm15804_vm15 = vmmov %vm15803_vm0 }
 0xae7   : > { %6704 = vmatpush1.bf16.msra.mxu0 %v6664_v62  ;;  %6786 = vmatpush1.bf16.msra.mxu1 %v13638_v23  ;;  %vm15807_vm1 = vmmov %vm15802_vm12 }
 0xae8   : > { %v6837_v17 = vpop.permute.xlu0 %6836  ;;  %6721 = vmatprep.mubr.bf16.mxu0 %v15778_v56 }
 0xaea   : > { %10857 = vmatmul.mubr.msk.bf16.gmra.mxu1 %vm15802_vm12, %v11341_v1  ;;  %v6839_v12 = vpop.permute.xlu1 %6838  ;;  %vm15808_vm12 = vcmask 924672  }
 0xaeb   : > { %v6841_v30 = vsel %vm15803_vm0, %v6837_v17, %v6839_v12  ;;  %v6850_v49 = vsel %vm15804_vm15, %v6839_v12, %v6837_v17  ;;  %6803 = vmatprep.mubr.bf16.mxu1 %v15778_v56  ;;  %vm15809_vm0 = vmmov %vm15808_vm12  ;;  %vm15812_vm15 = vnez %v15811_v38  ;;  %v11348_v12 = vld [vmem:[%s14917_s2 + $0x3b8] sm:$0xff]  }
 0xaec   : > { %v6943_v6 = vpop.permute.xlu0 %6942  ;;  %10882 = vmatprep.subr.msk.bf16.mxu0 %vm11803_vm8, %v6850_v49  ;;  %v6854_v63 = vsel %vm11817_vm6, %v6841_v30, 0 }
 0xaee   : > { %10866 = vmatmul.mubr.msk.bf16.vlgmr.msra.gmra.mxu0 %vm15807_vm1, %v11342_v41  ;;  %v6945_v26 = vpop.permute.xlu1 %6944  ;;  %vm15813_vm1 = vcmask 1039360  }
 0xaef   : > { %6890 = vmatpush1.bf16.msra.mxu0 %v6854_v63  ;;  %v6947_v43 = vsel %vm15808_vm12, %v6943_v6, %v6945_v26  ;;  %v6956_v8 = vsel %vm15809_vm0, %v6945_v26, %v6943_v6  ;;  %6731 = vmatprep.mubr.bf16.mxu0 %v15778_v56  ;;  %vm15814_vm14 = vmmov %vm15813_vm1  ;;  %v11349_v26 = vld [vmem:[%s14917_s2 + $0x3c8] sm:$0xff]  }
 0xaf0   : > { %v6833_v9 = vpop.permute.xlu0 %6832  ;;  %10892 = vmatprep.subr.msk.bf16.mxu1 %vm11822_vm11, %v6956_v8  ;;  %v6960_v50 = vsel %vm15812_vm15, %v6947_v43, 0  ;;  %vm15816_vm12 = vmmov %vm15809_vm0  ;;  %v11351_v43 = vld [vmem:[%s14917_s2 + $0x3e0] sm:$0xff]   ;;  %v11352_v8 = vld [vmem:[%s14917_s2 + $0x3d8] sm:$0xff]  }
 0xaf1   : > { %v6840_v15 = vsel %vm15813_vm1, %v6833_v9, %v6835_v18  ;;  %v6846_v54 = vsel %vm15814_vm14, %v6835_v18, %v6833_v9  ;;  %vm15817_vm14 = vmmov %vm15809_vm0  ;;  %vm15819_vm1 = vcmask 916480   ;;  %v11353_v9 = vld [vmem:[%s14917_s2 + $0x3e8] sm:$0xff]  }
 0xaf2   : > { %10874 = vmatmul.mubr.msk.bf16.vlgmr.msra.gmra.mxu1 %vm15815_vm13, %v11343_v20  ;;  %10883 = vmatprep.subr.msk.bf16.mxu0 %vm11803_vm8, %v6846_v54  ;;  %v6941_v37 = vpop.permute.xlu1 %6940  ;;  %v6852_v58 = vsel %vm11817_vm6, %v6840_v15, 0  ;;  %vm15818_vm0 = vmmov %vm15815_vm13  ;;  %v11350_v20 = vld [vmem:[%s14917_s2 + $0x3d0] sm:$0xff]  }
 0xaf3   : > { %6996 = vmatpush1.bf16.msra.mxu1 %v6960_v50  ;;  %6892 = vmatpush1.bf16.msra.mxu0 %v6852_v58 }
 0xaf4   : > { %v6939_v51 = vpop.permute.xlu0 %6938  ;;  %6813 = vmatprep.mubr.bf16.mxu1 %v15778_v56 }
 0xaf5   : > { %v6946_v55 = vsel %vm15816_vm12, %v6939_v51, %v6941_v37  ;;  %v6952_v33 = vsel %vm15817_vm14, %v6941_v37, %v6939_v51  ;;  %vm15820_vm12 = vmmov %vm15819_vm1 }
 0xaf6   : > { %10867 = vmatmul.mubr.msk.bf16.gmra.mxu0 %vm15815_vm13, %v11344_v10  ;;  %10893 = vmatprep.subr.msk.bf16.mxu1 %vm11822_vm11, %v6952_v33  ;;  %v7047_v61 = vpop.permute.xlu1 %7046  ;;  %v6958_v2 = vsel %vm15812_vm15, %v6946_v55, 0  ;;  %vm15823_vm14 = vmmov %vm15818_vm0  ;;  %vm15824_vm13 = vcmask 908288  }
 0xaf7   : > { %6998 = vmatpush1.bf16.msra.mxu1 %v6958_v2  ;;  %6909 = vmatprep.mubr.bf16.mxu0 %v15778_v56 }
 0xaf8   : > { %v7049_v40 = vpop.permute.xlu0 %7048 }
 0xafa   : > { %10875 = vmatmul.mubr.msk.bf16.gmra.mxu1 %vm15818_vm0, %v11345_v11  ;;  %v7051_v39 = vpop.permute.xlu1 %7050  ;;  %vm15825_vm0 = vmmov %vm15824_vm13 }
 0xafb   : > { %v7053_v19 = vsel %vm15819_vm1, %v7049_v40, %v7051_v39  ;;  %v7062_v44 = vsel %vm15820_vm12, %v7051_v39, %v7049_v40  ;;  %7015 = vmatprep.mubr.bf16.mxu1 %v15778_v56  ;;  %vm15828_vm12 = vmmov %vm15819_vm1 }
 0xafc   : > { %v7155_v14 = vpop.permute.xlu0 %7154  ;;  %10902 = vmatprep.subr.msk.bf16.mxu0 %vm11884_vm4, %v7062_v44  ;;  %v7066_v35 = vsel %vm11898_vm7, %v7053_v19, 0 }
 0xafe   : > { %10884 = vmatmul.mubr.msk.bf16.vlgmr.msra.gmra.mxu0 %vm15823_vm14, %v11346_v34  ;;  %v7157_v3 = vpop.permute.xlu1 %7156 }
 0xaff   : > { %7102 = vmatpush1.bf16.msra.mxu0 %v7066_v35  ;;  %v7159_v42 = vsel %vm15824_vm13, %v7155_v14, %v7157_v3  ;;  %v7168_v36 = vsel %vm15825_vm0, %v7157_v3, %v7155_v14  ;;  %6919 = vmatprep.mubr.bf16.mxu0 %v15778_v56  ;;  %vm15829_vm13 = vmmov %vm15825_vm0 }
 0xb00   : > { %v7045_v32 = vpop.permute.xlu0 %7044  ;;  %10912 = vmatprep.subr.msk.bf16.mxu1 %vm11903_vm9, %v7168_v36  ;;  %v7172_v18 = vsel %vm15729_vm10, %v7159_v42, 0 }
 0xb01   : > { %v7052_v62 = vsel %vm15819_vm1, %v7045_v32, %v7047_v61  ;;  %v7058_v1 = vsel %vm15828_vm12, %v7047_v61, %v7045_v32  ;;  %vm15830_vm1 = vmmov %vm15823_vm14 }
 0xb02   : > { %10894 = vmatmul.mubr.msk.bf16.vlgmr.msra.gmra.mxu1 %vm15823_vm14, %v11347_v7  ;;  %10903 = vmatprep.subr.msk.bf16.mxu0 %vm11884_vm4, %v7058_v1  ;;  %v7064_v17 = vsel %vm11898_vm7, %v7052_v62, 0  ;;  %v7153_v41 = vpop.permute.xlu1 %7152  ;;  %vm15831_vm12 = vmmov %vm15830_vm1 }
 0xb03   : > { %7208 = vmatpush1.bf16.msra.mxu1 %v7172_v18  ;;  %7104 = vmatpush1.bf16.msra.mxu0 %v7064_v17  ;;  %vm15832_vm14 = vmmov %vm15830_vm1 }
 0xb04   : > { %v7151_v30 = vpop.permute.xlu0 %7150  ;;  %7025 = vmatprep.mubr.bf16.mxu1 %v15778_v56 }
 0xb05   : > { %v7158_v49 = vsel %vm15829_vm13, %v7151_v30, %v7153_v41  ;;  %v7164_v6 = vsel %vm15825_vm0, %v7153_v41, %v7151_v30  ;;  %vm15833_vm13 = vmmov %vm15830_vm1 }
 0xb06   : > { %10885 = vmatmul.mubr.msk.bf16.gmra.mxu0 %vm15830_vm1, %v11348_v12  ;;  %10913 = vmatprep.subr.msk.bf16.mxu1 %vm11903_vm9, %v7164_v6  ;;  %v7170_v63 = vsel %vm15729_vm10, %v7158_v49, 0  ;;  %vm15834_vm0 = vmmov %vm15830_vm1 }
 0xb07   : > { %7210 = vmatpush1.bf16.msra.mxu1 %v7170_v63  ;;  %7121 = vmatprep.mubr.bf16.mxu0 %v15778_v56  ;;  %vm15835_vm1 = vmmov %vm15834_vm0 }
 0xb0a   : > { %10895 = vmatmul.mubr.msk.bf16.gmra.mxu1 %vm15831_vm12, %v11349_v26  ;;  %vm15852_vm12 = vcmask 130048  }
 0xb0b   : > { %7227 = vmatprep.mubr.bf16.mxu1 %v15778_v56 }
 0xb0e   : > { %10904 = vmatmul.mubr.msk.bf16.vlgmr.msra.gmra.mxu0 %vm15832_vm14, %v11350_v20  ;;  %vm15853_vm14 = vmmov %vm15852_vm12 }
 0xb0f   : > { %7131 = vmatprep.mubr.bf16.mxu0 %v15778_v56 }
 0xb12   : > { %10914 = vmatmul.mubr.msk.bf16.vlgmr.msra.gmra.mxu1 %vm15833_vm13, %v11351_v43 }
 0xb13   : > { %7237 = vmatprep.mubr.bf16.mxu1 %v15778_v56 }
 0xb16   : > { %10905 = vmatmul.mubr.msk.bf16.gmra.mxu0 %vm15834_vm0, %v11352_v8  ;;  %vm15857_vm0 = vmmov %vm15852_vm12 }
 0xb17   : > { %7411 = vmatprep.mubr.bf16.mxu0 %v15778_v56 }
 0xb1a   : > { %10915 = vmatmul.mubr.msk.bf16.gmra.mxu1 %vm15835_vm1, %v11353_v9  ;;  %vm15858_vm1 = vmmov %vm15857_vm0 }
 0xb1b   : > { %7480 = vmatprep.mubr.bf16.mxu1 %v15778_v56 }
 0xb92   : > { %v6450_v50 = vpop.f32.mrf.mxu1 }
 0xb94   : > { %v13906_v15 = vpop.f32.mrf.mxu1 }
 0xb96   : > { %v6454_v54 = vpop.f32.mrf.mxu1 }
 0xb98   : > { %v6456_v37 = vpop.f32.mrf.mxu1 }
 0xb9a   : > { %v6460_v58 = vpop.f32.mrf.mxu1 }
 0xb9c   : > { %v6462_v10 = vpop.f32.mrf.mxu1 }
 0xb9e   : > { %v6464_v51 = vpop.f32.mrf.mxu1  ;;  %v6519_v55 = vpop.f32.mrf.mxu0 }
 0xb9f   : > { %v6520_v31 = vadd.f32 %v6519_v55, %v6450_v50 }
 0xba0   : > { %v13908_v33 = vpop.f32.mrf.mxu1  ;;  %v6521_v61 = vpop.f32.mrf.mxu0 }
 0xba2   : > { %v6523_v2 = vpop.f32.mrf.mxu0  ;;  %v6617_v11 = vpop.f32.mrf.mxu1 }
 0xba3   : > { %v6524_v4 = vadd.f32 %v6523_v2, %v6454_v54 }
 0xba4   : > { %v6525_v40 = vpop.f32.mrf.mxu0  ;;  %v13910_v39 = vpop.f32.mrf.mxu1 }
 0xba5   : > { %15836 = vst [vmem:[#allocation2_spill] sm:$0xff] %v13910_v39  ;;  %v6526_v53 = vadd.f32 %v6525_v40, %v6456_v37 }
 0xba6   : > { %v6529_v34 = vpop.f32.mrf.mxu0  ;;  %v6621_v19 = vpop.f32.mrf.mxu1 }
 0xba7   : > { %v6530_v23 = vadd.f32 %v6529_v34, %v6460_v58 }
 0xba8   : > { %v6531_v44 = vpop.f32.mrf.mxu0  ;;  %v6623_v14 = vpop.f32.mrf.mxu1 }
 0xba9   : > { %v6532_v56 = vadd.f32 %v6531_v44, %v6462_v10 }
 0xbaa   : > { %v6533_v35 = vpop.f32.mrf.mxu0  ;;  %v6627_v3 = vpop.f32.mrf.mxu1 }
 0xbab   : > { %v6640_v59 = vadd.f32 %v6627_v3, %v6530_v23 }
 0xbac   : > { %v6535_v7 = vpop.f32.mrf.mxu0  ;;  %v6629_v42 = vpop.f32.mrf.mxu1  ;;  %v15844_v37 = vld [vmem:[#allocation2_spill] sm:$0xff] }
 0xbad   : > { %v6641_v39 = vadd.f32 %v6629_v42, %v6532_v56  ;;  %v7279_v42 = vpop.permute.xlu1 %7278 }
 0xbae   : > { %v6631_v36 = vpop.f32.mrf.mxu1  ;;  %v6723_v32 = vpop.f32.mrf.mxu0 }
 0xbb0   : > { %v6633_v18 = vpop.f32.mrf.mxu1  ;;  %v6725_v62 = vpop.f32.mrf.mxu0 }
 0xbb2   : > { %v6727_v1 = vpop.f32.mrf.mxu0  ;;  %v6805_v17 = vpop.f32.mrf.mxu1 }
 0xbb4   : > { %v6729_v12 = vpop.f32.mrf.mxu0  ;;  %v13912_v41 = vpop.f32.mrf.mxu1 }
 0xbb5   : > { %15837 = vst [vmem:[#allocation4_spill] sm:$0xff] %v13912_v41  ;;  %v6636_v41 = vadd.f32 %v6617_v11, %v6520_v31 }
 0xbb6   : > { %v6733_v30 = vpop.f32.mrf.mxu0  ;;  %v6809_v49 = vpop.f32.mrf.mxu1 }
 0xbb7   : > { %v6742_v55 = vadd.f32 %v6723_v32, %v6636_v41 }
 0xbb8   : > { %v6735_v6 = vpop.f32.mrf.mxu0  ;;  %v6811_v63 = vpop.f32.mrf.mxu1 }
 0xbb9   : > { %v6747_v40 = vadd.f32 %v6735_v6, %v6641_v39  ;;  %v6824_v56 = vadd.f32 %v6805_v17, %v6742_v55  ;;  %v7274_v6 = vpop.permute.xlu0 %7273 }
 0xbba   : > { %v6737_v26 = vpop.f32.mrf.mxu0  ;;  %v6815_v20 = vpop.f32.mrf.mxu1 }
 0xbbc   : > { %v6739_v43 = vpop.f32.mrf.mxu0  ;;  %v6817_v8 = vpop.f32.mrf.mxu1 }
 0xbbd   : > { %v6829_v11 = vadd.f32 %v6817_v8, %v6747_v40 }
 0xbbe   : > { %v6819_v9 = vpop.f32.mrf.mxu1  ;;  %v6911_v24 = vpop.f32.mrf.mxu0 }
 0xbc0   : > { %v13914_v5 = vpop.f32.mrf.mxu1  ;;  %v13916_v16 = vpop.f32.mrf.mxu0 }
 0xbc1   : > { %15838 = vst [vmem:[#allocation6_spill] sm:$0xff] %v13914_v5  ;;  %15839 = vst [vmem:[#allocation5_spill] sm:$0xff] %v13916_v16  ;;  %v6746_v16 = vadd.f32 %v6733_v30, %v6640_v59  ;;  %v6522_v5 = vadd.f32 %v6521_v61, %v13906_v15 }
 0xbc2   : > { %v6915_v60 = vpop.f32.mrf.mxu0  ;;  %v13918_v45 = vpop.f32.mrf.mxu1 }
 0xbc3   : > { %15840 = vst [vmem:[#allocation8_spill] sm:$0xff] %v13918_v45  ;;  %v6534_v45 = vadd.f32 %v6533_v35, %v6464_v51  ;;  %v6828_v50 = vadd.f32 %v6815_v20, %v6746_v16  ;;  %v6637_v10 = vadd.f32 %v15844_v37, %v6522_v5  ;;  %v15845_v5 = vld [vmem:[#allocation4_spill] sm:$0xff] }
 0xbc4   : > { %v6917_v28 = vpop.f32.mrf.mxu0  ;;  %v13920_v22 = vpop.f32.mrf.mxu1 }
 0xbc5   : > { %15841 = vst [vmem:[#allocation7_spill] sm:$0xff] %v13920_v22  ;;  %v6638_v22 = vadd.f32 %v6621_v19, %v6524_v4  ;;  %v6642_v54 = vadd.f32 %v6631_v36, %v6534_v45 }
 0xbc6   : > { %v6921_v0 = vpop.f32.mrf.mxu0  ;;  %v7021_v57 = vpop.f32.mrf.mxu1 }
 0xbc7   : > { %v6744_v23 = vadd.f32 %v6727_v1, %v6638_v22  ;;  %v6748_v15 = vadd.f32 %v6737_v26, %v6642_v54  ;;  %v6934_v31 = vadd.f32 %v6921_v0, %v6828_v50 }
 0xbc8   : > { %v6923_v27 = vpop.f32.mrf.mxu0  ;;  %v7023_v29 = vpop.f32.mrf.mxu1  ;;  %v15846_v36 = vld [vmem:[#allocation6_spill] sm:$0xff]  ;;  %v15847_v1 = vld [vmem:[#allocation5_spill] sm:$0xff] }
 0xbc9   : > { %v6826_v19 = vadd.f32 %v6809_v49, %v6744_v23  ;;  %v6830_v22 = vadd.f32 %v6819_v9, %v6748_v15  ;;  %v6935_v3 = vadd.f32 %v6923_v27, %v6829_v11 }
 0xbca   : > { %v6925_v13 = vpop.f32.mrf.mxu0  ;;  %v7027_v47 = vpop.f32.mrf.mxu1 }
 0xbcb   : > { %v6932_v16 = vadd.f32 %v6915_v60, %v6826_v19  ;;  %v7269_v19 = vpop.permute.xlu1 %7268 }
 0xbcc   : > { %v13922_v38 = vpop.f32.mrf.mxu0  ;;  %v7029_v52 = vpop.f32.mrf.mxu1  ;;  %v15850_v20 = vld [vmem:[#allocation7_spill] sm:$0xff] }
 0xbcd   : > { %15842 = vst [vmem:[#allocation3_spill] sm:$0xff] %v13922_v38  ;;  %v6639_v38 = vadd.f32 %v6623_v14, %v6526_v53  ;;  %v6743_v53 = vadd.f32 %v6725_v62, %v6637_v10  ;;  %v7040_v14 = vadd.f32 %v7027_v47, %v6934_v31  ;;  %v7038_v32 = vadd.f32 %v7021_v57, %v6932_v16 }
 0xbce   : > { %v7031_v25 = vpop.f32.mrf.mxu1  ;;  %v13924_v21 = vpop.f32.mrf.mxu0  ;;  %v7041_v60 = vadd.f32 %v7029_v52, %v6935_v3 }
 0xbcf   : > { %15843 = vst [vmem:[#allocation9_spill] sm:$0xff] %v13924_v21  ;;  %v6536_v21 = vadd.f32 %v6535_v7, %v13908_v33  ;;  %v6745_v2 = vadd.f32 %v6729_v12, %v6639_v38  ;;  %v6825_v35 = vadd.f32 %v15845_v5, %v6743_v53  ;;  %v6930_v38 = vadd.f32 %v6911_v24, %v6824_v56  ;;  %v15848_v12 = vld [vmem:[#allocation8_spill] sm:$0xff]  ;;  %v7264_v53 = vpop.permute.xlu0 %7263 }
 0xbd0   : > { %v7033_v46 = vpop.f32.mrf.mxu1  ;;  %v13926_v48 = vpop.f32.mrf.mxu0 }
 0xbd1   : > { %v6643_v59 = vadd.f32 %v6633_v18, %v6536_v21  ;;  %v6827_v61 = vadd.f32 %v6811_v63, %v6745_v2  ;;  %v6936_v18 = vadd.f32 %v6925_v13, %v6830_v22  ;;  %v6931_v17 = vadd.f32 %v15847_v1, %v6825_v35 }
 0xbd2   : > { %v7127_v58 = vpop.f32.mrf.mxu0  ;;  %v7229_v34 = vpop.f32.mrf.mxu1  ;;  %v7036_v41 = vadd.f32 %v15848_v12, %v6930_v38 }
 0xbd3   : > { %v6749_v45 = vadd.f32 %v6739_v43, %v6643_v59  ;;  %v6933_v39 = vadd.f32 %v6917_v28, %v6827_v61  ;;  %v7042_v27 = vadd.f32 %v7031_v25, %v6936_v18  ;;  %v7144_v63 = vadd.f32 %v7127_v58, %v7038_v32 }
 0xbd4   : > { %v7129_v4 = vpop.f32.mrf.mxu0  ;;  %v7231_v51 = vpop.f32.mrf.mxu1  ;;  %v15849_v24 = vld [vmem:[#allocation3_spill] sm:$0xff]  ;;  %v7037_v43 = vadd.f32 %v15850_v20, %v6931_v17 }
 0xbd5   : > { %v6831_v0 = vadd.f32 %v15846_v36, %v6749_v45  ;;  %v7039_v30 = vadd.f32 %v7023_v29, %v6933_v39  ;;  %v11009_v36 = vld [vmem:[%s14918_s3 + $0x108] sm:$0xff] }
 0xbd6   : > { %v7133_v44 = vpop.f32.mrf.mxu0  ;;  %v7233_v33 = vpop.f32.mrf.mxu1  ;;  %v15851_v8 = vld [vmem:[#allocation9_spill] sm:$0xff]  ;;  %v7143_v52 = vadd.f32 %v13926_v48, %v7037_v43 }
 0xbd7   : > { %v7146_v62 = vadd.f32 %v7133_v44, %v7040_v14  ;;  %v6937_v28 = vadd.f32 %v15849_v24, %v6831_v0  ;;  %v7142_v57 = vadd.f32 %v15851_v8, %v7036_v41  ;;  %v7145_v50 = vadd.f32 %v7129_v4, %v7039_v30  ;;  %v11008_v0 = vld [vmem:[%s14918_s3 + $0x100] sm:$0xff] }
 0xbd8   : > { %v7135_v7 = vpop.f32.mrf.mxu0  ;;  %v7235_v21 = vpop.f32.mrf.mxu1  ;;  %v7250_v37 = vadd.f32 %v7233_v33, %v7144_v63  ;;  %v7249_v15 = vadd.f32 %v7231_v51, %v7143_v52  ;;  %v15855_v41 = vld [vmem:[#allocation10_spill] sm:$0xff] }
 0xbd9   : > { %v7147_v13 = vadd.f32 %v7135_v7, %v7041_v60  ;;  %v7043_v23 = vadd.f32 %v7033_v46, %v6937_v28  ;;  %v7248_v10 = vadd.f32 %v7229_v34, %v7142_v57  ;;  %v7251_v40 = vadd.f32 %v7235_v21, %v7145_v50  ;;  %v11011_v21 = vld [vmem:[%s14918_s3 + $0x118] sm:$0xff]  ;;  %v11354_v28 = vld [vmem:[%s14917_s2 + $0x400] sm:$0xff]  }
 0xbda   : > { %v7137_v47 = vpop.f32.mrf.mxu0  ;;  %v7239_v49 = vpop.f32.mrf.mxu1  ;;  %v7283_v56 = vadd.f32 %v7269_v19, %v7250_v37  ;;  %v7282_v34 = vadd.f32 %v7264_v53, %v7249_v15  ;;  %vm15856_vm13 = vnez %v15855_v41 }
 0xbdb   : > { %v7252_v26 = vadd.f32 %v7239_v49, %v7146_v62  ;;  %v7148_v29 = vadd.f32 %v7137_v47, %v7042_v27  ;;  %v7281_v4 = vadd.f32 %v7264_v53, %v7248_v10  ;;  %v7284_v44 = vadd.f32 %v7269_v19, %v7251_v40 }
 0xbdc   : > { %v7139_v9 = vpop.f32.mrf.mxu0  ;;  %v7241_v54 = vpop.f32.mrf.mxu1  ;;  %v7291_v22 = vmax.f32 %v7283_v56, 0.0  ;;  %v7290_v39 = vmax.f32 %v7282_v34, 0.0  ;;  %v11358_v34 = vld [vmem:[%s14917_s2 + $0x3f8] sm:$0xff]  }
 0xbdd   : > { %v7253_v55 = vadd.f32 %v7241_v54, %v7147_v13  ;;  %v7285_v25 = vadd.f32 %v7274_v6, %v7252_v26  ;;  %v7149_v58 = vadd.f32 %v7139_v9, %v7043_v23  ;;  %v7289_v35 = vmax.f32 %v7281_v4, 0.0  ;;  %v11355_v23 = vld [vmem:[%s14917_s2 + $0x408] sm:$0xff]  }
 0xbde   : > { %v7243_v2 = vpop.f32.mrf.mxu1  ;;  %v7292_v38 = vmax.f32 %v7284_v44, 0.0  ;;  %v15860_v26 = vmov 0   ;;  %v15879_v44 = vld [vmem:[#allocation16_spill] sm:$0xff] }
 0xbdf   : > { %v7254_v59 = vadd.f32 %v7243_v2, %v7148_v29  ;;  %v7286_v61 = vadd.f32 %v7274_v6, %v7253_v55  ;;  %v7293_v33 = vmax.f32 %v7285_v25, 0.0  ;;  %v13945_v3 = vpack.c.bf16 %v7291_v22, %v7289_v35  ;;  %v15870_v55 = vld [vmem:[#allocation15_spill] sm:$0xff]  ;;  %v15872_v25 = vld [vmem:[#allocation14_spill] sm:$0xff] }
 0xbe0   : > { %v7245_v31 = vpop.f32.mrf.mxu1  ;;  %v13949_v7 = vpack.c.bf16 %v7292_v38, %v7290_v39 }
 0xbe1   : > { %v7287_v11 = vadd.f32 %v7279_v42, %v7254_v59  ;;  %v7255_v46 = vadd.f32 %v7245_v31, %v7149_v58  ;;  %v7294_v16 = vmax.f32 %v7286_v61, 0.0  ;;  %v11356_v59 = vld [vmem:[%s14917_s2 + $0x3f0] sm:$0xff]  }
 0xbe2   : > { %v11357_v61 = vld [vmem:[%s14917_s2 + $0x410] sm:$0xff]  }
 0xbe3   : > { %v7295_v45 = vmax.f32 %v7287_v11, 0.0  ;;  %v7288_v48 = vadd.f32 %v7279_v42, %v7255_v46  ;;  %v11010_v42 = vld [vmem:[%s14918_s3 + $0x110] sm:$0xff] }
 0xbe5   : > { %v13939_v14 = vpack.c.bf16 %v7295_v45, %v7293_v33  ;;  %v7296_v5 = vmax.f32 %v7288_v48, 0.0  ;;  %v15881_v45 = vld [vmem:[#allocation17_spill] sm:$0xff] }
 0xbe7   : > { %v13941_v51 = vpack.c.bf16 %v7296_v5, %v7294_v16  ;;  %7340 = vrot.lane.b32.xlu1 %v13939_v14, %s11418_s7 }
 0xbe9   : > { %7336 = vrot.lane.b32.xlu0 %v13941_v51, %s11418_s7 }
 0xbeb   : > { %7338 = vrot.lane.b32.xlu1 %v13945_v3, %s11418_s7 }
 0xbed   : > { %7334 = vrot.lane.b32.xlu0 %v13949_v7, %s11418_s7 }
 0xbef   : > { %7311 = vrot.lane.b32.xlu1 %v13939_v14, %s11419_s8 }
 0xbf1   : > { %7303 = vrot.lane.b32.xlu0 %v13949_v7, %s11419_s8 }
 0xbf3   : > { %7507 = vrot.lane.b32.xlu1 %v13939_v14, %s11420_s9 }
 0xbf5   : > { %7305 = vrot.lane.b32.xlu0 %v13941_v51, %s11419_s8 }
 0xbf7   : > { %7309 = vrot.lane.b32.xlu1 %v13945_v3, %s11419_s8 }
 0xbf9   : > { %7503 = vrot.lane.b32.xlu0 %v13941_v51, %s11420_s9 }
 0xbfb   : > { %7505 = vrot.lane.b32.xlu1 %v13945_v3, %s11420_s9 }
 0xbfd   : > { %7501 = vrot.lane.b32.xlu0 %v13949_v7, %s11420_s9 }
 0xbff   : > { %7613 = vrot.lane.b32.xlu1 %v13939_v14, %s11421_s10 }
 0xc01   : > { %7609 = vrot.lane.b32.xlu0 %v13941_v51, %s11421_s10 }
 0xc03   : > { %7611 = vrot.lane.b32.xlu1 %v13945_v3, %s11421_s10 }
 0xc05   : > { %7607 = vrot.lane.b32.xlu0 %v13949_v7, %s11421_s10 }
 0xc07   : > { %7797 = vrot.lane.b32.xlu1 %v13949_v7, %s11422_s11 }
 0xc09   : > { %7799 = vrot.lane.b32.xlu0 %v13939_v14, %s11422_s11 }
 0xc0b   : > { %7801 = vrot.lane.b32.xlu1 %v13941_v51, %s11422_s11 }
 0xc0d   : > { %7905 = vrot.lane.b32.xlu0 %v13939_v14, %s11423_s12 }
 0xc0f   : > { %7907 = vrot.lane.b32.xlu1 %v13941_v51, %s11423_s12 }
 0xc11   : > { %7795 = vrot.lane.b32.xlu0 %v13945_v3, %s11422_s11 }
 0xc13   : > { %7903 = vrot.lane.b32.xlu1 %v13949_v7, %s11423_s12 }
 0xc15   : > { %7901 = vrot.lane.b32.xlu0 %v13945_v3, %s11423_s12 }
 0xc17   : > { %8009 = vrot.lane.b32.xlu1 %v13949_v7, %s11424_s13 }
 0xc19   : > { %8011 = vrot.lane.b32.xlu0 %v13939_v14, %s11424_s13 }
 0xc1b   : > { %8013 = vrot.lane.b32.xlu1 %v13941_v51, %s11424_s13 }
 0xc1d   : > { %8117 = vrot.lane.b32.xlu0 %v13939_v14, %s11425_s14 }
 0xc1f   : > { %8119 = vrot.lane.b32.xlu1 %v13941_v51, %s11425_s14 }
 0xc21   : > { %8007 = vrot.lane.b32.xlu0 %v13945_v3, %s11424_s13 }
 0xc23   : > { %8115 = vrot.lane.b32.xlu1 %v13949_v7, %s11425_s14 }
 0xc25   : > { %8113 = vrot.lane.b32.xlu0 %v13945_v3, %s11425_s14 }
 0xc27   : > { %8249 = vperm.xlu1 %11222, %v11011_v21  }
 0xc29   : > { %8244 = vperm.xlu0 %11221, %v11010_v42  }
 0xc2b   : > { %8239 = vperm.xlu1 %11222, %v11009_v36  }
 0xc2d   : > { %8234 = vperm.xlu0 %11221, %v11008_v0  }
 0xc59   : > { %v7341_v32 = vpop.permute.xlu1 %7340 }
 0xc5b   : > { %v7337_v18 = vpop.permute.xlu0 %7336 }
 0xc5c   : > { %v7352_v62 = vsel %vm15852_vm12, %v7337_v18, %v7341_v32  ;;  %v7343_v1 = vsel %vm15853_vm14, %v7341_v32, %v7337_v18  ;;  %vm15859_vm12 = vcmask 261120   ;;  %vm15861_vm14 = vcmask 138240  }
 0xc5d   : > { %10930 = vmatprep.subr.msk.bf16.mxu0 %vm15676_vm2, %v7343_v1  ;;  %v7339_v12 = vpop.permute.xlu1 %7338  ;;  %v7356_v30 = vsel %vm15856_vm13, %v7352_v62, 0  ;;  %v11361_v62 = vld [vmem:[%s14917_s2 + $0x430] sm:$0xff]  }
 0xc5e   : > { %7392 = vmatpush1.bf16.msra.mxu0 %v7356_v30 }
 0xc5f   : > { %v7335_v60 = vpop.permute.xlu0 %7334 }
 0xc60   : > { %v7348_v47 = vsel %vm15857_vm0, %v7335_v60, %v7339_v12  ;;  %v7342_v49 = vsel %vm15858_vm1, %v7339_v12, %v7335_v60  ;;  %vm15862_vm0 = vmmov %vm15861_vm14 }
 0xc61   : > { %10931 = vmatprep.subr.msk.bf16.mxu0 %vm15676_vm2, %v7342_v49  ;;  %v7312_v6 = vpop.permute.xlu1 %7311  ;;  %v7354_v24 = vsel %vm15856_vm13, %v7348_v47, 0  ;;  %vm15865_vm1 = vmmov %vm15862_vm0  ;;  %vm15869_vm2 = vcmask 261120   ;;  %vm15871_vm13 = vnez %v15870_v55 }
 0xc62   : > { %7394 = vmatpush1.bf16.msra.mxu0 %v7354_v24 }
 0xc63   : > { %v7304_v27 = vpop.permute.xlu0 %7303 }
 0xc65   : > { %10932 = vmatmul.mubr.msk.bf16.vlgmr.msra.gmra.mxu0 %vm15859_vm12, %v11354_v28  ;;  %v7508_v63 = vpop.permute.xlu1 %7507  ;;  %vm15866_vm12 = vmmov %vm15862_vm0 }
 0xc66   : > { %7421 = vmatprep.mubr.bf16.mxu0 %v15860_v26 }
 0xc67   : > { %v7306_v20 = vpop.permute.xlu0 %7305 }
 0xc68   : > { %v7323_v43 = vsel %vm15861_vm14, %v7306_v20, %v7312_v6  ;;  %v7314_v8 = vsel %vm15862_vm0, %v7312_v6, %v7306_v20  ;;  %vm15867_vm14 = vcmask 121856  }
 0xc69   : > { %10936 = vmatprep.subr.msk.bf16.mxu1 %vm11689_vm5, %v7314_v8  ;;  %v7310_v13 = vpop.permute.xlu1 %7309  ;;  %v7327_v54 = vsel %vm11685_vm3, %v7323_v43, 0  ;;  %vm15868_vm0 = vmmov %vm15867_vm14 }
 0xc6a   : > { %v7319_v50 = vsel %vm15865_vm1, %v7304_v27, %v7310_v13  ;;  %7461 = vmatpush1.bf16.msra.mxu1 %v7327_v54  ;;  %v7313_v37 = vsel %vm15866_vm12, %v7310_v13, %v7304_v27  ;;  %vm15873_vm1 = vnez %v15872_v25  ;;  %vm15875_vm12 = vmmov %vm15868_vm0 }
 0xc6b   : > { %v7504_v29 = vpop.permute.xlu0 %7503  ;;  %10937 = vmatprep.subr.msk.bf16.mxu1 %vm11689_vm5, %v7313_v37  ;;  %v7325_v40 = vsel %vm11685_vm3, %v7319_v50, 0 }
 0xc6c   : > { %v7519_v52 = vsel %vm15867_vm14, %v7504_v29, %v7508_v63  ;;  %v7510_v10 = vsel %vm15868_vm0, %v7508_v63, %v7504_v29  ;;  %vm15876_vm14 = vcmask 261120   ;;  %v11362_v63 = vld [vmem:[%s14917_s2 + $0x428] sm:$0xff]   ;;  %v11364_v29 = vld [vmem:[%s14917_s2 + $0x440] sm:$0xff]  }
 0xc6d   : > { %10933 = vmatmul.mubr.msk.bf16.gmra.mxu0 %vm15869_vm2, %v11355_v23  ;;  %10946 = vmatprep.subr.msk.bf16.mxu0 %vm15871_vm13, %v7510_v10  ;;  %v7506_v2 = vpop.permute.xlu1 %7505  ;;  %v7523_v58 = vsel %vm15873_vm1, %v7519_v52, 0  ;;  %vm15874_vm2 = vmmov %vm15868_vm0  ;;  %vm15877_vm0 = vcmask 7168   ;;  %v11363_v23 = vld [vmem:[%s14917_s2 + $0x438] sm:$0xff]  }
 0xc6e   : > { %7463 = vmatpush1.bf16.msra.mxu1 %v7325_v40  ;;  %7559 = vmatpush1.bf16.msra.mxu0 %v7523_v58 }
 0xc6f   : > { %v7502_v19 = vpop.permute.xlu0 %7501  ;;  %7578 = vmatprep.mubr.bf16.mxu0 %v15860_v26 }
 0xc70   : > { %v7509_v15 = vsel %vm15874_vm2, %v7506_v2, %v7502_v19  ;;  %v7515_v31 = vsel %vm15875_vm12, %v7502_v19, %v7506_v2  ;;  %vm15878_vm2 = vmmov %vm15877_vm0  ;;  %vm15880_vm12 = vnez %v15879_v44 }
 0xc71   : > { %v7521_v53 = vsel %vm15873_vm1, %v7515_v31, 0  ;;  %10938 = vmatmul.mubr.msk.bf16.vlgmr.msra.gmra.mxu1 %vm15876_vm14, %v11356_v59  ;;  %10947 = vmatprep.subr.msk.bf16.mxu0 %vm15871_vm13, %v7509_v15  ;;  %v7614_v56 = vpop.permute.xlu1 %7613  ;;  %vm15882_vm13 = vnez %v15881_v45  ;;  %v11365_v15 = vld [vmem:[%s14917_s2 + $0x450] sm:$0xff]  }
 0xc72   : > { %7561 = vmatpush1.bf16.msra.mxu0 %v7521_v53  ;;  %7490 = vmatprep.mubr.bf16.mxu1 %v15860_v26 }
 0xc73   : > { %v7610_v11 = vpop.permute.xlu0 %7609  ;;  %7746 = vmatprep.subr.bf16.mxu0 %v13941_v51 }
 0xc74   : > { %v7616_v46 = vsel %vm15877_vm0, %v7614_v56, %v7610_v11  ;;  %v7625_v4 = vsel %vm15878_vm2, %v7610_v11, %v7614_v56  ;;  %vm15883_vm2 = vmmov %vm15877_vm0 }
 0xc75   : > { %v7629_v33 = vsel %vm15880_vm12, %v7625_v4, 0  ;;  %10948 = vmatmul.mubr.msk.bf16.vlgmr.msra.gmra.mxu0 %vm15876_vm14, %v11357_v61  ;;  %10956 = vmatprep.subr.msk.bf16.mxu1 %vm15882_vm13, %v7616_v46  ;;  %v7612_v48 = vpop.permute.xlu1 %7611 }
 0xc76   : > { %7665 = vmatpush1.bf16.msra.mxu1 %v7629_v33  ;;  %7747 = vmatpush1.bf16.msra.mxu0 %v13939_v14  ;;  %v11359_v14 = vld [vmem:[%s14917_s2 + $0x418] sm:$0xff]  }
 0xc77   : > { %v7608_v22 = vpop.permute.xlu0 %7607  ;;  %7748 = vmatprep.subr.bf16.mxu0 %v13949_v7  ;;  %7588 = vmatprep.mubr.bf16.mxu0 %v15860_v26  ;;  %v11360_v7 = vld [vmem:[%s14917_s2 + $0x420] sm:$0xff]  }
 0xc78   : > { %v7615_v16 = vsel %vm15877_vm0, %v7612_v48, %v7608_v22  ;;  %v7621_v5 = vsel %vm15883_vm2, %v7608_v22, %v7612_v48  ;;  %vm15884_vm0 = vmmov %vm15876_vm14  ;;  %vm15885_vm2 = vcmask 1039360  }
 0xc79   : > { %v7627_v35 = vsel %vm15880_vm12, %v7621_v5, 0  ;;  %10939 = vmatmul.mubr.msk.bf16.gmra.mxu1 %vm15876_vm14, %v11358_v34  ;;  %10957 = vmatprep.subr.msk.bf16.mxu1 %vm15882_vm13, %v7615_v16  ;;  %v7798_v38 = vpop.permute.xlu1 %7797  ;;  %vm15886_vm14 = vmmov %vm15885_vm2  ;;  %vm15896_vm12 = vcmask 261120   ;;  %v11366_v34 = vld [vmem:[%s14917_s2 + $0x448] sm:$0xff]  }
 0xc7a   : > { %7667 = vmatpush1.bf16.msra.mxu1 %v7627_v35  ;;  %7749 = vmatpush1.bf16.msra.mxu0 %v13945_v3  ;;  %vm15889_vm13 = vmmov %vm15884_vm0 }
 0xc7b   : > { %v7800_v51 = vpop.permute.xlu0 %7799  ;;  %7684 = vmatprep.mubr.bf16.mxu1 %v15860_v26 }
 0xc7d   : > { %10949 = vmatmul.mubr.msk.bf16.gmra.mxu0 %vm15884_vm0, %v11359_v14  ;;  %v7802_v39 = vpop.permute.xlu1 %7801  ;;  %vm15890_vm0 = vcmask 924672   ;;  %v11367_v14 = vld [vmem:[%s14917_s2 + $0x458] sm:$0xff]  }
 0xc7e   : > { %v7804_v21 = vsel %vm15885_vm2, %v7800_v51, %v7802_v39  ;;  %v7813_v42 = vsel %vm15886_vm14, %v7802_v39, %v7800_v51  ;;  %7766 = vmatprep.mubr.bf16.mxu0 %v15860_v26  ;;  %vm15891_vm2 = vmmov %vm15890_vm0  ;;  %v11368_v51 = vld [vmem:[%s14917_s2 + $0x460] sm:$0xff]   ;;  %v11369_v39 = vld [vmem:[%s14917_s2 + $0x470] sm:$0xff]  }
 0xc7f   : > { %v7817_v0 = vsel %vm11817_vm6, %v7804_v21, 0  ;;  %v7906_v3 = vpop.permute.xlu0 %7905  ;;  %10974 = vmatprep.subr.msk.bf16.mxu1 %vm11803_vm8, %v7813_v42  ;;  %v11371_v21 = vld [vmem:[%s14917_s2 + $0x478] sm:$0xff]  }
 0xc81   : > { %10958 = vmatmul.mubr.msk.bf16.vlgmr.msra.gmra.mxu1 %vm15889_vm13, %v11360_v7  ;;  %v7908_v18 = vpop.permute.xlu1 %7907  ;;  %vm15894_vm13 = vmmov %vm15886_vm14  ;;  %v11370_v7 = vld [vmem:[%s14917_s2 + $0x468] sm:$0xff]  }
 0xc82   : > { %7853 = vmatpush1.bf16.msra.mxu1 %v7817_v0  ;;  %v7910_v1 = vsel %vm15890_vm0, %v7906_v3, %v7908_v18  ;;  %v7919_v12 = vsel %vm15891_vm2, %v7908_v18, %v7906_v3  ;;  %7694 = vmatprep.mubr.bf16.mxu1 %v15860_v26  ;;  %vm15895_vm14 = vmmov %vm15894_vm13 }
 0xc83   : > { %v7923_v60 = vsel %vm15812_vm15, %v7910_v1, 0  ;;  %v7796_v47 = vpop.permute.xlu0 %7795  ;;  %10984 = vmatprep.subr.msk.bf16.mxu0 %vm11822_vm11, %v7919_v12  ;;  %vm15897_vm2 = vmmov %vm15890_vm0 }
 0xc84   : > { %v7803_v6 = vsel %vm15894_vm13, %v7796_v47, %v7798_v38  ;;  %v7809_v24 = vsel %vm15895_vm14, %v7798_v38, %v7796_v47  ;;  %vm15898_vm13 = vmmov %vm15896_vm12  ;;  %vm15899_vm14 = vcmask 916480  }
 0xc85   : > { %v7815_v28 = vsel %vm11817_vm6, %v7803_v6, 0  ;;  %10966 = vmatmul.mubr.msk.bf16.vlgmr.msra.gmra.mxu0 %vm15896_vm12, %v11361_v62  ;;  %10975 = vmatprep.subr.msk.bf16.mxu1 %vm11803_vm8, %v7809_v24  ;;  %v7904_v27 = vpop.permute.xlu1 %7903 }
 0xc86   : > { %7959 = vmatpush1.bf16.msra.mxu0 %v7923_v60  ;;  %7855 = vmatpush1.bf16.msra.mxu1 %v7815_v28 }
 0xc87   : > { %v7902_v20 = vpop.permute.xlu0 %7901  ;;  %7776 = vmatprep.mubr.bf16.mxu0 %v15860_v26 }
 0xc88   : > { %v7909_v43 = vsel %vm15890_vm0, %v7902_v20, %v7904_v27  ;;  %v7915_v8 = vsel %vm15897_vm2, %v7904_v27, %v7902_v20  ;;  %vm15900_vm0 = vmmov %vm15899_vm14 }
 0xc89   : > { %v7921_v13 = vsel %vm15812_vm15, %v7909_v43, 0  ;;  %10959 = vmatmul.mubr.msk.bf16.gmra.mxu1 %vm15896_vm12, %v11362_v63  ;;  %10985 = vmatprep.subr.msk.bf16.mxu0 %vm11822_vm11, %v7915_v8  ;;  %v8010_v54 = vpop.permute.xlu1 %8009  ;;  %vm15903_vm2 = vmmov %vm15896_vm12  ;;  %vm15904_vm12 = vcmask 908288  }
 0xc8a   : > { %7961 = vmatpush1.bf16.msra.mxu0 %v7921_v13  ;;  %7872 = vmatprep.mubr.bf16.mxu1 %v15860_v26 }
 0xc8b   : > { %v8012_v50 = vpop.permute.xlu0 %8011 }
 0xc8d   : > { %10967 = vmatmul.mubr.msk.bf16.gmra.mxu0 %vm15898_vm13, %v11363_v23  ;;  %v8014_v37 = vpop.permute.xlu1 %8013  ;;  %vm15905_vm13 = vmmov %vm15904_vm12 }
 0xc8e   : > { %v8016_v52 = vsel %vm15899_vm14, %v8012_v50, %v8014_v37  ;;  %v8025_v10 = vsel %vm15900_vm0, %v8014_v37, %v8012_v50  ;;  %7978 = vmatprep.mubr.bf16.mxu0 %v15860_v26  ;;  %vm15908_vm14 = vmmov %vm15900_vm0 }
 0xc8f   : > { %v8029_v40 = vsel %vm11898_vm7, %v8016_v52, 0  ;;  %v8118_v58 = vpop.permute.xlu0 %8117  ;;  %10994 = vmatprep.subr.msk.bf16.mxu1 %vm11884_vm4, %v8025_v10 }
 0xc91   : > { %10976 = vmatmul.mubr.msk.bf16.vlgmr.msra.gmra.mxu1 %vm15903_vm2, %v11364_v29  ;;  %v8120_v19 = vpop.permute.xlu1 %8119 }
 0xc92   : > { %8065 = vmatpush1.bf16.msra.mxu1 %v8029_v40  ;;  %v8122_v31 = vsel %vm15904_vm12, %v8118_v58, %v8120_v19  ;;  %v8131_v53 = vsel %vm15905_vm13, %v8120_v19, %v8118_v58  ;;  %7882 = vmatprep.mubr.bf16.mxu1 %v15860_v26  ;;  %vm15909_vm13 = vmmov %vm15904_vm12 }
 0xc93   : > { %v8135_v61 = vsel %vm15729_vm10, %v8122_v31, 0  ;;  %v8008_v11 = vpop.permute.xlu0 %8007  ;;  %11004 = vmatprep.subr.msk.bf16.mxu0 %vm11903_vm9, %v8131_v53 }
 0xc94   : > { %v8015_v4 = vsel %vm15908_vm14, %v8008_v11, %v8010_v54  ;;  %v8021_v33 = vsel %vm15900_vm0, %v8010_v54, %v8008_v11  ;;  %vm15910_vm14 = vmmov %vm15903_vm2 }
 0xc95   : > { %v8027_v48 = vsel %vm11898_vm7, %v8015_v4, 0  ;;  %10986 = vmatmul.mubr.msk.bf16.vlgmr.msra.gmra.mxu0 %vm15903_vm2, %v11365_v15  ;;  %10995 = vmatprep.subr.msk.bf16.mxu1 %vm11884_vm4, %v8021_v33  ;;  %v8116_v22 = vpop.permute.xlu1 %8115  ;;  %vm15911_vm0 = vmmov %vm15903_vm2 }
 0xc96   : > { %8171 = vmatpush1.bf16.msra.mxu0 %v8135_v61  ;;  %8067 = vmatpush1.bf16.msra.mxu1 %v8027_v48  ;;  %vm15912_vm2 = vmmov %vm15911_vm0 }
 0xc97   : > { %v8114_v16 = vpop.permute.xlu0 %8113  ;;  %7988 = vmatprep.mubr.bf16.mxu0 %v15860_v26 }
 0xc98   : > { %v8121_v5 = vsel %vm15904_vm12, %v8114_v16, %v8116_v22  ;;  %v8127_v35 = vsel %vm15909_vm13, %v8116_v22, %v8114_v16  ;;  %vm15913_vm12 = vmmov %vm15911_vm0 }
 0xc99   : > { %v8133_v38 = vsel %vm15729_vm10, %v8121_v5, 0  ;;  %10977 = vmatmul.mubr.msk.bf16.gmra.mxu1 %vm15910_vm14, %v11366_v34  ;;  %11005 = vmatprep.subr.msk.bf16.mxu0 %vm11903_vm9, %v8127_v35  ;;  %vm15914_vm13 = vmmov %vm15911_vm0 }
 0xc9a   : > { %8173 = vmatpush1.bf16.msra.mxu0 %v8133_v38  ;;  %8084 = vmatprep.mubr.bf16.mxu1 %v15860_v26  ;;  %vm15915_vm14 = vmmov %vm15911_vm0 }
 0xc9d   : > { %10987 = vmatmul.mubr.msk.bf16.gmra.mxu0 %vm15911_vm0, %v11367_v14  ;;  %vm15948_vm0 = vcmask 130048  }
 0xc9e   : > { %8190 = vmatprep.mubr.bf16.mxu0 %v15860_v26  ;;  %vm15955_vm9 = vmmov %vm15948_vm0 }
 0xca1   : > { %10996 = vmatmul.mubr.msk.bf16.vlgmr.msra.gmra.mxu1 %vm15912_vm2, %v11368_v51  ;;  %vm15949_vm2 = vmmov %vm15948_vm0 }
 0xca2   : > { %8094 = vmatprep.mubr.bf16.mxu1 %v15860_v26 }
 0xca5   : > { %11006 = vmatmul.mubr.msk.bf16.vlgmr.msra.gmra.mxu0 %vm15913_vm12, %v11369_v39 }
 0xca6   : > { %8200 = vmatprep.mubr.bf16.mxu0 %v15860_v26 }
 0xca9   : > { %10997 = vmatmul.mubr.msk.bf16.gmra.mxu1 %vm15914_vm13, %v11370_v7 }
 0xcaa   : > { %8390 = vmatprep.mubr.bf16.mxu1 %v15860_v26 }
 0xcad   : > { %11007 = vmatmul.mubr.msk.bf16.gmra.mxu0 %vm15915_vm14, %v11371_v21  ;;  %vm15954_vm14 = vmmov %vm15948_vm0 }
 0xcae   : > { %8459 = vmatprep.mubr.bf16.mxu0 %v15860_v26 }
 0xd25   : > { %v7413_v42 = vpop.f32.mrf.mxu0 }
 0xd27   : > { %v14213_v0 = vpop.f32.mrf.mxu0 }
 0xd29   : > { %v7417_v3 = vpop.f32.mrf.mxu0 }
 0xd2b   : > { %v7419_v18 = vpop.f32.mrf.mxu0 }
 0xd2d   : > { %v7423_v62 = vpop.f32.mrf.mxu0 }
 0xd2f   : > { %v7425_v1 = vpop.f32.mrf.mxu0 }
 0xd31   : > { %v7427_v12 = vpop.f32.mrf.mxu0  ;;  %v7482_v60 = vpop.f32.mrf.mxu1 }
 0xd32   : > { %v7483_v9 = vadd.f32 %v7482_v60, %v7413_v42 }
 0xd33   : > { %v14215_v47 = vpop.f32.mrf.mxu0  ;;  %v7484_v6 = vpop.f32.mrf.mxu1 }
 0xd34   : > { %15916 = vst [vmem:[#allocation2_spill] sm:$0xff] %v14215_v47 }
 0xd35   : > { %v7486_v24 = vpop.f32.mrf.mxu1  ;;  %v7580_v28 = vpop.f32.mrf.mxu0 }
 0xd36   : > { %v7487_v55 = vadd.f32 %v7486_v24, %v7417_v3 }
 0xd37   : > { %v7488_v27 = vpop.f32.mrf.mxu1  ;;  %v14217_v63 = vpop.f32.mrf.mxu0 }
 0xd38   : > { %15917 = vst [vmem:[#allocation4_spill] sm:$0xff] %v14217_v63  ;;  %v7489_v26 = vadd.f32 %v7488_v27, %v7419_v18  ;;  %v7599_v63 = vadd.f32 %v7580_v28, %v7483_v9 }
 0xd39   : > { %v7492_v20 = vpop.f32.mrf.mxu1  ;;  %v7584_v43 = vpop.f32.mrf.mxu0 }
 0xd3a   : > { %v7493_v36 = vadd.f32 %v7492_v20, %v7423_v62 }
 0xd3b   : > { %v7494_v8 = vpop.f32.mrf.mxu1  ;;  %v7586_v13 = vpop.f32.mrf.mxu0  ;;  %v15924_v62 = vld [vmem:[#allocation2_spill] sm:$0xff] }
 0xd3c   : > { %v7495_v25 = vadd.f32 %v7494_v8, %v7425_v1  ;;  %v7602_v47 = vadd.f32 %v7586_v13, %v7489_v26 }
 0xd3d   : > { %v7496_v54 = vpop.f32.mrf.mxu1  ;;  %v7590_v23 = vpop.f32.mrf.mxu0 }
 0xd3e   : > { %v7603_v57 = vadd.f32 %v7590_v23, %v7493_v36 }
 0xd3f   : > { %v7498_v50 = vpop.f32.mrf.mxu1  ;;  %v7592_v37 = vpop.f32.mrf.mxu0  ;;  %v15925_v18 = vld [vmem:[#allocation4_spill] sm:$0xff] }
 0xd40   : > { %v7499_v20 = vadd.f32 %v7498_v50, %v15924_v62 }
 0xd41   : > { %v7594_v29 = vpop.f32.mrf.mxu0  ;;  %v7686_v52 = vpop.f32.mrf.mxu1 }
 0xd42   : > { %v7705_v27 = vadd.f32 %v7686_v52, %v7599_v63 }
 0xd43   : > { %v7596_v10 = vpop.f32.mrf.mxu0  ;;  %v14219_v40 = vpop.f32.mrf.mxu1 }
 0xd44   : > { %15918 = vst [vmem:[#allocation6_spill] sm:$0xff] %v14219_v40  ;;  %v7485_v40 = vadd.f32 %v7484_v6, %v14213_v0  ;;  %v7606_v8 = vadd.f32 %v7596_v10, %v7499_v20 }
 0xd45   : > { %v7690_v58 = vpop.f32.mrf.mxu1  ;;  %v7768_v19 = vpop.f32.mrf.mxu0 }
 0xd46   : > { %v7600_v60 = vadd.f32 %v15925_v18, %v7485_v40  ;;  %v7787_v28 = vadd.f32 %v7768_v19, %v7705_v27 }
 0xd47   : > { %v7692_v15 = vpop.f32.mrf.mxu1  ;;  %v14221_v31 = vpop.f32.mrf.mxu0 }
 0xd48   : > { %15919 = vst [vmem:[#allocation5_spill] sm:$0xff] %v14221_v31 }
 0xd49   : > { %v7696_v53 = vpop.f32.mrf.mxu1  ;;  %v7772_v61 = vpop.f32.mrf.mxu0 }
 0xd4a   : > { %v7709_v31 = vadd.f32 %v7696_v53, %v7603_v57 }
 0xd4b   : > { %v7698_v11 = vpop.f32.mrf.mxu1  ;;  %v7774_v4 = vpop.f32.mrf.mxu0  ;;  %v15926_v26 = vld [vmem:[#allocation6_spill] sm:$0xff] }
 0xd4c   : > { %v7706_v6 = vadd.f32 %v15926_v26, %v7600_v60  ;;  %v15935_v26 = vld [vmem:[#allocation28_spill] sm:$0xff] }
 0xd4d   : > { %v7700_v33 = vpop.f32.mrf.mxu1  ;;  %v7778_v48 = vpop.f32.mrf.mxu0 }
 0xd4e   : > { %v7791_v42 = vadd.f32 %v7778_v48, %v7709_v31 }
 0xd4f   : > { %v7702_v34 = vpop.f32.mrf.mxu1  ;;  %v7780_v22 = vpop.f32.mrf.mxu0  ;;  %v15927_v63 = vld [vmem:[#allocation5_spill] sm:$0xff] }
 0xd50   : > { %v7788_v52 = vadd.f32 %v15927_v63, %v7706_v6 }
 0xd51   : > { %v7782_v16 = vpop.f32.mrf.mxu0  ;;  %v7874_v5 = vpop.f32.mrf.mxu1 }
 0xd53   : > { %v7784_v35 = vpop.f32.mrf.mxu0  ;;  %v14223_v38 = vpop.f32.mrf.mxu1 }
 0xd54   : > { %15920 = vst [vmem:[#allocation8_spill] sm:$0xff] %v14223_v38  ;;  %v7604_v38 = vadd.f32 %v7592_v37, %v7495_v25 }
 0xd55   : > { %v7878_v14 = vpop.f32.mrf.mxu1  ;;  %v14225_v51 = vpop.f32.mrf.mxu0 }
 0xd56   : > { %15921 = vst [vmem:[#allocation3_spill] sm:$0xff] %v14225_v51  ;;  %v7497_v51 = vadd.f32 %v7496_v54, %v7427_v12  ;;  %v7710_v36 = vadd.f32 %v7698_v11, %v7604_v38  ;;  %v7712_v54 = vadd.f32 %v7702_v34, %v7606_v8 }
 0xd57   : > { %v7880_v39 = vpop.f32.mrf.mxu1  ;;  %v14227_v7 = vpop.f32.mrf.mxu0 }
 0xd58   : > { %15922 = vst [vmem:[#allocation7_spill] sm:$0xff] %v14227_v7  ;;  %v7601_v7 = vadd.f32 %v7584_v43, %v7487_v55  ;;  %v7605_v24 = vadd.f32 %v7594_v29, %v7497_v51  ;;  %v7708_v55 = vadd.f32 %v7692_v15, %v7602_v47  ;;  %v7792_v0 = vadd.f32 %v7780_v22, %v7710_v36 }
 0xd59   : > { %v7884_v21 = vpop.f32.mrf.mxu1  ;;  %v7984_v46 = vpop.f32.mrf.mxu0  ;;  %v7893_v47 = vadd.f32 %v7874_v5, %v7787_v28  ;;  %v7794_v10 = vadd.f32 %v7784_v35, %v7712_v54 }
 0xd5a   : > { %v7707_v1 = vadd.f32 %v7690_v58, %v7601_v7  ;;  %v7711_v43 = vadd.f32 %v7700_v33, %v7605_v24  ;;  %v7897_v9 = vadd.f32 %v7884_v21, %v7791_v42  ;;  %v7790_v13 = vadd.f32 %v7774_v4, %v7708_v55  ;;  %v8250_v42 = vpop.permute.xlu1 %8249  ;;  %v8245_v55 = vpop.permute.xlu0 %8244 }
 0xd5b   : > { %v7886_v56 = vpop.f32.mrf.mxu1  ;;  %v7986_v59 = vpop.f32.mrf.mxu0  ;;  %v15928_v19 = vld [vmem:[#allocation8_spill] sm:$0xff] }
 0xd5c   : > { %v7789_v57 = vadd.f32 %v7772_v61, %v7707_v1  ;;  %v7793_v37 = vadd.f32 %v7782_v16, %v7711_v43  ;;  %v7898_v58 = vadd.f32 %v7886_v56, %v7792_v0  ;;  %v7896_v15 = vadd.f32 %v7880_v39, %v7790_v13  ;;  %v15936_v13 = vld [vmem:[#allocation30_spill] sm:$0xff] }
 0xd5d   : > { %v7888_v2 = vpop.f32.mrf.mxu1  ;;  %v7990_v49 = vpop.f32.mrf.mxu0  ;;  %v7894_v4 = vadd.f32 %v15928_v19, %v7788_v52  ;;  %v15929_v34 = vld [vmem:[#allocation3_spill] sm:$0xff]  ;;  %v11103_v19 = vld [vmem:[%s14918_s3 + $0x138] sm:$0xff] }
 0xd5e   : > { %v7895_v29 = vadd.f32 %v7878_v14, %v7789_v57  ;;  %v8003_v40 = vadd.f32 %v7990_v49, %v7897_v9  ;;  %v7899_v11 = vadd.f32 %v7888_v2, %v7793_v37  ;;  %v7999_v22 = vadd.f32 %v15929_v34, %v7893_v47  ;;  %v15934_v9 = vld [vmem:[#allocation27_spill] sm:$0xff]  ;;  %v15940_v37 = vld [vmem:[#allocation32_spill] sm:$0xff] }
 0xd5f   : > { %v7890_v30 = vpop.f32.mrf.mxu1  ;;  %v7992_v32 = vpop.f32.mrf.mxu0  ;;  %v8002_v38 = vadd.f32 %v7986_v59, %v7896_v15  ;;  %v15930_v35 = vld [vmem:[#allocation7_spill] sm:$0xff] }
 0xd60   : > { %v8001_v61 = vadd.f32 %v7984_v46, %v7895_v29  ;;  %v8004_v33 = vadd.f32 %v7992_v32, %v7898_v58  ;;  %v7900_v16 = vadd.f32 %v7890_v30, %v7794_v10  ;;  %v8000_v39 = vadd.f32 %v15930_v35, %v7894_v4  ;;  %v8240_v58 = vpop.permute.xlu1 %8239  ;;  %v8235_v15 = vpop.permute.xlu0 %8234  ;;  %v11102_v4 = vld [vmem:[%s14918_s3 + $0x130] sm:$0xff]  ;;  %v11101_v34 = vld [vmem:[%s14918_s3 + $0x128] sm:$0xff] }
 0xd61   : > { %v7994_v45 = vpop.f32.mrf.mxu0  ;;  %v14229_v44 = vpop.f32.mrf.mxu1 }
 0xd62   : > { %15923 = vst [vmem:[#allocation9_spill] sm:$0xff] %v14229_v44  ;;  %v8005_v49 = vadd.f32 %v7994_v45, %v7899_v11 }
 0xd63   : > { %v7996_v17 = vpop.f32.mrf.mxu0  ;;  %v14231_v41 = vpop.f32.mrf.mxu1 }
 0xd64   : > { %v8006_v46 = vadd.f32 %v7996_v17, %v7900_v16  ;;  %v8106_v30 = vadd.f32 %v14231_v41, %v8000_v39  ;;  %v15933_v17 = vld [vmem:[#allocation29_spill] sm:$0xff]  ;;  %v15937_v41 = vld [vmem:[#allocation31_spill] sm:$0xff] }
 0xd65   : > { %v8090_v44 = vpop.f32.mrf.mxu1  ;;  %v8192_v3 = vpop.f32.mrf.mxu0 }
 0xd66   : > { %v8107_v51 = vadd.f32 %v8090_v44, %v8001_v61  ;;  %v15932_v44 = vld [vmem:[#allocation26_spill] sm:$0xff] }
 0xd67   : > { %v8092_v12 = vpop.f32.mrf.mxu1  ;;  %v8194_v25 = vpop.f32.mrf.mxu0 }
 0xd68   : > { %v8108_v20 = vadd.f32 %v8092_v12, %v8002_v38  ;;  %v8212_v57 = vadd.f32 %v8194_v25, %v8106_v30  ;;  %v15941_v25 = vld [vmem:[#allocation33_spill] sm:$0xff] }
 0xd69   : > { %v8096_v23 = vpop.f32.mrf.mxu1  ;;  %v8196_v50 = vpop.f32.mrf.mxu0  ;;  %v15931_v21 = vld [vmem:[#allocation9_spill] sm:$0xff] }
 0xd6a   : > { %v8109_v48 = vadd.f32 %v8096_v23, %v8003_v40  ;;  %v8105_v62 = vadd.f32 %v15931_v21, %v7999_v22  ;;  %v8213_v24 = vadd.f32 %v8196_v50, %v8107_v51  ;;  %v8220_v40 = vadd.f32 %v8212_v57, %v15941_v25  ;;  %v11100_v22 = vld [vmem:[%s14918_s3 + $0x120] sm:$0xff]  ;;  %v15974_v25 = vld [vmem:[#allocation16_spill] sm:$0xff] }
 0xd6b   : > { %v8098_v31 = vpop.f32.mrf.mxu1  ;;  %v8198_v53 = vpop.f32.mrf.mxu0 }
 0xd6c   : > { %v8110_v7 = vadd.f32 %v8098_v31, %v8004_v33  ;;  %v8211_v59 = vadd.f32 %v8192_v3, %v8105_v62  ;;  %v8214_v45 = vadd.f32 %v8198_v53, %v8108_v20  ;;  %v8221_v0 = vadd.f32 %v8213_v24, %v15933_v17 }
 0xd6d   : > { %v8100_v14 = vpop.f32.mrf.mxu1  ;;  %v8202_v56 = vpop.f32.mrf.mxu0  ;;  %v14275_v11 = vadd.f32 %v8235_v15, %v8220_v40  ;;  %v15957_v24 = vmov 0  }
 0xd6e   : > { %v8215_v5 = vadd.f32 %v8202_v56, %v8109_v48  ;;  %v8111_v1 = vadd.f32 %v8100_v14, %v8005_v49  ;;  %v8219_v54 = vadd.f32 %v8211_v59, %v15936_v13  ;;  %v8222_v3 = vadd.f32 %v8214_v45, %v15937_v41  ;;  %v15950_v49 = vld [vmem:[#allocation10_spill] sm:$0xff] }
 0xd6f   : > { %v8102_v2 = vpop.f32.mrf.mxu1  ;;  %v8204_v32 = vpop.f32.mrf.mxu0  ;;  %v14255_v63 = vadd.f32 %v8240_v58, %v8221_v0  ;;  %15947 = vst [vmem:[#allocation9_spill] sm:$0xff] %v14275_v11  ;;  %vm15951_vm12 = vnez %v15950_v49 }
 0xd70   : > { %v8216_v36 = vadd.f32 %v8204_v32, %v8110_v7  ;;  %v8223_v60 = vadd.f32 %v8215_v5, %v15932_v44  ;;  %v8112_v27 = vadd.f32 %v8102_v2, %v8006_v46  ;;  %v14265_v31 = vadd.f32 %v8235_v15, %v8219_v54  ;;  %v15952_v7 = vld [vmem:[#allocation11_spill] sm:$0xff]  ;;  %v11372_v2 = vld [vmem:[%s14917_s2 + $0x490] sm:$0xff]   ;;  %v11373_v44 = vld [vmem:[%s14917_s2 + $0x498] sm:$0xff]  }
 0xd71   : > { %v8206_v18 = vpop.f32.mrf.mxu0  ;;  %15942 = vst [vmem:[#allocation6_spill] sm:$0xff] %v14255_v63  ;;  %v14267_v53 = vadd.f32 %v8240_v58, %v8222_v3  ;;  %vm15953_vm13 = vnez %v15952_v7  ;;  %v11375_v3 = vld [vmem:[%s14917_s2 + $0x4a0] sm:$0xff]   ;;  %v15976_v15 = vld [vmem:[#allocation17_spill] sm:$0xff] }
 0xd72   : > { %v8217_v8 = vadd.f32 %v8206_v18, %v8111_v1  ;;  %v8224_v12 = vadd.f32 %v8216_v36, %v15934_v9  ;;  %v14249_v23 = vadd.f32 %v8245_v55, %v8223_v60  ;;  %15945 = vst [vmem:[#allocation3_spill] sm:$0xff] %v14265_v31  ;;  %v14281_v33 = vpack.c.bf16 %v14255_v63, %v14265_v31  ;;  %v15968_v9 = vld [vmem:[#allocation15_spill] sm:$0xff] }
 0xd73   : > { %v8208_v43 = vpop.f32.mrf.mxu0  ;;  %15946 = vst [vmem:[#allocation7_spill] sm:$0xff] %v14267_v53  ;;  %v14287_v48 = vpack.c.bf16 %v14267_v53, %v14275_v11 }
 0xd74   : > { %v8225_v6 = vadd.f32 %v8217_v8, %v15935_v26  ;;  %v8218_v28 = vadd.f32 %v8208_v43, %v8112_v27  ;;  %15938 = vst [vmem:[#allocation2_spill] sm:$0xff] %v14249_v23  ;;  %v14257_v52 = vadd.f32 %v8245_v55, %v8224_v12  ;;  %v11374_v26 = vld [vmem:[%s14917_s2 + $0x480] sm:$0xff]  }
 0xd76   : > { %v14251_v50 = vadd.f32 %v8250_v42, %v8225_v6  ;;  %v8226_v29 = vadd.f32 %v8218_v28, %v15940_v37  ;;  %15943 = vst [vmem:[#allocation5_spill] sm:$0xff] %v14257_v52 }
 0xd78   : > { %15939 = vst [vmem:[#allocation4_spill] sm:$0xff] %v14251_v50  ;;  %v14259_v47 = vadd.f32 %v8250_v42, %v8226_v29  ;;  %v14263_v10 = vpack.c.bf16 %v14251_v50, %v14249_v23 }
 0xd7a   : > { %15944 = vst [vmem:[#allocation8_spill] sm:$0xff] %v14259_v47  ;;  %8319 = vrot.lane.b32.xlu1 %v14263_v10, %s11418_s7  ;;  %v14273_v61 = vpack.c.bf16 %v14259_v47, %v14257_v52 }
 0xd7c   : > { %8315 = vrot.lane.b32.xlu0 %v14273_v61, %s11418_s7 }
 0xd7e   : > { %8317 = vrot.lane.b32.xlu1 %v14281_v33, %s11418_s7 }
 0xd80   : > { %8313 = vrot.lane.b32.xlu0 %v14287_v48, %s11418_s7 }
 0xd82   : > { %8290 = vrot.lane.b32.xlu1 %v14263_v10, %s11419_s8 }
 0xd84   : > { %8282 = vrot.lane.b32.xlu0 %v14287_v48, %s11419_s8 }
 0xd86   : > { %8486 = vrot.lane.b32.xlu1 %v14263_v10, %s11420_s9 }
 0xd88   : > { %8284 = vrot.lane.b32.xlu0 %v14273_v61, %s11419_s8 }
 0xd8a   : > { %8288 = vrot.lane.b32.xlu1 %v14281_v33, %s11419_s8 }
 0xd8c   : > { %8482 = vrot.lane.b32.xlu0 %v14273_v61, %s11420_s9 }
 0xd8e   : > { %8484 = vrot.lane.b32.xlu1 %v14281_v33, %s11420_s9 }
 0xd90   : > { %8480 = vrot.lane.b32.xlu0 %v14287_v48, %s11420_s9 }
 0xd92   : > { %8592 = vrot.lane.b32.xlu1 %v14263_v10, %s11421_s10 }
 0xd94   : > { %8588 = vrot.lane.b32.xlu0 %v14273_v61, %s11421_s10 }
 0xd96   : > { %8590 = vrot.lane.b32.xlu1 %v14281_v33, %s11421_s10 }
 0xd98   : > { %8586 = vrot.lane.b32.xlu0 %v14287_v48, %s11421_s10 }
 0xd9a   : > { %8776 = vrot.lane.b32.xlu1 %v14287_v48, %s11422_s11 }
 0xd9c   : > { %8778 = vrot.lane.b32.xlu0 %v14263_v10, %s11422_s11 }
 0xd9e   : > { %8780 = vrot.lane.b32.xlu1 %v14273_v61, %s11422_s11 }
 0xda0   : > { %8884 = vrot.lane.b32.xlu0 %v14263_v10, %s11423_s12 }
 0xda2   : > { %8886 = vrot.lane.b32.xlu1 %v14273_v61, %s11423_s12 }
 0xda4   : > { %8774 = vrot.lane.b32.xlu0 %v14281_v33, %s11422_s11 }
 0xda6   : > { %8882 = vrot.lane.b32.xlu1 %v14287_v48, %s11423_s12 }
 0xda8   : > { %8880 = vrot.lane.b32.xlu0 %v14281_v33, %s11423_s12 }
 0xdaa   : > { %8988 = vrot.lane.b32.xlu1 %v14287_v48, %s11424_s13 }
 0xdac   : > { %8990 = vrot.lane.b32.xlu0 %v14263_v10, %s11424_s13 }
 0xdae   : > { %8992 = vrot.lane.b32.xlu1 %v14273_v61, %s11424_s13 }
 0xdb0   : > { %9096 = vrot.lane.b32.xlu0 %v14263_v10, %s11425_s14 }
 0xdb2   : > { %9098 = vrot.lane.b32.xlu1 %v14273_v61, %s11425_s14 }
 0xdb4   : > { %8986 = vrot.lane.b32.xlu0 %v14281_v33, %s11424_s13 }
 0xdb6   : > { %9094 = vrot.lane.b32.xlu1 %v14287_v48, %s11425_s14 }
 0xdb8   : > { %9092 = vrot.lane.b32.xlu0 %v14281_v33, %s11425_s14 }
 0xdba   : > { %9220 = vperm.xlu1 %11222, %v11103_v19  }
 0xdbc   : > { %9215 = vperm.xlu0 %11221, %v11102_v4   ;;  %v11376_v4 = vld [vmem:[%s14917_s2 + $0x488] sm:$0xff]  }
 0xdbe   : > { %9210 = vperm.xlu1 %11222, %v11101_v34  }
 0xdc0   : > { %9205 = vperm.xlu0 %11221, %v11100_v22  }
 0xdec   : > { %v8320_v38 = vpop.permute.xlu1 %8319 }
 0xdee   : > { %v8316_v16 = vpop.permute.xlu0 %8315 }
 0xdef   : > { %v8322_v14 = vsel %vm15948_vm0, %v8320_v38, %v8316_v16  ;;  %v8331_v56 = vsel %vm15949_vm2, %v8316_v16, %v8320_v38  ;;  %vm15956_vm0 = vcmask 261120  }
 0xdf0   : > { %v8335_v51 = vsel %vm15951_vm12, %v8331_v56, 0  ;;  %11022 = vmatprep.subr.msk.bf16.mxu1 %vm15953_vm13, %v8322_v14  ;;  %v8318_v5 = vpop.permute.xlu1 %8317  ;;  %v11378_v56 = vld [vmem:[%s14917_s2 + $0x4b0] sm:$0xff]  }
 0xdf1   : > { %8371 = vmatpush1.bf16.msra.mxu1 %v8335_v51 }
 0xdf2   : > { %v8314_v35 = vpop.permute.xlu0 %8313 }
 0xdf3   : > { %v8321_v39 = vsel %vm15954_vm14, %v8318_v5, %v8314_v35  ;;  %v8327_v21 = vsel %vm15955_vm9, %v8314_v35, %v8318_v5  ;;  %vm15958_vm9 = vcmask 138240  }
 0xdf4   : > { %v8333_v62 = vsel %vm15951_vm12, %v8327_v21, 0  ;;  %11023 = vmatprep.subr.msk.bf16.mxu1 %vm15953_vm13, %v8321_v39  ;;  %v8291_v46 = vpop.permute.xlu1 %8290  ;;  %vm15959_vm2 = vmmov %vm15958_vm9  ;;  %vm15967_vm13 = vcmask 261120  }
 0xdf5   : > { %8373 = vmatpush1.bf16.msra.mxu1 %v8333_v62  ;;  %vm15962_vm14 = vmmov %vm15959_vm2 }
 0xdf6   : > { %v8283_v32 = vpop.permute.xlu0 %8282 }
 0xdf8   : > { %11024 = vmatmul.mubr.msk.bf16.vlgmr.msra.gmra.mxu1 %vm15956_vm0, %v11372_v2  ;;  %v8487_v20 = vpop.permute.xlu1 %8486  ;;  %vm15963_vm0 = vmmov %vm15959_vm2 }
 0xdf9   : > { %8400 = vmatprep.mubr.bf16.mxu1 %v15957_v24 }
 0xdfa   : > { %v8285_v1 = vpop.permute.xlu0 %8284 }
 0xdfb   : > { %v8293_v36 = vsel %vm15958_vm9, %v8291_v46, %v8285_v1  ;;  %v8302_v42 = vsel %vm15959_vm2, %v8285_v1, %v8291_v46  ;;  %vm15964_vm9 = vcmask 121856   ;;  %v11379_v46 = vld [vmem:[%s14917_s2 + $0x4c0] sm:$0xff]  }
 0xdfc   : > { %v8306_v59 = vsel %vm11685_vm3, %v8302_v42, 0  ;;  %11028 = vmatprep.subr.msk.bf16.mxu0 %vm11689_vm5, %v8293_v36  ;;  %v8289_v45 = vpop.permute.xlu1 %8288  ;;  %vm15965_vm2 = vmmov %vm15964_vm9 }
 0xdfd   : > { %v8292_v60 = vsel %vm15962_vm14, %v8289_v45, %v8283_v32  ;;  %v8298_v27 = vsel %vm15963_vm0, %v8283_v32, %v8289_v45  ;;  %8440 = vmatpush1.bf16.msra.mxu0 %v8306_v59  ;;  %vm15969_vm14 = vnez %v15968_v9  ;;  %vm15970_vm0 = vmmov %vm15965_vm2 }
 0xdfe   : > { %v8483_v8 = vpop.permute.xlu0 %8482  ;;  %11029 = vmatprep.subr.msk.bf16.mxu0 %vm11689_vm5, %v8292_v60  ;;  %v8304_v43 = vsel %vm11685_vm3, %v8298_v27, 0  ;;  %v11380_v27 = vld [vmem:[%s14917_s2 + $0x4b8] sm:$0xff]  }
 0xdff   : > { %v8489_v55 = vsel %vm15964_vm9, %v8487_v20, %v8483_v8  ;;  %v8498_v57 = vsel %vm15965_vm2, %v8483_v8, %v8487_v20  ;;  %vm15971_vm9 = vmmov %vm15970_vm0  ;;  %vm15972_vm2 = vcmask 7168  }
 0xe00   : > { %v8502_v0 = vsel %vm15873_vm1, %v8498_v57, 0  ;;  %11025 = vmatmul.mubr.msk.bf16.gmra.mxu1 %vm15967_vm13, %v11373_v44  ;;  %11038 = vmatprep.subr.msk.bf16.mxu1 %vm15969_vm14, %v8489_v55  ;;  %v8485_v12 = vpop.permute.xlu1 %8484 }
 0xe01   : > { %8442 = vmatpush1.bf16.msra.mxu0 %v8304_v43  ;;  %8538 = vmatpush1.bf16.msra.mxu1 %v8502_v0 }
 0xe02   : > { %v8481_v6 = vpop.permute.xlu0 %8480  ;;  %8557 = vmatprep.mubr.bf16.mxu1 %v15957_v24 }
 0xe03   : > { %v8488_v28 = vsel %vm15970_vm0, %v8485_v12, %v8481_v6  ;;  %v8494_v13 = vsel %vm15971_vm9, %v8481_v6, %v8485_v12  ;;  %vm15973_vm0 = vmmov %vm15972_vm2  ;;  %vm15975_vm9 = vnez %v15974_v25  ;;  %v11381_v12 = vld [vmem:[%s14917_s2 + $0x4c8] sm:$0xff]  }
 0xe04   : > { %v8500_v54 = vsel %vm15873_vm1, %v8494_v13, 0  ;;  %11030 = vmatmul.mubr.msk.bf16.vlgmr.msra.gmra.mxu0 %vm15967_vm13, %v11374_v26  ;;  %11039 = vmatprep.subr.msk.bf16.mxu1 %vm15969_vm14, %v8488_v28  ;;  %v8593_v41 = vpop.permute.xlu1 %8592  ;;  %vm15977_vm14 = vnez %v15976_v15  ;;  %v11382_v28 = vld [vmem:[%s14917_s2 + $0x4d0] sm:$0xff]  }
 0xe05   : > { %8540 = vmatpush1.bf16.msra.mxu1 %v8500_v54  ;;  %8469 = vmatprep.mubr.bf16.mxu0 %v15957_v24 }
 0xe06   : > { %v8589_v37 = vpop.permute.xlu0 %8588  ;;  %8725 = vmatprep.subr.bf16.mxu1 %v14273_v61 }
 0xe07   : > { %v8595_v29 = vsel %vm15972_vm2, %v8593_v41, %v8589_v37  ;;  %v8604_v58 = vsel %vm15973_vm0, %v8589_v37, %v8593_v41  ;;  %vm15978_vm2 = vmmov %vm15973_vm0 }
 0xe08   : > { %v8608_v40 = vsel %vm15975_vm9, %v8604_v58, 0  ;;  %11040 = vmatmul.mubr.msk.bf16.vlgmr.msra.gmra.mxu1 %vm15967_vm13, %v11375_v3  ;;  %11048 = vmatprep.subr.msk.bf16.mxu0 %vm15977_vm14, %v8595_v29  ;;  %v8591_v19 = vpop.permute.xlu1 %8590 }
 0xe09   : > { %8644 = vmatpush1.bf16.msra.mxu0 %v8608_v40  ;;  %8726 = vmatpush1.bf16.msra.mxu1 %v14263_v10  ;;  %v11377_v10 = vld [vmem:[%s14917_s2 + $0x4a8] sm:$0xff]   ;;  %v11383_v40 = vld [vmem:[%s14917_s2 + $0x4e0] sm:$0xff]  }
 0xe0a   : > { %v8587_v61 = vpop.permute.xlu0 %8586  ;;  %8727 = vmatprep.subr.bf16.mxu1 %v14287_v48  ;;  %8567 = vmatprep.mubr.bf16.mxu1 %v15957_v24 }
 0xe0b   : > { %v8594_v34 = vsel %vm15978_vm2, %v8591_v19, %v8587_v61  ;;  %v8600_v22 = vsel %vm15973_vm0, %v8587_v61, %v8591_v19  ;;  %vm15979_vm2 = vmmov %vm15967_vm13  ;;  %vm15980_vm0 = vcmask 1039360  }
 0xe0c   : > { %v8606_v38 = vsel %vm15975_vm9, %v8600_v22, 0  ;;  %11031 = vmatmul.mubr.msk.bf16.gmra.mxu0 %vm15967_vm13, %v11376_v4  ;;  %11049 = vmatprep.subr.msk.bf16.mxu0 %vm15977_vm14, %v8594_v34  ;;  %v8777_v16 = vpop.permute.xlu1 %8776  ;;  %vm15981_vm13 = vmmov %vm15980_vm0  ;;  %vm15990_vm9 = vcmask 261120  }
 0xe0d   : > { %8646 = vmatpush1.bf16.msra.mxu0 %v8606_v38  ;;  %8728 = vmatpush1.bf16.msra.mxu1 %v14281_v33  ;;  %vm15984_vm14 = vmmov %vm15979_vm2  ;;  %v16001_v38 = vld [vmem:[#allocation24_spill] sm:$0xff] }
 0xe0e   : > { %v8779_v48 = vpop.permute.xlu0 %8778  ;;  %8663 = vmatprep.mubr.bf16.mxu0 %v15957_v24 }
 0xe10   : > { %11041 = vmatmul.mubr.msk.bf16.gmra.mxu1 %vm15979_vm2, %v11377_v10  ;;  %v8781_v14 = vpop.permute.xlu1 %8780  ;;  %vm15985_vm2 = vcmask 924672  }
 0xe11   : > { %v8783_v51 = vsel %vm15980_vm0, %v8779_v48, %v8781_v14  ;;  %v8792_v5 = vsel %vm15981_vm13, %v8781_v14, %v8779_v48  ;;  %8745 = vmatprep.mubr.bf16.mxu1 %v15957_v24  ;;  %vm15986_vm0 = vmmov %vm15985_vm2  ;;  %v11384_v14 = vld [vmem:[%s14917_s2 + $0x4d8] sm:$0xff]  }
 0xe12   : > { %v8796_v39 = vsel %vm11817_vm6, %v8783_v51, 0  ;;  %v8885_v33 = vpop.permute.xlu0 %8884  ;;  %11066 = vmatprep.subr.msk.bf16.mxu0 %vm11803_vm8, %v8792_v5 }
 0xe14   : > { %11050 = vmatmul.mubr.msk.bf16.vlgmr.msra.gmra.mxu0 %vm15984_vm14, %v11378_v56  ;;  %v8887_v62 = vpop.permute.xlu1 %8886  ;;  %vm15989_vm14 = vmmov %vm15981_vm13 }
 0xe15   : > { %8832 = vmatpush1.bf16.msra.mxu0 %v8796_v39  ;;  %v8889_v2 = vsel %vm15985_vm2, %v8885_v33, %v8887_v62  ;;  %v8898_v32 = vsel %vm15986_vm0, %v8887_v62, %v8885_v33  ;;  %8673 = vmatprep.mubr.bf16.mxu0 %v15957_v24  ;;  %vm15991_vm2 = vmmov %vm15986_vm0  ;;  %v11385_v62 = vld [vmem:[%s14917_s2 + $0x4e8] sm:$0xff]  }
 0xe16   : > { %v8902_v1 = vsel %vm15812_vm15, %v8889_v2, 0  ;;  %v8775_v36 = vpop.permute.xlu0 %8774  ;;  %11076 = vmatprep.subr.msk.bf16.mxu1 %vm11822_vm11, %v8898_v32  ;;  %v11387_v2 = vld [vmem:[%s14917_s2 + $0x500] sm:$0xff]   ;;  %v11388_v32 = vld [vmem:[%s14917_s2 + $0x4f8] sm:$0xff]  }
 0xe17   : > { %v8782_v59 = vsel %vm15989_vm14, %v8775_v36, %v8777_v16  ;;  %v8788_v45 = vsel %vm15981_vm13, %v8777_v16, %v8775_v36  ;;  %vm15992_vm14 = vmmov %vm15990_vm9  ;;  %vm15993_vm13 = vcmask 916480  }
 0xe18   : > { %v8794_v44 = vsel %vm11817_vm6, %v8782_v59, 0  ;;  %11058 = vmatmul.mubr.msk.bf16.vlgmr.msra.gmra.mxu1 %vm15990_vm9, %v11379_v46  ;;  %11067 = vmatprep.subr.msk.bf16.mxu0 %vm11803_vm8, %v8788_v45  ;;  %v8883_v60 = vpop.permute.xlu1 %8882  ;;  %v11386_v46 = vld [vmem:[%s14917_s2 + $0x4f0] sm:$0xff]  }
 0xe19   : > { %8938 = vmatpush1.bf16.msra.mxu1 %v8902_v1  ;;  %8834 = vmatpush1.bf16.msra.mxu0 %v8794_v44  ;;  %v11389_v1 = vld [vmem:[%s14917_s2 + $0x508] sm:$0xff]  }
 0xe1a   : > { %v8881_v8 = vpop.permute.xlu0 %8880  ;;  %8755 = vmatprep.mubr.bf16.mxu1 %v15957_v24 }
 0xe1b   : > { %v8888_v55 = vsel %vm15991_vm2, %v8881_v8, %v8883_v60  ;;  %v8894_v57 = vsel %vm15986_vm0, %v8883_v60, %v8881_v8  ;;  %vm15994_vm2 = vmmov %vm15993_vm13 }
 0xe1c   : > { %v8900_v43 = vsel %vm15812_vm15, %v8888_v55, 0  ;;  %11051 = vmatmul.mubr.msk.bf16.gmra.mxu0 %vm15990_vm9, %v11380_v27  ;;  %11077 = vmatprep.subr.msk.bf16.mxu1 %vm11822_vm11, %v8894_v57  ;;  %v8989_v0 = vpop.permute.xlu1 %8988  ;;  %vm15997_vm0 = vmmov %vm15990_vm9  ;;  %vm15998_vm9 = vcmask 908288   ;;  %vm16004_vm11 = vcmask 261120  }
 0xe1d   : > { %8940 = vmatpush1.bf16.msra.mxu1 %v8900_v43  ;;  %8851 = vmatprep.mubr.bf16.mxu0 %v15957_v24 }
 0xe1e   : > { %v8991_v26 = vpop.permute.xlu0 %8990 }
 0xe20   : > { %11059 = vmatmul.mubr.msk.bf16.gmra.mxu1 %vm15992_vm14, %v11381_v12  ;;  %v8993_v6 = vpop.permute.xlu1 %8992  ;;  %vm15999_vm14 = vmmov %vm15998_vm9 }
 0xe21   : > { %v8995_v13 = vsel %vm15993_vm13, %v8991_v26, %v8993_v6  ;;  %v9004_v54 = vsel %vm15994_vm2, %v8993_v6, %v8991_v26  ;;  %8957 = vmatprep.mubr.bf16.mxu1 %v15957_v24  ;;  %vm16002_vm13 = vnez %v16001_v38 }
 0xe22   : > { %v9008_v3 = vsel %vm11898_vm7, %v8995_v13, 0  ;;  %v9097_v37 = vpop.permute.xlu0 %9096  ;;  %11086 = vmatprep.subr.msk.bf16.mxu0 %vm11884_vm4, %v9004_v54 }
 0xe24   : > { %11068 = vmatmul.mubr.msk.bf16.vlgmr.msra.gmra.mxu0 %vm15997_vm0, %v11382_v28  ;;  %v9099_v58 = vpop.permute.xlu1 %9098  ;;  %vm16003_vm0 = vmmov %vm15994_vm2 }
 0xe25   : > { %9044 = vmatpush1.bf16.msra.mxu0 %v9008_v3  ;;  %v9101_v19 = vsel %vm15998_vm9, %v9097_v37, %v9099_v58  ;;  %v9110_v4 = vsel %vm15999_vm14, %v9099_v58, %v9097_v37  ;;  %8861 = vmatprep.mubr.bf16.mxu0 %v15957_v24  ;;  %vm16005_vm14 = vmmov %vm15998_vm9 }
 0xe26   : > { %v9114_v34 = vsel %vm15729_vm10, %v9101_v19, 0  ;;  %v8987_v22 = vpop.permute.xlu0 %8986  ;;  %11096 = vmatprep.subr.msk.bf16.mxu1 %vm16002_vm13, %v9110_v4 }
 0xe27   : > { %v8994_v16 = vsel %vm15994_vm2, %v8987_v22, %v8989_v0  ;;  %v9000_v10 = vsel %vm16003_vm0, %v8989_v0, %v8987_v22  ;;  %vm16006_vm2 = vmmov %vm16004_vm11 }
 0xe28   : > { %v9006_v48 = vsel %vm11898_vm7, %v8994_v16, 0  ;;  %11078 = vmatmul.mubr.msk.bf16.vlgmr.msra.gmra.mxu1 %vm16004_vm11, %v11383_v40  ;;  %11087 = vmatprep.subr.msk.bf16.mxu0 %vm11884_vm4, %v9000_v10  ;;  %v9095_v56 = vpop.permute.xlu1 %9094  ;;  %vm16007_vm0 = vmmov %vm16006_vm2 }
 0xe29   : > { %9150 = vmatpush1.bf16.msra.mxu1 %v9114_v34  ;;  %9046 = vmatpush1.bf16.msra.mxu0 %v9006_v48 }
 0xe2a   : > { %v9093_v51 = vpop.permute.xlu0 %9092  ;;  %8967 = vmatprep.mubr.bf16.mxu1 %v15957_v24 }
 0xe2b   : > { %v9100_v5 = vsel %vm15998_vm9, %v9093_v51, %v9095_v56  ;;  %v9106_v39 = vsel %vm16005_vm14, %v9095_v56, %v9093_v51  ;;  %vm16008_vm9 = vmmov %vm16007_vm0 }
 0xe2c   : > { %v9112_v33 = vsel %vm15729_vm10, %v9100_v5, 0  ;;  %11069 = vmatmul.mubr.msk.bf16.gmra.mxu0 %vm16004_vm11, %v11384_v14  ;;  %11097 = vmatprep.subr.msk.bf16.mxu1 %vm16002_vm13, %v9106_v39  ;;  %vm16009_vm14 = vmmov %vm16007_vm0 }
 0xe2d   : > { %9152 = vmatpush1.bf16.msra.mxu1 %v9112_v33  ;;  %9063 = vmatprep.mubr.bf16.mxu0 %v15957_v24  ;;  %vm16010_vm11 = vmmov %vm16007_vm0 }
 0xe30   : > { %11079 = vmatmul.mubr.msk.bf16.gmra.mxu1 %vm16006_vm2, %v11385_v62  ;;  %vm16027_vm2 = vcmask 130048  }
 0xe31   : > { %9169 = vmatprep.mubr.bf16.mxu1 %v15957_v24 }
 0xe34   : > { %11088 = vmatmul.mubr.msk.bf16.vlgmr.msra.gmra.mxu0 %vm16007_vm0, %v11386_v46  ;;  %vm16028_vm0 = vmmov %vm16027_vm2 }
 0xe35   : > { %9073 = vmatprep.mubr.bf16.mxu0 %v15957_v24 }
 0xe38   : > { %11098 = vmatmul.mubr.msk.bf16.vlgmr.msra.gmra.mxu1 %vm16008_vm9, %v11387_v2 }
 0xe39   : > { %9179 = vmatprep.mubr.bf16.mxu1 %v15957_v24 }
 0xe3c   : > { %11089 = vmatmul.mubr.msk.bf16.gmra.mxu0 %vm16009_vm14, %v11388_v32  ;;  %vm16032_vm14 = vmmov %vm16028_vm0 }
 0xe3d   : > { %9353 = vmatprep.mubr.bf16.mxu0 %v15957_v24 }
 0xe40   : > { %11099 = vmatmul.mubr.msk.bf16.gmra.mxu1 %vm16010_vm11, %v11389_v1  ;;  %vm16033_vm11 = vmmov %vm16028_vm0 }
 0xe41   : > { %9422 = vmatprep.mubr.bf16.mxu1 %v15957_v24 }
 0xeb8   : > { %v8392_v36 = vpop.f32.mrf.mxu1 }
 0xeba   : > { %v14549_v59 = vpop.f32.mrf.mxu1 }
 0xebc   : > { %v8396_v45 = vpop.f32.mrf.mxu1 }
 0xebe   : > { %v8398_v44 = vpop.f32.mrf.mxu1 }
 0xec0   : > { %v8402_v60 = vpop.f32.mrf.mxu1 }
 0xec2   : > { %v8404_v27 = vpop.f32.mrf.mxu1 }
 0xec4   : > { %v8406_v8 = vpop.f32.mrf.mxu1  ;;  %v8461_v55 = vpop.f32.mrf.mxu0 }
 0xec5   : > { %v8462_v18 = vadd.f32 %v8461_v55, %v8392_v36 }
 0xec6   : > { %v14551_v57 = vpop.f32.mrf.mxu1  ;;  %v8463_v43 = vpop.f32.mrf.mxu0 }
 0xec8   : > { %v8465_v0 = vpop.f32.mrf.mxu0  ;;  %v8559_v12 = vpop.f32.mrf.mxu1 }
 0xec9   : > { %v8466_v9 = vadd.f32 %v8465_v0, %v8396_v45 }
 0xeca   : > { %v8467_v26 = vpop.f32.mrf.mxu0  ;;  %v14553_v6 = vpop.f32.mrf.mxu1 }
 0xecb   : > { %16011 = vst [vmem:[#allocation26_spill] sm:$0xff] %v14553_v6  ;;  %v8468_v30 = vadd.f32 %v8467_v26, %v8398_v44 }
 0xecc   : > { %v8471_v28 = vpop.f32.mrf.mxu0  ;;  %v8563_v13 = vpop.f32.mrf.mxu1 }
 0xecd   : > { %v8472_v35 = vadd.f32 %v8471_v28, %v8402_v60 }
 0xece   : > { %v8473_v54 = vpop.f32.mrf.mxu0  ;;  %v8565_v3 = vpop.f32.mrf.mxu1 }
 0xecf   : > { %v8474_v24 = vadd.f32 %v8473_v54, %v8404_v27 }
 0xed0   : > { %v8475_v37 = vpop.f32.mrf.mxu0  ;;  %v8569_v58 = vpop.f32.mrf.mxu1 }
 0xed1   : > { %v8582_v17 = vadd.f32 %v8569_v58, %v8472_v35 }
 0xed2   : > { %v8477_v40 = vpop.f32.mrf.mxu0  ;;  %v8571_v19 = vpop.f32.mrf.mxu1  ;;  %v16019_v44 = vld [vmem:[#allocation26_spill] sm:$0xff] }
 0xed3   : > { %v8583_v6 = vadd.f32 %v8571_v19, %v8474_v24  ;;  %v9221_v19 = vpop.permute.xlu1 %9220 }
 0xed4   : > { %v8573_v4 = vpop.f32.mrf.mxu1  ;;  %v8665_v34 = vpop.f32.mrf.mxu0 }
 0xed6   : > { %v8575_v22 = vpop.f32.mrf.mxu1  ;;  %v8667_v16 = vpop.f32.mrf.mxu0 }
 0xed8   : > { %v8669_v10 = vpop.f32.mrf.mxu0  ;;  %v8747_v48 = vpop.f32.mrf.mxu1 }
 0xeda   : > { %v8671_v14 = vpop.f32.mrf.mxu0  ;;  %v14555_v56 = vpop.f32.mrf.mxu1 }
 0xedb   : > { %16012 = vst [vmem:[#allocation29_spill] sm:$0xff] %v14555_v56  ;;  %v8578_v56 = vadd.f32 %v8559_v12, %v8462_v18 }
 0xedc   : > { %v8675_v51 = vpop.f32.mrf.mxu0  ;;  %v8751_v5 = vpop.f32.mrf.mxu1 }
 0xedd   : > { %v8684_v55 = vadd.f32 %v8665_v34, %v8578_v56 }
 0xede   : > { %v8677_v39 = vpop.f32.mrf.mxu0  ;;  %v8753_v33 = vpop.f32.mrf.mxu1 }
 0xedf   : > { %v8689_v26 = vadd.f32 %v8677_v39, %v8583_v6  ;;  %v8766_v24 = vadd.f32 %v8747_v48, %v8684_v55  ;;  %v9216_v39 = vpop.permute.xlu0 %9215 }
 0xee0   : > { %v8679_v62 = vpop.f32.mrf.mxu0  ;;  %v8757_v46 = vpop.f32.mrf.mxu1 }
 0xee2   : > { %v8681_v2 = vpop.f32.mrf.mxu0  ;;  %v8759_v32 = vpop.f32.mrf.mxu1 }
 0xee3   : > { %v8771_v12 = vadd.f32 %v8759_v32, %v8689_v26 }
 0xee4   : > { %v8761_v1 = vpop.f32.mrf.mxu1  ;;  %v8853_v47 = vpop.f32.mrf.mxu0 }
 0xee6   : > { %v14557_v50 = vpop.f32.mrf.mxu1  ;;  %v14559_v52 = vpop.f32.mrf.mxu0 }
 0xee7   : > { %16013 = vst [vmem:[#allocation27_spill] sm:$0xff] %v14557_v50  ;;  %16014 = vst [vmem:[#allocation28_spill] sm:$0xff] %v14559_v52  ;;  %v8688_v52 = vadd.f32 %v8675_v51, %v8582_v17  ;;  %v8464_v50 = vadd.f32 %v8463_v43, %v14549_v59 }
 0xee8   : > { %v8857_v23 = vpop.f32.mrf.mxu0  ;;  %v14561_v53 = vpop.f32.mrf.mxu1 }
 0xee9   : > { %16015 = vst [vmem:[#allocation30_spill] sm:$0xff] %v14561_v53  ;;  %v8476_v53 = vadd.f32 %v8475_v37, %v8406_v8  ;;  %v8770_v36 = vadd.f32 %v8757_v46, %v8688_v52  ;;  %v8579_v27 = vadd.f32 %v16019_v44, %v8464_v50  ;;  %v16020_v50 = vld [vmem:[#allocation29_spill] sm:$0xff] }
 0xeea   : > { %v8859_v63 = vpop.f32.mrf.mxu0  ;;  %v14563_v11 = vpop.f32.mrf.mxu1 }
 0xeeb   : > { %16016 = vst [vmem:[#allocation31_spill] sm:$0xff] %v14563_v11  ;;  %v8580_v11 = vadd.f32 %v8563_v13, %v8466_v9  ;;  %v8584_v45 = vadd.f32 %v8573_v4, %v8476_v53 }
 0xeec   : > { %v8863_v31 = vpop.f32.mrf.mxu0  ;;  %v8963_v38 = vpop.f32.mrf.mxu1 }
 0xeed   : > { %v8686_v35 = vadd.f32 %v8669_v10, %v8580_v11  ;;  %v8690_v59 = vadd.f32 %v8679_v62, %v8584_v45  ;;  %v8876_v18 = vadd.f32 %v8863_v31, %v8770_v36 }
 0xeee   : > { %v8865_v61 = vpop.f32.mrf.mxu0  ;;  %v8965_v29 = vpop.f32.mrf.mxu1  ;;  %v16021_v4 = vld [vmem:[#allocation27_spill] sm:$0xff]  ;;  %v16022_v10 = vld [vmem:[#allocation28_spill] sm:$0xff] }
 0xeef   : > { %v8768_v13 = vadd.f32 %v8751_v5, %v8686_v35  ;;  %v8772_v11 = vadd.f32 %v8761_v1, %v8690_v59  ;;  %v8877_v58 = vadd.f32 %v8865_v61, %v8771_v12 }
 0xef0   : > { %v8867_v41 = vpop.f32.mrf.mxu0  ;;  %v8969_v42 = vpop.f32.mrf.mxu1 }
 0xef1   : > { %v8874_v52 = vadd.f32 %v8857_v23, %v8768_v13  ;;  %v9211_v13 = vpop.permute.xlu1 %9210 }
 0xef2   : > { %v14565_v20 = vpop.f32.mrf.mxu0  ;;  %v8971_v21 = vpop.f32.mrf.mxu1  ;;  %v16025_v46 = vld [vmem:[#allocation31_spill] sm:$0xff] }
 0xef3   : > { %16017 = vst [vmem:[#allocation32_spill] sm:$0xff] %v14565_v20  ;;  %v8581_v20 = vadd.f32 %v8565_v3, %v8468_v30  ;;  %v8685_v30 = vadd.f32 %v8667_v16, %v8579_v27  ;;  %v8982_v3 = vadd.f32 %v8969_v42, %v8876_v18  ;;  %v8980_v34 = vadd.f32 %v8963_v38, %v8874_v52 }
 0xef4   : > { %v8973_v15 = vpop.f32.mrf.mxu1  ;;  %v14567_v25 = vpop.f32.mrf.mxu0  ;;  %v8983_v23 = vadd.f32 %v8971_v21, %v8877_v58 }
 0xef5   : > { %16018 = vst [vmem:[#allocation33_spill] sm:$0xff] %v14567_v25  ;;  %v8478_v25 = vadd.f32 %v8477_v40, %v14551_v57  ;;  %v8687_v0 = vadd.f32 %v8671_v14, %v8581_v20  ;;  %v8767_v37 = vadd.f32 %v16020_v50, %v8685_v30  ;;  %v8872_v20 = vadd.f32 %v8853_v47, %v8766_v24  ;;  %v16023_v14 = vld [vmem:[#allocation30_spill] sm:$0xff]  ;;  %v9206_v30 = vpop.permute.xlu0 %9205 }
 0xef6   : > { %v8975_v7 = vpop.f32.mrf.mxu1  ;;  %v14569_v49 = vpop.f32.mrf.mxu0 }
 0xef7   : > { %v8585_v17 = vadd.f32 %v8575_v22, %v8478_v25  ;;  %v8769_v43 = vadd.f32 %v8753_v33, %v8687_v0  ;;  %v8878_v22 = vadd.f32 %v8867_v41, %v8772_v11  ;;  %v8873_v48 = vadd.f32 %v16022_v10, %v8767_v37 }
 0xef8   : > { %v9069_v60 = vpop.f32.mrf.mxu0  ;;  %v9171_v28 = vpop.f32.mrf.mxu1  ;;  %v8978_v56 = vadd.f32 %v16023_v14, %v8872_v20 }
 0xef9   : > { %v8691_v53 = vadd.f32 %v8681_v2, %v8585_v17  ;;  %v8875_v6 = vadd.f32 %v8859_v63, %v8769_v43  ;;  %v8984_v61 = vadd.f32 %v8973_v15, %v8878_v22  ;;  %v9086_v33 = vadd.f32 %v9069_v60, %v8980_v34 }
 0xefa   : > { %v9071_v9 = vpop.f32.mrf.mxu0  ;;  %v9173_v8 = vpop.f32.mrf.mxu1  ;;  %v16024_v47 = vld [vmem:[#allocation32_spill] sm:$0xff]  ;;  %v8979_v2 = vadd.f32 %v16025_v46, %v8873_v48 }
 0xefb   : > { %v8773_v31 = vadd.f32 %v16021_v4, %v8691_v53  ;;  %v8981_v51 = vadd.f32 %v8965_v29, %v8875_v6  ;;  %v11195_v4 = vld [vmem:[%s14918_s3 + $0x158] sm:$0xff] }
 0xefc   : > { %v9075_v54 = vpop.f32.mrf.mxu0  ;;  %v9175_v57 = vpop.f32.mrf.mxu1  ;;  %v16026_v32 = vld [vmem:[#allocation33_spill] sm:$0xff]  ;;  %v9085_v21 = vadd.f32 %v14569_v49, %v8979_v2 }
 0xefd   : > { %v9088_v16 = vadd.f32 %v9075_v54, %v8982_v3  ;;  %v8879_v63 = vadd.f32 %v16024_v47, %v8773_v31  ;;  %v9084_v38 = vadd.f32 %v16026_v32, %v8978_v56  ;;  %v9087_v36 = vadd.f32 %v9071_v9, %v8981_v51  ;;  %v11194_v31 = vld [vmem:[%s14918_s3 + $0x150] sm:$0xff]  ;;  %v16030_v56 = vld [vmem:[#allocation11_spill] sm:$0xff] }
 0xefe   : > { %v9077_v40 = vpop.f32.mrf.mxu0  ;;  %v9177_v25 = vpop.f32.mrf.mxu1  ;;  %v9192_v44 = vadd.f32 %v9175_v57, %v9086_v33  ;;  %v9191_v59 = vadd.f32 %v9173_v8, %v9085_v21  ;;  %vm16031_vm9 = vnez %v16030_v56 }
 0xeff   : > { %v9089_v41 = vadd.f32 %v9077_v40, %v8983_v23  ;;  %v8985_v35 = vadd.f32 %v8975_v7, %v8879_v63  ;;  %v9190_v27 = vadd.f32 %v9171_v28, %v9084_v38  ;;  %v9193_v26 = vadd.f32 %v9177_v25, %v9087_v36  ;;  %v11193_v25 = vld [vmem:[%s14918_s3 + $0x148] sm:$0xff]  ;;  %v11390_v63 = vld [vmem:[%s14917_s2 + $0x520] sm:$0xff]   ;;  %v11399_v38 = vld [vmem:[%s14917_s2 + $0x558] sm:$0xff]  }
 0xf00   : > { %v9079_v42 = vpop.f32.mrf.mxu0  ;;  %v9181_v5 = vpop.f32.mrf.mxu1  ;;  %v9225_v24 = vadd.f32 %v9211_v13, %v9192_v44  ;;  %v9224_v28 = vadd.f32 %v9206_v30, %v9191_v59 }
 0xf01   : > { %v9194_v62 = vadd.f32 %v9181_v5, %v9088_v16  ;;  %v9090_v29 = vadd.f32 %v9079_v42, %v8984_v61  ;;  %v9223_v9 = vadd.f32 %v9206_v30, %v9190_v27  ;;  %v9226_v54 = vadd.f32 %v9211_v13, %v9193_v26 }
 0xf02   : > { %v9081_v1 = vpop.f32.mrf.mxu0  ;;  %v9183_v45 = vpop.f32.mrf.mxu1  ;;  %v9233_v11 = vmax.f32 %v9225_v24, 0.0  ;;  %v9232_v6 = vmax.f32 %v9224_v28, 0.0  ;;  %v11394_v28 = vld [vmem:[%s14917_s2 + $0x518] sm:$0xff]  }
 0xf03   : > { %v9195_v55 = vadd.f32 %v9183_v45, %v9089_v41  ;;  %v9227_v15 = vadd.f32 %v9216_v39, %v9194_v62  ;;  %v9091_v60 = vadd.f32 %v9081_v1, %v8985_v35  ;;  %v9231_v37 = vmax.f32 %v9223_v9, 0.0  ;;  %v11391_v35 = vld [vmem:[%s14917_s2 + $0x528] sm:$0xff]  }
 0xf04   : > { %v9185_v0 = vpop.f32.mrf.mxu1  ;;  %v9234_v20 = vmax.f32 %v9226_v54, 0.0  ;;  %v16035_v62 = vmov 0   ;;  %v16053_v54 = vld [vmem:[#allocation16_spill] sm:$0xff] }
 0xf05   : > { %v9196_v17 = vadd.f32 %v9185_v0, %v9090_v29  ;;  %v9228_v43 = vadd.f32 %v9216_v39, %v9195_v55  ;;  %v9235_v57 = vmax.f32 %v9227_v15, 0.0  ;;  %v14588_v58 = vpack.c.bf16 %v9233_v11, %v9231_v37  ;;  %v16046_v15 = vld [vmem:[#allocation15_spill] sm:$0xff]  ;;  %v11401_v0 = vld [vmem:[%s14917_s2 + $0x570] sm:$0xff]  }
 0xf06   : > { %v9187_v18 = vpop.f32.mrf.mxu1  ;;  %v14592_v40 = vpack.c.bf16 %v9234_v20, %v9232_v6 }
 0xf07   : > { %v9229_v12 = vadd.f32 %v9221_v19, %v9196_v17  ;;  %v9197_v7 = vadd.f32 %v9187_v18, %v9091_v60  ;;  %v9236_v52 = vmax.f32 %v9228_v43, 0.0  ;;  %v11392_v17 = vld [vmem:[%s14917_s2 + $0x510] sm:$0xff]  }
 0xf08   : > { %v11393_v43 = vld [vmem:[%s14917_s2 + $0x530] sm:$0xff]  }
 0xf09   : > { %v9237_v53 = vmax.f32 %v9229_v12, 0.0  ;;  %v9230_v49 = vadd.f32 %v9221_v19, %v9197_v7  ;;  %v11192_v19 = vld [vmem:[%s14918_s3 + $0x140] sm:$0xff] }
 0xf0b   : > { %v14582_v3 = vpack.c.bf16 %v9237_v53, %v9235_v57  ;;  %v9238_v50 = vmax.f32 %v9230_v49, 0.0  ;;  %v16056_v53 = vld [vmem:[#allocation17_spill] sm:$0xff] }
 0xf0d   : > { %v14584_v8 = vpack.c.bf16 %v9238_v50, %v9236_v52  ;;  %9282 = vrot.lane.b32.xlu1 %v14582_v3, %s11418_s7 }
 0xf0f   : > { %9278 = vrot.lane.b32.xlu0 %v14584_v8, %s11418_s7 }
 0xf11   : > { %9280 = vrot.lane.b32.xlu1 %v14588_v58, %s11418_s7 }
 0xf13   : > { %9276 = vrot.lane.b32.xlu0 %v14592_v40, %s11418_s7 }
 0xf15   : > { %9253 = vrot.lane.b32.xlu1 %v14582_v3, %s11419_s8 }
 0xf17   : > { %9245 = vrot.lane.b32.xlu0 %v14592_v40, %s11419_s8 }
 0xf19   : > { %9449 = vrot.lane.b32.xlu1 %v14582_v3, %s11420_s9 }
 0xf1b   : > { %9247 = vrot.lane.b32.xlu0 %v14584_v8, %s11419_s8 }
 0xf1d   : > { %9251 = vrot.lane.b32.xlu1 %v14588_v58, %s11419_s8 }
 0xf1f   : > { %9445 = vrot.lane.b32.xlu0 %v14584_v8, %s11420_s9 }
 0xf21   : > { %9447 = vrot.lane.b32.xlu1 %v14588_v58, %s11420_s9 }
 0xf23   : > { %9443 = vrot.lane.b32.xlu0 %v14592_v40, %s11420_s9 }
 0xf25   : > { %9555 = vrot.lane.b32.xlu1 %v14582_v3, %s11421_s10 }
 0xf27   : > { %9551 = vrot.lane.b32.xlu0 %v14584_v8, %s11421_s10 }
 0xf29   : > { %9553 = vrot.lane.b32.xlu1 %v14588_v58, %s11421_s10 }
 0xf2b   : > { %9549 = vrot.lane.b32.xlu0 %v14592_v40, %s11421_s10 }
 0xf2d   : > { %9739 = vrot.lane.b32.xlu1 %v14592_v40, %s11422_s11 }
 0xf2f   : > { %9741 = vrot.lane.b32.xlu0 %v14582_v3, %s11422_s11 }
 0xf31   : > { %9743 = vrot.lane.b32.xlu1 %v14584_v8, %s11422_s11 }
 0xf33   : > { %9847 = vrot.lane.b32.xlu0 %v14582_v3, %s11423_s12 }
 0xf35   : > { %9849 = vrot.lane.b32.xlu1 %v14584_v8, %s11423_s12 }
 0xf37   : > { %9737 = vrot.lane.b32.xlu0 %v14588_v58, %s11422_s11 }
 0xf39   : > { %9845 = vrot.lane.b32.xlu1 %v14592_v40, %s11423_s12 }
 0xf3b   : > { %9843 = vrot.lane.b32.xlu0 %v14588_v58, %s11423_s12 }
 0xf3d   : > { %9951 = vrot.lane.b32.xlu1 %v14592_v40, %s11424_s13 }
 0xf3f   : > { %9953 = vrot.lane.b32.xlu0 %v14582_v3, %s11424_s13 }
 0xf41   : > { %9955 = vrot.lane.b32.xlu1 %v14584_v8, %s11424_s13 }
 0xf43   : > { %10059 = vrot.lane.b32.xlu0 %v14582_v3, %s11425_s14 }
 0xf45   : > { %10061 = vrot.lane.b32.xlu1 %v14584_v8, %s11425_s14 }
 0xf47   : > { %9949 = vrot.lane.b32.xlu0 %v14588_v58, %s11424_s13 }
 0xf49   : > { %10057 = vrot.lane.b32.xlu1 %v14592_v40, %s11425_s14 }
 0xf4b   : > { %10055 = vrot.lane.b32.xlu0 %v14588_v58, %s11425_s14 }
 0xf4d   : > { %10181 = vperm.xlu1 %11222, %v11193_v25  }
 0xf4f   : > { %10176 = vperm.xlu0 %11221, %v11192_v19  }
 0xf51   : > { %10191 = vperm.xlu1 %11222, %v11195_v4  }
 0xf53   : > { %10186 = vperm.xlu0 %11221, %v11194_v31  }
 0xf7f   : > { %v9283_v34 = vpop.permute.xlu1 %9282 }
 0xf81   : > { %v9279_v22 = vpop.permute.xlu0 %9278 }
 0xf82   : > { %v9285_v16 = vsel %vm16027_vm2, %v9283_v34, %v9279_v22  ;;  %v9294_v10 = vsel %vm16028_vm0, %v9279_v22, %v9283_v34  ;;  %vm16034_vm2 = vcmask 261120   ;;  %vm16036_vm0 = vcmask 138240  }
 0xf83   : > { %v9298_v14 = vsel %vm15951_vm12, %v9294_v10, 0  ;;  %11114 = vmatprep.subr.msk.bf16.mxu0 %vm16031_vm9, %v9285_v16  ;;  %v9281_v51 = vpop.permute.xlu1 %9280  ;;  %v11397_v16 = vld [vmem:[%s14917_s2 + $0x550] sm:$0xff]  }
 0xf84   : > { %9334 = vmatpush1.bf16.msra.mxu0 %v9298_v14 }
 0xf85   : > { %v9277_v23 = vpop.permute.xlu0 %9276 }
 0xf86   : > { %v9284_v42 = vsel %vm16032_vm14, %v9281_v51, %v9277_v23  ;;  %v9290_v5 = vsel %vm16033_vm11, %v9277_v23, %v9281_v51  ;;  %vm16037_vm14 = vmmov %vm16036_vm0  ;;  %vm16042_vm11 = vcmask 121856   ;;  %v16070_v23 = vld [vmem:[#allocation20_spill] sm:$0xff] }
 0xf87   : > { %v9296_v39 = vsel %vm15951_vm12, %v9290_v5, 0  ;;  %11115 = vmatprep.subr.msk.bf16.mxu0 %vm16031_vm9, %v9284_v42  ;;  %v9254_v47 = vpop.permute.xlu1 %9253  ;;  %vm16040_vm12 = vmmov %vm16036_vm0 }
 0xf88   : > { %9336 = vmatpush1.bf16.msra.mxu0 %v9296_v39  ;;  %vm16041_vm9 = vmmov %vm16036_vm0 }
 0xf89   : > { %v9246_v61 = vpop.permute.xlu0 %9245 }
 0xf8b   : > { %11116 = vmatmul.mubr.msk.bf16.vlgmr.msra.gmra.mxu0 %vm16034_vm2, %v11390_v63  ;;  %v9450_v33 = vpop.permute.xlu1 %9449  ;;  %vm16043_vm2 = vmmov %vm16042_vm11  ;;  %v11398_v63 = vld [vmem:[%s14917_s2 + $0x548] sm:$0xff]  }
 0xf8c   : > { %9363 = vmatprep.mubr.bf16.mxu0 %v16035_v62 }
 0xf8d   : > { %v9248_v46 = vpop.permute.xlu0 %9247 }
 0xf8e   : > { %v9256_v2 = vsel %vm16036_vm0, %v9254_v47, %v9248_v46  ;;  %v9265_v32 = vsel %vm16037_vm14, %v9248_v46, %v9254_v47  ;;  %vm16045_vm0 = vcmask 261120   ;;  %vm16047_vm14 = vnez %v16046_v15 }
 0xf8f   : > { %v9269_v41 = vsel %vm11685_vm3, %v9265_v32, 0  ;;  %11120 = vmatprep.subr.msk.bf16.mxu1 %vm11689_vm5, %v9256_v2  ;;  %v9252_v45 = vpop.permute.xlu1 %9251 }
 0xf90   : > { %v9255_v36 = vsel %vm16040_vm12, %v9252_v45, %v9246_v61  ;;  %v9261_v44 = vsel %vm16041_vm9, %v9246_v61, %v9252_v45  ;;  %9403 = vmatpush1.bf16.msra.mxu1 %v9269_v41  ;;  %vm16050_vm12 = vmmov %vm16045_vm0  ;;  %vm16051_vm9 = vcmask 7168   ;;  %v11400_v45 = vld [vmem:[%s14917_s2 + $0x560] sm:$0xff]  }
 0xf91   : > { %v9446_v29 = vpop.permute.xlu0 %9445  ;;  %11121 = vmatprep.subr.msk.bf16.mxu1 %vm11689_vm5, %v9255_v36  ;;  %v9267_v55 = vsel %vm11685_vm3, %v9261_v44, 0  ;;  %vm16048_vm5 = vmmov %vm16043_vm2 }
 0xf92   : > { %v9452_v21 = vsel %vm16042_vm11, %v9450_v33, %v9446_v29  ;;  %v9461_v27 = vsel %vm16043_vm2, %v9446_v29, %v9450_v33  ;;  %vm16049_vm3 = vmmov %vm16043_vm2 }
 0xf93   : > { %v9465_v26 = vsel %vm15873_vm1, %v9461_v27, 0  ;;  %11117 = vmatmul.mubr.msk.bf16.gmra.mxu0 %vm16045_vm0, %v11391_v35  ;;  %11130 = vmatprep.subr.msk.bf16.mxu0 %vm16047_vm14, %v9452_v21  ;;  %v9448_v60 = vpop.permute.xlu1 %9447  ;;  %vm16052_vm11 = vmmov %vm16051_vm9 }
 0xf94   : > { %9405 = vmatpush1.bf16.msra.mxu1 %v9267_v55  ;;  %9501 = vmatpush1.bf16.msra.mxu0 %v9465_v26  ;;  %vm16055_vm2 = vmmov %vm16045_vm0  ;;  %vm16057_vm0 = vnez %v16056_v53  ;;  %v11403_v53 = vld [vmem:[%s14917_s2 + $0x578] sm:$0xff]  }
 0xf95   : > { %v9444_v13 = vpop.permute.xlu0 %9443  ;;  %9520 = vmatprep.mubr.bf16.mxu0 %v16035_v62 }
 0xf96   : > { %v9451_v59 = vsel %vm16048_vm5, %v9448_v60, %v9444_v13  ;;  %v9457_v18 = vsel %vm16049_vm3, %v9444_v13, %v9448_v60  ;;  %vm16059_vm5 = vmmov %vm16051_vm9 }
 0xf97   : > { %v9463_v30 = vsel %vm15873_vm1, %v9457_v18, 0  ;;  %11122 = vmatmul.mubr.msk.bf16.vlgmr.msra.gmra.mxu1 %vm16050_vm12, %v11392_v17  ;;  %11131 = vmatprep.subr.msk.bf16.mxu0 %vm16047_vm14, %v9451_v59  ;;  %v9556_v24 = vpop.permute.xlu1 %9555  ;;  %vm16054_vm1 = vnez %v16053_v54  ;;  %vm16058_vm14 = vmmov %vm16051_vm9 }
 0xf98   : > { %9503 = vmatpush1.bf16.msra.mxu0 %v9463_v30  ;;  %9432 = vmatprep.mubr.bf16.mxu1 %v16035_v62  ;;  %vm16060_vm3 = vmmov %vm16055_vm2 }
 0xf99   : > { %v9552_v12 = vpop.permute.xlu0 %9551  ;;  %9688 = vmatprep.subr.bf16.mxu0 %v14584_v8  ;;  %vm16061_vm12 = vmmov %vm16055_vm2 }
 0xf9a   : > { %v9558_v7 = vsel %vm16051_vm9, %v9556_v24, %v9552_v12  ;;  %v9567_v9 = vsel %vm16052_vm11, %v9552_v12, %v9556_v24  ;;  %vm16062_vm9 = vcmask 1039360  }
 0xf9b   : > { %v9571_v57 = vsel %vm16054_vm1, %v9567_v9, 0  ;;  %11132 = vmatmul.mubr.msk.bf16.vlgmr.msra.gmra.mxu0 %vm16055_vm2, %v11393_v43  ;;  %11140 = vmatprep.subr.msk.bf16.mxu1 %vm16057_vm0, %v9558_v7  ;;  %v9554_v49 = vpop.permute.xlu1 %9553  ;;  %vm16063_vm11 = vmmov %vm16062_vm9  ;;  %v11402_v43 = vld [vmem:[%s14917_s2 + $0x568] sm:$0xff]  }
 0xf9c   : > { %9607 = vmatpush1.bf16.msra.mxu1 %v9571_v57  ;;  %9689 = vmatpush1.bf16.msra.mxu0 %v14582_v3  ;;  %v11395_v3 = vld [vmem:[%s14917_s2 + $0x538] sm:$0xff]  }
 0xf9d   : > { %v9550_v11 = vpop.permute.xlu0 %9549  ;;  %9690 = vmatprep.subr.bf16.mxu0 %v14592_v40  ;;  %9530 = vmatprep.mubr.bf16.mxu0 %v16035_v62  ;;  %v11396_v40 = vld [vmem:[%s14917_s2 + $0x540] sm:$0xff]  }
 0xf9e   : > { %v9557_v52 = vsel %vm16058_vm14, %v9554_v49, %v9550_v11  ;;  %v9563_v50 = vsel %vm16059_vm5, %v9550_v11, %v9554_v49  ;;  %vm16071_vm14 = vnez %v16070_v23  ;;  %vm16072_vm5 = vmmov %vm16062_vm9  ;;  %v11404_v49 = vld [vmem:[%s14917_s2 + $0x580] sm:$0xff]   ;;  %v11406_v11 = vld [vmem:[%s14917_s2 + $0x588] sm:$0xff]  }
 0xf9f   : > { %v9569_v37 = vsel %vm16054_vm1, %v9563_v50, 0  ;;  %11123 = vmatmul.mubr.msk.bf16.gmra.mxu1 %vm16060_vm3, %v11394_v28  ;;  %11141 = vmatprep.subr.msk.bf16.mxu1 %vm16057_vm0, %v9557_v52  ;;  %v9740_v20 = vpop.permute.xlu1 %9739  ;;  %vm16066_vm1 = vmmov %vm16055_vm2  ;;  %vm16067_vm2 = vcmask 924672   ;;  %v11405_v28 = vld [vmem:[%s14917_s2 + $0x590] sm:$0xff]   ;;  %v11407_v52 = vld [vmem:[%s14917_s2 + $0x598] sm:$0xff]  }
 0xfa0   : > { %9609 = vmatpush1.bf16.msra.mxu1 %v9569_v37  ;;  %9691 = vmatpush1.bf16.msra.mxu0 %v14588_v58  ;;  %vm16068_vm0 = vmmov %vm16067_vm2 }
 0xfa1   : > { %v9742_v8 = vpop.permute.xlu0 %9741  ;;  %9626 = vmatprep.mubr.bf16.mxu1 %v16035_v62  ;;  %vm16073_vm3 = vmmov %vm16072_vm5 }
 0xfa3   : > { %11133 = vmatmul.mubr.msk.bf16.gmra.mxu0 %vm16061_vm12, %v11395_v3  ;;  %v9744_v6 = vpop.permute.xlu1 %9743  ;;  %vm16074_vm12 = vmmov %vm16066_vm1 }
 0xfa4   : > { %v9746_v25 = vsel %vm16062_vm9, %v9742_v8, %v9744_v6  ;;  %v9755_v19 = vsel %vm16063_vm11, %v9744_v6, %v9742_v8  ;;  %9708 = vmatprep.mubr.bf16.mxu0 %v16035_v62  ;;  %vm16075_vm9 = vmmov %vm16068_vm0 }
 0xfa5   : > { %v9759_v31 = vsel %vm11817_vm6, %v9746_v25, 0  ;;  %v9848_v58 = vpop.permute.xlu0 %9847  ;;  %11158 = vmatprep.subr.msk.bf16.mxu1 %vm11803_vm8, %v9755_v19  ;;  %vm16076_vm11 = vmmov %vm16068_vm0 }
 0xfa7   : > { %11142 = vmatmul.mubr.msk.bf16.vlgmr.msra.gmra.mxu1 %vm16066_vm1, %v11396_v40  ;;  %v9850_v22 = vpop.permute.xlu1 %9849 }
 0xfa8   : > { %9795 = vmatpush1.bf16.msra.mxu1 %v9759_v31  ;;  %v9852_v10 = vsel %vm16067_vm2, %v9848_v58, %v9850_v22  ;;  %v9861_v48 = vsel %vm16068_vm0, %v9850_v22, %v9848_v58  ;;  %9636 = vmatprep.mubr.bf16.mxu1 %v16035_v62  ;;  %vm16084_vm0 = vcmask 908288  }
 0xfa9   : > { %v9865_v56 = vsel %vm15812_vm15, %v9852_v10, 0  ;;  %v9738_v51 = vpop.permute.xlu0 %9737  ;;  %11168 = vmatprep.subr.msk.bf16.mxu0 %vm16071_vm14, %v9861_v48 }
 0xfaa   : > { %v9745_v42 = vsel %vm16072_vm5, %v9738_v51, %v9740_v20  ;;  %v9751_v5 = vsel %vm16073_vm3, %v9740_v20, %v9738_v51 }
 0xfab   : > { %v9757_v39 = vsel %vm11817_vm6, %v9745_v42, 0  ;;  %11150 = vmatmul.mubr.msk.bf16.vlgmr.msra.gmra.mxu0 %vm16074_vm12, %v11397_v16  ;;  %11159 = vmatprep.subr.msk.bf16.mxu1 %vm11803_vm8, %v9751_v5  ;;  %v9846_v47 = vpop.permute.xlu1 %9845  ;;  %vm16077_vm6 = vmmov %vm16066_vm1 }
 0xfac   : > { %9901 = vmatpush1.bf16.msra.mxu0 %v9865_v56  ;;  %9797 = vmatpush1.bf16.msra.mxu1 %v9757_v39  ;;  %vm16078_vm8 = vmmov %vm16066_vm1 }
 0xfad   : > { %v9844_v61 = vpop.permute.xlu0 %9843  ;;  %9718 = vmatprep.mubr.bf16.mxu0 %v16035_v62  ;;  %vm16083_vm2 = vmmov %vm16077_vm6 }
 0xfae   : > { %v9851_v33 = vsel %vm16075_vm9, %v9844_v61, %v9846_v47  ;;  %v9857_v46 = vsel %vm16076_vm11, %v9846_v47, %v9844_v61  ;;  %vm16090_vm12 = vmmov %vm16083_vm2 }
 0xfaf   : > { %v9863_v2 = vsel %vm15812_vm15, %v9851_v33, 0  ;;  %11143 = vmatmul.mubr.msk.bf16.gmra.mxu1 %vm16077_vm6, %v11398_v63  ;;  %11169 = vmatprep.subr.msk.bf16.mxu0 %vm16071_vm14, %v9857_v46  ;;  %v9952_v32 = vpop.permute.xlu1 %9951  ;;  %vm16079_vm15 = vcmask 916480   ;;  %vm16085_vm14 = vmmov %vm16084_vm0 }
 0xfb0   : > { %9903 = vmatpush1.bf16.msra.mxu0 %v9863_v2  ;;  %9814 = vmatprep.mubr.bf16.mxu1 %v16035_v62  ;;  %vm16080_vm1 = vmmov %vm16079_vm15 }
 0xfb1   : > { %v9954_v41 = vpop.permute.xlu0 %9953  ;;  %vm16088_vm5 = vmmov %vm16080_vm1 }
 0xfb2   : > { %vm16089_vm3 = vmmov %vm16080_vm1 }
 0xfb3   : > { %11151 = vmatmul.mubr.msk.bf16.gmra.mxu0 %vm16078_vm8, %v11399_v38  ;;  %v9956_v1 = vpop.permute.xlu1 %9955  ;;  %vm16091_vm9 = vmmov %vm16084_vm0 }
 0xfb4   : > { %v9958_v35 = vsel %vm16079_vm15, %v9954_v41, %v9956_v1  ;;  %v9967_v36 = vsel %vm16080_vm1, %v9956_v1, %v9954_v41  ;;  %9920 = vmatprep.mubr.bf16.mxu0 %v16035_v62  ;;  %vm16092_vm11 = vmmov %vm16084_vm0 }
 0xfb5   : > { %v9971_v29 = vsel %vm11898_vm7, %v9958_v35, 0  ;;  %v10060_v21 = vpop.permute.xlu0 %10059  ;;  %11178 = vmatprep.subr.msk.bf16.mxu1 %vm11884_vm4, %v9967_v36  ;;  %vm16097_vm6 = vmmov %vm16083_vm2 }
 0xfb6   : > { %vm16098_vm8 = vmmov %vm16083_vm2 }
 0xfb7   : > { %11160 = vmatmul.mubr.msk.bf16.vlgmr.msra.gmra.mxu1 %vm16083_vm2, %v11400_v45  ;;  %v10062_v55 = vpop.permute.xlu1 %10061 }
 0xfb8   : > { %10007 = vmatpush1.bf16.msra.mxu1 %v9971_v29  ;;  %v10064_v26 = vsel %vm16084_vm0, %v10060_v21, %v10062_v55  ;;  %v10073_v15 = vsel %vm16085_vm14, %v10062_v55, %v10060_v21  ;;  %9824 = vmatprep.mubr.bf16.mxu1 %v16035_v62 }
 0xfb9   : > { %v10077_v17 = vsel %vm15729_vm10, %v10064_v26, 0  ;;  %v9950_v13 = vpop.permute.xlu0 %9949  ;;  %11188 = vmatprep.subr.msk.bf16.mxu0 %vm16002_vm13, %v10073_v15 }
 0xfba   : > { %v9957_v18 = vsel %vm16088_vm5, %v9950_v13, %v9952_v32  ;;  %v9963_v30 = vsel %vm16089_vm3, %v9952_v32, %v9950_v13 }
 0xfbb   : > { %v9969_v24 = vsel %vm11898_vm7, %v9957_v18, 0  ;;  %11170 = vmatmul.mubr.msk.bf16.vlgmr.msra.gmra.mxu0 %vm16090_vm12, %v11401_v0  ;;  %11179 = vmatprep.subr.msk.bf16.mxu1 %vm11884_vm4, %v9963_v30  ;;  %v10058_v12 = vpop.permute.xlu1 %10057  ;;  %vm16093_vm7 = vmmov %vm16083_vm2 }
 0xfbc   : > { %10113 = vmatpush1.bf16.msra.mxu0 %v10077_v17  ;;  %10009 = vmatpush1.bf16.msra.mxu1 %v9969_v24  ;;  %vm16094_vm4 = vmmov %vm16083_vm2 }
 0xfbd   : > { %v10056_v7 = vpop.permute.xlu0 %10055  ;;  %9930 = vmatprep.mubr.bf16.mxu0 %v16035_v62 }
 0xfbe   : > { %v10063_v9 = vsel %vm16091_vm9, %v10056_v7, %v10058_v12  ;;  %v10069_v54 = vsel %vm16092_vm11, %v10058_v12, %v10056_v7 }
 0xfbf   : > { %v10075_v57 = vsel %vm15729_vm10, %v10063_v9, 0  ;;  %11161 = vmatmul.mubr.msk.bf16.gmra.mxu1 %vm16093_vm7, %v11402_v43  ;;  %11189 = vmatprep.subr.msk.bf16.mxu0 %vm16002_vm13, %v10069_v54  ;;  %vm16095_vm10 = vmmov %vm16083_vm2 }
 0xfc0   : > { %10115 = vmatpush1.bf16.msra.mxu0 %v10075_v57  ;;  %10026 = vmatprep.mubr.bf16.mxu1 %v16035_v62  ;;  %vm16096_vm13 = vmmov %vm16083_vm2 }
 0xfc3   : > { %11171 = vmatmul.mubr.msk.bf16.gmra.mxu0 %vm16094_vm4, %v11403_v53 }
 0xfc4   : > { %10132 = vmatprep.mubr.bf16.mxu0 %v16035_v62 }
 0xfc7   : > { %11180 = vmatmul.mubr.msk.bf16.vlgmr.msra.gmra.mxu1 %vm16095_vm10, %v11404_v49 }
 0xfc8   : > { %10036 = vmatprep.mubr.bf16.mxu1 %v16035_v62 }
 0xfcb   : > { %11190 = vmatmul.mubr.msk.bf16.vlgmr.msra.gmra.mxu0 %vm16096_vm13, %v11405_v28 }
 0xfcc   : > { %10142 = vmatprep.mubr.bf16.mxu0 %v16035_v62 }
 0xfcf   : > { %11181 = vmatmul.mubr.msk.bf16.gmra.mxu1 %vm16097_vm6, %v11406_v11 }
 0xfd3   : > { %11191 = vmatmul.mubr.msk.bf16.gmra.mxu0 %vm16098_vm8, %v11407_v52 }
0x104b   : > { %v9355_v50 = vpop.f32.mrf.mxu0 }
0x104d   : > { %v9357_v37 = vpop.f32.mrf.mxu0 }
0x104f   : > { %v9359_v20 = vpop.f32.mrf.mxu0 }
0x1051   : > { %v9361_v3 = vpop.f32.mrf.mxu0 }
0x1053   : > { %v9365_v8 = vpop.f32.mrf.mxu0 }
0x1055   : > { %v14854_v6 = vpop.f32.mrf.mxu0 }
0x1057   : > { %v14856_v40 = vpop.f32.mrf.mxu0  ;;  %v9424_v25 = vpop.f32.mrf.mxu1 }
0x1058   : > { %v9425_v60 = vadd.f32 %v9424_v25, %v9355_v50 }
0x1059   : > { %v14858_v19 = vpop.f32.mrf.mxu0  ;;  %v9426_v62 = vpop.f32.mrf.mxu1 }
0x105a   : > { %v9427_v59 = vadd.f32 %v9426_v62, %v9357_v37 }
0x105b   : > { %v9428_v4 = vpop.f32.mrf.mxu1  ;;  %v9522_v31 = vpop.f32.mrf.mxu0 }
0x105c   : > { %v9541_v18 = vadd.f32 %v9522_v31, %v9425_v60  ;;  %v9429_v43 = vadd.f32 %v9428_v4, %v9359_v20 }
0x105d   : > { %v9430_v58 = vpop.f32.mrf.mxu1  ;;  %v9524_v34 = vpop.f32.mrf.mxu0 }
0x105e   : > { %v9542_v12 = vadd.f32 %v9524_v34, %v9427_v59  ;;  %v9431_v57 = vadd.f32 %v9430_v58, %v9361_v3 }
0x105f   : > { %v9434_v22 = vpop.f32.mrf.mxu1  ;;  %v9526_v16 = vpop.f32.mrf.mxu0 }
0x1060   : > { %v9543_v53 = vadd.f32 %v9526_v16, %v9429_v43  ;;  %v9435_v11 = vadd.f32 %v9434_v22, %v9365_v8 }
0x1061   : > { %v9436_v10 = vpop.f32.mrf.mxu1  ;;  %v9528_v48 = vpop.f32.mrf.mxu0 }
0x1062   : > { %v9544_v25 = vadd.f32 %v9528_v48, %v9431_v57  ;;  %v9437_v31 = vadd.f32 %v9436_v10, %v14854_v6 }
0x1063   : > { %v9438_v14 = vpop.f32.mrf.mxu1  ;;  %v9532_v56 = vpop.f32.mrf.mxu0 }
0x1064   : > { %v9545_v20 = vadd.f32 %v9532_v56, %v9435_v11  ;;  %v9439_v58 = vadd.f32 %v9438_v14, %v14856_v40 }
0x1065   : > { %v14860_v51 = vpop.f32.mrf.mxu1  ;;  %v9534_v23 = vpop.f32.mrf.mxu0 }
0x1066   : > { %v9546_v8 = vadd.f32 %v9534_v23, %v9437_v31  ;;  %v9441_v6 = vadd.f32 %v14860_v51, %v14858_v19  ;;  %v10177_v19 = vpop.permute.xlu0 %10176 }
0x1067   : > { %v14862_v42 = vpop.f32.mrf.mxu0  ;;  %v9628_v5 = vpop.f32.mrf.mxu1 }
0x1068   : > { %v9647_v7 = vadd.f32 %v9628_v5, %v9541_v18  ;;  %v9547_v10 = vadd.f32 %v14862_v42, %v9439_v58 }
0x1069   : > { %v14864_v39 = vpop.f32.mrf.mxu0  ;;  %v9630_v47 = vpop.f32.mrf.mxu1 }
0x106a   : > { %v9648_v49 = vadd.f32 %v9630_v47, %v9542_v12  ;;  %v16101_v12 = vld [vmem:[#allocation9_spill] sm:$0xff] }
0x106b   : > { %v9632_v63 = vpop.f32.mrf.mxu1  ;;  %v9710_v61 = vpop.f32.mrf.mxu0 }
0x106c   : > { %v9729_v28 = vadd.f32 %v9710_v61, %v9647_v7 }
0x106d   : > { %v9634_v33 = vpop.f32.mrf.mxu1  ;;  %v9712_v46 = vpop.f32.mrf.mxu0 }
0x106e   : > { %v9730_v37 = vadd.f32 %v9712_v46, %v9648_v49  ;;  %v9650_v5 = vadd.f32 %v9634_v33, %v9544_v25 }
0x106f   : > { %v9638_v2 = vpop.f32.mrf.mxu1  ;;  %v9714_v32 = vpop.f32.mrf.mxu0 }
0x1070   : > { %v9651_v22 = vadd.f32 %v9638_v2, %v9545_v20  ;;  %v9548_v2 = vadd.f32 %v14864_v39, %v9441_v6 }
0x1071   : > { %v9640_v38 = vpop.f32.mrf.mxu1  ;;  %v9716_v41 = vpop.f32.mrf.mxu0 }
0x1072   : > { %v9732_v48 = vadd.f32 %v9716_v41, %v9650_v5  ;;  %v9652_v56 = vadd.f32 %v9640_v38, %v9546_v8  ;;  %v16100_v38 = vld [vmem:[#allocation3_spill] sm:$0xff] }
0x1073   : > { %v14866_v1 = vpop.f32.mrf.mxu1  ;;  %v9720_v45 = vpop.f32.mrf.mxu0 }
0x1074   : > { %v9733_v33 = vadd.f32 %v9720_v45, %v9651_v22  ;;  %v9653_v41 = vadd.f32 %v14866_v1, %v9547_v10 }
0x1075   : > { %v14868_v35 = vpop.f32.mrf.mxu1  ;;  %v9722_v36 = vpop.f32.mrf.mxu0 }
0x1077   : > { %v14870_v44 = vpop.f32.mrf.mxu0  ;;  %v9816_v29 = vpop.f32.mrf.mxu1 }
0x1078   : > { %v9835_v62 = vadd.f32 %v9816_v29, %v9729_v28  ;;  %v9735_v39 = vadd.f32 %v14870_v44, %v9653_v41 }
0x1079   : > { %v14872_v21 = vpop.f32.mrf.mxu0  ;;  %v9818_v27 = vpop.f32.mrf.mxu1 }
0x107a   : > { %16099 = vst [vmem:[#allocation26_spill] sm:$0xff] %v14872_v21  ;;  %v9649_v21 = vadd.f32 %v9632_v63, %v9543_v53  ;;  %v9836_v59 = vadd.f32 %v9818_v27, %v9730_v37  ;;  %v9734_v27 = vadd.f32 %v9722_v36, %v9652_v56  ;;  %v10182_v37 = vpop.permute.xlu1 %10181 }
0x107b   : > { %v9820_v55 = vpop.f32.mrf.mxu1  ;;  %v9922_v0 = vpop.f32.mrf.mxu0 }
0x107c   : > { %v9731_v60 = vadd.f32 %v9714_v32, %v9649_v21  ;;  %v9941_v3 = vadd.f32 %v9922_v0, %v9835_v62 }
0x107d   : > { %v9822_v26 = vpop.f32.mrf.mxu1  ;;  %v9924_v15 = vpop.f32.mrf.mxu0 }
0x107e   : > { %v9837_v63 = vadd.f32 %v9820_v55, %v9731_v60  ;;  %v9942_v61 = vadd.f32 %v9924_v15, %v9836_v59  ;;  %v9838_v21 = vadd.f32 %v9822_v26, %v9732_v48  ;;  %v9654_v26 = vadd.f32 %v14868_v35, %v9548_v2  ;;  %v10192_v2 = vpop.permute.xlu1 %10191 }
0x107f   : > { %v9826_v17 = vpop.f32.mrf.mxu1  ;;  %v9926_v13 = vpop.f32.mrf.mxu0 }
0x1080   : > { %v9943_v40 = vadd.f32 %v9926_v13, %v9837_v63  ;;  %v9839_v55 = vadd.f32 %v9826_v17, %v9733_v33  ;;  %v16106_v33 = vld [vmem:[#allocation5_spill] sm:$0xff] }
0x1081   : > { %v9828_v30 = vpop.f32.mrf.mxu1  ;;  %v9928_v24 = vpop.f32.mrf.mxu0  ;;  %v16102_v53 = vld [vmem:[#allocation26_spill] sm:$0xff] }
0x1082   : > { %v9944_v51 = vadd.f32 %v9928_v24, %v9838_v21  ;;  %v9840_v1 = vadd.f32 %v9828_v30, %v9734_v27  ;;  %v9736_v49 = vadd.f32 %v16102_v53, %v9654_v26  ;;  %v16108_v27 = vld [vmem:[#allocation8_spill] sm:$0xff] }
0x1083   : > { %v14874_v9 = vpop.f32.mrf.mxu1  ;;  %v9932_v54 = vpop.f32.mrf.mxu0 }
0x1084   : > { %v9945_v36 = vadd.f32 %v9932_v54, %v9839_v55  ;;  %v9841_v28 = vadd.f32 %v14874_v9, %v9735_v39  ;;  %v16103_v54 = vld [vmem:[#allocation6_spill] sm:$0xff] }
0x1085   : > { %v14876_v52 = vpop.f32.mrf.mxu1  ;;  %v9934_v50 = vpop.f32.mrf.mxu0 }
0x1086   : > { %v9946_v11 = vadd.f32 %v9934_v50, %v9840_v1  ;;  %v9842_v20 = vadd.f32 %v14876_v52, %v9736_v49  ;;  %v16104_v50 = vld [vmem:[#allocation7_spill] sm:$0xff] }
0x1087   : > { %v9936_v4 = vpop.f32.mrf.mxu0  ;;  %v10028_v34 = vpop.f32.mrf.mxu1 }
0x1088   : > { %v10047_v46 = vadd.f32 %v10028_v34, %v9941_v3  ;;  %v9947_v34 = vadd.f32 %v9936_v4, %v9841_v28 }
0x1089   : > { %v9938_v16 = vpop.f32.mrf.mxu0  ;;  %v10030_v47 = vpop.f32.mrf.mxu1 }
0x108a   : > { %v10048_v14 = vadd.f32 %v10030_v47, %v9942_v61  ;;  %v9948_v8 = vadd.f32 %v9938_v16, %v9842_v20  ;;  %v16105_v61 = vld [vmem:[#allocation2_spill] sm:$0xff] }
0x108b   : > { %v10032_v32 = vpop.f32.mrf.mxu1  ;;  %v10134_v29 = vpop.f32.mrf.mxu0 }
0x108c   : > { %v10153_v23 = vadd.f32 %v10134_v29, %v10047_v46  ;;  %v10049_v42 = vadd.f32 %v10032_v32, %v9943_v40  ;;  %v10187_v46 = vpop.permute.xlu0 %10186  ;;  %v16107_v40 = vld [vmem:[#allocation4_spill] sm:$0xff] }
0x108d   : > { %v10034_v0 = vpop.f32.mrf.mxu1  ;;  %v10136_v15 = vpop.f32.mrf.mxu0 }
0x108e   : > { %v10161_v45 = vadd.f32 %v10153_v23, %v16100_v38  ;;  %v10154_v18 = vadd.f32 %v10136_v15, %v10048_v14  ;;  %v10050_v24 = vadd.f32 %v10034_v0, %v9944_v51 }
0x108f   : > { %v10038_v17 = vpop.f32.mrf.mxu1  ;;  %v10138_v13 = vpop.f32.mrf.mxu0 }
0x1090   : > { %v10194_v43 = vadd.f32 %v10177_v19, %v10161_v45  ;;  %v10162_v7 = vadd.f32 %v10154_v18, %v16101_v12  ;;  %v10155_v57 = vadd.f32 %v10138_v13, %v10049_v42  ;;  %v10051_v30 = vadd.f32 %v10038_v17, %v9945_v36 }
0x1091   : > { %v10040_v25 = vpop.f32.mrf.mxu1  ;;  %v10140_v35 = vpop.f32.mrf.mxu0 }
0x1092   : > { %10202 = vst [vmem:[%s14890_s27] sm:$0xff] %v10194_v43  ;;  %v10195_v44 = vadd.f32 %v10177_v19, %v10162_v7  ;;  %v10163_v62 = vadd.f32 %v10155_v57, %v16103_v54  ;;  %v10156_v31 = vadd.f32 %v10140_v35, %v10050_v24  ;;  %v10052_v9 = vadd.f32 %v10040_v25, %v9946_v11 }
0x1093   : > { %v10042_v5 = vpop.f32.mrf.mxu1  ;;  %v10144_v60 = vpop.f32.mrf.mxu0 }
0x1094   : > { %10203 = vst [vmem:[%s14890_s27 + $0x8] sm:$0xff] %v10195_v44  ;;  %v10196_v59 = vadd.f32 %v10182_v37, %v10163_v62  ;;  %v10164_v3 = vadd.f32 %v10156_v31, %v16104_v50  ;;  %v10157_v58 = vadd.f32 %v10144_v60, %v10051_v30  ;;  %v10053_v63 = vadd.f32 %v10042_v5, %v9947_v34 }
0x1095   : > { %v10044_v22 = vpop.f32.mrf.mxu1  ;;  %v10146_v47 = vpop.f32.mrf.mxu0 }
0x1096   : > { %10204 = vst [vmem:[%s14890_s27 + $0x10] sm:$0xff] %v10196_v59  ;;  %v10197_v48 = vadd.f32 %v10182_v37, %v10164_v3  ;;  %v10165_v52 = vadd.f32 %v10157_v58, %v16105_v61  ;;  %v10158_v4 = vadd.f32 %v10146_v47, %v10052_v9  ;;  %v10054_v56 = vadd.f32 %v10044_v22, %v9948_v8 }
0x1097   : > { %v10148_v6 = vpop.f32.mrf.mxu0 }
0x1098   : > { %10205 = vst [vmem:[%s14890_s27 + $0x18] sm:$0xff] %v10197_v48  ;;  %v10198_v10 = vadd.f32 %v10187_v46, %v10165_v52  ;;  %v10166_v32 = vadd.f32 %v10158_v4, %v16106_v33  ;;  %v10159_v16 = vadd.f32 %v10148_v6, %v10053_v63 }
0x1099   : > { %v10150_v29 = vpop.f32.mrf.mxu0 }
0x109a   : > { %10206 = vst [vmem:[%s14890_s27 + $0x20] sm:$0xff] %v10198_v10  ;;  %v10199_v21 = vadd.f32 %v10187_v46, %v10166_v32  ;;  %v10167_v14 = vadd.f32 %v10159_v16, %v16107_v40  ;;  %v10160_v23 = vadd.f32 %v10150_v29, %v10054_v56 }
0x109c   : > { %10207 = vst [vmem:[%s14890_s27 + $0x28] sm:$0xff] %v10199_v21  ;;  %v10200_v41 = vadd.f32 %v10192_v2, %v10167_v14  ;;  %v10168_v55 = vadd.f32 %v10160_v23, %v16108_v27 }
0x109e   : > { %10208 = vst [vmem:[%s14890_s27 + $0x30] sm:$0xff] %v10200_v41  ;;  %v10201_v0 = vadd.f32 %v10192_v2, %v10168_v55 }
0x10a0   : > { %10209 = vst [vmem:[%s14890_s27 + $0x38] sm:$0xff] %v10201_v0 }
0x10a1 PF: > { %s14_s15 = sadd.s32 1, %s11414_s15  }
0x10a2   : > { %p11_p4 = scmp.ge.s32.totalorder %s14_s15, 4  }
0x10a4   :  { %13 = sbr.rel (!%p11_p4) target bundleno = 1 (0x1), region = 165 }

</bundles_post_ra>
